<compile_context>
chip_gen: v7x
topology: tpu7x:2x2x1
jax: 0.10.0
libtpu: 0.0.40
codegen_flags: <defaults>
</compile_context>

<pallas_src>
import functools

import jax
import jax.numpy as jnp
from jax.experimental import pallas as pl
from jax.experimental.pallas import tpu as pltpu

EPS = 1e-5
SLOPE = 0.2


def _round_up(x, m):
    return (x + m - 1) // m * m


def _pick_vmem_limit():
    # Re-derive per generation: stay <= ~3/4 of physical VMEM (v7x: 64 MiB ->
    # 48 MiB), capped at 96 MiB on the 128 MiB parts (v5e / v6e).
    try:
        cap = int(pltpu.get_tpu_info().vmem_capacity_bytes)
        return int(min(96 * 1024 * 1024, cap * 3 // 4))
    except Exception:
        return 48 * 1024 * 1024


VMEM_LIMIT = _pick_vmem_limit()


# ---------------------------------------------------------------------------
# Conv block pass: im2col-GEMM + bias + leaky_relu (bf16 out) + BN statistics.
# ---------------------------------------------------------------------------
def _conv_block_kernel(p_ref, w_ref, b_ref, y_ref, sum_ref, ssq_ref, *,
                       m_total, tile_m, steps):
    c = pl.program_id(0)   # stats shard ("parallel" -> megacore on v7x)
    i = pl.program_id(1)   # M tile within shard ("arbitrary", carries stats)

    # bf16 x bf16 -> f32 accumulation on the MXU.
    y = jnp.dot(p_ref[...], w_ref[...], preferred_element_type=jnp.float32)
    y = y + b_ref[...]
    y = jnp.where(y > 0, y, SLOPE * y)            # leaky_relu(0.2)
    yb = y.astype(y_ref.dtype)                    # bf16 activation write
    y_ref[...] = yb

    # Per-channel sum / sum-of-squares of the rows that belong to the true M
    # (zero-padded tail rows masked).  Kept as 8 sublane partials so the stats
    # block is a tiling-friendly (8, Cout); combined in XLA after the call.
    row = (c * steps + i) * tile_m + jax.lax.broadcasted_iota(
        jnp.int32, (tile_m, 1), 0)
    yf = jnp.where(row < m_total, yb.astype(jnp.float32), 0.0)
    yfr = yf.reshape(tile_m // 8, 8, yf.shape[-1])

    @pl.when(i == 0)
    def _():
        sum_ref[...] = jnp.zeros_like(sum_ref)
        ssq_ref[...] = jnp.zeros_like(ssq_ref)

    sum_ref[...] += jnp.sum(yfr, axis=0)
    ssq_ref[...] += jnp.sum(yfr * yfr, axis=0)


# ---------------------------------------------------------------------------
# Head: feat @ w1a' + row_bias -> leaky_relu -> VPU reduce vs w2 -> sigmoid.
# ---------------------------------------------------------------------------
def _head_kernel(f_ref, rb_ref, w1_ref, w2_ref, b2_ref, o_ref):
    h = jnp.dot(f_ref[...], w1_ref[...], preferred_element_type=jnp.float32)
    h = h + rb_ref[...]                            # b1 + BN4-shift + label@w1b
    h = jnp.where(h > 0, h, SLOPE * h)
    # (tn,256)@(256,1) as VPU multiply + lane reduction (no 1-column MXU pass).
    logit = jnp.sum(h * w2_ref[...], axis=1, keepdims=True) + b2_ref[...]
    o_ref[...] = jax.nn.sigmoid(logit)


# ---------------------------------------------------------------------------
# Plain-JAX glue: im2col (patch order (kh, kw, ci), matching the weight reshape)
# ---------------------------------------------------------------------------
def _im2col(x_nhwc, k, stride):
    n, h, w, c = x_nhwc.shape
    oh = (h - k) // stride + 1
    ow = (w - k) // stride + 1
    cols = []
    for kh in range(k):
        for kw in range(k):
            cols.append(
                x_nhwc[:, kh:kh + stride * (oh - 1) + 1:stride,
                          kw:kw + stride * (ow - 1) + 1:stride, :])
    patches = jnp.concatenate(cols, axis=-1)       # (N, OH, OW, k*k*C), bf16
    return patches.reshape(n * oh * ow, k * k * c), oh, ow


def _w2d(w_oihw):
    cout, cin, kh, kw = w_oihw.shape
    # (Cout,Cin,KH,KW) -> (KH,KW,Cin,Cout) -> (KH*KW*Cin, Cout); matches im2col.
    return jnp.transpose(w_oihw, (2, 3, 1, 0)).reshape(kh * kw * cin, cout)


def conv_lrelu_stats(x_nhwc_bf16, w2d_f32, b_f32, *, stride=2, tile_m=1024):
    """leaky_relu(conv(x)) in bf16 plus per-channel (sum, sumsq) for the BN fold."""
    # TODO(synk): fuse the 9-tap im2col into the kernel (shifted loads straight
    # from the NHWC activation) to drop the patch-matrix HBM round trip.
    patches, oh, ow = _im2col(x_nhwc_bf16, 3, stride)
    m, kk = patches.shape
    cout = w2d_f32.shape[1]

    tm = min(tile_m, _round_up(m, 8))
    n_tiles = (m + tm - 1) // tm
    n_shards = 2 if n_tiles >= 2 else 1            # leading "parallel" axis
    steps = (n_tiles + n_shards - 1) // n_shards
    mp = n_shards * steps * tm
    if mp != m:
        patches = jnp.pad(patches, ((0, mp - m), (0, 0)))

    w_bf = w2d_f32.astype(jnp.bfloat16)
    b2d = b_f32.reshape(1, cout).astype(jnp.float32)

    y, ssum, ssq = pl.pallas_call(
        functools.partial(_conv_block_kernel, m_total=m, tile_m=tm, steps=steps),
        grid=(n_shards, steps),
        in_specs=[
            pl.BlockSpec((tm, kk), lambda c, i, s=steps: (c * s + i, 0)),
            pl.BlockSpec((kk, cout), lambda c, i: (0, 0)),   # resident weights
            pl.BlockSpec((1, cout), lambda c, i: (0, 0)),    # resident bias
        ],
        out_specs=[
            pl.BlockSpec((tm, cout), lambda c, i, s=steps: (c * s + i, 0)),
            pl.BlockSpec((8, cout), lambda c, i: (c, 0)),    # per-shard partials
            pl.BlockSpec((8, cout), lambda c, i: (c, 0)),
        ],
        out_shape=[
            jax.ShapeDtypeStruct((mp, cout), jnp.bfloat16),
            jax.ShapeDtypeStruct((8 * n_shards, cout), jnp.float32),
            jax.ShapeDtypeStruct((8 * n_shards, cout), jnp.float32),
        ],
        compiler_params=pltpu.CompilerParams(
            dimension_semantics=("parallel", "arbitrary"),
            vmem_limit_bytes=VMEM_LIMIT),
    )(patches, w_bf, b2d)

    n = x_nhwc_bf16.shape[0]
    act = y[:m].reshape(n, oh, ow, cout)
    return act, ssum, ssq, m


def _bn_scale_shift(ssum, ssq, gamma, beta, m):
    s = jnp.sum(ssum, axis=0)
    q = jnp.sum(ssq, axis=0)
    mean = s / m
    var = jnp.maximum(q / m - mean * mean, 0.0)    # biased (training-mode) var
    scale = gamma * jax.lax.rsqrt(var + EPS)
    shift = beta - mean * scale
    return scale, shift


def head(feat_bf16, row_bias_f32, w1a_bf16, w2, b2, *, tile_n=1024):
    n = feat_bf16.shape[0]
    tn = min(tile_n, _round_up(n, 8))
    n_pad = _round_up(n, tn)
    if n_pad != n:
        feat_bf16 = jnp.pad(feat_bf16, ((0, n_pad - n), (0, 0)))
        row_bias_f32 = jnp.pad(row_bias_f32, ((0, n_pad - n), (0, 0)))

    out = pl.pallas_call(
        _head_kernel,
        grid=(n_pad // tn,),
        in_specs=[
            pl.BlockSpec((tn, 512), lambda i: (i, 0)),
            pl.BlockSpec((tn, 256), lambda i: (i, 0)),
            pl.BlockSpec((512, 256), lambda i: (0, 0)),
            pl.BlockSpec((1, 256), lambda i: (0, 0)),
            pl.BlockSpec((1, 1), lambda i: (0, 0)),
        ],
        out_specs=pl.BlockSpec((tn, 1), lambda i: (i, 0)),
        out_shape=jax.ShapeDtypeStruct((n_pad, 1), jnp.float32),
        compiler_params=pltpu.CompilerParams(
            dimension_semantics=("parallel",),
            vmem_limit_bytes=VMEM_LIMIT),
    )(feat_bf16, row_bias_f32, w1a_bf16,
      w2.reshape(1, 256).astype(jnp.float32),
      b2.reshape(1, 1).astype(jnp.float32))
    return out[:n]


def init_params(key):
    ks = jax.random.split(key, 12)

    def w(k, shape, scale=0.05):
        return scale * jax.random.normal(k, shape, jnp.float32)

    p = {}
    chans = [(3, 64), (64, 128), (128, 256), (256, 512)]
    for i, (cin, cout) in enumerate(chans, start=1):
        p[f"conv{i}_w"] = w(ks[2 * i - 2], (cout, cin, 3, 3))
        p[f"conv{i}_b"] = w(ks[2 * i - 1], (cout,))
        p[f"bn{i}_g"] = jnp.ones((cout,), jnp.float32)   # PyTorch BN default init
        p[f"bn{i}_b"] = jnp.zeros((cout,), jnp.float32)
    p["fc1_w"] = w(ks[8], (512 + 10, 256))
    p["fc1_b"] = w(ks[9], (256,))
    p["fc2_w"] = w(ks[10], (256, 1))
    p["fc2_b"] = w(ks[11], (1,))
    return p


@jax.jit
def discriminator_forward(params, x_nchw, label):
    x = jnp.transpose(x_nchw, (0, 2, 3, 1)).astype(jnp.bfloat16)  # NCHW -> NHWC

    act = x
    scale = shift = None
    for i in range(1, 5):
        w2d = _w2d(params[f"conv{i}_w"])               # (9*Cin, Cout) f32
        b = params[f"conv{i}_b"]
        if scale is not None:
            # Fold the previous block's BN (per-channel affine on this conv's
            # input) into this conv's weights / bias — exact with padding=0.
            sk = jnp.tile(scale, 9)                    # (kh,kw) major, ci minor
            hk = jnp.tile(shift, 9)
            b = b + hk @ w2d
            w2d = w2d * sk[:, None]
        act, ssum, ssq, m = conv_lrelu_stats(act, w2d, b, stride=2)
        scale, shift = _bn_scale_shift(ssum, ssq, params[f"bn{i}_g"],
                                       params[f"bn{i}_b"], m)

    n = act.shape[0]
    feat = act.reshape(n, 512)   # (N,1,1,512) -> (N,512); H=W=1 matches .view(-1,512)

    # Head: fold BN4 into w1a and the per-row bias; label @ w1b is precomputed
    # in XLA (labels one-hot, K=10 -> tiny) so the kernel has one dense GEMM.
    w1 = params["fc1_w"]
    w1a, w1b = w1[:512], w1[512:]
    w1a_fold = (w1a * scale[:, None]).astype(jnp.bfloat16)
    row_bias = (params["fc1_b"][None, :] + shift @ w1a
                + label.astype(jnp.float32) @ w1b)
    return head(feat, row_bias, w1a_fold, params["fc2_w"], params["fc2_b"])


if __name__ == "__main__":
    key = jax.random.PRNGKey(0)
    kp, kx, kl = jax.random.split(key, 3)
    params = init_params(kp)
    # CIFAR-10 geometry is required so the conv stack reduces 32x32 -> 1x1.
    batch = 2
    x = jax.random.normal(kx, (batch, 3, 32, 32), jnp.float32)
    onehot = jax.nn.one_hot(jax.random.randint(kl, (batch,), 0, 10), 10,
                            dtype=jnp.float32)
    out = discriminator_forward(params, x, onehot)
    jax.block_until_ready(out)
    assert out.shape == (batch, 1)
    assert bool(jnp.all((out >= 0.0) & (out <= 1.0)))
    print("KERNEL_OK")
</pallas_src>

<mosaic_0001>
module attributes {stable_mosaic.version = 11 : i64} {
  func.func @_conv_block_kernel(%arg0: i32, %arg1: i32, %arg2: memref<456x27xbf16, #tpu.memory_space<vmem>>, %arg3: memref<27x64xbf16, #tpu.memory_space<vmem>>, %arg4: memref<1x64xf32, #tpu.memory_space<vmem>>, %arg5: memref<456x64xbf16, #tpu.memory_space<vmem>>, %arg6: memref<8x64xf32, #tpu.memory_space<vmem>>, %arg7: memref<8x64xf32, #tpu.memory_space<vmem>>) attributes {dimension_semantics = [#tpu.dimension_semantics<parallel>, #tpu.dimension_semantics<arbitrary>], iteration_bounds = array<i64: 1, 1>, scalar_prefetch = 0 : i64, scratch_operands = 0 : i64, tpu.core_type = #tpu.core_type<tc>, window_params = [{transform_indices = @transform_0, window_bounds = array<i64: 456, 27>}, {pipeline_mode = #tpu.pipeline_mode<synchronous>, transform_indices = @transform_1, window_bounds = array<i64: 27, 64>}, {pipeline_mode = #tpu.pipeline_mode<synchronous>, transform_indices = @transform_2, window_bounds = array<i64: 1, 64>}, {transform_indices = @transform_3, window_bounds = array<i64: 456, 64>}, {transform_indices = @transform_4, window_bounds = array<i64: 8, 64>}, {transform_indices = @transform_5, window_bounds = array<i64: 8, 64>}]} {
    %c0 = arith.constant 0 : index
    %c0_0 = arith.constant 0 : index
    %0 = vector.load %arg2[%c0, %c0_0] : memref<456x27xbf16, #tpu.memory_space<vmem>>, vector<456x27xbf16>
    %c0_1 = arith.constant 0 : index
    %c0_2 = arith.constant 0 : index
    %1 = vector.load %arg3[%c0_1, %c0_2] : memref<27x64xbf16, #tpu.memory_space<vmem>>, vector<27x64xbf16>
    %cst = arith.constant dense<0.000000e+00> : vector<456x64xf32>
    %2 = tpu.matmul %0, %1, %cst {dimension_numbers = #tpu.dot_dimension_numbers<[1], [0], [0], [1], [0, 0, 1, 1], [], []>} : vector<456x27xbf16>, vector<27x64xbf16>, vector<456x64xf32> -> vector<456x64xf32>
    %c0_3 = arith.constant 0 : index
    %c0_4 = arith.constant 0 : index
    %3 = vector.load %arg4[%c0_3, %c0_4] : memref<1x64xf32, #tpu.memory_space<vmem>>, vector<1x64xf32>
    %4 = vector.broadcast %3 : vector<1x64xf32> to vector<456x64xf32>
    %5 = arith.addf %2, %4 : vector<456x64xf32>
    %cst_5 = arith.constant 0.000000e+00 : f32
    %6 = vector.broadcast %cst_5 : f32 to vector<456x64xf32>
    %7 = arith.cmpf ogt, %5, %6 : vector<456x64xf32>
    %cst_6 = arith.constant 2.000000e-01 : f32
    %8 = vector.broadcast %cst_6 : f32 to vector<456x64xf32>
    %9 = arith.mulf %8, %5 : vector<456x64xf32>
    %10 = arith.select %7, %5, %9 : vector<456x64xi1>, vector<456x64xf32>
    %11 = arith.truncf %10 : vector<456x64xf32> to vector<456x64xbf16>
    %c0_7 = arith.constant 0 : index
    %c0_8 = arith.constant 0 : index
    %12 = vector.load %arg5[%c0_7, %c0_8] : memref<456x64xbf16, #tpu.memory_space<vmem>>, vector<456x64xbf16>
    tpu.vector_store %arg5[%c0_7, %c0_8], %11 {strides = array<i32>} : memref<456x64xbf16, #tpu.memory_space<vmem>>, vector<456x64xbf16>,
    %c1_i32 = arith.constant 1 : i32
    %13 = arith.muli %arg0, %c1_i32 : i32
    %14 = arith.addi %13, %arg1 : i32
    %c456_i32 = arith.constant 456 : i32
    %15 = arith.muli %14, %c456_i32 : i32
    %16 = tpu.iota {dimensions = array<i32: 0>} : vector<456x1xi32>
    %17 = vector.broadcast %15 : i32 to vector<456x1xi32>
    %18 = arith.addi %17, %16 : vector<456x1xi32>
    %c450_i32 = arith.constant 450 : i32
    %19 = vector.broadcast %c450_i32 : i32 to vector<456x1xi32>
    %20 = arith.cmpi slt, %18, %19 : vector<456x1xi32>
    %21 = arith.extf %11 : vector<456x64xbf16> to vector<456x64xf32>
    %cst_9 = arith.constant 0.000000e+00 : f32
    %22 = vector.shape_cast %20 : vector<456x1xi1> to vector<456x1xi1>
    %23 = vector.broadcast %22 : vector<456x1xi1> to vector<456x64xi1>
    %24 = vector.broadcast %cst_9 : f32 to vector<456x64xf32>
    %25 = arith.select %23, %21, %24 : vector<456x64xi1>, vector<456x64xf32>
    %26 = vector.shape_cast %25 : vector<456x64xf32> to vector<57x8x64xf32>
    %c0_i32 = arith.constant 0 : i32
    %27 = arith.cmpi eq, %arg1, %c0_i32 : i32
    %28 = arith.extui %27 : i1 to i32
    %c0_i32_10 = arith.constant 0 : i32
    %29 = arith.cmpi ne, %28, %c0_i32_10 : i32
    scf.if %29 {
      %cst_21 = arith.constant 0.000000e+00 : f32
      %39 = vector.broadcast %cst_21 : f32 to vector<8x64xf32>
      %c0_22 = arith.constant 0 : index
      %c0_23 = arith.constant 0 : index
      %40 = vector.load %arg6[%c0_22, %c0_23] : memref<8x64xf32, #tpu.memory_space<vmem>>, vector<8x64xf32>
      tpu.vector_store %arg6[%c0_22, %c0_23], %39 {strides = array<i32>} : memref<8x64xf32, #tpu.memory_space<vmem>>, vector<8x64xf32>,
      %cst_24 = arith.constant 0.000000e+00 : f32
      %41 = vector.broadcast %cst_24 : f32 to vector<8x64xf32>
      %c0_25 = arith.constant 0 : index
      %c0_26 = arith.constant 0 : index
      %42 = vector.load %arg7[%c0_25, %c0_26] : memref<8x64xf32, #tpu.memory_space<vmem>>, vector<8x64xf32>
      tpu.vector_store %arg7[%c0_25, %c0_26], %41 {strides = array<i32>} : memref<8x64xf32, #tpu.memory_space<vmem>>, vector<8x64xf32>,
    } else {
    }
    %c0_11 = arith.constant 0 : index
    %c0_12 = arith.constant 0 : index
    %30 = vector.load %arg6[%c0_11, %c0_12] : memref<8x64xf32, #tpu.memory_space<vmem>>, vector<8x64xf32>
    %cst_13 = arith.constant dense<0.000000e+00> : vector<8x64xf32>
    %31 = vector.multi_reduction <add>, %26, %cst_13 [0] : vector<57x8x64xf32> to vector<8x64xf32>
    %32 = arith.addf %30, %31 : vector<8x64xf32>
    %c0_14 = arith.constant 0 : index
    %c0_15 = arith.constant 0 : index
    %33 = vector.load %arg6[%c0_14, %c0_15] : memref<8x64xf32, #tpu.memory_space<vmem>>, vector<8x64xf32>
    tpu.vector_store %arg6[%c0_14, %c0_15], %32 {strides = array<i32>} : memref<8x64xf32, #tpu.memory_space<vmem>>, vector<8x64xf32>,
    %c0_16 = arith.constant 0 : index
    %c0_17 = arith.constant 0 : index
    %34 = vector.load %arg7[%c0_16, %c0_17] : memref<8x64xf32, #tpu.memory_space<vmem>>, vector<8x64xf32>
    %35 = arith.mulf %26, %26 : vector<57x8x64xf32>
    %cst_18 = arith.constant dense<0.000000e+00> : vector<8x64xf32>
    %36 = vector.multi_reduction <add>, %35, %cst_18 [0] : vector<57x8x64xf32> to vector<8x64xf32>
    %37 = arith.addf %34, %36 : vector<8x64xf32>
    %c0_19 = arith.constant 0 : index
    %c0_20 = arith.constant 0 : index
    %38 = vector.load %arg7[%c0_19, %c0_20] : memref<8x64xf32, #tpu.memory_space<vmem>>, vector<8x64xf32>
    tpu.vector_store %arg7[%c0_19, %c0_20], %37 {strides = array<i32>} : memref<8x64xf32, #tpu.memory_space<vmem>>, vector<8x64xf32>,
    return
  }
  func.func @transform_0(%arg0: i32, %arg1: i32) -> (i32, i32) {
    %c1_i32 = arith.constant 1 : i32
    %0 = arith.muli %arg0, %c1_i32 : i32
    %1 = arith.addi %0, %arg1 : i32
    %c0_i32 = arith.constant 0 : i32
    %c0_i32_0 = arith.constant 0 : i32
    return %1, %c0_i32 : i32, i32
  }
  func.func @transform_1(%arg0: i32, %arg1: i32) -> (i32, i32) {
    %c0_i32 = arith.constant 0 : i32
    %c0_i32_0 = arith.constant 0 : i32
    %c0_i32_1 = arith.constant 0 : i32
    return %c0_i32, %c0_i32_0 : i32, i32
  }
  func.func @transform_2(%arg0: i32, %arg1: i32) -> (i32, i32) {
    %c0_i32 = arith.constant 0 : i32
    %c0_i32_0 = arith.constant 0 : i32
    %c0_i32_1 = arith.constant 0 : i32
    return %c0_i32, %c0_i32_0 : i32, i32
  }
  func.func @transform_3(%arg0: i32, %arg1: i32) -> (i32, i32) {
    %c1_i32 = arith.constant 1 : i32
    %0 = arith.muli %arg0, %c1_i32 : i32
    %1 = arith.addi %0, %arg1 : i32
    %c0_i32 = arith.constant 0 : i32
    %c0_i32_0 = arith.constant 0 : i32
    return %1, %c0_i32 : i32, i32
  }
  func.func @transform_4(%arg0: i32, %arg1: i32) -> (i32, i32) {
    %c0_i32 = arith.constant 0 : i32
    %c0_i32_0 = arith.constant 0 : i32
    return %arg0, %c0_i32 : i32, i32
  }
  func.func @transform_5(%arg0: i32, %arg1: i32) -> (i32, i32) {
    %c0_i32 = arith.constant 0 : i32
    %c0_i32_0 = arith.constant 0 : i32
    return %arg0, %c0_i32 : i32, i32
  }
}

module attributes {stable_mosaic.version = 11 : i64} {
  func.func @_conv_block_kernel(%arg0: i32, %arg1: i32, %arg2: memref<104x576xbf16, #tpu.memory_space<vmem>>, %arg3: memref<576x128xbf16, #tpu.memory_space<vmem>>, %arg4: memref<1x128xf32, #tpu.memory_space<vmem>>, %arg5: memref<104x128xbf16, #tpu.memory_space<vmem>>, %arg6: memref<8x128xf32, #tpu.memory_space<vmem>>, %arg7: memref<8x128xf32, #tpu.memory_space<vmem>>) attributes {dimension_semantics = [#tpu.dimension_semantics<parallel>, #tpu.dimension_semantics<arbitrary>], iteration_bounds = array<i64: 1, 1>, scalar_prefetch = 0 : i64, scratch_operands = 0 : i64, tpu.core_type = #tpu.core_type<tc>, window_params = [{transform_indices = @transform_0, window_bounds = array<i64: 104, 576>}, {pipeline_mode = #tpu.pipeline_mode<synchronous>, transform_indices = @transform_1, window_bounds = array<i64: 576, 128>}, {pipeline_mode = #tpu.pipeline_mode<synchronous>, transform_indices = @transform_2, window_bounds = array<i64: 1, 128>}, {transform_indices = @transform_3, window_bounds = array<i64: 104, 128>}, {transform_indices = @transform_4, window_bounds = array<i64: 8, 128>}, {transform_indices = @transform_5, window_bounds = array<i64: 8, 128>}]} {
    %c0 = arith.constant 0 : index
    %c0_0 = arith.constant 0 : index
    %0 = vector.load %arg2[%c0, %c0_0] : memref<104x576xbf16, #tpu.memory_space<vmem>>, vector<104x576xbf16>
    %c0_1 = arith.constant 0 : index
    %c0_2 = arith.constant 0 : index
    %1 = vector.load %arg3[%c0_1, %c0_2] : memref<576x128xbf16, #tpu.memory_space<vmem>>, vector<576x128xbf16>
    %cst = arith.constant dense<0.000000e+00> : vector<104x128xf32>
    %2 = tpu.matmul %0, %1, %cst {dimension_numbers = #tpu.dot_dimension_numbers<[1], [0], [0], [1], [0, 0, 1, 1], [], []>} : vector<104x576xbf16>, vector<576x128xbf16>, vector<104x128xf32> -> vector<104x128xf32>
    %c0_3 = arith.constant 0 : index
    %c0_4 = arith.constant 0 : index
    %3 = vector.load %arg4[%c0_3, %c0_4] : memref<1x128xf32, #tpu.memory_space<vmem>>, vector<1x128xf32>
    %4 = vector.broadcast %3 : vector<1x128xf32> to vector<104x128xf32>
    %5 = arith.addf %2, %4 : vector<104x128xf32>
    %cst_5 = arith.constant 0.000000e+00 : f32
    %6 = vector.broadcast %cst_5 : f32 to vector<104x128xf32>
    %7 = arith.cmpf ogt, %5, %6 : vector<104x128xf32>
    %cst_6 = arith.constant 2.000000e-01 : f32
    %8 = vector.broadcast %cst_6 : f32 to vector<104x128xf32>
    %9 = arith.mulf %8, %5 : vector<104x128xf32>
    %10 = arith.select %7, %5, %9 : vector<104x128xi1>, vector<104x128xf32>
    %11 = arith.truncf %10 : vector<104x128xf32> to vector<104x128xbf16>
    %c0_7 = arith.constant 0 : index
    %c0_8 = arith.constant 0 : index
    %12 = vector.load %arg5[%c0_7, %c0_8] : memref<104x128xbf16, #tpu.memory_space<vmem>>, vector<104x128xbf16>
    tpu.vector_store %arg5[%c0_7, %c0_8], %11 {strides = array<i32>} : memref<104x128xbf16, #tpu.memory_space<vmem>>, vector<104x128xbf16>,
    %c1_i32 = arith.constant 1 : i32
    %13 = arith.muli %arg0, %c1_i32 : i32
    %14 = arith.addi %13, %arg1 : i32
    %c104_i32 = arith.constant 104 : i32
    %15 = arith.muli %14, %c104_i32 : i32
    %16 = tpu.iota {dimensions = array<i32: 0>} : vector<104x1xi32>
    %17 = vector.broadcast %15 : i32 to vector<104x1xi32>
    %18 = arith.addi %17, %16 : vector<104x1xi32>
    %c98_i32 = arith.constant 98 : i32
    %19 = vector.broadcast %c98_i32 : i32 to vector<104x1xi32>
    %20 = arith.cmpi slt, %18, %19 : vector<104x1xi32>
    %21 = arith.extf %11 : vector<104x128xbf16> to vector<104x128xf32>
    %cst_9 = arith.constant 0.000000e+00 : f32
    %22 = vector.shape_cast %20 : vector<104x1xi1> to vector<104x1xi1>
    %23 = vector.broadcast %22 : vector<104x1xi1> to vector<104x128xi1>
    %24 = vector.broadcast %cst_9 : f32 to vector<104x128xf32>
    %25 = arith.select %23, %21, %24 : vector<104x128xi1>, vector<104x128xf32>
    %26 = vector.shape_cast %25 : vector<104x128xf32> to vector<13x8x128xf32>
    %c0_i32 = arith.constant 0 : i32
    %27 = arith.cmpi eq, %arg1, %c0_i32 : i32
    %28 = arith.extui %27 : i1 to i32
    %c0_i32_10 = arith.constant 0 : i32
    %29 = arith.cmpi ne, %28, %c0_i32_10 : i32
    scf.if %29 {
      %cst_21 = arith.constant 0.000000e+00 : f32
      %39 = vector.broadcast %cst_21 : f32 to vector<8x128xf32>
      %c0_22 = arith.constant 0 : index
      %c0_23 = arith.constant 0 : index
      %40 = vector.load %arg6[%c0_22, %c0_23] : memref<8x128xf32, #tpu.memory_space<vmem>>, vector<8x128xf32>
      tpu.vector_store %arg6[%c0_22, %c0_23], %39 {strides = array<i32>} : memref<8x128xf32, #tpu.memory_space<vmem>>, vector<8x128xf32>,
      %cst_24 = arith.constant 0.000000e+00 : f32
      %41 = vector.broadcast %cst_24 : f32 to vector<8x128xf32>
      %c0_25 = arith.constant 0 : index
      %c0_26 = arith.constant 0 : index
      %42 = vector.load %arg7[%c0_25, %c0_26] : memref<8x128xf32, #tpu.memory_space<vmem>>, vector<8x128xf32>
      tpu.vector_store %arg7[%c0_25, %c0_26], %41 {strides = array<i32>} : memref<8x128xf32, #tpu.memory_space<vmem>>, vector<8x128xf32>,
    } else {
    }
    %c0_11 = arith.constant 0 : index
    %c0_12 = arith.constant 0 : index
    %30 = vector.load %arg6[%c0_11, %c0_12] : memref<8x128xf32, #tpu.memory_space<vmem>>, vector<8x128xf32>
    %cst_13 = arith.constant dense<0.000000e+00> : vector<8x128xf32>
    %31 = vector.multi_reduction <add>, %26, %cst_13 [0] : vector<13x8x128xf32> to vector<8x128xf32>
    %32 = arith.addf %30, %31 : vector<8x128xf32>
    %c0_14 = arith.constant 0 : index
    %c0_15 = arith.constant 0 : index
    %33 = vector.load %arg6[%c0_14, %c0_15] : memref<8x128xf32, #tpu.memory_space<vmem>>, vector<8x128xf32>
    tpu.vector_store %arg6[%c0_14, %c0_15], %32 {strides = array<i32>} : memref<8x128xf32, #tpu.memory_space<vmem>>, vector<8x128xf32>,
    %c0_16 = arith.constant 0 : index
    %c0_17 = arith.constant 0 : index
    %34 = vector.load %arg7[%c0_16, %c0_17] : memref<8x128xf32, #tpu.memory_space<vmem>>, vector<8x128xf32>
    %35 = arith.mulf %26, %26 : vector<13x8x128xf32>
    %cst_18 = arith.constant dense<0.000000e+00> : vector<8x128xf32>
    %36 = vector.multi_reduction <add>, %35, %cst_18 [0] : vector<13x8x128xf32> to vector<8x128xf32>
    %37 = arith.addf %34, %36 : vector<8x128xf32>
    %c0_19 = arith.constant 0 : index
    %c0_20 = arith.constant 0 : index
    %38 = vector.load %arg7[%c0_19, %c0_20] : memref<8x128xf32, #tpu.memory_space<vmem>>, vector<8x128xf32>
    tpu.vector_store %arg7[%c0_19, %c0_20], %37 {strides = array<i32>} : memref<8x128xf32, #tpu.memory_space<vmem>>, vector<8x128xf32>,
    return
  }
  func.func @transform_0(%arg0: i32, %arg1: i32) -> (i32, i32) {
    %c1_i32 = arith.constant 1 : i32
    %0 = arith.muli %arg0, %c1_i32 : i32
    %1 = arith.addi %0, %arg1 : i32
    %c0_i32 = arith.constant 0 : i32
    %c0_i32_0 = arith.constant 0 : i32
    return %1, %c0_i32 : i32, i32
  }
  func.func @transform_1(%arg0: i32, %arg1: i32) -> (i32, i32) {
    %c0_i32 = arith.constant 0 : i32
    %c0_i32_0 = arith.constant 0 : i32
    %c0_i32_1 = arith.constant 0 : i32
    return %c0_i32, %c0_i32_0 : i32, i32
  }
  func.func @transform_2(%arg0: i32, %arg1: i32) -> (i32, i32) {
    %c0_i32 = arith.constant 0 : i32
    %c0_i32_0 = arith.constant 0 : i32
    %c0_i32_1 = arith.constant 0 : i32
    return %c0_i32, %c0_i32_0 : i32, i32
  }
  func.func @transform_3(%arg0: i32, %arg1: i32) -> (i32, i32) {
    %c1_i32 = arith.constant 1 : i32
    %0 = arith.muli %arg0, %c1_i32 : i32
    %1 = arith.addi %0, %arg1 : i32
    %c0_i32 = arith.constant 0 : i32
    %c0_i32_0 = arith.constant 0 : i32
    return %1, %c0_i32 : i32, i32
  }
  func.func @transform_4(%arg0: i32, %arg1: i32) -> (i32, i32) {
    %c0_i32 = arith.constant 0 : i32
    %c0_i32_0 = arith.constant 0 : i32
    return %arg0, %c0_i32 : i32, i32
  }
  func.func @transform_5(%arg0: i32, %arg1: i32) -> (i32, i32) {
    %c0_i32 = arith.constant 0 : i32
    %c0_i32_0 = arith.constant 0 : i32
    return %arg0, %c0_i32 : i32, i32
  }
}

module attributes {stable_mosaic.version = 11 : i64} {
  func.func @_conv_block_kernel(%arg0: i32, %arg1: i32, %arg2: memref<24x1152xbf16, #tpu.memory_space<vmem>>, %arg3: memref<1152x256xbf16, #tpu.memory_space<vmem>>, %arg4: memref<1x256xf32, #tpu.memory_space<vmem>>, %arg5: memref<24x256xbf16, #tpu.memory_space<vmem>>, %arg6: memref<8x256xf32, #tpu.memory_space<vmem>>, %arg7: memref<8x256xf32, #tpu.memory_space<vmem>>) attributes {dimension_semantics = [#tpu.dimension_semantics<parallel>, #tpu.dimension_semantics<arbitrary>], iteration_bounds = array<i64: 1, 1>, scalar_prefetch = 0 : i64, scratch_operands = 0 : i64, tpu.core_type = #tpu.core_type<tc>, window_params = [{transform_indices = @transform_0, window_bounds = array<i64: 24, 1152>}, {pipeline_mode = #tpu.pipeline_mode<synchronous>, transform_indices = @transform_1, window_bounds = array<i64: 1152, 256>}, {pipeline_mode = #tpu.pipeline_mode<synchronous>, transform_indices = @transform_2, window_bounds = array<i64: 1, 256>}, {transform_indices = @transform_3, window_bounds = array<i64: 24, 256>}, {transform_indices = @transform_4, window_bounds = array<i64: 8, 256>}, {transform_indices = @transform_5, window_bounds = array<i64: 8, 256>}]} {
    %c0 = arith.constant 0 : index
    %c0_0 = arith.constant 0 : index
    %0 = vector.load %arg2[%c0, %c0_0] : memref<24x1152xbf16, #tpu.memory_space<vmem>>, vector<24x1152xbf16>
    %c0_1 = arith.constant 0 : index
    %c0_2 = arith.constant 0 : index
    %1 = vector.load %arg3[%c0_1, %c0_2] : memref<1152x256xbf16, #tpu.memory_space<vmem>>, vector<1152x256xbf16>
    %cst = arith.constant dense<0.000000e+00> : vector<24x256xf32>
    %2 = tpu.matmul %0, %1, %cst {dimension_numbers = #tpu.dot_dimension_numbers<[1], [0], [0], [1], [0, 0, 1, 1], [], []>} : vector<24x1152xbf16>, vector<1152x256xbf16>, vector<24x256xf32> -> vector<24x256xf32>
    %c0_3 = arith.constant 0 : index
    %c0_4 = arith.constant 0 : index
    %3 = vector.load %arg4[%c0_3, %c0_4] : memref<1x256xf32, #tpu.memory_space<vmem>>, vector<1x256xf32>
    %4 = vector.broadcast %3 : vector<1x256xf32> to vector<24x256xf32>
    %5 = arith.addf %2, %4 : vector<24x256xf32>
    %cst_5 = arith.constant 0.000000e+00 : f32
    %6 = vector.broadcast %cst_5 : f32 to vector<24x256xf32>
    %7 = arith.cmpf ogt, %5, %6 : vector<24x256xf32>
    %cst_6 = arith.constant 2.000000e-01 : f32
    %8 = vector.broadcast %cst_6 : f32 to vector<24x256xf32>
    %9 = arith.mulf %8, %5 : vector<24x256xf32>
    %10 = arith.select %7, %5, %9 : vector<24x256xi1>, vector<24x256xf32>
    %11 = arith.truncf %10 : vector<24x256xf32> to vector<24x256xbf16>
    %c0_7 = arith.constant 0 : index
    %c0_8 = arith.constant 0 : index
    %12 = vector.load %arg5[%c0_7, %c0_8] : memref<24x256xbf16, #tpu.memory_space<vmem>>, vector<24x256xbf16>
    tpu.vector_store %arg5[%c0_7, %c0_8], %11 {strides = array<i32>} : memref<24x256xbf16, #tpu.memory_space<vmem>>, vector<24x256xbf16>,
    %c1_i32 = arith.constant 1 : i32
    %13 = arith.muli %arg0, %c1_i32 : i32
    %14 = arith.addi %13, %arg1 : i32
    %c24_i32 = arith.constant 24 : i32
    %15 = arith.muli %14, %c24_i32 : i32
    %16 = tpu.iota {dimensions = array<i32: 0>} : vector<24x1xi32>
    %17 = vector.broadcast %15 : i32 to vector<24x1xi32>
    %18 = arith.addi %17, %16 : vector<24x1xi32>
    %c18_i32 = arith.constant 18 : i32
    %19 = vector.broadcast %c18_i32 : i32 to vector<24x1xi32>
    %20 = arith.cmpi slt, %18, %19 : vector<24x1xi32>
    %21 = arith.extf %11 : vector<24x256xbf16> to vector<24x256xf32>
    %cst_9 = arith.constant 0.000000e+00 : f32
    %22 = vector.shape_cast %20 : vector<24x1xi1> to vector<24x1xi1>
    %23 = vector.broadcast %22 : vector<24x1xi1> to vector<24x256xi1>
    %24 = vector.broadcast %cst_9 : f32 to vector<24x256xf32>
    %25 = arith.select %23, %21, %24 : vector<24x256xi1>, vector<24x256xf32>
    %26 = vector.shape_cast %25 : vector<24x256xf32> to vector<3x8x256xf32>
    %c0_i32 = arith.constant 0 : i32
    %27 = arith.cmpi eq, %arg1, %c0_i32 : i32
    %28 = arith.extui %27 : i1 to i32
    %c0_i32_10 = arith.constant 0 : i32
    %29 = arith.cmpi ne, %28, %c0_i32_10 : i32
    scf.if %29 {
      %cst_21 = arith.constant 0.000000e+00 : f32
      %39 = vector.broadcast %cst_21 : f32 to vector<8x256xf32>
      %c0_22 = arith.constant 0 : index
      %c0_23 = arith.constant 0 : index
      %40 = vector.load %arg6[%c0_22, %c0_23] : memref<8x256xf32, #tpu.memory_space<vmem>>, vector<8x256xf32>
      tpu.vector_store %arg6[%c0_22, %c0_23], %39 {strides = array<i32>} : memref<8x256xf32, #tpu.memory_space<vmem>>, vector<8x256xf32>,
      %cst_24 = arith.constant 0.000000e+00 : f32
      %41 = vector.broadcast %cst_24 : f32 to vector<8x256xf32>
      %c0_25 = arith.constant 0 : index
      %c0_26 = arith.constant 0 : index
      %42 = vector.load %arg7[%c0_25, %c0_26] : memref<8x256xf32, #tpu.memory_space<vmem>>, vector<8x256xf32>
      tpu.vector_store %arg7[%c0_25, %c0_26], %41 {strides = array<i32>} : memref<8x256xf32, #tpu.memory_space<vmem>>, vector<8x256xf32>,
    } else {
    }
    %c0_11 = arith.constant 0 : index
    %c0_12 = arith.constant 0 : index
    %30 = vector.load %arg6[%c0_11, %c0_12] : memref<8x256xf32, #tpu.memory_space<vmem>>, vector<8x256xf32>
    %cst_13 = arith.constant dense<0.000000e+00> : vector<8x256xf32>
    %31 = vector.multi_reduction <add>, %26, %cst_13 [0] : vector<3x8x256xf32> to vector<8x256xf32>
    %32 = arith.addf %30, %31 : vector<8x256xf32>
    %c0_14 = arith.constant 0 : index
    %c0_15 = arith.constant 0 : index
    %33 = vector.load %arg6[%c0_14, %c0_15] : memref<8x256xf32, #tpu.memory_space<vmem>>, vector<8x256xf32>
    tpu.vector_store %arg6[%c0_14, %c0_15], %32 {strides = array<i32>} : memref<8x256xf32, #tpu.memory_space<vmem>>, vector<8x256xf32>,
    %c0_16 = arith.constant 0 : index
    %c0_17 = arith.constant 0 : index
    %34 = vector.load %arg7[%c0_16, %c0_17] : memref<8x256xf32, #tpu.memory_space<vmem>>, vector<8x256xf32>
    %35 = arith.mulf %26, %26 : vector<3x8x256xf32>
    %cst_18 = arith.constant dense<0.000000e+00> : vector<8x256xf32>
    %36 = vector.multi_reduction <add>, %35, %cst_18 [0] : vector<3x8x256xf32> to vector<8x256xf32>
    %37 = arith.addf %34, %36 : vector<8x256xf32>
    %c0_19 = arith.constant 0 : index
    %c0_20 = arith.constant 0 : index
    %38 = vector.load %arg7[%c0_19, %c0_20] : memref<8x256xf32, #tpu.memory_space<vmem>>, vector<8x256xf32>
    tpu.vector_store %arg7[%c0_19, %c0_20], %37 {strides = array<i32>} : memref<8x256xf32, #tpu.memory_space<vmem>>, vector<8x256xf32>,
    return
  }
  func.func @transform_0(%arg0: i32, %arg1: i32) -> (i32, i32) {
    %c1_i32 = arith.constant 1 : i32
    %0 = arith.muli %arg0, %c1_i32 : i32
    %1 = arith.addi %0, %arg1 : i32
    %c0_i32 = arith.constant 0 : i32
    %c0_i32_0 = arith.constant 0 : i32
    return %1, %c0_i32 : i32, i32
  }
  func.func @transform_1(%arg0: i32, %arg1: i32) -> (i32, i32) {
    %c0_i32 = arith.constant 0 : i32
    %c0_i32_0 = arith.constant 0 : i32
    %c0_i32_1 = arith.constant 0 : i32
    return %c0_i32, %c0_i32_0 : i32, i32
  }
  func.func @transform_2(%arg0: i32, %arg1: i32) -> (i32, i32) {
    %c0_i32 = arith.constant 0 : i32
    %c0_i32_0 = arith.constant 0 : i32
    %c0_i32_1 = arith.constant 0 : i32
    return %c0_i32, %c0_i32_0 : i32, i32
  }
  func.func @transform_3(%arg0: i32, %arg1: i32) -> (i32, i32) {
    %c1_i32 = arith.constant 1 : i32
    %0 = arith.muli %arg0, %c1_i32 : i32
    %1 = arith.addi %0, %arg1 : i32
    %c0_i32 = arith.constant 0 : i32
    %c0_i32_0 = arith.constant 0 : i32
    return %1, %c0_i32 : i32, i32
  }
  func.func @transform_4(%arg0: i32, %arg1: i32) -> (i32, i32) {
    %c0_i32 = arith.constant 0 : i32
    %c0_i32_0 = arith.constant 0 : i32
    return %arg0, %c0_i32 : i32, i32
  }
  func.func @transform_5(%arg0: i32, %arg1: i32) -> (i32, i32) {
    %c0_i32 = arith.constant 0 : i32
    %c0_i32_0 = arith.constant 0 : i32
    return %arg0, %c0_i32 : i32, i32
  }
}

module attributes {stable_mosaic.version = 11 : i64} {
  func.func @_conv_block_kernel(%arg0: i32, %arg1: i32, %arg2: memref<8x2304xbf16, #tpu.memory_space<vmem>>, %arg3: memref<2304x512xbf16, #tpu.memory_space<vmem>>, %arg4: memref<1x512xf32, #tpu.memory_space<vmem>>, %arg5: memref<8x512xbf16, #tpu.memory_space<vmem>>, %arg6: memref<8x512xf32, #tpu.memory_space<vmem>>, %arg7: memref<8x512xf32, #tpu.memory_space<vmem>>) attributes {dimension_semantics = [#tpu.dimension_semantics<parallel>, #tpu.dimension_semantics<arbitrary>], iteration_bounds = array<i64: 1, 1>, scalar_prefetch = 0 : i64, scratch_operands = 0 : i64, tpu.core_type = #tpu.core_type<tc>, window_params = [{transform_indices = @transform_0, window_bounds = array<i64: 8, 2304>}, {pipeline_mode = #tpu.pipeline_mode<synchronous>, transform_indices = @transform_1, window_bounds = array<i64: 2304, 512>}, {pipeline_mode = #tpu.pipeline_mode<synchronous>, transform_indices = @transform_2, window_bounds = array<i64: 1, 512>}, {transform_indices = @transform_3, window_bounds = array<i64: 8, 512>}, {transform_indices = @transform_4, window_bounds = array<i64: 8, 512>}, {transform_indices = @transform_5, window_bounds = array<i64: 8, 512>}]} {
    %c0 = arith.constant 0 : index
    %c0_0 = arith.constant 0 : index
    %0 = vector.load %arg2[%c0, %c0_0] : memref<8x2304xbf16, #tpu.memory_space<vmem>>, vector<8x2304xbf16>
    %c0_1 = arith.constant 0 : index
    %c0_2 = arith.constant 0 : index
    %1 = vector.load %arg3[%c0_1, %c0_2] : memref<2304x512xbf16, #tpu.memory_space<vmem>>, vector<2304x512xbf16>
    %cst = arith.constant dense<0.000000e+00> : vector<8x512xf32>
    %2 = tpu.matmul %0, %1, %cst {dimension_numbers = #tpu.dot_dimension_numbers<[1], [0], [0], [1], [0, 0, 1, 1], [], []>} : vector<8x2304xbf16>, vector<2304x512xbf16>, vector<8x512xf32> -> vector<8x512xf32>
    %c0_3 = arith.constant 0 : index
    %c0_4 = arith.constant 0 : index
    %3 = vector.load %arg4[%c0_3, %c0_4] : memref<1x512xf32, #tpu.memory_space<vmem>>, vector<1x512xf32>
    %4 = vector.broadcast %3 : vector<1x512xf32> to vector<8x512xf32>
    %5 = arith.addf %2, %4 : vector<8x512xf32>
    %cst_5 = arith.constant 0.000000e+00 : f32
    %6 = vector.broadcast %cst_5 : f32 to vector<8x512xf32>
    %7 = arith.cmpf ogt, %5, %6 : vector<8x512xf32>
    %cst_6 = arith.constant 2.000000e-01 : f32
    %8 = vector.broadcast %cst_6 : f32 to vector<8x512xf32>
    %9 = arith.mulf %8, %5 : vector<8x512xf32>
    %10 = arith.select %7, %5, %9 : vector<8x512xi1>, vector<8x512xf32>
    %11 = arith.truncf %10 : vector<8x512xf32> to vector<8x512xbf16>
    %c0_7 = arith.constant 0 : index
    %c0_8 = arith.constant 0 : index
    %12 = vector.load %arg5[%c0_7, %c0_8] : memref<8x512xbf16, #tpu.memory_space<vmem>>, vector<8x512xbf16>
    tpu.vector_store %arg5[%c0_7, %c0_8], %11 {strides = array<i32>} : memref<8x512xbf16, #tpu.memory_space<vmem>>, vector<8x512xbf16>,
    %c1_i32 = arith.constant 1 : i32
    %13 = arith.muli %arg0, %c1_i32 : i32
    %14 = arith.addi %13, %arg1 : i32
    %c8_i32 = arith.constant 8 : i32
    %15 = arith.muli %14, %c8_i32 : i32
    %16 = tpu.iota {dimensions = array<i32: 0>} : vector<8x1xi32>
    %17 = vector.broadcast %15 : i32 to vector<8x1xi32>
    %18 = arith.addi %17, %16 : vector<8x1xi32>
    %c2_i32 = arith.constant 2 : i32
    %19 = vector.broadcast %c2_i32 : i32 to vector<8x1xi32>
    %20 = arith.cmpi slt, %18, %19 : vector<8x1xi32>
    %21 = arith.extf %11 : vector<8x512xbf16> to vector<8x512xf32>
    %cst_9 = arith.constant 0.000000e+00 : f32
    %22 = vector.shape_cast %20 : vector<8x1xi1> to vector<8x1xi1>
    %23 = vector.broadcast %22 : vector<8x1xi1> to vector<8x512xi1>
    %24 = vector.broadcast %cst_9 : f32 to vector<8x512xf32>
    %25 = arith.select %23, %21, %24 : vector<8x512xi1>, vector<8x512xf32>
    %26 = vector.shape_cast %25 : vector<8x512xf32> to vector<1x8x512xf32>
    %c0_i32 = arith.constant 0 : i32
    %27 = arith.cmpi eq, %arg1, %c0_i32 : i32
    %28 = arith.extui %27 : i1 to i32
    %c0_i32_10 = arith.constant 0 : i32
    %29 = arith.cmpi ne, %28, %c0_i32_10 : i32
    scf.if %29 {
      %cst_21 = arith.constant 0.000000e+00 : f32
      %39 = vector.broadcast %cst_21 : f32 to vector<8x512xf32>
      %c0_22 = arith.constant 0 : index
      %c0_23 = arith.constant 0 : index
      %40 = vector.load %arg6[%c0_22, %c0_23] : memref<8x512xf32, #tpu.memory_space<vmem>>, vector<8x512xf32>
      tpu.vector_store %arg6[%c0_22, %c0_23], %39 {strides = array<i32>} : memref<8x512xf32, #tpu.memory_space<vmem>>, vector<8x512xf32>,
      %cst_24 = arith.constant 0.000000e+00 : f32
      %41 = vector.broadcast %cst_24 : f32 to vector<8x512xf32>
      %c0_25 = arith.constant 0 : index
      %c0_26 = arith.constant 0 : index
      %42 = vector.load %arg7[%c0_25, %c0_26] : memref<8x512xf32, #tpu.memory_space<vmem>>, vector<8x512xf32>
      tpu.vector_store %arg7[%c0_25, %c0_26], %41 {strides = array<i32>} : memref<8x512xf32, #tpu.memory_space<vmem>>, vector<8x512xf32>,
    } else {
    }
    %c0_11 = arith.constant 0 : index
    %c0_12 = arith.constant 0 : index
    %30 = vector.load %arg6[%c0_11, %c0_12] : memref<8x512xf32, #tpu.memory_space<vmem>>, vector<8x512xf32>
    %cst_13 = arith.constant dense<0.000000e+00> : vector<8x512xf32>
    %31 = vector.multi_reduction <add>, %26, %cst_13 [0] : vector<1x8x512xf32> to vector<8x512xf32>
    %32 = arith.addf %30, %31 : vector<8x512xf32>
    %c0_14 = arith.constant 0 : index
    %c0_15 = arith.constant 0 : index
    %33 = vector.load %arg6[%c0_14, %c0_15] : memref<8x512xf32, #tpu.memory_space<vmem>>, vector<8x512xf32>
    tpu.vector_store %arg6[%c0_14, %c0_15], %32 {strides = array<i32>} : memref<8x512xf32, #tpu.memory_space<vmem>>, vector<8x512xf32>,
    %c0_16 = arith.constant 0 : index
    %c0_17 = arith.constant 0 : index
    %34 = vector.load %arg7[%c0_16, %c0_17] : memref<8x512xf32, #tpu.memory_space<vmem>>, vector<8x512xf32>
    %35 = arith.mulf %26, %26 : vector<1x8x512xf32>
    %cst_18 = arith.constant dense<0.000000e+00> : vector<8x512xf32>
    %36 = vector.multi_reduction <add>, %35, %cst_18 [0] : vector<1x8x512xf32> to vector<8x512xf32>
    %37 = arith.addf %34, %36 : vector<8x512xf32>
    %c0_19 = arith.constant 0 : index
    %c0_20 = arith.constant 0 : index
    %38 = vector.load %arg7[%c0_19, %c0_20] : memref<8x512xf32, #tpu.memory_space<vmem>>, vector<8x512xf32>
    tpu.vector_store %arg7[%c0_19, %c0_20], %37 {strides = array<i32>} : memref<8x512xf32, #tpu.memory_space<vmem>>, vector<8x512xf32>,
    return
  }
  func.func @transform_0(%arg0: i32, %arg1: i32) -> (i32, i32) {
    %c1_i32 = arith.constant 1 : i32
    %0 = arith.muli %arg0, %c1_i32 : i32
    %1 = arith.addi %0, %arg1 : i32
    %c0_i32 = arith.constant 0 : i32
    %c0_i32_0 = arith.constant 0 : i32
    return %1, %c0_i32 : i32, i32
  }
  func.func @transform_1(%arg0: i32, %arg1: i32) -> (i32, i32) {
    %c0_i32 = arith.constant 0 : i32
    %c0_i32_0 = arith.constant 0 : i32
    %c0_i32_1 = arith.constant 0 : i32
    return %c0_i32, %c0_i32_0 : i32, i32
  }
  func.func @transform_2(%arg0: i32, %arg1: i32) -> (i32, i32) {
    %c0_i32 = arith.constant 0 : i32
    %c0_i32_0 = arith.constant 0 : i32
    %c0_i32_1 = arith.constant 0 : i32
    return %c0_i32, %c0_i32_0 : i32, i32
  }
  func.func @transform_3(%arg0: i32, %arg1: i32) -> (i32, i32) {
    %c1_i32 = arith.constant 1 : i32
    %0 = arith.muli %arg0, %c1_i32 : i32
    %1 = arith.addi %0, %arg1 : i32
    %c0_i32 = arith.constant 0 : i32
    %c0_i32_0 = arith.constant 0 : i32
    return %1, %c0_i32 : i32, i32
  }
  func.func @transform_4(%arg0: i32, %arg1: i32) -> (i32, i32) {
    %c0_i32 = arith.constant 0 : i32
    %c0_i32_0 = arith.constant 0 : i32
    return %arg0, %c0_i32 : i32, i32
  }
  func.func @transform_5(%arg0: i32, %arg1: i32) -> (i32, i32) {
    %c0_i32 = arith.constant 0 : i32
    %c0_i32_0 = arith.constant 0 : i32
    return %arg0, %c0_i32 : i32, i32
  }
}

module attributes {stable_mosaic.version = 11 : i64} {
  func.func @_head_kernel(%arg0: i32, %arg1: memref<8x512xbf16, #tpu.memory_space<vmem>>, %arg2: memref<8x256xf32, #tpu.memory_space<vmem>>, %arg3: memref<512x256xbf16, #tpu.memory_space<vmem>>, %arg4: memref<1x256xf32, #tpu.memory_space<vmem>>, %arg5: memref<1x1xf32, #tpu.memory_space<vmem>>, %arg6: memref<8x1xf32, #tpu.memory_space<vmem>>) attributes {dimension_semantics = [#tpu.dimension_semantics<parallel>], iteration_bounds = array<i64: 1>, scalar_prefetch = 0 : i64, scratch_operands = 0 : i64, tpu.core_type = #tpu.core_type<tc>, window_params = [{transform_indices = @transform_0, window_bounds = array<i64: 8, 512>}, {transform_indices = @transform_1, window_bounds = array<i64: 8, 256>}, {pipeline_mode = #tpu.pipeline_mode<synchronous>, transform_indices = @transform_2, window_bounds = array<i64: 512, 256>}, {pipeline_mode = #tpu.pipeline_mode<synchronous>, transform_indices = @transform_3, window_bounds = array<i64: 1, 256>}, {pipeline_mode = #tpu.pipeline_mode<synchronous>, transform_indices = @transform_4, window_bounds = array<i64: 1, 1>}, {transform_indices = @transform_5, window_bounds = array<i64: 8, 1>}]} {
    %c0 = arith.constant 0 : index
    %c0_0 = arith.constant 0 : index
    %0 = vector.load %arg1[%c0, %c0_0] : memref<8x512xbf16, #tpu.memory_space<vmem>>, vector<8x512xbf16>
    %c0_1 = arith.constant 0 : index
    %c0_2 = arith.constant 0 : index
    %1 = vector.load %arg3[%c0_1, %c0_2] : memref<512x256xbf16, #tpu.memory_space<vmem>>, vector<512x256xbf16>
    %cst = arith.constant dense<0.000000e+00> : vector<8x256xf32>
    %2 = tpu.matmul %0, %1, %cst {dimension_numbers = #tpu.dot_dimension_numbers<[1], [0], [0], [1], [0, 0, 1, 1], [], []>} : vector<8x512xbf16>, vector<512x256xbf16>, vector<8x256xf32> -> vector<8x256xf32>
    %c0_3 = arith.constant 0 : index
    %c0_4 = arith.constant 0 : index
    %3 = vector.load %arg2[%c0_3, %c0_4] : memref<8x256xf32, #tpu.memory_space<vmem>>, vector<8x256xf32>
    %4 = arith.addf %2, %3 : vector<8x256xf32>
    %cst_5 = arith.constant 0.000000e+00 : f32
    %5 = vector.broadcast %cst_5 : f32 to vector<8x256xf32>
    %6 = arith.cmpf ogt, %4, %5 : vector<8x256xf32>
    %cst_6 = arith.constant 2.000000e-01 : f32
    %7 = vector.broadcast %cst_6 : f32 to vector<8x256xf32>
    %8 = arith.mulf %7, %4 : vector<8x256xf32>
    %9 = arith.select %6, %4, %8 : vector<8x256xi1>, vector<8x256xf32>
    %c0_7 = arith.constant 0 : index
    %c0_8 = arith.constant 0 : index
    %10 = vector.load %arg4[%c0_7, %c0_8] : memref<1x256xf32, #tpu.memory_space<vmem>>, vector<1x256xf32>
    %11 = vector.broadcast %10 : vector<1x256xf32> to vector<8x256xf32>
    %12 = arith.mulf %9, %11 : vector<8x256xf32>
    %cst_9 = arith.constant dense<0.000000e+00> : vector<8xf32>
    %13 = vector.multi_reduction <add>, %12, %cst_9 [1] : vector<8x256xf32> to vector<8xf32>
    %14 = vector.shape_cast %13 : vector<8xf32> to vector<8x1xf32>
    %c0_10 = arith.constant 0 : index
    %c0_11 = arith.constant 0 : index
    %15 = vector.load %arg5[%c0_10, %c0_11] : memref<1x1xf32, #tpu.memory_space<vmem>>, vector<1x1xf32>
    %16 = vector.broadcast %15 : vector<1x1xf32> to vector<8x1xf32>
    %17 = arith.addf %14, %16 : vector<8x1xf32>
    %18 = arith.negf %17 : vector<8x1xf32>
    %19 = math.exp %18 : vector<8x1xf32>
    %cst_12 = arith.constant 1.000000e+00 : f32
    %20 = vector.broadcast %cst_12 : f32 to vector<8x1xf32>
    %21 = arith.addf %20, %19 : vector<8x1xf32>
    %22 = arith.divf %20, %21 : vector<8x1xf32>
    %c0_13 = arith.constant 0 : index
    %c0_14 = arith.constant 0 : index
    %23 = vector.load %arg6[%c0_13, %c0_14] : memref<8x1xf32, #tpu.memory_space<vmem>>, vector<8x1xf32>
    tpu.vector_store %arg6[%c0_13, %c0_14], %22 {strides = array<i32>} : memref<8x1xf32, #tpu.memory_space<vmem>>, vector<8x1xf32>,
    return
  }
  func.func @transform_0(%arg0: i32) -> (i32, i32) {
    %c0_i32 = arith.constant 0 : i32
    %c0_i32_0 = arith.constant 0 : i32
    return %arg0, %c0_i32 : i32, i32
  }
  func.func @transform_1(%arg0: i32) -> (i32, i32) {
    %c0_i32 = arith.constant 0 : i32
    %c0_i32_0 = arith.constant 0 : i32
    return %arg0, %c0_i32 : i32, i32
  }
  func.func @transform_2(%arg0: i32) -> (i32, i32) {
    %c0_i32 = arith.constant 0 : i32
    %c0_i32_0 = arith.constant 0 : i32
    %c0_i32_1 = arith.constant 0 : i32
    return %c0_i32, %c0_i32_0 : i32, i32
  }
  func.func @transform_3(%arg0: i32) -> (i32, i32) {
    %c0_i32 = arith.constant 0 : i32
    %c0_i32_0 = arith.constant 0 : i32
    %c0_i32_1 = arith.constant 0 : i32
    return %c0_i32, %c0_i32_0 : i32, i32
  }
  func.func @transform_4(%arg0: i32) -> (i32, i32) {
    %c0_i32 = arith.constant 0 : i32
    %c0_i32_0 = arith.constant 0 : i32
    %c0_i32_1 = arith.constant 0 : i32
    return %c0_i32, %c0_i32_0 : i32, i32
  }
  func.func @transform_5(%arg0: i32) -> (i32, i32) {
    %c0_i32 = arith.constant 0 : i32
    %c0_i32_0 = arith.constant 0 : i32
    return %arg0, %c0_i32 : i32, i32
  }
}

</mosaic_0001>

<bundles_post_ra>
// kernel: mul.32
= control target key start
LH: loop header
LB: loop body
LE: loop exit
PB: predicated region body
PF: predicated region fallthrough
CT: control target
= control target key end

     0   :  { %vm3_vm0 = vcmask 523264   ;;  %s13_s11 = smov 64   ;;  %vm9_vm1 = vcmask 1048064   ;;  %s36_s0 = inlined_call_operand.vmem [shape: f32[9,64], index: 0, kind: input, shape index: {}]   ;;  %s37_s1 = inlined_call_operand.vmem [shape: f32[576], index: 1, kind: output, shape index: {}]  }
   0x1   :  { %v2_v0 = vld [vmem:[%s36_s0] ss:$2 sm:$0x1f]   ;;  %v11_v1 = vld [vmem:[%s36_s0 + $0x1] ss:$2 sm:$0xf]  }
   0x2   :  { %4 = vst.msk [vmem:[%s37_s1] sm:$0x1f] %vm3_vm0, %v2_v0   ;;  %7 = vrot.lane.b32.xlu0 %v11_v1, %s13_s11 }
  0x74   :  { %v8_v2 = vpop.permute.xlu0 %7  }
  0x75   :  { %10 = vst.msk [vmem:[%s37_s1] sm:$0xf] %vm9_vm1, %v8_v2  }

// kernel: tile.33
= control target key start
LH: loop header
LB: loop body
LE: loop exit
PB: predicated region body
PF: predicated region fallthrough
CT: control target
= control target key end

     0   :  { %s28_s0 = inlined_call_operand.vmem [shape: f32[64], index: 0, kind: input, shape index: {}]   ;;  %s29_s1 = inlined_call_operand.vmem [shape: f32[9,64], index: 1, kind: output, shape index: {}]  }
   0x1   :  { %v4_v0 = vld [vmem:[%s28_s0] ss:$0 sm:$0xff] }
   0x2   :  { %5 = vst [vmem:[%s29_s1] sm:$0xff] %v4_v0  ;;  %8 = vst [vmem:[%s29_s1 + $0x8] sm:$0xff] %v4_v0 }

// kernel: discriminator_forward.5
= control target key start
LH: loop header
LB: loop body
LE: loop exit
PB: predicated region body
PF: predicated region fallthrough
CT: control target
= control target key end

     0   :  { %11 = vsyncpa [#allocation3], 0  ;;  %s2236_s18 = smov [#allocation2]   ;;  %s3067_s0 = inlined_call_operand.vmem [shape: bf16[456,27], index: 0, kind: input, shape index: {}]   ;;  %s3068_s1 = inlined_call_operand.vmem [shape: bf16[27,64], index: 1, kind: input, shape index: {}]   ;;  %s3069_s2 = inlined_call_operand.hbm [shape: f32[1,64], index: 2, kind: input, shape index: {}]   ;;  %s3070_s3 = inlined_call_operand.vmem [shape: bf16[456,64], index: 3, kind: output, shape index: {0}]   ;;  %s3071_s4 = inlined_call_operand.vmem [shape: f32[8,64], index: 4, kind: output, shape index: {1}]   ;;  %s3072_s5 = inlined_call_operand.vmem [shape: f32[8,64], index: 5, kind: output, shape index: {2}]  }
   0x1   :  { %s30_s19 = sshll.u32 %s2236_s18, 4  ;;  %s2212_s22 = scalar_lea.hbm %s3069_s2, 16  ;;  %s31_s19 = int_to_ptr.vmem [resolvable:$true] %s30_s19 }
   0x2   :  { %p2213_p0 = scmp.ne.s32.totalorder %s3069_s2, %s2212_s22  ;;  %p2216_p1 = scmp.lt.u32.totalorder %s2212_s22, %s3069_s2 }
   0x4   :  { %p2218_p2 = pnand %p2216_p1, %p2213_p0 }
   0x6   :  { %2221 = shalt.err (!%p2218_p2)
}
   0x7   :  { %s2222_s27 = scalar_lea.vmem %s31_s19, 16  ;;  %s2226_s28 = scalar_lea.vmem %s31_s19, 32 }
   0x8   :  { %p2223_p3 = scmp.ne.s32.totalorder %s31_s19, %s2222_s27  ;;  %p2227_p4 = scmp.lt.s32.totalorder %s31_s19, %s31_s19 }
   0x9   :  { %p2228_p5 = scmp.lt.s32.totalorder %s2226_s28, %s2222_s27 }
   0xb   :  { %p2229_p6 = por %p2228_p5, %p2227_p4 }
   0xd   :  { %p2230_p7 = pnand %p2229_p6, %p2223_p3 }
   0xf   :  { %2233 = shalt.err (!%p2230_p7)
}
  0x10   :  { %33 = dma.hbm_to_vmem [thread:$0]  %s3069_s2, 16, %s31_s19, [#allocation3]  }
  0x11   :  { %2234 = dma.done.wait [#allocation3], 16  }
  0x12   :  { %2235 = vsyncadd [#allocation3], 4294967280  ;;  %v2237_v0 = vmov 0.0   ;;  %vm376_vm0 = vcmask 1044480   ;;  %vm2238_vm1 = vmmov 0   ;;  %vm377_vm2 = vcmask 1045504  }
  0x13   :  { %2052 = vmatprep.subr.bf16.mxu0 %v2237_v0  ;;  %2172 = vmatprep.subr.bf16.mxu1 %v2237_v0  ;;  %v2239_v1 = vmov 65535   ;;  %v2180_v3 = vld [vmem:[%s3068_s1] sm:$0xff]   ;;  %v2181_v5 = vld [vmem:[%s3068_s1 + $0x8] sm:$0x3f]   ;;  %vm288_vm3 = vcmask 220160   ;;  %v2190_v8 = vld [vmem:[%s3067_s0 + $0x78] sm:$0xff]  }
  0x14   :  { %2056 = vmatprep.mubr.msk.bf16.mxu0 %vm2238_vm1, %v2237_v0  ;;  %2116 = vmatprep.mubr.msk.bf16.mxu1 %vm2238_vm1, %v2237_v0  ;;  %v378_v2 = vsel %vm376_vm0, 4294967295, %v2239_v1  ;;  %v2182_v7 = vld [vmem:[%s3067_s0] sm:$0xff]   ;;  %v2183_v9 = vld [vmem:[%s3067_s0 + $0x8] sm:$0xff]   ;;  %v2184_v11 = vld [vmem:[%s3067_s0 + $0x10] sm:$0xff]   ;;  %vm1512_vm4 = vcmask 523264   ;;  %vm1047_vm6 = vcmask 519168  }
  0x15   :  { %v379_v4 = vsel %vm377_vm2, %v378_v2, 0  ;;  %2053 = vmatpush3.bf16.msra.mxu0 %v2180_v3  ;;  %2174 = vmatpush3.bf16.msra.mxu1 %v2180_v3  ;;  %v2192_v10 = vld [vmem:[%s3067_s0 + $0x80] sm:$0xff]   ;;  %v2194_v12 = vld [vmem:[%s3067_s0 + $0x88] sm:$0xff]   ;;  %v2185_v13 = vld [vmem:[%s3067_s0 + $0x18] sm:$0xff]   ;;  %1513 = vst.msk [vmem:[%s3071_s4] sm:$0xff] %vm1512_vm4, %v2237_v0 }
  0x16   :  { %2054 = vmatprep.subr.bf16.mxu0 %v2237_v0  ;;  %v381_v6 = vand.u32 %v2181_v5, %v379_v4  ;;  %2173 = vmatprep.subr.bf16.mxu1 %v2237_v0  ;;  %v2196_v14 = vld [vmem:[%s3067_s0 + $0x90] sm:$0xff]   ;;  %v2186_v15 = vld [vmem:[%s3067_s0 + $0x20] sm:$0xff]   ;;  %v2198_v16 = vld [vmem:[%s3067_s0 + $0x98] sm:$0xff]   ;;  %1514 = vst.msk [vmem:[%s3072_s5] sm:$0xff] %vm1512_vm4, %v2237_v0 }
  0x17   :  { %v2187_v17 = vld [vmem:[%s3067_s0 + $0x28] sm:$0xff]   ;;  %v2200_v18 = vld [vmem:[%s3067_s0 + $0xa0] sm:$0xff]   ;;  %v2188_v19 = vld [vmem:[%s3067_s0 + $0x30] sm:$0xff]  }
  0x18   :  { %v2202_v20 = vld [vmem:[%s3067_s0 + $0xa8] sm:$0xff]   ;;  %v2189_v21 = vld [vmem:[%s3067_s0 + $0x38] sm:$0xff]   ;;  %v2204_v22 = vld [vmem:[%s3067_s0 + $0xb0] sm:$0xff]  }
  0x19   :  { %2055 = vmatpush3.bf16.msra.mxu0 %v381_v6  ;;  %2175 = vmatpush3.bf16.msra.mxu1 %v381_v6  ;;  %v2191_v23 = vld [vmem:[%s3067_s0 + $0x40] sm:$0xff]   ;;  %v2205_v24 = vld [vmem:[%s3067_s0 + $0xb8] sm:$0xff]   ;;  %v2193_v25 = vld [vmem:[%s3067_s0 + $0x48] sm:$0xff]  }
  0x1a   :  { %v2206_v26 = vld [vmem:[%s3067_s0 + $0xc0] sm:$0xff]   ;;  %v2195_v27 = vld [vmem:[%s3067_s0 + $0x50] sm:$0xff]   ;;  %v2207_v28 = vld [vmem:[%s3067_s0 + $0xc8] sm:$0xff]  }
  0x1b   :  { %v2197_v29 = vld [vmem:[%s3067_s0 + $0x58] sm:$0xff]   ;;  %v2208_v30 = vld [vmem:[%s3067_s0 + $0xd0] sm:$0xff]   ;;  %v2199_v31 = vld [vmem:[%s3067_s0 + $0x60] sm:$0xff]  }
  0x1c   :  { %2057 = vmatmul.mubr.msk.bf16.vlgmr.msra.gmra.mrb[0].mxu0 %vm288_vm3, %v2182_v7  ;;  %2117 = vmatmul.mubr.msk.bf16.vlgmr.msra.gmra.mrb[0].mxu1 %vm288_vm3, %v2190_v8  ;;  %v2209_v32 = vld [vmem:[%s3067_s0 + $0xd8] sm:$0xff]   ;;  %v2201_v33 = vld [vmem:[%s3067_s0 + $0x68] sm:$0xff]   ;;  %v2210_v34 = vld [vmem:[%s3067_s0 + $0xe0] ss:$0 sps:$4 sm:$0xff]  }
  0x1d   :  { %2060 = vmatprep.mubr.msk.bf16.mxu0 %vm2238_vm1, %v2237_v0  ;;  %2120 = vmatprep.mubr.msk.bf16.mxu1 %vm2238_vm1, %v2237_v0  ;;  %v2203_v35 = vld [vmem:[%s3067_s0 + $0x70] sm:$0xff]   ;;  %v2476_v36 = vld [vmem:[#allocation2] ss:$0 sm:$0xff] }
  0x24   :  { %2061 = vmatmul.mubr.msk.bf16.gmra.mrb[4].mxu0 %vm288_vm3, %v2183_v9  ;;  %2121 = vmatmul.mubr.msk.bf16.gmra.mrb[4].mxu1 %vm288_vm3, %v2192_v10 }
  0x25   :  { %2064 = vmatprep.mubr.msk.bf16.mxu0 %vm2238_vm1, %v2237_v0  ;;  %2124 = vmatprep.mubr.msk.bf16.mxu1 %vm2238_vm1, %v2237_v0 }
  0x2c   :  { %2065 = vmatmul.mubr.msk.bf16.gmra.mrb[8].mxu0 %vm288_vm3, %v2184_v11  ;;  %2125 = vmatmul.mubr.msk.bf16.gmra.mrb[8].mxu1 %vm288_vm3, %v2194_v12 }
  0x2d   :  { %2068 = vmatprep.mubr.msk.bf16.mxu0 %vm2238_vm1, %v2237_v0  ;;  %2128 = vmatprep.mubr.msk.bf16.mxu1 %vm2238_vm1, %v2237_v0 }
  0x34   :  { %2069 = vmatmul.mubr.msk.bf16.gmra.mrb[12].mxu0 %vm288_vm3, %v2185_v13  ;;  %2129 = vmatmul.mubr.msk.bf16.gmra.mrb[12].mxu1 %vm288_vm3, %v2196_v14 }
  0x35   :  { %2072 = vmatprep.mubr.msk.bf16.mxu0 %vm2238_vm1, %v2237_v0  ;;  %2132 = vmatprep.mubr.msk.bf16.mxu1 %vm2238_vm1, %v2237_v0 }
  0x3c   :  { %2073 = vmatmul.mubr.msk.bf16.gmra.mrb[16].mxu0 %vm288_vm3, %v2186_v15  ;;  %2133 = vmatmul.mubr.msk.bf16.gmra.mrb[16].mxu1 %vm288_vm3, %v2198_v16 }
  0x3d   :  { %2076 = vmatprep.mubr.msk.bf16.mxu0 %vm2238_vm1, %v2237_v0  ;;  %2136 = vmatprep.mubr.msk.bf16.mxu1 %vm2238_vm1, %v2237_v0 }
  0x44   :  { %2077 = vmatmul.mubr.msk.bf16.gmra.mrb[20].mxu0 %vm288_vm3, %v2187_v17  ;;  %2137 = vmatmul.mubr.msk.bf16.gmra.mrb[20].mxu1 %vm288_vm3, %v2200_v18 }
  0x45   :  { %2080 = vmatprep.mubr.msk.bf16.mxu0 %vm2238_vm1, %v2237_v0  ;;  %2140 = vmatprep.mubr.msk.bf16.mxu1 %vm2238_vm1, %v2237_v0 }
  0x4c   :  { %2081 = vmatmul.mubr.msk.bf16.gmra.mrb[24].mxu0 %vm288_vm3, %v2188_v19  ;;  %2141 = vmatmul.mubr.msk.bf16.gmra.mrb[24].mxu1 %vm288_vm3, %v2202_v20 }
  0x4d   :  { %2084 = vmatprep.mubr.msk.bf16.mxu0 %vm2238_vm1, %v2237_v0  ;;  %2144 = vmatprep.mubr.msk.bf16.mxu1 %vm2238_vm1, %v2237_v0 }
  0x54   :  { %2085 = vmatmul.mubr.msk.bf16.gmra.mrb[28].mxu0 %vm288_vm3, %v2189_v21  ;;  %2145 = vmatmul.mubr.msk.bf16.gmra.mrb[28].mxu1 %vm288_vm3, %v2204_v22 }
  0x55   :  { %2088 = vmatprep.mubr.msk.bf16.mxu0 %vm2238_vm1, %v2237_v0  ;;  %2148 = vmatprep.mubr.msk.bf16.mxu1 %vm2238_vm1, %v2237_v0 }
  0x5c   :  { %2089 = vmatmul.mubr.msk.bf16.gmra.mrb[32].mxu0 %vm288_vm3, %v2191_v23  ;;  %2149 = vmatmul.mubr.msk.bf16.gmra.mrb[32].mxu1 %vm288_vm3, %v2205_v24 }
  0x5d   :  { %2092 = vmatprep.mubr.msk.bf16.mxu0 %vm2238_vm1, %v2237_v0  ;;  %2152 = vmatprep.mubr.msk.bf16.mxu1 %vm2238_vm1, %v2237_v0 }
  0x64   :  { %2093 = vmatmul.mubr.msk.bf16.gmra.mrb[36].mxu0 %vm288_vm3, %v2193_v25  ;;  %2153 = vmatmul.mubr.msk.bf16.gmra.mrb[36].mxu1 %vm288_vm3, %v2206_v26 }
  0x65   :  { %2096 = vmatprep.mubr.msk.bf16.mxu0 %vm2238_vm1, %v2237_v0  ;;  %2156 = vmatprep.mubr.msk.bf16.mxu1 %vm2238_vm1, %v2237_v0 }
  0x6c   :  { %2097 = vmatmul.mubr.msk.bf16.gmra.mrb[40].mxu0 %vm288_vm3, %v2195_v27  ;;  %2157 = vmatmul.mubr.msk.bf16.gmra.mrb[40].mxu1 %vm288_vm3, %v2207_v28 }
  0x6d   :  { %2100 = vmatprep.mubr.msk.bf16.mxu0 %vm2238_vm1, %v2237_v0  ;;  %2160 = vmatprep.mubr.msk.bf16.mxu1 %vm2238_vm1, %v2237_v0 }
  0x74   :  { %2101 = vmatmul.mubr.msk.bf16.gmra.mrb[44].mxu0 %vm288_vm3, %v2197_v29  ;;  %2161 = vmatmul.mubr.msk.bf16.gmra.mrb[44].mxu1 %vm288_vm3, %v2208_v30 }
  0x75   :  { %2104 = vmatprep.mubr.msk.bf16.mxu0 %vm2238_vm1, %v2237_v0  ;;  %2164 = vmatprep.mubr.msk.bf16.mxu1 %vm2238_vm1, %v2237_v0 }
  0x7c   :  { %2105 = vmatmul.mubr.msk.bf16.gmra.mrb[48].mxu0 %vm288_vm3, %v2199_v31  ;;  %2165 = vmatmul.mubr.msk.bf16.gmra.mrb[48].mxu1 %vm288_vm3, %v2209_v32 }
  0x7d   :  { %2108 = vmatprep.mubr.msk.bf16.mxu0 %vm2238_vm1, %v2237_v0  ;;  %2168 = vmatprep.mubr.msk.bf16.mxu1 %vm2238_vm1, %v2237_v0 }
  0x84   :  { %2109 = vmatmul.mubr.msk.bf16.gmra.mrb[52].mxu0 %vm288_vm3, %v2201_v33  ;;  %2169 = vmatmul.mubr.msk.bf16.gmra.mrb[52].mxu1 %vm288_vm3, %v2210_v34 }
  0x85   :  { %2112 = vmatprep.mubr.msk.bf16.mxu0 %vm2238_vm1, %v2237_v0 }
  0x8c   :  { %2113 = vmatmul.mubr.msk.bf16.gmra.mrb[56].mxu0 %vm288_vm3, %v2203_v35 }
  0xef   :  { %v417_v37 = vpop.f32.mrb[0].mxu0  ;;  %v537_v44 = vpop.f32.mrb[0].mxu1 }
  0xf0   :  { %v418_v38 = vadd.f32 %v2476_v36, %v417_v37  ;;  %v2058_v39 = vpop.f32.mrb[1].mxu0  ;;  %v538_v45 = vadd.f32 %v2476_v36, %v537_v44  ;;  %v2118_v46 = vpop.f32.mrb[1].mxu1 }
  0xf1   :  { %v420_v40 = vpop.f32.mrb[2].mxu0  ;;  %v540_v49 = vpop.f32.mrb[2].mxu1 }
  0xf2   :  { %vm647_vm5 = vcmp.gt.f32.partialorder %v418_v38, 0.0  ;;  %v704_v41 = vmul.f32 0.2, %v418_v38  ;;  %v421_v42 = vadd.f32 %v2476_v36, %v420_v40  ;;  %v2059_v43 = vpop.f32.mrb[3].mxu0  ;;  %vm677_vm8 = vcmp.gt.f32.partialorder %v538_v45, 0.0  ;;  %v2119_v53 = vpop.f32.mrb[3].mxu1 }
  0xf3   :  { %v734_v51 = vmul.f32 0.2, %v538_v45  ;;  %v541_v52 = vadd.f32 %v2476_v36, %v540_v49 }
  0xf4   :  { %v761_v47 = vsel %vm647_vm5, %v418_v38, %v704_v41  ;;  %vm648_vm7 = vcmp.gt.f32.partialorder %v421_v42, 0.0  ;;  %v705_v48 = vmul.f32 0.2, %v421_v42 }
  0xf5   :  { %v1964_v50 = vpack.c.bf16 %v761_v47, %v761_v47  ;;  %v791_v58 = vsel %vm677_vm8, %v538_v45, %v734_v51  ;;  %vm678_vm9 = vcmp.gt.f32.partialorder %v541_v52, 0.0  ;;  %v735_v62 = vmul.f32 0.2, %v541_v52 }
  0xf6   :  { %v762_v54 = vsel %vm648_vm7, %v421_v42, %v705_v48  ;;  %v1994_v61 = vpack.c.bf16 %v791_v58, %v791_v58 }
  0xf7   :  { %1048 = vst.msk [vmem:[%s3070_s3] sm:$0xf] %vm1047_vm6, %v1964_v50  ;;  %v818_v55 = vpack.c.bf16 %v762_v54, %v761_v47  ;;  %v1965_v56 = vpack.c.bf16 %v762_v54, %v762_v54  ;;  %v425_v57 = vpop.f32.mrb[4].mxu0  ;;  %v792_v5 = vsel %vm678_vm9, %v541_v52, %v735_v62  ;;  %v545_v6 = vpop.f32.mrb[4].mxu1 }
  0xf8   :  { %v426_v59 = vadd.f32 %v2476_v36, %v425_v57  ;;  %v2062_v60 = vpop.f32.mrb[5].mxu0  ;;  %1078 = vst.msk [vmem:[%s3070_s3 + $0x78] sm:$0xf] %vm1047_vm6, %v1994_v61  ;;  %v2122_v9 = vpop.f32.mrb[5].mxu1  ;;  %v2499_v17 = vpack.c.bf16 %v792_v5, %v791_v58  ;;  %v1995_v21 = vpack.c.bf16 %v792_v5, %v792_v5  ;;  %v546_v22 = vadd.f32 %v2476_v36, %v545_v6 }
  0xf9   :  { %1049 = vst.msk [vmem:[%s3070_s3 + $0x4] sm:$0xf] %vm1047_vm6, %v1965_v56  ;;  %v1280_v63 = vunpack.c.l.bf16 %v818_v55  ;;  %v1281_v0 = vunpack.c.h.bf16 %v818_v55  ;;  %v428_v1 = vpop.f32.mrb[6].mxu0  ;;  %v548_v13 = vpop.f32.mrb[6].mxu1 }
  0xfa   :  { %vm649_vm10 = vcmp.gt.f32.partialorder %v426_v59, 0.0  ;;  %v706_v2 = vmul.f32 0.2, %v426_v59  ;;  %v429_v3 = vadd.f32 %v2476_v36, %v428_v1  ;;  %v2063_v4 = vpop.f32.mrb[7].mxu0  ;;  %v2123_v18 = vpop.f32.mrb[7].mxu1  ;;  %vm679_vm13 = vcmp.gt.f32.partialorder %v546_v22, 0.0 }
  0xfb   :  { %v1633_v7 = vmul.f32 %v1280_v63, %v1280_v63  ;;  %v1634_v8 = vmul.f32 %v1281_v0, %v1281_v0  ;;  %v1517_v10 = vsel %vm1512_vm4, %v1280_v63, 0.0  ;;  %v1518_v14 = vsel %vm1512_vm4, %v1281_v0, 0.0  ;;  %1079 = vst.msk [vmem:[%s3070_s3 + $0x7c] sm:$0xf] %vm1047_vm6, %v1995_v21 }
  0xfc   :  { %v763_v11 = vsel %vm649_vm10, %v426_v59, %v706_v2  ;;  %vm650_vm11 = vcmp.gt.f32.partialorder %v429_v3, 0.0  ;;  %v707_v12 = vmul.f32 0.2, %v429_v3  ;;  %v1519_v28 = vadd.f32 %v1518_v14, %v1517_v10 }
  0xfd   :  { %v1690_v15 = vsel %vm1512_vm4, %v1633_v7, 0.0  ;;  %v1966_v16 = vpack.c.bf16 %v763_v11, %v763_v11  ;;  %v1691_v19 = vsel %vm1512_vm4, %v1634_v8, 0.0  ;;  %v736_v41 = vmul.f32 0.2, %v546_v22 }
  0xfe   :  { %v764_v20 = vsel %vm650_vm11, %v429_v3, %v707_v12  ;;  %v1692_v29 = vadd.f32 %v1691_v19, %v1690_v15  ;;  %v549_v50 = vadd.f32 %v2476_v36, %v548_v13 }
  0xff   :  { %1050 = vst.msk [vmem:[%s3070_s3 + $0x8] sm:$0xf] %vm1047_vm6, %v1966_v16  ;;  %v819_v23 = vpack.c.bf16 %v764_v20, %v763_v11  ;;  %v1967_v24 = vpack.c.bf16 %v764_v20, %v764_v20  ;;  %v433_v25 = vpop.f32.mrb[8].mxu0  ;;  %v553_v37 = vpop.f32.mrb[8].mxu1  ;;  %v793_v59 = vsel %vm679_vm13, %v546_v22, %v736_v41 }
 0x100   :  { %v434_v26 = vadd.f32 %v2476_v36, %v433_v25  ;;  %v2066_v27 = vpop.f32.mrb[9].mxu0  ;;  %v2126_v42 = vpop.f32.mrb[9].mxu1  ;;  %v1996_v63 = vpack.c.bf16 %v793_v59, %v793_v59  ;;  %v737_v3 = vmul.f32 0.2, %v549_v50  ;;  %vm680_vm0 = vcmp.gt.f32.partialorder %v549_v50, 0.0 }
 0x101   :  { %1051 = vst.msk [vmem:[%s3070_s3 + $0xc] sm:$0xf] %vm1047_vm6, %v1967_v24  ;;  %v1282_v30 = vunpack.c.l.bf16 %v819_v23  ;;  %v1283_v31 = vunpack.c.h.bf16 %v819_v23  ;;  %v436_v32 = vpop.f32.mrb[10].mxu0  ;;  %v2518_v46 = vpop.f32.mrb[10].mxu1  ;;  %v554_v11 = vadd.f32 %v2476_v36, %v553_v37 }
 0x102   :  { %vm651_vm12 = vcmp.gt.f32.partialorder %v434_v26, 0.0  ;;  %v708_v33 = vmul.f32 0.2, %v434_v26  ;;  %v437_v34 = vadd.f32 %v2476_v36, %v436_v32  ;;  %v2067_v35 = vpop.f32.mrb[11].mxu0  ;;  %v2127_v51 = vpop.f32.mrb[11].mxu1  ;;  %v794_v21 = vsel %vm680_vm0, %v549_v50, %v737_v3 }
 0x103   :  { %v1520_v38 = vsel %vm1512_vm4, %v1282_v30, 0.0  ;;  %v1635_v39 = vmul.f32 %v1282_v30, %v1282_v30  ;;  %v1636_v40 = vmul.f32 %v1283_v31, %v1283_v31  ;;  %v1522_v47 = vsel %vm1512_vm4, %v1283_v31, 0.0  ;;  %1080 = vst.msk [vmem:[%s3070_s3 + $0x80] sm:$0xf] %vm1047_vm6, %v1996_v63 }
 0x104   :  { %v1521_v43 = vadd.f32 %v1520_v38, %v1519_v28  ;;  %v765_v44 = vsel %vm651_vm12, %v434_v26, %v708_v33  ;;  %vm652_vm14 = vcmp.gt.f32.partialorder %v437_v34, 0.0  ;;  %v709_v45 = vmul.f32 0.2, %v437_v34 }
 0x105   :  { %v1693_v48 = vsel %vm1512_vm4, %v1635_v39, 0.0  ;;  %v1968_v49 = vpack.c.bf16 %v765_v44, %v765_v44  ;;  %v1695_v55 = vsel %vm1512_vm4, %v1636_v40, 0.0  ;;  %v2547_v26 = vpack.c.bf16 %v794_v21, %v793_v59 }
 0x106   :  { %v1523_v52 = vadd.f32 %v1522_v47, %v1521_v43  ;;  %v1694_v53 = vadd.f32 %v1693_v48, %v1692_v29  ;;  %v766_v54 = vsel %vm652_vm14, %v437_v34, %v709_v45  ;;  %v1997_v31 = vpack.c.bf16 %v794_v21, %v794_v21 }
 0x107   :  { %1052 = vst.msk [vmem:[%s3070_s3 + $0x10] sm:$0xf] %vm1047_vm6, %v1968_v49  ;;  %v820_v56 = vpack.c.bf16 %v766_v54, %v765_v44  ;;  %v1969_v57 = vpack.c.bf16 %v766_v54, %v766_v54  ;;  %v441_v58 = vpop.f32.mrb[12].mxu0  ;;  %v2539_v7 = vpop.f32.mrb[12].mxu1  ;;  %vm681_vm3 = vcmp.gt.f32.partialorder %v554_v11, 0.0 }
 0x108   :  { %v1696_v60 = vadd.f32 %v1695_v55, %v1694_v53  ;;  %v442_v61 = vadd.f32 %v2476_v36, %v441_v58  ;;  %v2070_v62 = vpop.f32.mrb[13].mxu0  ;;  %v2130_v12 = vpop.f32.mrb[13].mxu1  ;;  %1081 = vst.msk [vmem:[%s3070_s3 + $0x84] sm:$0xf] %vm1047_vm6, %v1997_v31  ;;  %v738_v47 = vmul.f32 0.2, %v554_v11 }
 0x109   :  { %1053 = vst.msk [vmem:[%s3070_s3 + $0x14] sm:$0xf] %vm1047_vm6, %v1969_v57  ;;  %v1284_v0 = vunpack.c.l.bf16 %v820_v56  ;;  %v1285_v1 = vunpack.c.h.bf16 %v820_v56  ;;  %v444_v2 = vpop.f32.mrb[14].mxu0  ;;  %v2543_v16 = vpop.f32.mrb[14].mxu1  ;;  %v557_v56 = vadd.f32 %v2476_v36, %v2518_v46 }
 0x10a   :  { %vm653_vm15 = vcmp.gt.f32.partialorder %v442_v61, 0.0  ;;  %v710_v4 = vmul.f32 0.2, %v442_v61  ;;  %v445_v5 = vadd.f32 %v2476_v36, %v444_v2  ;;  %v2071_v6 = vpop.f32.mrb[15].mxu0  ;;  %v2131_v22 = vpop.f32.mrb[15].mxu1 }
 0x10b   :  { %v1524_v8 = vsel %vm1512_vm4, %v1284_v0, 0.0  ;;  %v1637_v9 = vmul.f32 %v1284_v0, %v1284_v0  ;;  %v1638_v10 = vmul.f32 %v1285_v1, %v1285_v1  ;;  %v1526_v18 = vsel %vm1512_vm4, %v1285_v1, 0.0 }
 0x10c   :  { %v1525_v13 = vadd.f32 %v1524_v8, %v1523_v52  ;;  %v767_v14 = vsel %vm653_vm15, %v442_v61, %v710_v4  ;;  %vm654_vm1 = vcmp.gt.f32.partialorder %v445_v5, 0.0  ;;  %v711_v15 = vmul.f32 0.2, %v445_v5 }
 0x10d   :  { %v1697_v19 = vsel %vm1512_vm4, %v1637_v9, 0.0  ;;  %v1970_v20 = vpack.c.bf16 %v767_v14, %v767_v14  ;;  %v1699_v27 = vsel %vm1512_vm4, %v1638_v10, 0.0  ;;  %v795_v1 = vsel %vm681_vm3, %v554_v11, %v738_v47 }
 0x10e   :  { %v1527_v23 = vadd.f32 %v1526_v18, %v1525_v13  ;;  %v1698_v24 = vadd.f32 %v1697_v19, %v1696_v60  ;;  %v768_v25 = vsel %vm654_vm1, %v445_v5, %v711_v15  ;;  %v1998_v4 = vpack.c.bf16 %v795_v1, %v795_v1 }
 0x10f   :  { %1054 = vst.msk [vmem:[%s3070_s3 + $0x18] sm:$0xf] %vm1047_vm6, %v1970_v20  ;;  %v821_v28 = vpack.c.bf16 %v768_v25, %v767_v14  ;;  %v1971_v29 = vpack.c.bf16 %v768_v25, %v768_v25  ;;  %v449_v30 = vpop.f32.mrb[16].mxu0  ;;  %v2564_v42 = vpop.f32.mrb[16].mxu1  ;;  %v739_v9 = vmul.f32 0.2, %v557_v56  ;;  %v562_v19 = vadd.f32 %v2476_v36, %v2539_v7 }
 0x110   :  { %v1700_v32 = vadd.f32 %v1699_v27, %v1698_v24  ;;  %v450_v33 = vadd.f32 %v2476_v36, %v449_v30  ;;  %v2074_v34 = vpop.f32.mrb[17].mxu0  ;;  %v2134_v48 = vpop.f32.mrb[17].mxu1  ;;  %1082 = vst.msk [vmem:[%s3070_s3 + $0x88] sm:$0xf] %vm1047_vm6, %v1998_v4  ;;  %vm682_vm8 = vcmp.gt.f32.partialorder %v557_v56, 0.0 }
 0x111   :  { %1055 = vst.msk [vmem:[%s3070_s3 + $0x1c] sm:$0xf] %vm1047_vm6, %v1971_v29  ;;  %v1286_v35 = vunpack.c.l.bf16 %v821_v28  ;;  %v1287_v37 = vunpack.c.h.bf16 %v821_v28  ;;  %v452_v38 = vpop.f32.mrb[18].mxu0  ;;  %v2567_v52 = vpop.f32.mrb[18].mxu1  ;;  %v796_v29 = vsel %vm682_vm8, %v557_v56, %v739_v9  ;;  %vm683_vm11 = vcmp.gt.f32.partialorder %v562_v19, 0.0 }
 0x112   :  { %vm655_vm2 = vcmp.gt.f32.partialorder %v450_v33, 0.0  ;;  %v712_v39 = vmul.f32 0.2, %v450_v33  ;;  %v453_v40 = vadd.f32 %v2476_v36, %v452_v38  ;;  %v2075_v41 = vpop.f32.mrb[19].mxu0  ;;  %v2135_v57 = vpop.f32.mrb[19].mxu1  ;;  %v2598_v34 = vpack.c.bf16 %v796_v29, %v795_v1 }
 0x113   :  { %v1528_v43 = vsel %vm1512_vm4, %v1286_v35, 0.0  ;;  %v1639_v44 = vmul.f32 %v1286_v35, %v1286_v35  ;;  %v1640_v45 = vmul.f32 %v1287_v37, %v1287_v37  ;;  %v1530_v53 = vsel %vm1512_vm4, %v1287_v37, 0.0 }
 0x114   :  { %v1529_v49 = vadd.f32 %v1528_v43, %v1527_v23  ;;  %v769_v50 = vsel %vm655_vm2, %v450_v33, %v712_v39  ;;  %vm656_vm5 = vcmp.gt.f32.partialorder %v453_v40, 0.0  ;;  %v713_v51 = vmul.f32 0.2, %v453_v40 }
 0x115   :  { %v1701_v54 = vsel %vm1512_vm4, %v1639_v44, 0.0  ;;  %v1972_v55 = vpack.c.bf16 %v769_v50, %v769_v50  ;;  %v1703_v61 = vsel %vm1512_vm4, %v1640_v45, 0.0  ;;  %v1999_v39 = vpack.c.bf16 %v796_v29, %v796_v29 }
 0x116   :  { %v1531_v58 = vadd.f32 %v1530_v53, %v1529_v49  ;;  %v1702_v59 = vadd.f32 %v1701_v54, %v1700_v32  ;;  %v770_v60 = vsel %vm656_vm5, %v453_v40, %v713_v51  ;;  %v740_v56 = vmul.f32 0.2, %v562_v19 }
 0x117   :  { %1056 = vst.msk [vmem:[%s3070_s3 + $0x20] sm:$0xf] %vm1047_vm6, %v1972_v55  ;;  %v822_v62 = vpack.c.bf16 %v770_v60, %v769_v50  ;;  %v1973_v63 = vpack.c.bf16 %v770_v60, %v770_v60  ;;  %v457_v0 = vpop.f32.mrb[20].mxu0  ;;  %v2589_v11 = vpop.f32.mrb[20].mxu1  ;;  %1083 = vst.msk [vmem:[%s3070_s3 + $0x8c] sm:$0xf] %vm1047_vm6, %v1999_v39  ;;  %v565_v1 = vadd.f32 %v2476_v36, %v2543_v16 }
 0x118   :  { %v1704_v2 = vadd.f32 %v1703_v61, %v1702_v59  ;;  %v458_v3 = vadd.f32 %v2476_v36, %v457_v0  ;;  %v2078_v46 = vpop.f32.mrb[21].mxu0  ;;  %v2138_v20 = vpop.f32.mrb[21].mxu1 }
 0x119   :  { %1057 = vst.msk [vmem:[%s3070_s3 + $0x24] sm:$0xf] %vm1047_vm6, %v1973_v63  ;;  %v1288_v5 = vunpack.c.l.bf16 %v822_v62  ;;  %v1289_v6 = vunpack.c.h.bf16 %v822_v62  ;;  %v460_v8 = vpop.f32.mrb[22].mxu0  ;;  %v2594_v24 = vpop.f32.mrb[22].mxu1  ;;  %vm684_vm13 = vcmp.gt.f32.partialorder %v565_v1, 0.0 }
 0x11a   :  { %vm657_vm7 = vcmp.gt.f32.partialorder %v458_v3, 0.0  ;;  %v714_v10 = vmul.f32 0.2, %v458_v3  ;;  %v461_v12 = vadd.f32 %v2476_v36, %v460_v8  ;;  %v2079_v13 = vpop.f32.mrb[23].mxu0  ;;  %v2139_v30 = vpop.f32.mrb[23].mxu1 }
 0x11b   :  { %v1532_v14 = vsel %vm1512_vm4, %v1288_v5, 0.0  ;;  %v1641_v15 = vmul.f32 %v1288_v5, %v1288_v5  ;;  %v1642_v18 = vmul.f32 %v1289_v6, %v1289_v6  ;;  %v1534_v25 = vsel %vm1512_vm4, %v1289_v6, 0.0 }
 0x11c   :  { %v1533_v21 = vadd.f32 %v1532_v14, %v1531_v58  ;;  %v771_v22 = vsel %vm657_vm7, %v458_v3, %v714_v10  ;;  %vm658_vm9 = vcmp.gt.f32.partialorder %v461_v12, 0.0  ;;  %v715_v23 = vmul.f32 0.2, %v461_v12 }
 0x11d   :  { %v1705_v27 = vsel %vm1512_vm4, %v1641_v15, 0.0  ;;  %v1974_v28 = vpack.c.bf16 %v771_v22, %v771_v22  ;;  %v1707_v7 = vsel %vm1512_vm4, %v1642_v18, 0.0  ;;  %v797_v10 = vsel %vm683_vm11, %v562_v19, %v740_v56 }
 0x11e   :  { %v1535_v31 = vadd.f32 %v1534_v25, %v1533_v21  ;;  %v1706_v32 = vadd.f32 %v1705_v27, %v1704_v2  ;;  %v772_v33 = vsel %vm658_vm9, %v461_v12, %v715_v23  ;;  %v2000_v14 = vpack.c.bf16 %v797_v10, %v797_v10 }
 0x11f   :  { %1058 = vst.msk [vmem:[%s3070_s3 + $0x28] sm:$0xf] %vm1047_vm6, %v1974_v28  ;;  %v823_v35 = vpack.c.bf16 %v772_v33, %v771_v22  ;;  %v1975_v37 = vpack.c.bf16 %v772_v33, %v772_v33  ;;  %v465_v38 = vpop.f32.mrb[24].mxu0  ;;  %v2615_v51 = vpop.f32.mrb[24].mxu1  ;;  %v741_v19 = vmul.f32 0.2, %v565_v1 }
 0x120   :  { %v1708_v40 = vadd.f32 %v1707_v7, %v1706_v32  ;;  %v466_v41 = vadd.f32 %v2476_v36, %v465_v38  ;;  %v2082_v43 = vpop.f32.mrb[25].mxu0  ;;  %v2142_v57 = vpop.f32.mrb[25].mxu1  ;;  %1084 = vst.msk [vmem:[%s3070_s3 + $0x90] sm:$0xf] %vm1047_vm6, %v2000_v14 }
 0x121   :  { %1059 = vst.msk [vmem:[%s3070_s3 + $0x2c] sm:$0xf] %vm1047_vm6, %v1975_v37  ;;  %v1290_v44 = vunpack.c.l.bf16 %v823_v35  ;;  %v1291_v45 = vunpack.c.h.bf16 %v823_v35  ;;  %v468_v47 = vpop.f32.mrb[26].mxu0  ;;  %v2618_v61 = vpop.f32.mrb[26].mxu1  ;;  %v798_v39 = vsel %vm684_vm13, %v565_v1, %v741_v19 }
 0x122   :  { %vm659_vm10 = vcmp.gt.f32.partialorder %v466_v41, 0.0  ;;  %v716_v48 = vmul.f32 0.2, %v466_v41  ;;  %v469_v49 = vadd.f32 %v2476_v36, %v468_v47  ;;  %v2083_v50 = vpop.f32.mrb[27].mxu0  ;;  %v2143_v2 = vpop.f32.mrb[27].mxu1 }
 0x123   :  { %v1536_v53 = vsel %vm1512_vm4, %v1290_v44, 0.0  ;;  %v1643_v54 = vmul.f32 %v1290_v44, %v1290_v44  ;;  %v1644_v55 = vmul.f32 %v1291_v45, %v1291_v45  ;;  %v1538_v62 = vsel %vm1512_vm4, %v1291_v45, 0.0 }
 0x124   :  { %v1537_v58 = vadd.f32 %v1536_v53, %v1535_v31  ;;  %v773_v59 = vsel %vm659_vm10, %v466_v41, %v716_v48  ;;  %vm660_vm12 = vcmp.gt.f32.partialorder %v469_v49, 0.0  ;;  %v717_v60 = vmul.f32 0.2, %v469_v49 }
 0x125   :  { %v1709_v63 = vsel %vm1512_vm4, %v1643_v54, 0.0  ;;  %v1976_v0 = vpack.c.bf16 %v773_v59, %v773_v59  ;;  %v1711_v5 = vsel %vm1512_vm4, %v1644_v55, 0.0  ;;  %v2649_v45 = vpack.c.bf16 %v798_v39, %v797_v10 }
 0x126   :  { %v1539_v3 = vadd.f32 %v1538_v62, %v1537_v58  ;;  %v1710_v46 = vadd.f32 %v1709_v63, %v1708_v40  ;;  %v774_v4 = vsel %vm660_vm12, %v469_v49, %v717_v60  ;;  %v2001_v53 = vpack.c.bf16 %v798_v39, %v798_v39 }
 0x127   :  { %1060 = vst.msk [vmem:[%s3070_s3 + $0x30] sm:$0xf] %vm1047_vm6, %v1976_v0  ;;  %v824_v6 = vpack.c.bf16 %v774_v4, %v773_v59  ;;  %v1977_v8 = vpack.c.bf16 %v774_v4, %v774_v4  ;;  %v473_v9 = vpop.f32.mrb[28].mxu0  ;;  %v2642_v30 = vpop.f32.mrb[28].mxu1  ;;  %v570_v54 = vadd.f32 %v2476_v36, %v2564_v42 }
 0x128   :  { %v1712_v12 = vadd.f32 %v1711_v5, %v1710_v46  ;;  %v474_v13 = vadd.f32 %v2476_v36, %v473_v9  ;;  %v2086_v16 = vpop.f32.mrb[29].mxu0  ;;  %v2146_v7 = vpop.f32.mrb[29].mxu1  ;;  %1085 = vst.msk [vmem:[%s3070_s3 + $0x94] sm:$0xf] %vm1047_vm6, %v2001_v53 }
 0x129   :  { %1061 = vst.msk [vmem:[%s3070_s3 + $0x34] sm:$0xf] %vm1047_vm6, %v1977_v8  ;;  %v1292_v15 = vunpack.c.l.bf16 %v824_v6  ;;  %v1293_v18 = vunpack.c.h.bf16 %v824_v6  ;;  %v476_v20 = vpop.f32.mrb[30].mxu0  ;;  %v2647_v40 = vpop.f32.mrb[30].mxu1  ;;  %vm685_vm1 = vcmp.gt.f32.partialorder %v570_v54, 0.0  ;;  %v573_v7 = vadd.f32 %v2476_v36, %v2567_v52 }
 0x12a   :  { %vm661_vm14 = vcmp.gt.f32.partialorder %v474_v13, 0.0  ;;  %v718_v21 = vmul.f32 0.2, %v474_v13  ;;  %v477_v22 = vadd.f32 %v2476_v36, %v476_v20  ;;  %v2087_v23 = vpop.f32.mrb[31].mxu0  ;;  %v2147_v47 = vpop.f32.mrb[31].mxu1 }
 0x12b   :  { %v1540_v25 = vsel %vm1512_vm4, %v1292_v15, 0.0  ;;  %v1542_v27 = vsel %vm1512_vm4, %v1293_v18, 0.0  ;;  %v1645_v28 = vmul.f32 %v1292_v15, %v1292_v15  ;;  %v1646_v29 = vmul.f32 %v1293_v18, %v1293_v18 }
 0x12c   :  { %v1541_v31 = vadd.f32 %v1540_v25, %v1539_v3  ;;  %v775_v32 = vsel %vm661_vm14, %v474_v13, %v718_v21  ;;  %vm662_vm15 = vcmp.gt.f32.partialorder %v477_v22, 0.0  ;;  %v719_v33 = vmul.f32 0.2, %v477_v22 }
 0x12d   :  { %v1713_v35 = vsel %vm1512_vm4, %v1645_v28, 0.0  ;;  %v1715_v37 = vsel %vm1512_vm4, %v1646_v29, 0.0  ;;  %v1978_v38 = vpack.c.bf16 %v775_v32, %v775_v32  ;;  %v742_v46 = vmul.f32 0.2, %v570_v54 }
 0x12e   :  { %v1543_v41 = vadd.f32 %v1542_v27, %v1541_v31  ;;  %v1714_v43 = vadd.f32 %v1713_v35, %v1712_v12  ;;  %v776_v44 = vsel %vm662_vm15, %v477_v22, %v719_v33  ;;  %v578_v47 = vadd.f32 %v2476_v36, %v2589_v11 }
 0x12f   :  { %1062 = vst.msk [vmem:[%s3070_s3 + $0x38] sm:$0xf] %vm1047_vm6, %v1978_v38  ;;  %v825_v48 = vpack.c.bf16 %v776_v44, %v775_v32  ;;  %v1979_v49 = vpack.c.bf16 %v776_v44, %v776_v44  ;;  %v481_v50 = vpop.f32.mrb[32].mxu0  ;;  %v2667_v0 = vpop.f32.mrb[32].mxu1  ;;  %v799_v19 = vsel %vm685_vm1, %v570_v54, %v742_v46  ;;  %vm686_vm7 = vcmp.gt.f32.partialorder %v573_v7, 0.0 }
 0x130   :  { %v1716_v55 = vadd.f32 %v1715_v37, %v1714_v43  ;;  %v482_v56 = vadd.f32 %v2476_v36, %v481_v50  ;;  %v2090_v57 = vpop.f32.mrb[33].mxu0  ;;  %v2150_v4 = vpop.f32.mrb[33].mxu1  ;;  %v2002_v29 = vpack.c.bf16 %v799_v19, %v799_v19  ;;  %vm687_vm9 = vcmp.gt.f32.partialorder %v578_v47, 0.0 }
 0x131   :  { %1063 = vst.msk [vmem:[%s3070_s3 + $0x3c] sm:$0xf] %vm1047_vm6, %v1979_v49  ;;  %v1294_v58 = vunpack.c.l.bf16 %v825_v48  ;;  %v1295_v59 = vunpack.c.h.bf16 %v825_v48  ;;  %v484_v60 = vpop.f32.mrb[34].mxu0  ;;  %v2670_v9 = vpop.f32.mrb[34].mxu1 }
 0x132   :  { %vm663_vm0 = vcmp.gt.f32.partialorder %v482_v56, 0.0  ;;  %v720_v62 = vmul.f32 0.2, %v482_v56  ;;  %v485_v42 = vadd.f32 %v2476_v36, %v484_v60  ;;  %v2091_v63 = vpop.f32.mrb[35].mxu0  ;;  %v2151_v16 = vpop.f32.mrb[35].mxu1 }
 0x133   :  { %v1544_v1 = vsel %vm1512_vm4, %v1294_v58, 0.0  ;;  %v1647_v2 = vmul.f32 %v1294_v58, %v1294_v58  ;;  %v1648_v3 = vmul.f32 %v1295_v59, %v1295_v59  ;;  %v1546_v10 = vsel %vm1512_vm4, %v1295_v59, 0.0  ;;  %1086 = vst.msk [vmem:[%s3070_s3 + $0x98] sm:$0xf] %vm1047_vm6, %v2002_v29 }
 0x134   :  { %v1545_v5 = vadd.f32 %v1544_v1, %v1543_v41  ;;  %v777_v6 = vsel %vm663_vm0, %v482_v56, %v720_v62  ;;  %vm664_vm2 = vcmp.gt.f32.partialorder %v485_v42, 0.0  ;;  %v721_v8 = vmul.f32 0.2, %v485_v42 }
 0x135   :  { %v1717_v12 = vsel %vm1512_vm4, %v1647_v2, 0.0  ;;  %v1980_v13 = vpack.c.bf16 %v777_v6, %v777_v6  ;;  %v1719_v20 = vsel %vm1512_vm4, %v1648_v3, 0.0  ;;  %v743_v62 = vmul.f32 0.2, %v573_v7 }
 0x136   :  { %v1547_v14 = vadd.f32 %v1546_v10, %v1545_v5  ;;  %v1718_v15 = vadd.f32 %v1717_v12, %v1716_v55  ;;  %v778_v18 = vsel %vm664_vm2, %v485_v42, %v721_v8  ;;  %v744_v5 = vmul.f32 0.2, %v578_v47 }
 0x137   :  { %1064 = vst.msk [vmem:[%s3070_s3 + $0x40] sm:$0xf] %vm1047_vm6, %v1980_v13  ;;  %v826_v21 = vpack.c.bf16 %v778_v18, %v777_v6  ;;  %v1981_v22 = vpack.c.bf16 %v778_v18, %v778_v18  ;;  %v489_v23 = vpop.f32.mrb[36].mxu0  ;;  %v2692_v39 = vpop.f32.mrb[36].mxu1  ;;  %v800_v4 = vsel %vm686_vm7, %v573_v7, %v743_v62  ;;  %v1310_v29 = vunpack.c.l.bf16 %v2499_v17 }
 0x138   :  { %v1720_v25 = vadd.f32 %v1719_v20, %v1718_v15  ;;  %v490_v27 = vadd.f32 %v2476_v36, %v489_v23  ;;  %v2094_v28 = vpop.f32.mrb[37].mxu0  ;;  %v2154_v52 = vpop.f32.mrb[37].mxu1  ;;  %v2711_v12 = vpack.c.bf16 %v800_v4, %v799_v19  ;;  %v2003_v13 = vpack.c.bf16 %v800_v4, %v800_v4 }
 0x139   :  { %1065 = vst.msk [vmem:[%s3070_s3 + $0x44] sm:$0xf] %vm1047_vm6, %v1981_v22  ;;  %v1296_v31 = vunpack.c.l.bf16 %v826_v21  ;;  %v1297_v32 = vunpack.c.h.bf16 %v826_v21  ;;  %v492_v33 = vpop.f32.mrb[38].mxu0  ;;  %v2697_v53 = vpop.f32.mrb[38].mxu1 }
 0x13a   :  { %vm665_vm3 = vcmp.gt.f32.partialorder %v490_v27, 0.0  ;;  %v722_v35 = vmul.f32 0.2, %v490_v27  ;;  %v493_v37 = vadd.f32 %v2476_v36, %v492_v33  ;;  %v2095_v38 = vpop.f32.mrb[39].mxu0  ;;  %v2155_v57 = vpop.f32.mrb[39].mxu1 }
 0x13b   :  { %v1548_v41 = vsel %vm1512_vm4, %v1296_v31, 0.0  ;;  %v1649_v43 = vmul.f32 %v1296_v31, %v1296_v31  ;;  %v1650_v44 = vmul.f32 %v1297_v32, %v1297_v32  ;;  %v1550_v54 = vsel %vm1512_vm4, %v1297_v32, 0.0  ;;  %1087 = vst.msk [vmem:[%s3070_s3 + $0x9c] sm:$0xf] %vm1047_vm6, %v2003_v13 }
 0x13c   :  { %v1549_v48 = vadd.f32 %v1548_v41, %v1547_v14  ;;  %v779_v49 = vsel %vm665_vm3, %v490_v27, %v722_v35  ;;  %vm666_vm5 = vcmp.gt.f32.partialorder %v493_v37, 0.0  ;;  %v723_v50 = vmul.f32 0.2, %v493_v37 }
 0x13d   :  { %v1721_v55 = vsel %vm1512_vm4, %v1649_v43, 0.0  ;;  %v1982_v56 = vpack.c.bf16 %v779_v49, %v779_v49  ;;  %v1723_v11 = vsel %vm1512_vm4, %v1650_v44, 0.0  ;;  %v801_v41 = vsel %vm687_vm9, %v578_v47, %v744_v5 }
 0x13e   :  { %v1551_v58 = vadd.f32 %v1550_v54, %v1549_v48  ;;  %v1722_v59 = vadd.f32 %v1721_v55, %v1720_v25  ;;  %v780_v60 = vsel %vm666_vm5, %v493_v37, %v723_v50 }
 0x13f   :  { %1066 = vst.msk [vmem:[%s3070_s3 + $0x48] sm:$0xf] %vm1047_vm6, %v1982_v56  ;;  %v827_v42 = vpack.c.bf16 %v780_v60, %v779_v49  ;;  %v1983_v63 = vpack.c.bf16 %v780_v60, %v780_v60  ;;  %v497_v1 = vpop.f32.mrb[40].mxu0  ;;  %v2714_v18 = vpop.f32.mrb[40].mxu1  ;;  %v1311_v49 = vunpack.c.h.bf16 %v2499_v17  ;;  %v2740_v60 = vsel %vm1512_vm4, %v1310_v29, 0.0 }
 0x140   :  { %v1724_v2 = vadd.f32 %v1723_v11, %v1722_v59  ;;  %v498_v3 = vadd.f32 %v2476_v36, %v497_v1  ;;  %v2098_v46 = vpop.f32.mrb[41].mxu0  ;;  %v2158_v23 = vpop.f32.mrb[41].mxu1  ;;  %v581_v59 = vadd.f32 %v2476_v36, %v2594_v24 }
 0x141   :  { %1067 = vst.msk [vmem:[%s3070_s3 + $0x4c] sm:$0xf] %vm1047_vm6, %v1983_v63  ;;  %v1298_v6 = vunpack.c.l.bf16 %v827_v42  ;;  %v1299_v8 = vunpack.c.h.bf16 %v827_v42  ;;  %v500_v10 = vpop.f32.mrb[42].mxu0  ;;  %v2721_v28 = vpop.f32.mrb[42].mxu1  ;;  %v1663_v63 = vmul.f32 %v1310_v29, %v1310_v29  ;;  %v1664_v29 = vmul.f32 %v1311_v49, %v1311_v49 }
 0x142   :  { %vm667_vm8 = vcmp.gt.f32.partialorder %v498_v3, 0.0  ;;  %v724_v16 = vmul.f32 0.2, %v498_v3  ;;  %v501_v14 = vadd.f32 %v2476_v36, %v500_v10  ;;  %v2099_v15 = vpop.f32.mrb[43].mxu0  ;;  %v2159_v7 = vpop.f32.mrb[43].mxu1  ;;  %vm688_vm13 = vcmp.gt.f32.partialorder %v581_v59, 0.0 }
 0x143   :  { %v1552_v20 = vsel %vm1512_vm4, %v1298_v6, 0.0  ;;  %v1651_v21 = vmul.f32 %v1298_v6, %v1298_v6  ;;  %v1652_v22 = vmul.f32 %v1299_v8, %v1299_v8  ;;  %v1554_v31 = vsel %vm1512_vm4, %v1299_v8, 0.0 }
 0x144   :  { %v1553_v19 = vadd.f32 %v1552_v20, %v1551_v58  ;;  %v781_v25 = vsel %vm667_vm8, %v498_v3, %v724_v16  ;;  %vm668_vm10 = vcmp.gt.f32.partialorder %v501_v14, 0.0  ;;  %v725_v27 = vmul.f32 0.2, %v501_v14 }
 0x145   :  { %v1725_v32 = vsel %vm1512_vm4, %v1651_v21, 0.0  ;;  %v1984_v33 = vpack.c.bf16 %v781_v25, %v781_v25  ;;  %v1727_v43 = vsel %vm1512_vm4, %v1652_v22, 0.0  ;;  %v2004_v58 = vpack.c.bf16 %v801_v41, %v801_v41 }
 0x146   :  { %v1555_v35 = vadd.f32 %v1554_v31, %v1553_v19  ;;  %v1726_v37 = vadd.f32 %v1725_v32, %v1724_v2  ;;  %v782_v38 = vsel %vm668_vm10, %v501_v14, %v725_v27  ;;  %v745_v21 = vmul.f32 0.2, %v581_v59 }
 0x147   :  { %1068 = vst.msk [vmem:[%s3070_s3 + $0x50] sm:$0xf] %vm1047_vm6, %v1984_v33  ;;  %v828_v44 = vpack.c.bf16 %v782_v38, %v781_v25  ;;  %v1985_v52 = vpack.c.bf16 %v782_v38, %v782_v38  ;;  %v505_v48 = vpop.f32.mrb[44].mxu0  ;;  %v2743_v42 = vpop.f32.mrb[44].mxu1  ;;  %1088 = vst.msk [vmem:[%s3070_s3 + $0xa0] sm:$0xf] %vm1047_vm6, %v2004_v58 }
 0x148   :  { %v1728_v50 = vadd.f32 %v1727_v43, %v1726_v37  ;;  %v506_v54 = vadd.f32 %v2476_v36, %v505_v48  ;;  %v2102_v55 = vpop.f32.mrb[45].mxu0  ;;  %v2162_v24 = vpop.f32.mrb[45].mxu1  ;;  %v2755_v22 = vsel %vm1512_vm4, %v1311_v49, 0.0  ;;  %v802_v7 = vsel %vm688_vm13, %v581_v59, %v745_v21 }
 0x149   :  { %1069 = vst.msk [vmem:[%s3070_s3 + $0x54] sm:$0xf] %vm1047_vm6, %v1985_v52  ;;  %v1300_v47 = vunpack.c.l.bf16 %v828_v44  ;;  %v1301_v56 = vunpack.c.h.bf16 %v828_v44  ;;  %v508_v57 = vpop.f32.mrb[46].mxu0  ;;  %v2750_v6 = vpop.f32.mrb[46].mxu1  ;;  %v2768_v43 = vpack.c.bf16 %v802_v7, %v801_v41  ;;  %v2005_v44 = vpack.c.bf16 %v802_v7, %v802_v7 }
 0x14a   :  { %vm669_vm11 = vcmp.gt.f32.partialorder %v506_v54, 0.0  ;;  %v726_v17 = vmul.f32 0.2, %v506_v54  ;;  %v509_v62 = vadd.f32 %v2476_v36, %v508_v57  ;;  %v2103_v11 = vpop.f32.mrb[47].mxu0  ;;  %v2163_v16 = vpop.f32.mrb[47].mxu1  ;;  %v2771_v52 = vsel %vm1512_vm4, %v1663_v63, 0.0 }
 0x14b   :  { %v1556_v1 = vsel %vm1512_vm4, %v1300_v47, 0.0  ;;  %v1653_v2 = vmul.f32 %v1300_v47, %v1300_v47  ;;  %v1654_v3 = vmul.f32 %v1301_v56, %v1301_v56  ;;  %v1558_v8 = vsel %vm1512_vm4, %v1301_v56, 0.0  ;;  %1089 = vst.msk [vmem:[%s3070_s3 + $0xa4] sm:$0xf] %vm1047_vm6, %v2005_v44 }
 0x14c   :  { %v1557_v46 = vadd.f32 %v1556_v1, %v1555_v35  ;;  %v783_v4 = vsel %vm669_vm11, %v506_v54, %v726_v17  ;;  %vm670_vm12 = vcmp.gt.f32.partialorder %v509_v62, 0.0  ;;  %v727_v5 = vmul.f32 0.2, %v509_v62 }
 0x14d   :  { %v1729_v10 = vsel %vm1512_vm4, %v1653_v2, 0.0  ;;  %v1986_v13 = vpack.c.bf16 %v783_v4, %v783_v4  ;;  %v1731_v23 = vsel %vm1512_vm4, %v1654_v3, 0.0  ;;  %v2777_v55 = vunpack.c.l.bf16 %v2547_v26 }
 0x14e   :  { %v1559_v14 = vadd.f32 %v1558_v8, %v1557_v46  ;;  %v1730_v15 = vadd.f32 %v1729_v10, %v1728_v50  ;;  %v784_v20 = vsel %vm670_vm12, %v509_v62, %v727_v5  ;;  %v586_v2 = vadd.f32 %v2476_v36, %v2615_v51 }
 0x14f   :  { %1070 = vst.msk [vmem:[%s3070_s3 + $0x58] sm:$0xf] %vm1047_vm6, %v1986_v13  ;;  %v829_v19 = vpack.c.bf16 %v784_v20, %v783_v4  ;;  %v1987_v25 = vpack.c.bf16 %v784_v20, %v784_v20  ;;  %v513_v27 = vpop.f32.mrb[48].mxu0  ;;  %v2774_v54 = vpop.f32.mrb[48].mxu1  ;;  %v2791_v24 = vsel %vm1512_vm4, %v1664_v29, 0.0  ;;  %v2794_v8 = vunpack.c.h.bf16 %v2547_v26 }
 0x150   :  { %v1732_v31 = vadd.f32 %v1731_v23, %v1730_v15  ;;  %v514_v32 = vadd.f32 %v2476_v36, %v513_v27  ;;  %v2106_v33 = vpop.f32.mrb[49].mxu0  ;;  %v2166_v41 = vpop.f32.mrb[49].mxu1  ;;  %v589_v26 = vadd.f32 %v2476_v36, %v2618_v61  ;;  %v746_v27 = vmul.f32 0.2, %v586_v2  ;;  %v2812_v29 = vld [vmem:[#allocation2] ss:$0 sm:$0xff] }
 0x151   :  { %1071 = vst.msk [vmem:[%s3070_s3 + $0x5c] sm:$0xf] %vm1047_vm6, %v1987_v25  ;;  %v1302_v35 = vunpack.c.l.bf16 %v829_v19  ;;  %v1303_v37 = vunpack.c.h.bf16 %v829_v19  ;;  %v516_v38 = vpop.f32.mrb[50].mxu0  ;;  %v2784_v62 = vpop.f32.mrb[50].mxu1  ;;  %vm689_vm1 = vcmp.gt.f32.partialorder %v586_v2, 0.0 }
 0x152   :  { %vm671_vm14 = vcmp.gt.f32.partialorder %v514_v32, 0.0  ;;  %v728_v48 = vmul.f32 0.2, %v514_v32  ;;  %v517_v49 = vadd.f32 %v2476_v36, %v516_v38  ;;  %v2107_v50 = vpop.f32.mrb[51].mxu0  ;;  %v2167_v3 = vpop.f32.mrb[51].mxu1  ;;  %v803_v41 = vsel %vm689_vm1, %v586_v2, %v746_v27 }
 0x153   :  { %v1560_v47 = vsel %vm1512_vm4, %v1302_v35, 0.0  ;;  %v1655_v56 = vmul.f32 %v1302_v35, %v1302_v35  ;;  %v1656_v57 = vmul.f32 %v1303_v37, %v1303_v37  ;;  %v1562_v11 = vsel %vm1512_vm4, %v1303_v37, 0.0 }
 0x154   :  { %v1561_v58 = vadd.f32 %v1560_v47, %v1559_v14  ;;  %v785_v59 = vsel %vm671_vm14, %v514_v32, %v728_v48  ;;  %vm672_vm15 = vcmp.gt.f32.partialorder %v517_v49, 0.0  ;;  %v729_v17 = vmul.f32 0.2, %v517_v49 }
 0x155   :  { %v1733_v63 = vsel %vm1512_vm4, %v1655_v56, 0.0  ;;  %v1988_v1 = vpack.c.bf16 %v785_v59, %v785_v59  ;;  %v1735_v10 = vsel %vm1512_vm4, %v1656_v57, 0.0  ;;  %v2803_v14 = vsel %vm1512_vm4, %v2777_v55, 0.0 }
 0x156   :  { %v1563_v46 = vadd.f32 %v1562_v11, %v1561_v58  ;;  %v1734_v4 = vadd.f32 %v1733_v63, %v1732_v31  ;;  %v786_v5 = vsel %vm672_vm15, %v517_v49, %v729_v17  ;;  %v2816_v31 = vadd.f32 %v2812_v29, %v2642_v30 }
 0x157   :  { %1072 = vst.msk [vmem:[%s3070_s3 + $0x60] sm:$0xf] %vm1047_vm6, %v1988_v1  ;;  %v830_v13 = vpack.c.bf16 %v786_v5, %v785_v59  ;;  %v1989_v16 = vpack.c.bf16 %v786_v5, %v786_v5  ;;  %v521_v51 = vpop.f32.mrb[52].mxu0  ;;  %v2819_v61 = vpop.f32.mrb[52].mxu1  ;;  %v2006_v63 = vpack.c.bf16 %v803_v41, %v803_v41  ;;  %vm690_vm3 = vcmp.gt.f32.partialorder %v589_v26, 0.0 }
 0x158   :  { %v1736_v15 = vadd.f32 %v1735_v10, %v1734_v4  ;;  %v522_v20 = vadd.f32 %v2476_v36, %v521_v51  ;;  %v2110_v21 = vpop.f32.mrb[53].mxu0  ;;  %v2170_v44 = vpop.f32.mrb[53].mxu1  ;;  %v1665_v5 = vmul.f32 %v2777_v55, %v2777_v55  ;;  %v1666_v2 = vmul.f32 %v2794_v8, %v2794_v8 }
 0x159   :  { %1073 = vst.msk [vmem:[%s3070_s3 + $0x64] sm:$0xf] %vm1047_vm6, %v1989_v16  ;;  %v1304_v23 = vunpack.c.l.bf16 %v830_v13  ;;  %v1305_v19 = vunpack.c.h.bf16 %v830_v13  ;;  %v524_v25 = vpop.f32.mrb[54].mxu0  ;;  %v644_v50 = vpop.f32.mrb[54].mxu1  ;;  %1090 = vst.msk [vmem:[%s3070_s3 + $0xa8] sm:$0xf] %vm1047_vm6, %v2006_v63  ;;  %v1314_v51 = vunpack.c.l.bf16 %v2598_v34 }
 0x15a   :  { %vm673_vm0 = vcmp.gt.f32.partialorder %v522_v20, 0.0  ;;  %v730_v32 = vmul.f32 0.2, %v522_v20  ;;  %v525_v33 = vadd.f32 %v2812_v29, %v524_v25  ;;  %v2111_v36 = vpop.f32.mrb[55].mxu0  ;;  %v2171_v58 = vpop.f32.mrb[55].mxu1  ;;  %vm691_vm7 = vcmp.gt.f32.partialorder %v2816_v31, 0.0 }
 0x15b   :  { %v1564_v7 = vsel %vm1512_vm4, %v1304_v23, 0.0  ;;  %v1566_v35 = vsel %vm1512_vm4, %v1305_v19, 0.0  ;;  %v1657_v37 = vmul.f32 %v1304_v23, %v1304_v23  ;;  %v1658_v38 = vmul.f32 %v1305_v19, %v1305_v19 }
 0x15c   :  { %v1565_v48 = vadd.f32 %v1564_v7, %v1563_v46  ;;  %v787_v49 = vsel %vm673_vm0, %v522_v20, %v730_v32  ;;  %vm674_vm2 = vcmp.gt.f32.partialorder %v525_v33, 0.0  ;;  %v731_v30 = vmul.f32 0.2, %v525_v33 }
 0x15d   :  { %v1737_v47 = vsel %vm1512_vm4, %v1657_v37, 0.0  ;;  %v1739_v56 = vsel %vm1512_vm4, %v1658_v38, 0.0  ;;  %v1990_v57 = vpack.c.bf16 %v787_v49, %v787_v49  ;;  %v747_v46 = vmul.f32 0.2, %v589_v26 }
 0x15e   :  { %v1567_v59 = vadd.f32 %v1566_v35, %v1565_v48  ;;  %v1738_v17 = vadd.f32 %v1737_v47, %v1736_v15  ;;  %v788_v11 = vsel %vm674_vm2, %v525_v33, %v731_v30  ;;  %v748_v35 = vmul.f32 0.2, %v2816_v31 }
 0x15f   :  { %1074 = vst.msk [vmem:[%s3070_s3 + $0x68] sm:$0xf] %vm1047_vm6, %v1990_v57  ;;  %v831_v1 = vpack.c.bf16 %v788_v11, %v787_v49  ;;  %v1991_v3 = vpack.c.bf16 %v788_v11, %v788_v11  ;;  %v529_v4 = vpop.f32.mrb[56].mxu0  ;;  %v804_v20 = vsel %vm690_vm3, %v589_v26, %v747_v46  ;;  %v597_v37 = vadd.f32 %v2812_v29, %v2647_v40 }
 0x160   :  { %v1740_v10 = vadd.f32 %v1739_v56, %v1738_v17  ;;  %v530_v13 = vadd.f32 %v2812_v29, %v529_v4  ;;  %v2114_v16 = vpop.f32.mrb[57].mxu0  ;;  %v2843_v23 = vpack.c.bf16 %v804_v20, %v803_v41  ;;  %v2007_v19 = vpack.c.bf16 %v804_v20, %v804_v20 }
 0x161   :  { %1075 = vst.msk [vmem:[%s3070_s3 + $0x6c] sm:$0xf] %vm1047_vm6, %v1991_v3  ;;  %v1306_v55 = vunpack.c.l.bf16 %v831_v1  ;;  %v1307_v15 = vunpack.c.h.bf16 %v831_v1  ;;  %v532_v21 = vpop.f32.mrb[58].mxu0  ;;  %v2859_v30 = vsel %vm1512_vm4, %v2794_v8, 0.0  ;;  %v2862_v50 = vsel %vm1512_vm4, %v1665_v5, 0.0 }
 0x162   :  { %vm675_vm5 = vcmp.gt.f32.partialorder %v530_v13, 0.0  ;;  %v732_v25 = vmul.f32 0.2, %v530_v13  ;;  %v2115_v27 = vpop.f32.mrb[59].mxu0  ;;  %1091 = vst.msk [vmem:[%s3070_s3 + $0xac] sm:$0xf] %vm1047_vm6, %v2007_v19  ;;  %v533_v49 = vadd.f32 %v2812_v29, %v532_v21  ;;  %v1315_v57 = vunpack.c.h.bf16 %v2598_v34 }
 0x163   :  { %v1568_v32 = vsel %vm1512_vm4, %v1306_v55, 0.0  ;;  %v1659_v33 = vmul.f32 %v1306_v55, %v1306_v55  ;;  %v1660_v36 = vmul.f32 %v1307_v15, %v1307_v15  ;;  %v1570_v38 = vsel %vm1512_vm4, %v1307_v15, 0.0 }
 0x164   :  { %v1569_v7 = vadd.f32 %v1568_v32, %v1567_v59  ;;  %v789_v26 = vsel %vm675_vm5, %v530_v13, %v732_v25  ;;  %vm676_vm8 = vcmp.gt.f32.partialorder %v533_v49, 0.0  ;;  %v733_v41 = vmul.f32 0.2, %v533_v49 }
 0x165   :  { %v1741_v44 = vsel %vm1512_vm4, %v1659_v33, 0.0  ;;  %v1992_v48 = vpack.c.bf16 %v789_v26, %v789_v26  ;;  %v1743_v40 = vsel %vm1512_vm4, %v1660_v36, 0.0  ;;  %v805_v8 = vsel %vm691_vm7, %v2816_v31, %v748_v35 }
 0x166   :  { %v1571_v47 = vadd.f32 %v1570_v38, %v1569_v7  ;;  %v1742_v56 = vadd.f32 %v1741_v44, %v1740_v10  ;;  %vm692_vm9 = vcmp.gt.f32.partialorder %v597_v37, 0.0  ;;  %v749_v59 = vmul.f32 0.2, %v597_v37 }
 0x167   :  { %1076 = vst.msk [vmem:[%s3070_s3 + $0x70] sm:$0xf] %vm1047_vm6, %v1992_v48  ;;  %v2874_v17 = vsel %vm1512_vm4, %v1666_v2, 0.0  ;;  %v1667_v34 = vmul.f32 %v1314_v51, %v1314_v51  ;;  %v790_v11 = vsel %vm676_vm8, %v533_v49, %v733_v41  ;;  %v2008_v63 = vpack.c.bf16 %v805_v8, %v805_v8 }
 0x168   :  { %v1744_v58 = vadd.f32 %v1743_v40, %v1742_v56  ;;  %v832_v1 = vpack.c.bf16 %v790_v11, %v789_v26  ;;  %v1993_v3 = vpack.c.bf16 %v790_v11, %v790_v11  ;;  %v806_v46 = vsel %vm692_vm9, %v597_v37, %v749_v59 }
 0x169   :  { %v602_v4 = vadd.f32 %v2812_v29, %v2667_v0  ;;  %v1668_v5 = vmul.f32 %v1315_v57, %v1315_v57  ;;  %1092 = vst.msk [vmem:[%s3070_s3 + $0xb0] sm:$0xf] %vm1047_vm6, %v2008_v63  ;;  %v2882_v31 = vpack.c.bf16 %v806_v46, %v805_v8  ;;  %v2009_v10 = vpack.c.bf16 %v806_v46, %v806_v46 }
 0x16a   :  { %v605_v2 = vadd.f32 %v2812_v29, %v2670_v9  ;;  %v2887_v13 = vsel %vm1512_vm4, %v1314_v51, 0.0  ;;  %1077 = vst.msk [vmem:[%s3070_s3 + $0x74] sm:$0xf] %vm1047_vm6, %v1993_v3  ;;  %v1308_v0 = vunpack.c.l.bf16 %v832_v1  ;;  %v1309_v16 = vunpack.c.h.bf16 %v832_v1 }
 0x16b   :  { %v750_v55 = vmul.f32 0.2, %v602_v4  ;;  %v2894_v15 = vsel %vm1512_vm4, %v1315_v57, 0.0  ;;  %v1316_v20 = vunpack.c.l.bf16 %v2649_v45  ;;  %1093 = vst.msk [vmem:[%s3070_s3 + $0xb4] sm:$0xf] %vm1047_vm6, %v2009_v10  ;;  %vm693_vm10 = vcmp.gt.f32.partialorder %v602_v4, 0.0 }
 0x16c   :  { %v610_v9 = vadd.f32 %v2812_v29, %v2692_v39  ;;  %v1572_v51 = vsel %vm1512_vm4, %v1308_v0, 0.0  ;;  %v1661_v21 = vmul.f32 %v1308_v0, %v1308_v0  ;;  %v1662_v19 = vmul.f32 %v1309_v16, %v1309_v16 }
 0x16d   :  { %v751_v25 = vmul.f32 0.2, %v605_v2  ;;  %v1757_v27 = vsel %vm1512_vm4, %v1667_v34, 0.0  ;;  %v2906_v32 = vsel %vm1512_vm4, %v1668_v5, 0.0  ;;  %v1573_v33 = vadd.f32 %v1572_v51, %v1571_v47 }
 0x16e   :  { %vm694_vm11 = vcmp.gt.f32.partialorder %v605_v2, 0.0  ;;  %v1317_v36 = vunpack.c.h.bf16 %v2649_v45  ;;  %v1574_v7 = vsel %vm1512_vm4, %v1309_v16, 0.0  ;;  %v1745_v26 = vsel %vm1512_vm4, %v1661_v21, 0.0 }
 0x16f   :  { %v807_v35 = vsel %vm693_vm10, %v602_v4, %v750_v55  ;;  %v1588_v39 = vsel %vm1512_vm4, %v1316_v20, 0.0  ;;  %v1575_v37 = vadd.f32 %v1574_v7, %v1573_v33  ;;  %v1746_v38 = vadd.f32 %v1745_v26, %v1744_v58 }
 0x170   :  { %v2010_v44 = vpack.c.bf16 %v807_v35, %v807_v35  ;;  %v1747_v48 = vsel %vm1512_vm4, %v1662_v19, 0.0  ;;  %v808_v49 = vsel %vm694_vm11, %v605_v2, %v751_v25  ;;  %vm695_vm12 = vcmp.gt.f32.partialorder %v610_v9, 0.0 }
 0x171   :  { %v752_v56 = vmul.f32 0.2, %v610_v9  ;;  %v1577_v47 = vadd.f32 %v2740_v60, %v1575_v37  ;;  %v1748_v57 = vadd.f32 %v1747_v48, %v1746_v38  ;;  %v2918_v45 = vpack.c.bf16 %v808_v49, %v807_v35 }
 0x172   :  { %1094 = vst.msk [vmem:[%s3070_s3 + $0xb8] sm:$0xf] %vm1047_vm6, %v2010_v44  ;;  %v2011_v40 = vpack.c.bf16 %v808_v49, %v808_v49  ;;  %v1669_v41 = vmul.f32 %v1316_v20, %v1316_v20  ;;  %v613_v58 = vadd.f32 %v2812_v29, %v2697_v53  ;;  %v618_v59 = vadd.f32 %v2812_v29, %v2714_v18 }
 0x173   :  { %v809_v8 = vsel %vm695_vm12, %v610_v9, %v752_v56  ;;  %v1590_v34 = vsel %vm1512_vm4, %v1317_v36, 0.0  ;;  %v1670_v60 = vmul.f32 %v1317_v36, %v1317_v36  ;;  %v1579_v11 = vadd.f32 %v2755_v22, %v1577_v47 }
 0x174   :  { %v1750_v63 = vadd.f32 %v2771_v52, %v1748_v57  ;;  %1095 = vst.msk [vmem:[%s3070_s3 + $0xbc] sm:$0xf] %vm1047_vm6, %v2011_v40  ;;  %v1318_v1 = vunpack.c.l.bf16 %v2711_v12  ;;  %v2012_v3 = vpack.c.bf16 %v809_v8, %v809_v8  ;;  %vm696_vm13 = vcmp.gt.f32.partialorder %v613_v58, 0.0 }
 0x175   :  { %v753_v53 = vmul.f32 0.2, %v613_v58  ;;  %v1581_v46 = vadd.f32 %v2803_v14, %v1579_v11  ;;  %vm697_vm14 = vcmp.gt.f32.partialorder %v618_v59, 0.0  ;;  %v621_v22 = vadd.f32 %v2812_v29, %v2721_v28 }
 0x176   :  { %v1752_v18 = vadd.f32 %v2791_v24, %v1750_v63  ;;  %v1761_v52 = vsel %vm1512_vm4, %v1669_v41, 0.0  ;;  %v1319_v4 = vunpack.c.h.bf16 %v2711_v12  ;;  %1096 = vst.msk [vmem:[%s3070_s3 + $0xc0] sm:$0xf] %vm1047_vm6, %v2012_v3  ;;  %v754_v10 = vmul.f32 0.2, %v618_v59 }
 0x177   :  { %v810_v5 = vsel %vm696_vm13, %v613_v58, %v753_v53  ;;  %v1583_v2 = vadd.f32 %v2859_v30, %v1581_v46  ;;  %v1763_v28 = vsel %vm1512_vm4, %v1670_v60, 0.0  ;;  %v1592_v16 = vsel %vm1512_vm4, %v1318_v1, 0.0 }
 0x178   :  { %v1754_v14 = vadd.f32 %v2862_v50, %v1752_v18  ;;  %v2944_v24 = vpack.c.bf16 %v810_v5, %v809_v8  ;;  %v2013_v0 = vpack.c.bf16 %v810_v5, %v810_v5  ;;  %v1320_v12 = vunpack.c.l.bf16 %v2768_v43 }
 0x179   :  { %v811_v55 = vsel %vm697_vm14, %v618_v59, %v754_v10  ;;  %v1671_v20 = vmul.f32 %v1318_v1, %v1318_v1  ;;  %v1585_v9 = vadd.f32 %v2887_v13, %v1583_v2  ;;  %vm698_vm15 = vcmp.gt.f32.partialorder %v621_v22, 0.0 }
 0x17a   :  { %v1756_v51 = vadd.f32 %v2874_v17, %v1754_v14  ;;  %1097 = vst.msk [vmem:[%s3070_s3 + $0xc4] sm:$0xf] %vm1047_vm6, %v2013_v0  ;;  %v1672_v30 = vmul.f32 %v1319_v4, %v1319_v4  ;;  %v2014_v50 = vpack.c.bf16 %v811_v55, %v811_v55  ;;  %v755_v21 = vmul.f32 0.2, %v621_v22 }
 0x17b   :  { %v626_v19 = vadd.f32 %v2812_v29, %v2743_v42  ;;  %v1321_v25 = vunpack.c.h.bf16 %v2768_v43  ;;  %v1587_v33 = vadd.f32 %v2894_v15, %v1585_v9  ;;  %v629_v17 = vadd.f32 %v2812_v29, %v2750_v6 }
 0x17c   :  { %v1758_v36 = vadd.f32 %v1757_v27, %v1756_v51  ;;  %v1594_v13 = vsel %vm1512_vm4, %v1319_v4, 0.0  ;;  %v1673_v7 = vmul.f32 %v1320_v12, %v1320_v12  ;;  %1098 = vst.msk [vmem:[%s3070_s3 + $0xc8] sm:$0xf] %vm1047_vm6, %v2014_v50  ;;  %v812_v26 = vsel %vm698_vm15, %v621_v22, %v755_v21 }
 0x17d   :  { %vm699_vm0 = vcmp.gt.f32.partialorder %v626_v19, 0.0  ;;  %v1589_v35 = vadd.f32 %v1588_v39, %v1587_v33  ;;  %v2967_v43 = vpack.c.bf16 %v812_v26, %v811_v55  ;;  %v2015_v15 = vpack.c.bf16 %v812_v26, %v812_v26 }
 0x17e   :  { %v1760_v42 = vadd.f32 %v2906_v32, %v1758_v36  ;;  %v1765_v27 = vsel %vm1512_vm4, %v1671_v20, 0.0  ;;  %v1767_v6 = vsel %vm1512_vm4, %v1672_v30, 0.0  ;;  %v1596_v37 = vsel %vm1512_vm4, %v1320_v12, 0.0 }
 0x17f   :  { %v756_v38 = vmul.f32 0.2, %v626_v19  ;;  %v1674_v44 = vmul.f32 %v1321_v25, %v1321_v25  ;;  %v1591_v49 = vadd.f32 %v1590_v34, %v1589_v35  ;;  %1099 = vst.msk [vmem:[%s3070_s3 + $0xcc] sm:$0xf] %vm1047_vm6, %v2015_v15  ;;  %vm700_vm1 = vcmp.gt.f32.partialorder %v629_v17, 0.0 }
 0x180   :  { %v1762_v48 = vadd.f32 %v1761_v52, %v1760_v42  ;;  %v1322_v32 = vunpack.c.l.bf16 %v2843_v23  ;;  %v757_v56 = vmul.f32 0.2, %v629_v17  ;;  %v634_v47 = vadd.f32 %v2812_v29, %v2774_v54 }
 0x181   :  { %v813_v39 = vsel %vm699_vm0, %v626_v19, %v756_v38  ;;  %v1598_v57 = vsel %vm1512_vm4, %v1321_v25, 0.0  ;;  %v1769_v40 = vsel %vm1512_vm4, %v1673_v7, 0.0  ;;  %v1593_v41 = vadd.f32 %v1592_v16, %v1591_v49 }
 0x182   :  { %v1764_v8 = vadd.f32 %v1763_v28, %v1762_v48  ;;  %v1323_v58 = vunpack.c.h.bf16 %v2843_v23  ;;  %v2016_v59 = vpack.c.bf16 %v813_v39, %v813_v39  ;;  %v814_v34 = vsel %vm700_vm1, %v629_v17, %v757_v56 }
 0x183   :  { %v637_v60 = vadd.f32 %v2812_v29, %v2784_v62  ;;  %v1595_v11 = vadd.f32 %v1594_v13, %v1593_v41  ;;  %v2984_v1 = vpack.c.bf16 %v814_v34, %v813_v39  ;;  %v2017_v3 = vpack.c.bf16 %v814_v34, %v814_v34 }
 0x184   :  { %v1766_v63 = vadd.f32 %v1765_v27, %v1764_v8  ;;  %v1771_v54 = vsel %vm1512_vm4, %v1674_v44, 0.0  ;;  %v1675_v53 = vmul.f32 %v1322_v32, %v1322_v32  ;;  %1100 = vst.msk [vmem:[%s3070_s3 + $0xd0] sm:$0xf] %vm1047_vm6, %v2016_v59  ;;  %vm701_vm2 = vcmp.gt.f32.partialorder %v634_v47, 0.0 }
 0x185   :  { %v758_v23 = vmul.f32 0.2, %v634_v47  ;;  %v1600_v46 = vsel %vm1512_vm4, %v1322_v32, 0.0  ;;  %v1324_v18 = vunpack.c.l.bf16 %v2882_v31  ;;  %v1597_v62 = vadd.f32 %v1596_v37, %v1595_v11  ;;  %1101 = vst.msk [vmem:[%s3070_s3 + $0xd4] sm:$0xf] %vm1047_vm6, %v2017_v3 }
 0x186   :  { %v1768_v22 = vadd.f32 %v1767_v6, %v1766_v63  ;;  %vm702_vm3 = vcmp.gt.f32.partialorder %v637_v60, 0.0  ;;  %v759_v4 = vmul.f32 0.2, %v637_v60  ;;  %v642_v5 = vadd.f32 %v2812_v29, %v2819_v61 }
 0x187   :  { %v815_v52 = vsel %vm701_vm2, %v634_v47, %v758_v23  ;;  %v1602_v10 = vsel %vm1512_vm4, %v1323_v58, 0.0  ;;  %v1325_v2 = vunpack.c.h.bf16 %v2882_v31  ;;  %v1599_v14 = vadd.f32 %v1598_v57, %v1597_v62 }
 0x188   :  { %v1770_v0 = vadd.f32 %v1769_v40, %v1768_v22  ;;  %v1676_v28 = vmul.f32 %v1323_v58, %v1323_v58  ;;  %v1773_v16 = vsel %vm1512_vm4, %v1675_v53, 0.0  ;;  %v2018_v12 = vpack.c.bf16 %v815_v52, %v815_v52 }
 0x189   :  { %v816_v55 = vsel %vm702_vm3, %v637_v60, %v759_v4  ;;  %v1601_v20 = vadd.f32 %v1600_v46, %v1599_v14  ;;  %v1677_v50 = vmul.f32 %v1324_v18, %v1324_v18  ;;  %v1326_v21 = vunpack.c.l.bf16 %v2918_v45 }
 0x18a   :  { %v1772_v9 = vadd.f32 %v1771_v54, %v1770_v0  ;;  %v3002_v51 = vpack.c.bf16 %v816_v55, %v815_v52  ;;  %v2019_v30 = vpack.c.bf16 %v816_v55, %v816_v55  ;;  %1102 = vst.msk [vmem:[%s3070_s3 + $0xd8] sm:$0xf] %vm1047_vm6, %v2018_v12  ;;  %vm703_vm5 = vcmp.gt.f32.partialorder %v642_v5, 0.0 }
 0x18b   :  { %v760_v29 = vmul.f32 0.2, %v642_v5  ;;  %v1603_v61 = vadd.f32 %v1602_v10, %v1601_v20  ;;  %v1678_v31 = vmul.f32 %v1325_v2, %v1325_v2  ;;  %v1775_v25 = vsel %vm1512_vm4, %v1676_v28, 0.0 }
 0x18c   :  { %v1774_v19 = vadd.f32 %v1773_v16, %v1772_v9  ;;  %1103 = vst.msk [vmem:[%s3070_s3 + $0xdc] sm:$0xf] %vm1047_vm6, %v2019_v30  ;;  %v1604_v33 = vsel %vm1512_vm4, %v1324_v18, 0.0  ;;  %v1327_v36 = vunpack.c.h.bf16 %v2918_v45  ;;  %v1606_v7 = vsel %vm1512_vm4, %v1325_v2, 0.0 }
 0x18d   :  { %v817_v17 = vsel %vm703_vm5, %v642_v5, %v760_v29  ;;  %v1605_v13 = vadd.f32 %v1604_v33, %v1603_v61  ;;  %v1777_v35 = vsel %vm1512_vm4, %v1677_v50, 0.0  ;;  %v1679_v42 = vmul.f32 %v1326_v21, %v1326_v21 }
 0x18e   :  { %v1776_v26 = vadd.f32 %v1775_v25, %v1774_v19  ;;  %v1328_v15 = vunpack.c.l.bf16 %v2944_v24  ;;  %v846_v27 = vpack.c.bf16 %v817_v17, %v817_v17  ;;  %v1779_v38 = vsel %vm1512_vm4, %v1678_v31, 0.0 }
 0x18f   :  { %v1607_v6 = vadd.f32 %v1606_v7, %v1605_v13  ;;  %v1608_v44 = vsel %vm1512_vm4, %v1326_v21, 0.0  ;;  %v1680_v48 = vmul.f32 %v1327_v36, %v1327_v36  ;;  %v1329_v45 = vunpack.c.h.bf16 %v2944_v24 }
 0x190   :  { %v1778_v37 = vadd.f32 %v1777_v35, %v1776_v26  ;;  %1104 = vst.msk [vmem:[%s3070_s3 + $0xe0] sm:$0xf] %vm1047_vm6, %v846_v27  ;;  %v1107_v49 = vlaneseq  ;;  %v1610_v56 = vsel %vm1512_vm4, %v1327_v36, 0.0  ;;  %v1781_v47 = vsel %vm1512_vm4, %v1679_v42, 0.0 }
 0x191   :  { %v1609_v39 = vadd.f32 %v1608_v44, %v1607_v6  ;;  %v1681_v57 = vmul.f32 %v1328_v15, %v1328_v15  ;;  %v1330_v40 = vunpack.c.l.bf16 %v2967_v43  ;;  %v1331_v58 = vunpack.c.h.bf16 %v2967_v43 }
 0x192   :  { %v1780_v32 = vadd.f32 %v1779_v38, %v1778_v37  ;;  %v1783_v24 = vsel %vm1512_vm4, %v1680_v48, 0.0  ;;  %v1612_v59 = vsel %vm1512_vm4, %v1328_v15, 0.0  ;;  %v1682_v34 = vmul.f32 %v1329_v45, %v1329_v45  ;;  %v1515_v37 = vld [vmem:[%s3071_s4] sm:$0xff] }
 0x193   :  { %v1611_v41 = vadd.f32 %v1610_v56, %v1609_v39  ;;  %v1108_v60 = vshrl.u32 %v1107_v49, 7  ;;  %v1614_v3 = vsel %vm1512_vm4, %v1329_v45, 0.0  ;;  %v1785_v54 = vsel %vm1512_vm4, %v1681_v57, 0.0  ;;  %v1632_v45 = vld [vmem:[%s3072_s5] sm:$0xff] }
 0x194   :  { %v1782_v8 = vadd.f32 %v1781_v47, %v1780_v32  ;;  %v1683_v53 = vmul.f32 %v1330_v40, %v1330_v40  ;;  %v1332_v23 = vunpack.c.l.bf16 %v2984_v1  ;;  %v1684_v62 = vmul.f32 %v1331_v58, %v1331_v58 }
 0x195   :  { %v1613_v63 = vadd.f32 %v1612_v59, %v1611_v41  ;;  %v1787_v43 = vsel %vm1512_vm4, %v1682_v34, 0.0  ;;  %v1616_v22 = vsel %vm1512_vm4, %v1330_v40, 0.0  ;;  %v1333_v52 = vunpack.c.h.bf16 %v2984_v1 }
 0x196   :  { %v1784_v11 = vadd.f32 %v1783_v24, %v1782_v8  ;;  %v1164_v4 = vadd.s32 448, %v1108_v60  ;;  %v1618_v2 = vsel %vm1512_vm4, %v1331_v58, 0.0  ;;  %v1789_v14 = vsel %vm1512_vm4, %v1683_v53, 0.0 }
 0x197   :  { %v1615_v46 = vadd.f32 %v1614_v3, %v1613_v63  ;;  %v1685_v0 = vmul.f32 %v1332_v23, %v1332_v23  ;;  %v1334_v28 = vunpack.c.l.bf16 %v3002_v51  ;;  %v1791_v55 = vsel %vm1512_vm4, %v1684_v62, 0.0 }
 0x198   :  { %v1786_v18 = vadd.f32 %v1785_v54, %v1784_v11  ;;  %v1336_v20 = vunpack.c.l.bf16 %v846_v27  ;;  %v1620_v9 = vsel %vm1512_vm4, %v1332_v23, 0.0  ;;  %v1686_v30 = vmul.f32 %v1333_v52, %v1333_v52 }
 0x199   :  { %v1617_v10 = vadd.f32 %v1616_v22, %v1615_v46  ;;  %v1335_v1 = vunpack.c.h.bf16 %v3002_v51  ;;  %vm1279_vm6 = vcmp.lt.s32.totalorder %v1164_v4, 450  ;;  %v1622_v29 = vsel %vm1512_vm4, %v1333_v52, 0.0 }
 0x19a   :  { %v1788_v5 = vadd.f32 %v1787_v43, %v1786_v18  ;;  %v1793_v61 = vsel %vm1512_vm4, %v1685_v0, 0.0  ;;  %v1687_v31 = vmul.f32 %v1334_v28, %v1334_v28  ;;  %v1507_v33 = vsel %vm1279_vm6, %v1336_v20, 0.0 }
 0x19b   :  { %v1619_v16 = vadd.f32 %v1618_v2, %v1617_v10  ;;  %v1795_v36 = vsel %vm1512_vm4, %v1686_v30, 0.0  ;;  %v1624_v17 = vsel %vm1512_vm4, %v1334_v28, 0.0  ;;  %v1688_v13 = vmul.f32 %v1335_v1, %v1335_v1 }
 0x19c   :  { %v1790_v12 = vadd.f32 %v1789_v14, %v1788_v5  ;;  %v1626_v51 = vsel %vm1512_vm4, %v1335_v1, 0.0  ;;  %v1797_v35 = vsel %vm1512_vm4, %v1687_v31, 0.0  ;;  %v1689_v42 = vmul.f32 %v1507_v33, %v1507_v33 }
 0x19d   :  { %v1621_v21 = vadd.f32 %v1620_v9, %v1619_v16  ;;  %v1799_v6 = vsel %vm1512_vm4, %v1688_v13, 0.0  ;;  %v1628_v38 = vsel %vm1512_vm4, %v1507_v33, 0.0 }
 0x19e   :  { %v1792_v50 = vadd.f32 %v1791_v55, %v1790_v12  ;;  %v1801_v49 = vsel %vm1512_vm4, %v1689_v42, 0.0 }
 0x19f   :  { %v1623_v19 = vadd.f32 %v1622_v29, %v1621_v21 }
 0x1a0   :  { %v1794_v25 = vadd.f32 %v1793_v61, %v1792_v50 }
 0x1a1   :  { %v1625_v26 = vadd.f32 %v1624_v17, %v1623_v19 }
 0x1a2   :  { %v1796_v7 = vadd.f32 %v1795_v36, %v1794_v25 }
 0x1a3   :  { %v1627_v15 = vadd.f32 %v1626_v51, %v1625_v26 }
 0x1a4   :  { %v1798_v27 = vadd.f32 %v1797_v35, %v1796_v7 }
 0x1a5   :  { %v1629_v48 = vadd.f32 %v1628_v38, %v1627_v15 }
 0x1a6   :  { %v1800_v44 = vadd.f32 %v1799_v6, %v1798_v27 }
 0x1a7   :  { %v1630_v32 = vadd.f32 %v1629_v48, %v1515_v37 }
 0x1a8   :  { %v1802_v39 = vadd.f32 %v1801_v49, %v1800_v44 }
 0x1a9   :  { %1631 = vst.msk [vmem:[%s3071_s4] sm:$0xff] %vm1512_vm4, %v1630_v32 }
 0x1aa   :  { %v1803_v56 = vadd.f32 %v1802_v39, %v1632_v45 }
 0x1ac   :  { %1804 = vst.msk [vmem:[%s3072_s5] sm:$0xff] %vm1512_vm4, %v1803_v56 }
 0x1ad   :  { %1831 = vsyncpa [#allocation3], 1 }

// kernel: discriminator_forward.6
= control target key start
LH: loop header
LB: loop body
LE: loop exit
PB: predicated region body
PF: predicated region fallthrough
CT: control target
= control target key end

     0   :  { %v1529_v34 = vmov 0.0   ;;  %vm1530_vm0 = vmmov 0   ;;  %vm558_vm1 = vcmask 523264   ;;  %s1876_s1 = inlined_call_operand.vmem [shape: bf16[576,128], index: 1, kind: input, shape index: {}]   ;;  %s1877_s0 = inlined_call_operand.vmem [shape: bf16[104,576], index: 0, kind: input, shape index: {}]   ;;  %s1878_s2 = inlined_call_operand.vmem [shape: f32[1,128], index: 2, kind: input, shape index: {}]   ;;  %s1879_s3 = inlined_call_operand.vmem [shape: bf16[104,128], index: 3, kind: output, shape index: {0}]   ;;  %s1880_s4 = inlined_call_operand.vmem [shape: f32[8,128], index: 4, kind: output, shape index: {1}]   ;;  %s1881_s5 = inlined_call_operand.vmem [shape: f32[8,128], index: 5, kind: output, shape index: {2}]  }
   0x1   :  { %v1446_v0 = vld [vmem:[%s1876_s1 + $0x40] sm:$0xff]   ;;  %v1450_v4 = vld [vmem:[%s1876_s1 + $0x48] sm:$0xff]   ;;  %v1454_v8 = vld [vmem:[%s1876_s1 + $0x50] sm:$0xff]  }
   0x2   :  { %v1447_v1 = vld [vmem:[%s1876_s1 + $0xc0] sm:$0xff]   ;;  %1273 = vmatprep.subr.bf16.mxu0 %v1446_v0  ;;  %v1451_v5 = vld [vmem:[%s1876_s1 + $0xc8] sm:$0xff]   ;;  %v1455_v9 = vld [vmem:[%s1876_s1 + $0xd0] sm:$0xff]  }
   0x3   :  { %v1448_v2 = vld [vmem:[%s1876_s1] sm:$0xff]   ;;  %1331 = vmatprep.subr.bf16.mxu1 %v1447_v1  ;;  %v1452_v6 = vld [vmem:[%s1876_s1 + $0x8] sm:$0xff]   ;;  %v1456_v10 = vld [vmem:[%s1876_s1 + $0x10] sm:$0xff]  }
   0x4   :  { %v1449_v3 = vld [vmem:[%s1876_s1 + $0x80] sm:$0xff]   ;;  %1274 = vmatpush3.bf16.msra.mxu0 %v1448_v2  ;;  %v1453_v7 = vld [vmem:[%s1876_s1 + $0x88] sm:$0xff]   ;;  %v1457_v11 = vld [vmem:[%s1876_s1 + $0x90] sm:$0xff]  }
   0x5   :  { %1332 = vmatpush3.bf16.msra.mxu1 %v1449_v3  ;;  %1275 = vmatprep.subr.bf16.mxu0 %v1450_v4  ;;  %v1458_v12 = vld [vmem:[%s1876_s1 + $0x58] sm:$0xff]   ;;  %v1462_v16 = vld [vmem:[%s1876_s1 + $0x60] sm:$0xff]   ;;  %v1466_v20 = vld [vmem:[%s1876_s1 + $0x68] sm:$0xff]  }
   0x6   :  { %1333 = vmatprep.subr.bf16.mxu1 %v1451_v5  ;;  %v1459_v13 = vld [vmem:[%s1876_s1 + $0xd8] sm:$0xff]   ;;  %v1463_v17 = vld [vmem:[%s1876_s1 + $0xe0] sm:$0xff]   ;;  %v1467_v21 = vld [vmem:[%s1876_s1 + $0xe8] sm:$0xff]  }
   0x7   :  { %v1460_v14 = vld [vmem:[%s1876_s1 + $0x18] sm:$0xff]   ;;  %v1464_v18 = vld [vmem:[%s1876_s1 + $0x20] sm:$0xff]   ;;  %v1468_v22 = vld [vmem:[%s1876_s1 + $0x28] sm:$0xff]  }
   0x8   :  { %1276 = vmatpush3.bf16.msra.mxu0 %v1452_v6  ;;  %v1461_v15 = vld [vmem:[%s1876_s1 + $0x98] sm:$0xff]   ;;  %v1465_v19 = vld [vmem:[%s1876_s1 + $0xa0] sm:$0xff]   ;;  %v1469_v23 = vld [vmem:[%s1876_s1 + $0xa8] sm:$0xff]  }
   0x9   :  { %1334 = vmatpush3.bf16.msra.mxu1 %v1453_v7  ;;  %1277 = vmatprep.subr.bf16.mxu0 %v1454_v8  ;;  %v1470_v24 = vld [vmem:[%s1876_s1 + $0x70] sm:$0xff]   ;;  %v1474_v28 = vld [vmem:[%s1876_s1 + $0x78] sm:$0xff]   ;;  %v1483_v36 = vld [vmem:[%s1877_s0 + $0xc] ss:$20 sps:$4 sm:$0xff]  }
   0xa   :  { %1335 = vmatprep.subr.bf16.mxu1 %v1455_v9  ;;  %v1471_v25 = vld [vmem:[%s1876_s1 + $0xf0] sm:$0xff]   ;;  %v1475_v29 = vld [vmem:[%s1876_s1 + $0xf8] sm:$0xff]   ;;  %v1484_v37 = vld [vmem:[%s1876_s1 + $0x100] sm:$0xff]   ;;  %700 = vmatprep.mubr.bf16.mxu1 %v1483_v36 }
   0xb   :  { %v1472_v26 = vld [vmem:[%s1876_s1 + $0x30] sm:$0xff]   ;;  %v1476_v30 = vld [vmem:[%s1876_s1 + $0x38] sm:$0xff]   ;;  %v1485_v38 = vld [vmem:[%s1877_s0 + $0x2c] ss:$20 sps:$4 sm:$0xff]  }
   0xc   :  { %1278 = vmatpush3.bf16.msra.mxu0 %v1456_v10  ;;  %v1473_v27 = vld [vmem:[%s1876_s1 + $0xb0] sm:$0xff]   ;;  %v1477_v31 = vld [vmem:[%s1876_s1 + $0xb8] sm:$0xff]   ;;  %v1495_v43 = vld [vmem:[%s1876_s1 + $0x108] sm:$0xff]  }
   0xd   :  { %1336 = vmatpush3.bf16.msra.mxu1 %v1457_v11  ;;  %1279 = vmatprep.subr.bf16.mxu0 %v1458_v12  ;;  %v1478_v32 = vld [vmem:[%s1877_s0] ss:$20 sps:$4 sm:$0xff]   ;;  %v1480_v33 = vld [vmem:[%s1877_s0 + $0x4] ss:$20 sps:$4 sm:$0xff]   ;;  %v1481_v35 = vld [vmem:[%s1877_s0 + $0x8] ss:$20 sps:$4 sm:$0xff]  }
   0xe   :  { %1337 = vmatprep.subr.bf16.mxu1 %v1459_v13  ;;  %612 = vmatprep.mubr.bf16.mxu0 %v1480_v33  ;;  %v1487_v39 = vld [vmem:[%s1877_s0 + $0x34] ss:$20 sps:$4 sm:$0xff]   ;;  %v1490_v41 = vld [vmem:[%s1877_s0 + $0x30] ss:$20 sps:$4 sm:$0xff]   ;;  %v1497_v47 = vld [vmem:[%s1877_s0 + $0x58] ss:$20 sps:$4 sm:$0xff]  }
   0xf   :  { %v1489_v40 = vld [vmem:[%s1877_s0 + $0x28] ss:$20 sps:$4 sm:$0xff]   ;;  %v1504_v45 = vld [vmem:[%s1876_s1 + $0x110] sm:$0xff]   ;;  %v1500_v49 = vld [vmem:[%s1877_s0 + $0x84] ss:$20 sps:$4 sm:$0xff]  }
  0x10   :  { %1280 = vmatpush3.bf16.msra.mxu0 %v1460_v14  ;;  %v1491_v42 = vld [vmem:[%s1877_s0 + $0x54] ss:$20 sps:$4 sm:$0xff]   ;;  %v1493_v44 = vld [vmem:[%s1877_s0 + $0x5c] ss:$20 sps:$4 sm:$0xff]   ;;  %v1502_v51 = vld [vmem:[%s1877_s0 + $0x78] ss:$20 sps:$4 sm:$0xff]  }
  0x11   :  { %1338 = vmatpush3.bf16.msra.mxu1 %v1461_v15  ;;  %1281 = vmatprep.subr.bf16.mxu0 %v1462_v16  ;;  %v1496_v46 = vld [vmem:[%s1877_s0 + $0x50] ss:$20 sps:$4 sm:$0xff]   ;;  %v1517_v50 = vld [vmem:[%s1876_s1 + $0x118] sm:$0xff]   ;;  %v1503_v52 = vld [vmem:[%s1877_s0 + $0x80] ss:$20 sps:$4 sm:$0xff]  }
  0x12   :  { %1339 = vmatprep.subr.bf16.mxu1 %v1463_v17  ;;  %v1498_v48 = vld [vmem:[%s1877_s0 + $0x7c] ss:$20 sps:$4 sm:$0xff]   ;;  %v1505_v53 = vld [vmem:[%s1877_s0 + $0xa4] ss:$20 sps:$4 sm:$0xff]   ;;  %v1507_v54 = vld [vmem:[%s1877_s0 + $0xac] ss:$20 sps:$4 sm:$0xff]  }
  0x13   :  { %v1509_v55 = vld [vmem:[%s1877_s0 + $0xa0] ss:$20 sps:$4 sm:$0xff]   ;;  %v1510_v56 = vld [vmem:[%s1877_s0 + $0xa8] ss:$20 sps:$4 sm:$0xff]   ;;  %v1516_v62 = vld [vmem:[%s1877_s0 + $0xd0] ss:$20 sps:$4 sm:$0xff]  }
  0x14   :  { %1282 = vmatpush3.bf16.msra.mxu0 %v1464_v18  ;;  %v1511_v57 = vld [vmem:[%s1877_s0 + $0xcc] ss:$20 sps:$4 sm:$0xff]   ;;  %v1513_v58 = vld [vmem:[%s1877_s0 + $0xd4] ss:$20 sps:$4 sm:$0xff]   ;;  %v94_v60 = vld [vmem:[%s1877_s0 + $0xf8] sm:$0xff] }
  0x15   :  { %1340 = vmatpush3.bf16.msra.mxu1 %v1465_v19  ;;  %1283 = vmatprep.subr.bf16.mxu0 %v1466_v20  ;;  %v93_v59 = vld [vmem:[%s1877_s0 + $0xf0] sm:$0xff]  ;;  %v1515_v61 = vld [vmem:[%s1877_s0 + $0xc8] ss:$20 sps:$4 sm:$0xff]   ;;  %v1167_v0 = vcombine.high %v94_v60, %v94_v60  ;;  %v1166_v2 = vcombine.low %v94_v60, %v94_v60  ;;  %v1524_v5 = vld [vmem:[%s1877_s0 + $0x38] ss:$20 sps:$4 sm:$0xff]  }
  0x16   :  { %1341 = vmatprep.subr.bf16.mxu1 %v1467_v21  ;;  %v1165_v63 = vcombine.high %v93_v59, %v93_v59  ;;  %v1164_v1 = vcombine.low %v93_v59, %v93_v59  ;;  %v1522_v3 = vld [vmem:[%s1877_s0 + $0x10] ss:$20 sps:$4 sm:$0xff]   ;;  %v1525_v6 = vld [vmem:[%s1877_s0 + $0xd8] ss:$20 sps:$4 sm:$0xff]   ;;  %v1526_v7 = vld [vmem:[%s1877_s0 + $0x60] ss:$20 sps:$4 sm:$0xff]  }
  0x17   :  { %v1523_v4 = vld [vmem:[%s1877_s0 + $0xb0] ss:$20 sps:$4 sm:$0xff]   ;;  %v1527_v8 = vld [vmem:[%s1877_s0 + $0x100] ss:$0 sps:$4 sm:$0xff]   ;;  %v1528_v9 = vld [vmem:[%s1877_s0 + $0x88] ss:$20 sps:$4 sm:$0xff]  }
  0x18   :  { %1284 = vmatpush3.bf16.msra.mxu0 %v1468_v22  ;;  %v1800_v11 = vld [vmem:[%s1878_s2] ss:$0 sm:$0xff] }
  0x19   :  { %1342 = vmatpush3.bf16.msra.mxu1 %v1469_v23  ;;  %1285 = vmatprep.subr.bf16.mxu0 %v1470_v24 }
  0x1a   :  { %1343 = vmatprep.subr.bf16.mxu1 %v1471_v25 }
  0x1c   :  { %1286 = vmatpush3.bf16.msra.mxu0 %v1472_v26 }
  0x1d   :  { %1344 = vmatpush3.bf16.msra.mxu1 %v1473_v27  ;;  %1287 = vmatprep.subr.bf16.mxu0 %v1474_v28 }
  0x1e   :  { %1345 = vmatprep.subr.bf16.mxu1 %v1475_v29 }
  0x20   :  { %1288 = vmatpush3.bf16.msra.mxu0 %v1476_v30 }
  0x21   :  { %1346 = vmatpush3.bf16.msra.mxu1 %v1477_v31  ;;  %1400 = vmatprep.subr.bf16.mxu0 %v1529_v34 }
  0x22   :  { %1436 = vmatprep.subr.bf16.mxu1 %v1529_v34 }
  0x23   :  { %613 = vmatmul.mubr.bf16.vlgmr.msra.gmra.mrb[0].mxu0 %v1478_v32 }
  0x24   :  { %701 = vmatmul.mubr.bf16.vlgmr.msra.gmra.mrb[0].mxu1 %v1481_v35  ;;  %1401 = vmatpush3.bf16.msra.mxu0 %v1484_v37 }
  0x25   :  { %620 = vmatprep.mubr.bf16.mxu0 %v1485_v38  ;;  %1402 = vmatprep.subr.bf16.mxu0 %v1529_v34 }
  0x26   :  { %708 = vmatprep.mubr.bf16.mxu1 %v1487_v39  ;;  %1440 = vmatpush3.bf16.msra.mxu1 %v1484_v37 }
  0x27   :  { %1437 = vmatprep.subr.bf16.mxu1 %v1529_v34 }
  0x28   :  { %1403 = vmatpush3.bf16.msra.mxu0 %v1495_v43 }
  0x29   :  { %1404 = vmatprep.subr.bf16.mxu0 %v1529_v34 }
  0x2a   :  { %1441 = vmatpush3.bf16.msra.mxu1 %v1495_v43 }
  0x2b   :  { %621 = vmatmul.mubr.bf16.gmra.mrb[4].mxu0 %v1489_v40  ;;  %1438 = vmatprep.subr.bf16.mxu1 %v1529_v34 }
  0x2c   :  { %709 = vmatmul.mubr.bf16.gmra.mrb[4].mxu1 %v1490_v41  ;;  %628 = vmatprep.mubr.bf16.mxu0 %v1491_v42 }
  0x2d   :  { %716 = vmatprep.mubr.bf16.mxu1 %v1493_v44  ;;  %1405 = vmatpush3.bf16.msra.mxu0 %v1504_v45 }
  0x2e   :  { %1442 = vmatpush3.bf16.msra.mxu1 %v1504_v45  ;;  %1406 = vmatprep.subr.bf16.mxu0 %v1529_v34 }
  0x2f   :  { %1439 = vmatprep.subr.bf16.mxu1 %v1529_v34 }
  0x31   :  { %1407 = vmatpush3.bf16.msra.mxu0 %v1517_v50 }
  0x32   :  { %1443 = vmatpush3.bf16.msra.mxu1 %v1517_v50 }
  0x33   :  { %629 = vmatmul.mubr.bf16.gmra.mrb[8].mxu0 %v1496_v46 }
  0x34   :  { %717 = vmatmul.mubr.bf16.gmra.mrb[8].mxu1 %v1497_v47  ;;  %636 = vmatprep.mubr.bf16.mxu0 %v1498_v48 }
  0x35   :  { %724 = vmatprep.mubr.bf16.mxu1 %v1500_v49 }
  0x3b   :  { %637 = vmatmul.mubr.bf16.gmra.mrb[12].mxu0 %v1502_v51 }
  0x3c   :  { %725 = vmatmul.mubr.bf16.gmra.mrb[12].mxu1 %v1503_v52  ;;  %644 = vmatprep.mubr.bf16.mxu0 %v1505_v53 }
  0x3d   :  { %732 = vmatprep.mubr.bf16.mxu1 %v1507_v54 }
  0x43   :  { %645 = vmatmul.mubr.bf16.gmra.mrb[16].mxu0 %v1509_v55 }
  0x44   :  { %733 = vmatmul.mubr.bf16.gmra.mrb[16].mxu1 %v1510_v56  ;;  %652 = vmatprep.mubr.bf16.mxu0 %v1511_v57 }
  0x45   :  { %740 = vmatprep.mubr.bf16.mxu1 %v1513_v58 }
  0x4b   :  { %653 = vmatmul.mubr.bf16.gmra.mrb[20].mxu0 %v1515_v61 }
  0x4c   :  { %741 = vmatmul.mubr.bf16.gmra.mrb[20].mxu1 %v1516_v62  ;;  %660 = vmatprep.mubr.bf16.mxu0 %v1165_v63 }
  0x4d   :  { %748 = vmatprep.mubr.bf16.mxu1 %v1167_v0 }
  0x53   :  { %661 = vmatmul.mubr.bf16.gmra.mrb[24].mxu0 %v1164_v1 }
  0x54   :  { %749 = vmatmul.mubr.bf16.gmra.mrb[24].mxu1 %v1166_v2  ;;  %1408 = vmatprep.mubr.msk.bf16.mxu0 %vm1530_vm0, %v1529_v34 }
  0x55   :  { %1424 = vmatprep.mubr.msk.bf16.mxu1 %vm1530_vm0, %v1529_v34 }
  0x5b   :  { %1409 = vmatmul.mubr.msk.bf16.vlgmr.msra.gmra.mrb[28].mxu0 %vm558_vm1, %v1522_v3 }
  0x5c   :  { %1425 = vmatmul.mubr.msk.bf16.vlgmr.msra.gmra.mrb[28].mxu1 %vm558_vm1, %v1523_v4  ;;  %1412 = vmatprep.mubr.msk.bf16.mxu0 %vm1530_vm0, %v1529_v34 }
  0x5d   :  { %1428 = vmatprep.mubr.msk.bf16.mxu1 %vm1530_vm0, %v1529_v34 }
  0x63   :  { %1413 = vmatmul.mubr.msk.bf16.gmra.mrb[32].mxu0 %vm558_vm1, %v1524_v5 }
  0x64   :  { %1429 = vmatmul.mubr.msk.bf16.gmra.mrb[32].mxu1 %vm558_vm1, %v1525_v6  ;;  %1416 = vmatprep.mubr.msk.bf16.mxu0 %vm1530_vm0, %v1529_v34 }
  0x65   :  { %1432 = vmatprep.mubr.msk.bf16.mxu1 %vm1530_vm0, %v1529_v34 }
  0x6b   :  { %1417 = vmatmul.mubr.msk.bf16.gmra.mrb[36].mxu0 %vm558_vm1, %v1526_v7 }
  0x6c   :  { %1433 = vmatmul.mubr.msk.bf16.gmra.mrb[36].mxu1 %vm558_vm1, %v1527_v8  ;;  %1420 = vmatprep.mubr.msk.bf16.mxu0 %vm1530_vm0, %v1529_v34 }
  0x73   :  { %1421 = vmatmul.mubr.msk.bf16.gmra.mrb[40].mxu0 %vm558_vm1, %v1528_v9 }
  0xf6   :  { %v1289_v10 = vpop.f32.mrb[0].mxu0 }
  0xf7   :  { %v1290_v12 = vpop.f32.mrb[1].mxu0  ;;  %v1347_v13 = vpop.f32.mrb[0].mxu1 }
  0xf8   :  { %v1291_v14 = vadd.f32 %v1290_v12, %v1289_v10  ;;  %v1292_v15 = vpop.f32.mrb[2].mxu0  ;;  %v1348_v16 = vpop.f32.mrb[1].mxu1 }
  0xf9   :  { %v1293_v17 = vpop.f32.mrb[3].mxu0  ;;  %v1349_v18 = vadd.f32 %v1348_v16, %v1347_v13  ;;  %v1350_v19 = vpop.f32.mrb[2].mxu1 }
  0xfa   :  { %v615_v20 = vadd.f32 %v1291_v14, %v1800_v11  ;;  %v1294_v21 = vadd.f32 %v1293_v17, %v1292_v15  ;;  %v1351_v22 = vpop.f32.mrb[3].mxu1 }
  0xfb   :  { %v1352_v23 = vadd.f32 %v1351_v22, %v1350_v19 }
  0xfc   :  { %v618_v24 = vadd.f32 %v1294_v21, %v1800_v11  ;;  %v1804_v25 = vadd.f32 %v1349_v18, %v615_v20 }
  0xfe   :  { %v1295_v26 = vpop.f32.mrb[4].mxu0  ;;  %v1806_v27 = vadd.f32 %v1352_v23, %v618_v24 }
  0xff   :  { %v1296_v28 = vpop.f32.mrb[5].mxu0  ;;  %v1353_v29 = vpop.f32.mrb[4].mxu1 }
 0x100   :  { %v1297_v30 = vadd.f32 %v1296_v28, %v1295_v26  ;;  %v1298_v31 = vpop.f32.mrb[6].mxu0  ;;  %v1354_v32 = vpop.f32.mrb[5].mxu1 }
 0x101   :  { %v1299_v33 = vpop.f32.mrb[7].mxu0  ;;  %v1355_v34 = vadd.f32 %v1354_v32, %v1353_v29  ;;  %v1356_v35 = vpop.f32.mrb[6].mxu1 }
 0x102   :  { %v623_v36 = vadd.f32 %v1297_v30, %v1800_v11  ;;  %v1300_v37 = vadd.f32 %v1299_v33, %v1298_v31  ;;  %v1357_v38 = vpop.f32.mrb[7].mxu1 }
 0x103   :  { %v1358_v39 = vadd.f32 %v1357_v38, %v1356_v35 }
 0x104   :  { %v626_v40 = vadd.f32 %v1300_v37, %v1800_v11  ;;  %v1810_v41 = vadd.f32 %v1355_v34, %v623_v36 }
 0x106   :  { %v1301_v42 = vpop.f32.mrb[8].mxu0  ;;  %v1812_v43 = vadd.f32 %v1358_v39, %v626_v40 }
 0x107   :  { %v1302_v44 = vpop.f32.mrb[9].mxu0  ;;  %v1359_v45 = vpop.f32.mrb[8].mxu1 }
 0x108   :  { %v1303_v46 = vadd.f32 %v1302_v44, %v1301_v42  ;;  %v1304_v47 = vpop.f32.mrb[10].mxu0  ;;  %v1360_v48 = vpop.f32.mrb[9].mxu1 }
 0x109   :  { %v1305_v49 = vpop.f32.mrb[11].mxu0  ;;  %v1361_v50 = vadd.f32 %v1360_v48, %v1359_v45  ;;  %v1362_v51 = vpop.f32.mrb[10].mxu1 }
 0x10a   :  { %v631_v52 = vadd.f32 %v1303_v46, %v1800_v11  ;;  %v1306_v53 = vadd.f32 %v1305_v49, %v1304_v47  ;;  %v1363_v54 = vpop.f32.mrb[11].mxu1 }
 0x10b   :  { %v1364_v55 = vadd.f32 %v1363_v54, %v1362_v51 }
 0x10c   :  { %v634_v56 = vadd.f32 %v1306_v53, %v1800_v11  ;;  %v1816_v57 = vadd.f32 %v1361_v50, %v631_v52 }
 0x10e   :  { %v1307_v58 = vpop.f32.mrb[12].mxu0  ;;  %v1818_v59 = vadd.f32 %v1364_v55, %v634_v56 }
 0x10f   :  { %v1308_v60 = vpop.f32.mrb[13].mxu0  ;;  %v1365_v61 = vpop.f32.mrb[12].mxu1 }
 0x110   :  { %v1309_v62 = vadd.f32 %v1308_v60, %v1307_v58  ;;  %v1310_v63 = vpop.f32.mrb[14].mxu0  ;;  %v1366_v0 = vpop.f32.mrb[13].mxu1 }
 0x111   :  { %v1311_v1 = vpop.f32.mrb[15].mxu0  ;;  %v1367_v2 = vadd.f32 %v1366_v0, %v1365_v61  ;;  %v1368_v3 = vpop.f32.mrb[14].mxu1 }
 0x112   :  { %v639_v4 = vadd.f32 %v1309_v62, %v1800_v11  ;;  %v1312_v5 = vadd.f32 %v1311_v1, %v1310_v63  ;;  %v1369_v6 = vpop.f32.mrb[15].mxu1 }
 0x113   :  { %v1370_v7 = vadd.f32 %v1369_v6, %v1368_v3 }
 0x114   :  { %v642_v8 = vadd.f32 %v1312_v5, %v1800_v11  ;;  %v1822_v9 = vadd.f32 %v1367_v2, %v639_v4 }
 0x116   :  { %v1313_v10 = vpop.f32.mrb[16].mxu0  ;;  %v1824_v12 = vadd.f32 %v1370_v7, %v642_v8 }
 0x117   :  { %v1314_v13 = vpop.f32.mrb[17].mxu0  ;;  %v1371_v14 = vpop.f32.mrb[16].mxu1 }
 0x118   :  { %v1315_v15 = vadd.f32 %v1314_v13, %v1313_v10  ;;  %v1316_v16 = vpop.f32.mrb[18].mxu0  ;;  %v1372_v17 = vpop.f32.mrb[17].mxu1 }
 0x119   :  { %v1317_v18 = vpop.f32.mrb[19].mxu0  ;;  %v1373_v19 = vadd.f32 %v1372_v17, %v1371_v14  ;;  %v1374_v20 = vpop.f32.mrb[18].mxu1 }
 0x11a   :  { %v647_v21 = vadd.f32 %v1315_v15, %v1800_v11  ;;  %v1318_v22 = vadd.f32 %v1317_v18, %v1316_v16  ;;  %v1375_v23 = vpop.f32.mrb[19].mxu1 }
 0x11b   :  { %v1376_v24 = vadd.f32 %v1375_v23, %v1374_v20 }
 0x11c   :  { %v650_v26 = vadd.f32 %v1318_v22, %v1800_v11  ;;  %v735_v28 = vadd.f32 %v1373_v19, %v647_v21 }
 0x11e   :  { %v1319_v29 = vpop.f32.mrb[20].mxu0  ;;  %v738_v30 = vadd.f32 %v1376_v24, %v650_v26 }
 0x11f   :  { %v1320_v31 = vpop.f32.mrb[21].mxu0  ;;  %v1377_v32 = vpop.f32.mrb[20].mxu1 }
 0x120   :  { %v1321_v33 = vadd.f32 %v1320_v31, %v1319_v29  ;;  %v1322_v34 = vpop.f32.mrb[22].mxu0  ;;  %v1378_v35 = vpop.f32.mrb[21].mxu1 }
 0x121   :  { %v1323_v36 = vpop.f32.mrb[23].mxu0  ;;  %v1379_v37 = vadd.f32 %v1378_v35, %v1377_v32  ;;  %v1380_v38 = vpop.f32.mrb[22].mxu1 }
 0x122   :  { %v655_v39 = vadd.f32 %v1321_v33, %v1800_v11  ;;  %v1324_v40 = vadd.f32 %v1323_v36, %v1322_v34  ;;  %v1381_v42 = vpop.f32.mrb[23].mxu1 }
 0x123   :  { %v1382_v44 = vadd.f32 %v1381_v42, %v1380_v38 }
 0x124   :  { %v658_v45 = vadd.f32 %v1324_v40, %v1800_v11  ;;  %v743_v46 = vadd.f32 %v1379_v37, %v655_v39 }
 0x126   :  { %v1325_v47 = vpop.f32.mrb[24].mxu0  ;;  %v746_v48 = vadd.f32 %v1382_v44, %v658_v45 }
 0x127   :  { %v1326_v49 = vpop.f32.mrb[25].mxu0  ;;  %v1383_v50 = vpop.f32.mrb[24].mxu1 }
 0x128   :  { %v1327_v51 = vadd.f32 %v1326_v49, %v1325_v47  ;;  %v1328_v52 = vpop.f32.mrb[26].mxu0  ;;  %v1384_v53 = vpop.f32.mrb[25].mxu1 }
 0x129   :  { %v1329_v54 = vpop.f32.mrb[27].mxu0  ;;  %v1385_v55 = vadd.f32 %v1384_v53, %v1383_v50  ;;  %v1386_v56 = vpop.f32.mrb[26].mxu1 }
 0x12a   :  { %v663_v58 = vadd.f32 %v1327_v51, %v1800_v11  ;;  %v1387_v60 = vpop.f32.mrb[27].mxu1 }
 0x12c   :  { %v751_v61 = vadd.f32 %v1385_v55, %v663_v58 }
 0x12e   :  { %v790_v62 = vpop.f32.mrb[28].mxu0 }
 0x12f   :  { %v791_v63 = vadd.f32 %v790_v62, %v1804_v25  ;;  %v822_v0 = vpop.f32.mrb[28].mxu1  ;;  %v1410_v1 = vpop.f32.mrb[29].mxu0 }
 0x130   :  { %v823_v2 = vadd.f32 %v822_v0, %v735_v28  ;;  %v1426_v3 = vpop.f32.mrb[29].mxu1  ;;  %v793_v4 = vpop.f32.mrb[30].mxu0 }
 0x131   :  { %v857_v5 = vmul.f32 0.2, %v791_v63  ;;  %v794_v6 = vadd.f32 %v793_v4, %v1806_v27  ;;  %v825_v7 = vpop.f32.mrb[30].mxu1  ;;  %v1411_v8 = vpop.f32.mrb[31].mxu0  ;;  %vm844_vm2 = vcmp.gt.f32.partialorder %v791_v63, 0.0 }
 0x132   :  { %v865_v10 = vmul.f32 0.2, %v823_v2  ;;  %v826_v13 = vadd.f32 %v825_v7, %v738_v30  ;;  %v1427_v14 = vpop.f32.mrb[31].mxu1  ;;  %vm852_vm3 = vcmp.gt.f32.partialorder %v823_v2, 0.0 }
 0x133   :  { %vm845_vm4 = vcmp.gt.f32.partialorder %v794_v6, 0.0  ;;  %v858_v11 = vmul.f32 0.2, %v794_v6  ;;  %v870_v25 = vsel %vm844_vm2, %v791_v63, %v857_v5 }
 0x134   :  { %vm853_vm5 = vcmp.gt.f32.partialorder %v826_v13, 0.0  ;;  %v866_v15 = vmul.f32 0.2, %v826_v13  ;;  %v878_v17 = vsel %vm852_vm3, %v823_v2, %v865_v10 }
 0x135   :  { %v871_v16 = vsel %vm845_vm4, %v794_v6, %v858_v11 }
 0x136   :  { %v883_v18 = vpack.c.bf16 %v871_v16, %v870_v25  ;;  %v879_v19 = vsel %vm853_vm5, %v826_v13, %v866_v15  ;;  %v798_v20 = vpop.f32.mrb[32].mxu0 }
 0x137   :  { %v1833_v21 = vpack.c.bf16 %v879_v19, %v878_v17  ;;  %v799_v27 = vadd.f32 %v798_v20, %v1810_v41  ;;  %v830_v22 = vpop.f32.mrb[32].mxu1  ;;  %v1414_v23 = vpop.f32.mrb[33].mxu0 }
 0x138   :  { %1242 = vst [vmem:[%s1879_s3] sm:$0xff] %v883_v18   ;;  %v831_v24 = vadd.f32 %v830_v22, %v743_v46  ;;  %v1430_v26 = vpop.f32.mrb[33].mxu1  ;;  %v801_v28 = vpop.f32.mrb[34].mxu0  ;;  %v992_v35 = vunpack.c.l.bf16 %v883_v18  ;;  %v993_v36 = vunpack.c.h.bf16 %v883_v18  ;;  %v951_v22 = vlaneseq }
 0x139   :  { %1271 = vst [vmem:[%s1879_s3 + $0x20] sm:$0xff] %v1833_v21   ;;  %v833_v29 = vpop.f32.mrb[34].mxu1  ;;  %v1415_v30 = vpop.f32.mrb[35].mxu0  ;;  %v859_v32 = vmul.f32 0.2, %v799_v27  ;;  %vm846_vm6 = vcmp.gt.f32.partialorder %v799_v27, 0.0  ;;  %v802_v41 = vadd.f32 %v801_v28, %v1812_v43 }
 0x13a   :  { %v1431_v31 = vpop.f32.mrb[35].mxu1  ;;  %v867_v33 = vmul.f32 0.2, %v831_v24  ;;  %vm854_vm7 = vcmp.gt.f32.partialorder %v831_v24, 0.0  ;;  %v834_v34 = vadd.f32 %v833_v29, %v746_v48  ;;  %v1066_v52 = vmul.f32 %v992_v35, %v992_v35 }
 0x13b   :  { %vm847_vm8 = vcmp.gt.f32.partialorder %v802_v41, 0.0  ;;  %v860_v37 = vmul.f32 0.2, %v802_v41  ;;  %v872_v39 = vsel %vm846_vm6, %v799_v27, %v859_v32  ;;  %v1067_v43 = vmul.f32 %v993_v36, %v993_v36 }
 0x13c   :  { %vm855_vm9 = vcmp.gt.f32.partialorder %v834_v34, 0.0  ;;  %v868_v38 = vmul.f32 0.2, %v834_v34  ;;  %v880_v40 = vsel %vm854_vm7, %v831_v24, %v867_v33  ;;  %v1051_v58 = vadd.f32 %v993_v36, %v992_v35 }
 0x13d   :  { %v873_v45 = vsel %vm847_vm8, %v802_v41, %v860_v37  ;;  %v1079_v2 = vadd.f32 %v1067_v43, %v1066_v52  ;;  %v952_v41 = vshrl.u32 %v951_v22, 7  ;;  %v1000_v36 = vunpack.c.l.bf16 %v1833_v21 }
 0x13e   :  { %v806_v42 = vpop.f32.mrb[36].mxu0  ;;  %v881_v46 = vsel %vm855_vm9, %v834_v34, %v868_v38  ;;  %v884_v48 = vpack.c.bf16 %v873_v45, %v872_v39 }
 0x13f   :  { %v838_v44 = vpop.f32.mrb[36].mxu1  ;;  %v807_v47 = vadd.f32 %v806_v42, %v1816_v57  ;;  %v1418_v50 = vpop.f32.mrb[37].mxu0  ;;  %v1845_v53 = vpack.c.bf16 %v881_v46, %v880_v40  ;;  %v964_v39 = vadd.s32 96, %v952_v41  ;;  %v1001_v40 = vunpack.c.h.bf16 %v1833_v21 }
 0x140   :  { %v839_v49 = vadd.f32 %v838_v44, %v751_v61  ;;  %v1434_v51 = vpop.f32.mrb[37].mxu1  ;;  %v809_v54 = vpop.f32.mrb[38].mxu0  ;;  %1268 = vst [vmem:[%s1879_s3 + $0x8] sm:$0xff] %v884_v48   ;;  %v994_v60 = vunpack.c.l.bf16 %v884_v48  ;;  %v995_v62 = vunpack.c.h.bf16 %v884_v48  ;;  %v1074_v46 = vmul.f32 %v1000_v36, %v1000_v36 }
 0x141   :  { %v841_v55 = vpop.f32.mrb[38].mxu1  ;;  %1272 = vst [vmem:[%s1879_s3 + $0x28] sm:$0xff] %v1845_v53   ;;  %v1419_v57 = vpop.f32.mrb[39].mxu0  ;;  %v861_v63 = vmul.f32 0.2, %v807_v47  ;;  %v810_v1 = vadd.f32 %v809_v54, %v1818_v59  ;;  %vm848_vm11 = vcmp.gt.f32.partialorder %v807_v47, 0.0  ;;  %v1075_v52 = vmul.f32 %v1001_v40, %v1001_v40 }
 0x142   :  { %vm856_vm10 = vcmp.gt.f32.partialorder %v839_v49, 0.0  ;;  %v869_v56 = vmul.f32 0.2, %v839_v49  ;;  %v1435_v61 = vpop.f32.mrb[39].mxu1  ;;  %v1052_v3 = vadd.f32 %v1051_v58, %v994_v60  ;;  %v1068_v4 = vmul.f32 %v994_v60, %v994_v60 }
 0x143   :  { %vm849_vm12 = vcmp.gt.f32.partialorder %v810_v1, 0.0  ;;  %v862_v6 = vmul.f32 0.2, %v810_v1  ;;  %v1069_v10 = vmul.f32 %v995_v62, %v995_v62  ;;  %v874_v15 = vsel %vm848_vm11, %v807_v47, %v861_v63 }
 0x144   :  { %v882_v0 = vsel %vm856_vm10, %v839_v49, %v869_v56  ;;  %v1053_v8 = vadd.f32 %v1052_v3, %v995_v62  ;;  %v1080_v13 = vadd.f32 %v1079_v2, %v1068_v4  ;;  %v1002_v47 = vunpack.c.l.bf16 %v1845_v53 }
 0x145   :  { %v889_v5 = vpack.c.bf16 %v882_v0, %v882_v0  ;;  %v875_v59 = vsel %vm849_vm12, %v810_v1, %v862_v6  ;;  %vm991_vm15 = vcmp.lt.s32.totalorder %v964_v39, 98  ;;  %v1003_v43 = vunpack.c.h.bf16 %v1845_v53 }
 0x146   :  { %v814_v7 = vpop.f32.mrb[40].mxu0  ;;  %v1081_v16 = vadd.f32 %v1080_v13, %v1069_v10  ;;  %v885_v17 = vpack.c.bf16 %v875_v59, %v874_v15  ;;  %v1076_v55 = vmul.f32 %v1002_v47, %v1002_v47 }
 0x147   :  { %v815_v14 = vadd.f32 %v814_v7, %v1822_v9  ;;  %v1422_v11 = vpop.f32.mrb[41].mxu0  ;;  %948 = vst [vmem:[%s1879_s3 + $0x30] sm:$0xf] %v889_v5  ;;  %v1004_v51 = vunpack.c.l.bf16 %v889_v5  ;;  %v1077_v21 = vmul.f32 %v1003_v43, %v1003_v43 }
 0x148   :  { %v817_v25 = vpop.f32.mrb[42].mxu0  ;;  %1269 = vst [vmem:[%s1879_s3 + $0x10] sm:$0xff] %v885_v17   ;;  %v996_v27 = vunpack.c.l.bf16 %v885_v17  ;;  %v997_v9 = vunpack.c.h.bf16 %v885_v17 }
 0x149   :  { %v1423_v18 = vpop.f32.mrb[43].mxu0  ;;  %v863_v19 = vmul.f32 0.2, %v815_v14  ;;  %v818_v20 = vadd.f32 %v817_v25, %v1824_v12  ;;  %vm850_vm13 = vcmp.gt.f32.partialorder %v815_v14, 0.0  ;;  %v1043_v60 = vsel %vm991_vm15, %v1004_v51, 0.0 }
 0x14a   :  { %v1054_v24 = vadd.f32 %v1053_v8, %v996_v27  ;;  %v1070_v26 = vmul.f32 %v996_v27, %v996_v27  ;;  %v1071_v31 = vmul.f32 %v997_v9, %v997_v9  ;;  %v1078_v61 = vmul.f32 %v1043_v60, %v1043_v60 }
 0x14b   :  { %vm851_vm14 = vcmp.gt.f32.partialorder %v818_v20, 0.0  ;;  %v864_v23 = vmul.f32 0.2, %v818_v20  ;;  %v876_v28 = vsel %vm850_vm13, %v815_v14, %v863_v19 }
 0x14c   :  { %v1055_v30 = vadd.f32 %v1054_v24, %v997_v9  ;;  %v1082_v32 = vadd.f32 %v1081_v16, %v1070_v26 }
 0x14d   :  { %v877_v29 = vsel %vm851_vm14, %v818_v20, %v864_v23 }
 0x14e   :  { %v886_v33 = vpack.c.bf16 %v877_v29, %v876_v28  ;;  %v1083_v12 = vadd.f32 %v1082_v32, %v1071_v31 }
 0x150   :  { %1270 = vst [vmem:[%s1879_s3 + $0x18] sm:$0xff] %v886_v33   ;;  %v998_v34 = vunpack.c.l.bf16 %v886_v33  ;;  %v999_v35 = vunpack.c.h.bf16 %v886_v33 }
 0x152   :  { %v1056_v37 = vadd.f32 %v1055_v30, %v998_v34  ;;  %v1072_v38 = vmul.f32 %v998_v34, %v998_v34  ;;  %v1073_v44 = vmul.f32 %v999_v35, %v999_v35 }
 0x154   :  { %v1057_v42 = vadd.f32 %v1056_v37, %v999_v35  ;;  %v1084_v45 = vadd.f32 %v1083_v12, %v1072_v38 }
 0x156   :  { %v1058_v49 = vadd.f32 %v1057_v42, %v1000_v36  ;;  %v1085_v50 = vadd.f32 %v1084_v45, %v1073_v44 }
 0x158   :  { %v1059_v48 = vadd.f32 %v1058_v49, %v1001_v40  ;;  %v1086_v54 = vadd.f32 %v1085_v50, %v1074_v46 }
 0x15a   :  { %v1060_v56 = vadd.f32 %v1059_v48, %v1002_v47  ;;  %v1087_v58 = vadd.f32 %v1086_v54, %v1075_v52 }
 0x15c   :  { %v1061_v62 = vadd.f32 %v1060_v56, %v1003_v43  ;;  %v1088_v57 = vadd.f32 %v1087_v58, %v1076_v55 }
 0x15e   :  { %v1062_v63 = vadd.f32 %v1061_v62, %v1043_v60  ;;  %v1089_v0 = vadd.f32 %v1088_v57, %v1077_v21 }
 0x160   :  { %v1090_v1 = vadd.f32 %v1089_v0, %v1078_v61  ;;  %1064 = vst [vmem:[%s1880_s4] sm:$0xff] %v1062_v63 }
 0x162   :  { %1092 = vst [vmem:[%s1881_s5] sm:$0xff] %v1090_v1 }

// kernel: tile.53
= control target key start
LH: loop header
LB: loop body
LE: loop exit
PB: predicated region body
PF: predicated region fallthrough
CT: control target
= control target key end

     0   :  { %s46_s0 = inlined_call_operand.vmem [shape: f32[256], index: 0, kind: input, shape index: {}]   ;;  %s47_s1 = inlined_call_operand.vmem [shape: f32[9,256], index: 1, kind: output, shape index: {}]  }
   0x1   :  { %v4_v0 = vld [vmem:[%s46_s0] ss:$0 sm:$0xff]  ;;  %v15_v1 = vld [vmem:[%s46_s0 + $0x1] ss:$0 sm:$0xff] }
   0x2   :  { %5 = vst [vmem:[%s47_s1] sm:$0xff] %v4_v0  ;;  %14 = vst [vmem:[%s47_s1 + $0x10] sm:$0xff] %v4_v0 }
   0x3   :  { %16 = vst [vmem:[%s47_s1 + $0x8] sm:$0xff] %v15_v1  ;;  %17 = vst [vmem:[%s47_s1 + $0x18] sm:$0xff] %v15_v1 }

// kernel: mul.46
= control target key start
LH: loop header
LB: loop body
LE: loop exit
PB: predicated region body
PF: predicated region fallthrough
CT: control target
= control target key end

     0   :  { %s9_s6 = smov 3  ;;  %s45_s0 = inlined_call_operand.vmem [shape: f32[9,256], index: 0, kind: input, shape index: {}]   ;;  %s46_s1 = inlined_call_operand.vmem [shape: f32[2304], index: 1, kind: output, shape index: {}]  }
   0x1   :  { %v2_v0 = vld [vmem:[%s45_s0] sm:$0xff]   ;;  %v13_v1 = vld [vmem:[%s45_s0 + $0x8] sm:$0xff]  }
   0x2   :  { %v15_v2 = vld [vmem:[%s45_s0 + $0x10] ss:$8 sm:%s9_s6]   ;;  %3 = vst [vmem:[%s46_s1] ss:$2 sm:$0xff] %v2_v0   ;;  %14 = vst [vmem:[%s46_s1 + $0x1] ss:$2 sm:$0xff] %v13_v1  }
   0x3   :  { %16 = vst [vmem:[%s46_s1 + $0x10] sm:$0x3] %v15_v2  }

// kernel: discriminator_forward.7
= control target key start
LH: loop header
LB: loop body
LE: loop exit
PB: predicated region body
PF: predicated region fallthrough
CT: control target
= control target key end

     0   :  { %s2418_s1 = inlined_call_operand.vmem [shape: bf16[1152,256], index: 1, kind: input, shape index: {}]   ;;  %s2419_s0 = inlined_call_operand.vmem [shape: bf16[24,1152], index: 0, kind: input, shape index: {}]   ;;  %s2420_s2 = inlined_call_operand.vmem [shape: f32[1,256], index: 2, kind: input, shape index: {}]   ;;  %s2421_s3 = inlined_call_operand.vmem [shape: bf16[24,256], index: 3, kind: output, shape index: {0}]   ;;  %s2422_s4 = inlined_call_operand.vmem [shape: f32[8,256], index: 4, kind: output, shape index: {1}]   ;;  %s2423_s5 = inlined_call_operand.vmem [shape: f32[8,256], index: 5, kind: output, shape index: {2}]  }
   0x1   :  { %v1651_v0 = vld [vmem:[%s2418_s1 + $0x4] ss:$8 sps:$4 sm:$0xff]   ;;  %v1655_v2 = vld [vmem:[%s2418_s1] ss:$8 sps:$4 sm:$0xff]   ;;  %v1657_v4 = vld [vmem:[%s2418_s1 + $0x14] ss:$8 sps:$4 sm:$0xff]  }
   0x2   :  { %v1653_v1 = vld [vmem:[%s2418_s1 + $0x204] ss:$8 sps:$4 sm:$0xff]   ;;  %1028 = vmatprep.subr.bf16.mxu1 %v1651_v0  ;;  %v1656_v3 = vld [vmem:[%s2418_s1 + $0x200] ss:$8 sps:$4 sm:$0xff]   ;;  %v1659_v5 = vld [vmem:[%s2418_s1 + $0x214] ss:$8 sps:$4 sm:$0xff]  }
   0x3   :  { %1130 = vmatprep.subr.bf16.mxu0 %v1653_v1  ;;  %1029 = vmatpush1.bf16.msra.mxu1 %v1655_v2  ;;  %v1661_v6 = vld [vmem:[%s2418_s1 + $0x10] ss:$8 sps:$4 sm:$0xff]   ;;  %v1663_v8 = vld [vmem:[%s2418_s1 + $0x24] ss:$8 sps:$4 sm:$0xff]   ;;  %v1667_v10 = vld [vmem:[%s2418_s1 + $0x20] ss:$8 sps:$4 sm:$0xff]  }
   0x4   :  { %1131 = vmatpush1.bf16.msra.mxu0 %v1656_v3  ;;  %1030 = vmatprep.subr.bf16.mxu1 %v1657_v4  ;;  %v1662_v7 = vld [vmem:[%s2418_s1 + $0x210] ss:$8 sps:$4 sm:$0xff]   ;;  %v1665_v9 = vld [vmem:[%s2418_s1 + $0x224] ss:$8 sps:$4 sm:$0xff]   ;;  %v1668_v11 = vld [vmem:[%s2418_s1 + $0x220] ss:$8 sps:$4 sm:$0xff]  }
   0x5   :  { %1132 = vmatprep.subr.bf16.mxu0 %v1659_v5  ;;  %v1669_v12 = vld [vmem:[%s2418_s1 + $0x34] ss:$8 sps:$4 sm:$0xff]   ;;  %v1673_v14 = vld [vmem:[%s2418_s1 + $0x30] ss:$8 sps:$4 sm:$0xff]   ;;  %v1675_v16 = vld [vmem:[%s2418_s1 + $0x44] ss:$8 sps:$4 sm:$0xff]  }
   0x6   :  { %v1671_v13 = vld [vmem:[%s2418_s1 + $0x234] ss:$8 sps:$4 sm:$0xff]   ;;  %v1674_v15 = vld [vmem:[%s2418_s1 + $0x230] ss:$8 sps:$4 sm:$0xff]   ;;  %v1677_v17 = vld [vmem:[%s2418_s1 + $0x244] ss:$8 sps:$4 sm:$0xff]  }
   0x7   :  { %1031 = vmatpush1.bf16.msra.mxu1 %v1661_v6  ;;  %v1679_v18 = vld [vmem:[%s2418_s1 + $0x40] ss:$8 sps:$4 sm:$0xff]   ;;  %v1681_v20 = vld [vmem:[%s2418_s1 + $0x54] ss:$8 sps:$4 sm:$0xff]   ;;  %v1685_v22 = vld [vmem:[%s2418_s1 + $0x50] ss:$8 sps:$4 sm:$0xff]  }
   0x8   :  { %1133 = vmatpush1.bf16.msra.mxu0 %v1662_v7  ;;  %1032 = vmatprep.subr.bf16.mxu1 %v1663_v8  ;;  %v1680_v19 = vld [vmem:[%s2418_s1 + $0x240] ss:$8 sps:$4 sm:$0xff]   ;;  %v1683_v21 = vld [vmem:[%s2418_s1 + $0x254] ss:$8 sps:$4 sm:$0xff]   ;;  %v1686_v23 = vld [vmem:[%s2418_s1 + $0x250] ss:$8 sps:$4 sm:$0xff]  }
   0x9   :  { %1134 = vmatprep.subr.bf16.mxu0 %v1665_v9  ;;  %v1687_v24 = vld [vmem:[%s2418_s1 + $0x64] ss:$8 sps:$4 sm:$0xff]   ;;  %v1691_v26 = vld [vmem:[%s2418_s1 + $0x60] ss:$8 sps:$4 sm:$0xff]   ;;  %v1693_v28 = vld [vmem:[%s2418_s1 + $0x74] ss:$8 sps:$4 sm:$0xff]  }
   0xa   :  { %v1689_v25 = vld [vmem:[%s2418_s1 + $0x264] ss:$8 sps:$4 sm:$0xff]   ;;  %v1692_v27 = vld [vmem:[%s2418_s1 + $0x260] ss:$8 sps:$4 sm:$0xff]   ;;  %v1695_v29 = vld [vmem:[%s2418_s1 + $0x274] ss:$8 sps:$4 sm:$0xff]  }
   0xb   :  { %1033 = vmatpush1.bf16.msra.mxu1 %v1667_v10  ;;  %v1697_v30 = vld [vmem:[%s2418_s1 + $0x70] ss:$8 sps:$4 sm:$0xff]   ;;  %v1699_v32 = vld [vmem:[%s2418_s1 + $0x84] ss:$8 sps:$4 sm:$0xff]   ;;  %v1703_v34 = vld [vmem:[%s2418_s1 + $0x80] ss:$8 sps:$4 sm:$0xff]  }
   0xc   :  { %1135 = vmatpush1.bf16.msra.mxu0 %v1668_v11  ;;  %1034 = vmatprep.subr.bf16.mxu1 %v1669_v12  ;;  %v1698_v31 = vld [vmem:[%s2418_s1 + $0x270] ss:$8 sps:$4 sm:$0xff]   ;;  %v1701_v33 = vld [vmem:[%s2418_s1 + $0x284] ss:$8 sps:$4 sm:$0xff]   ;;  %v1704_v35 = vld [vmem:[%s2418_s1 + $0x280] ss:$8 sps:$4 sm:$0xff]  }
   0xd   :  { %1136 = vmatprep.subr.bf16.mxu0 %v1671_v13  ;;  %v1705_v36 = vld [vmem:[%s2418_s1 + $0x94] ss:$8 sps:$4 sm:$0xff]   ;;  %v1709_v38 = vld [vmem:[%s2418_s1 + $0x90] ss:$8 sps:$4 sm:$0xff]   ;;  %v1711_v40 = vld [vmem:[%s2418_s1 + $0xa4] ss:$8 sps:$4 sm:$0xff]  }
   0xe   :  { %v1707_v37 = vld [vmem:[%s2418_s1 + $0x294] ss:$8 sps:$4 sm:$0xff]   ;;  %v1710_v39 = vld [vmem:[%s2418_s1 + $0x290] ss:$8 sps:$4 sm:$0xff]   ;;  %v1713_v41 = vld [vmem:[%s2418_s1 + $0x2a4] ss:$8 sps:$4 sm:$0xff]  }
   0xf   :  { %1035 = vmatpush1.bf16.msra.mxu1 %v1673_v14  ;;  %v1715_v42 = vld [vmem:[%s2418_s1 + $0xa0] ss:$8 sps:$4 sm:$0xff]   ;;  %v1717_v44 = vld [vmem:[%s2418_s1 + $0xb4] ss:$8 sps:$4 sm:$0xff]   ;;  %v1721_v46 = vld [vmem:[%s2418_s1 + $0xb0] ss:$8 sps:$4 sm:$0xff]  }
  0x10   :  { %1137 = vmatpush1.bf16.msra.mxu0 %v1674_v15  ;;  %1036 = vmatprep.subr.bf16.mxu1 %v1675_v16  ;;  %v1716_v43 = vld [vmem:[%s2418_s1 + $0x2a0] ss:$8 sps:$4 sm:$0xff]   ;;  %v1719_v45 = vld [vmem:[%s2418_s1 + $0x2b4] ss:$8 sps:$4 sm:$0xff]   ;;  %v1722_v47 = vld [vmem:[%s2418_s1 + $0x2b0] ss:$8 sps:$4 sm:$0xff]  }
  0x11   :  { %1138 = vmatprep.subr.bf16.mxu0 %v1677_v17  ;;  %v1749_v48 = vld [vmem:[%s2419_s0 + $0x4] ss:$36 sps:$4 sm:$0xff]   ;;  %v1755_v51 = vld [vmem:[%s2419_s0 + $0x14] ss:$36 sps:$4 sm:$0xff]  }
  0x12   :  { %v1723_v49 = vld [vmem:[%s2418_s1 + $0xc4] ss:$8 sps:$4 sm:$0xff]   ;;  %1060 = vmatprep.mubr.bf16.mxu1 %v1749_v48  ;;  %v1727_v52 = vld [vmem:[%s2418_s1 + $0xc0] ss:$8 sps:$4 sm:$0xff]   ;;  %v1729_v54 = vld [vmem:[%s2418_s1 + $0xd4] ss:$8 sps:$4 sm:$0xff]   ;;  %1162 = vmatprep.mubr.bf16.mxu0 %v1755_v51 }
  0x13   :  { %1037 = vmatpush1.bf16.msra.mxu1 %v1679_v18  ;;  %v1725_v50 = vld [vmem:[%s2418_s1 + $0x2c4] ss:$8 sps:$4 sm:$0xff]   ;;  %v1728_v53 = vld [vmem:[%s2418_s1 + $0x2c0] ss:$8 sps:$4 sm:$0xff]   ;;  %v1731_v55 = vld [vmem:[%s2418_s1 + $0x2d4] ss:$8 sps:$4 sm:$0xff]  }
  0x14   :  { %1139 = vmatpush1.bf16.msra.mxu0 %v1680_v19  ;;  %1038 = vmatprep.subr.bf16.mxu1 %v1681_v20  ;;  %v1733_v56 = vld [vmem:[%s2418_s1 + $0xd0] ss:$8 sps:$4 sm:$0xff]   ;;  %v1735_v58 = vld [vmem:[%s2418_s1 + $0xe4] ss:$8 sps:$4 sm:$0xff]   ;;  %v1739_v60 = vld [vmem:[%s2418_s1 + $0xe0] ss:$8 sps:$4 sm:$0xff]  }
  0x15   :  { %1140 = vmatprep.subr.bf16.mxu0 %v1683_v21  ;;  %v1734_v57 = vld [vmem:[%s2418_s1 + $0x2d0] ss:$8 sps:$4 sm:$0xff]   ;;  %v1737_v59 = vld [vmem:[%s2418_s1 + $0x2e4] ss:$8 sps:$4 sm:$0xff]   ;;  %v1740_v61 = vld [vmem:[%s2418_s1 + $0x2e0] ss:$8 sps:$4 sm:$0xff]  }
  0x16   :  { %v1741_v62 = vld [vmem:[%s2418_s1 + $0xf4] ss:$8 sps:$4 sm:$0xff]   ;;  %v1745_v0 = vld [vmem:[%s2418_s1 + $0xf0] ss:$8 sps:$4 sm:$0xff]   ;;  %v1752_v2 = vld [vmem:[%s2418_s1 + $0x104] ss:$8 sps:$4 sm:$0xff]  }
  0x17   :  { %1039 = vmatpush1.bf16.msra.mxu1 %v1685_v22  ;;  %v1743_v63 = vld [vmem:[%s2418_s1 + $0x2f4] ss:$8 sps:$4 sm:$0xff]   ;;  %v1746_v1 = vld [vmem:[%s2418_s1 + $0x2f0] ss:$8 sps:$4 sm:$0xff]   ;;  %v1758_v3 = vld [vmem:[%s2418_s1 + $0x304] ss:$8 sps:$4 sm:$0xff]  }
  0x18   :  { %1141 = vmatpush1.bf16.msra.mxu0 %v1686_v23  ;;  %1040 = vmatprep.subr.bf16.mxu1 %v1687_v24  ;;  %v1747_v4 = vld [vmem:[%s2419_s0] ss:$36 sps:$4 sm:$0xff]   ;;  %v1753_v6 = vld [vmem:[%s2419_s0 + $0x10] ss:$36 sps:$4 sm:$0xff]  }
  0x19   :  { %1142 = vmatprep.subr.bf16.mxu0 %v1689_v25  ;;  %v1750_v5 = vld [vmem:[%s2418_s1 + $0x100] ss:$8 sps:$4 sm:$0xff]   ;;  %v1761_v8 = vld [vmem:[%s2418_s1 + $0x114] ss:$8 sps:$4 sm:$0xff]   ;;  %v1759_v10 = vld [vmem:[%s2418_s1 + $0x110] ss:$8 sps:$4 sm:$0xff]  }
  0x1a   :  { %v1756_v7 = vld [vmem:[%s2418_s1 + $0x300] ss:$8 sps:$4 sm:$0xff]   ;;  %v1764_v9 = vld [vmem:[%s2418_s1 + $0x314] ss:$8 sps:$4 sm:$0xff]   ;;  %v1762_v11 = vld [vmem:[%s2418_s1 + $0x310] ss:$8 sps:$4 sm:$0xff]  }
  0x1b   :  { %1041 = vmatpush1.bf16.msra.mxu1 %v1691_v26  ;;  %v1767_v12 = vld [vmem:[%s2418_s1 + $0x124] ss:$8 sps:$4 sm:$0xff]   ;;  %v1765_v14 = vld [vmem:[%s2418_s1 + $0x120] ss:$8 sps:$4 sm:$0xff]   ;;  %v1773_v16 = vld [vmem:[%s2418_s1 + $0x134] ss:$8 sps:$4 sm:$0xff]  }
  0x1c   :  { %1143 = vmatpush1.bf16.msra.mxu0 %v1692_v27  ;;  %1042 = vmatprep.subr.bf16.mxu1 %v1693_v28  ;;  %v1770_v13 = vld [vmem:[%s2418_s1 + $0x324] ss:$8 sps:$4 sm:$0xff]   ;;  %v1768_v15 = vld [vmem:[%s2418_s1 + $0x320] ss:$8 sps:$4 sm:$0xff]   ;;  %v1776_v17 = vld [vmem:[%s2418_s1 + $0x334] ss:$8 sps:$4 sm:$0xff]  }
  0x1d   :  { %1144 = vmatprep.subr.bf16.mxu0 %v1695_v29  ;;  %v1771_v18 = vld [vmem:[%s2418_s1 + $0x130] ss:$8 sps:$4 sm:$0xff]   ;;  %v1779_v20 = vld [vmem:[%s2418_s1 + $0x144] ss:$8 sps:$4 sm:$0xff]   ;;  %v1777_v22 = vld [vmem:[%s2418_s1 + $0x140] ss:$8 sps:$4 sm:$0xff]  }
  0x1e   :  { %v1774_v19 = vld [vmem:[%s2418_s1 + $0x330] ss:$8 sps:$4 sm:$0xff]   ;;  %v1782_v21 = vld [vmem:[%s2418_s1 + $0x344] ss:$8 sps:$4 sm:$0xff]   ;;  %v1780_v23 = vld [vmem:[%s2418_s1 + $0x340] ss:$8 sps:$4 sm:$0xff]  }
  0x1f   :  { %1043 = vmatpush1.bf16.msra.mxu1 %v1697_v30  ;;  %v1785_v24 = vld [vmem:[%s2418_s1 + $0x154] ss:$8 sps:$4 sm:$0xff]   ;;  %v69_v26 = vld [vmem:[%s2419_s0 + $0x48] sm:$0xff]  ;;  %v1783_v30 = vld [vmem:[%s2418_s1 + $0x150] ss:$8 sps:$4 sm:$0xff]  }
  0x20   :  { %1145 = vmatpush1.bf16.msra.mxu0 %v1698_v31  ;;  %1044 = vmatprep.subr.bf16.mxu1 %v1699_v32  ;;  %v1788_v25 = vld [vmem:[%s2418_s1 + $0x354] ss:$8 sps:$4 sm:$0xff]   ;;  %v1441_v27 = vcombine.high %v69_v26, %v69_v26  ;;  %v1440_v29 = vcombine.low %v69_v26, %v69_v26  ;;  %v1786_v31 = vld [vmem:[%s2418_s1 + $0x350] ss:$8 sps:$4 sm:$0xff]  }
  0x21   :  { %1146 = vmatprep.subr.bf16.mxu0 %v1701_v33  ;;  %v71_v28 = vld [vmem:[%s2419_s0 + $0x58] sm:$0xff] }
  0x22   :  { %v1445_v32 = vcombine.high %v71_v28, %v71_v28  ;;  %v1444_v33 = vcombine.low %v71_v28, %v71_v28  ;;  %v1809_v48 = vld [vmem:[%s2418_s1 + $0x194] ss:$8 sps:$4 sm:$0xff]   ;;  %v1810_v51 = vld [vmem:[%s2418_s1 + $0x390] ss:$8 sps:$4 sm:$0xff]   ;;  %v1877_v28 = vld [vmem:[%s2418_s1 + $0x444] ss:$8 sps:$4 sm:$0xff]  }
  0x23   :  { %1045 = vmatpush1.bf16.msra.mxu1 %v1703_v34  ;;  %v1791_v34 = vld [vmem:[%s2418_s1 + $0x164] ss:$8 sps:$4 sm:$0xff]   ;;  %v1874_v26 = vld [vmem:[%s2418_s1 + $0x434] ss:$8 sps:$4 sm:$0xff]  }
  0x24   :  { %1147 = vmatpush1.bf16.msra.mxu0 %v1704_v35  ;;  %1046 = vmatprep.subr.bf16.mxu1 %v1705_v36  ;;  %v1794_v35 = vld [vmem:[%s2418_s1 + $0x364] ss:$8 sps:$4 sm:$0xff]   ;;  %v1789_v36 = vld [vmem:[%s2418_s1 + $0x160] ss:$8 sps:$4 sm:$0xff]  }
  0x25   :  { %1148 = vmatprep.subr.bf16.mxu0 %v1707_v37  ;;  %v1792_v37 = vld [vmem:[%s2418_s1 + $0x360] ss:$8 sps:$4 sm:$0xff]  }
  0x27   :  { %1047 = vmatpush1.bf16.msra.mxu1 %v1709_v38  ;;  %v1797_v38 = vld [vmem:[%s2418_s1 + $0x174] ss:$8 sps:$4 sm:$0xff]  }
  0x28   :  { %1149 = vmatpush1.bf16.msra.mxu0 %v1710_v39  ;;  %1048 = vmatprep.subr.bf16.mxu1 %v1711_v40  ;;  %v1800_v39 = vld [vmem:[%s2418_s1 + $0x374] ss:$8 sps:$4 sm:$0xff]   ;;  %v1855_v40 = vld [vmem:[%s2419_s0 + $0xc] ss:$36 sps:$4 sm:$0xff]  }
  0x29   :  { %1150 = vmatprep.subr.bf16.mxu0 %v1713_v41  ;;  %v1858_v41 = vld [vmem:[%s2419_s0 + $0x1c] ss:$36 sps:$4 sm:$0xff]  }
  0x2b   :  { %1049 = vmatpush1.bf16.msra.mxu1 %v1715_v42  ;;  %v1795_v42 = vld [vmem:[%s2418_s1 + $0x170] ss:$8 sps:$4 sm:$0xff]  }
  0x2c   :  { %1151 = vmatpush1.bf16.msra.mxu0 %v1716_v43  ;;  %1050 = vmatprep.subr.bf16.mxu1 %v1717_v44  ;;  %v1798_v43 = vld [vmem:[%s2418_s1 + $0x370] ss:$8 sps:$4 sm:$0xff]   ;;  %v1803_v44 = vld [vmem:[%s2418_s1 + $0x184] ss:$8 sps:$4 sm:$0xff]  }
  0x2d   :  { %1152 = vmatprep.subr.bf16.mxu0 %v1719_v45  ;;  %v1806_v45 = vld [vmem:[%s2418_s1 + $0x384] ss:$8 sps:$4 sm:$0xff]  }
  0x2f   :  { %1051 = vmatpush1.bf16.msra.mxu1 %v1721_v46  ;;  %v1801_v46 = vld [vmem:[%s2418_s1 + $0x180] ss:$8 sps:$4 sm:$0xff]  }
  0x30   :  { %1153 = vmatpush1.bf16.msra.mxu0 %v1722_v47  ;;  %1052 = vmatprep.subr.bf16.mxu1 %v1723_v49  ;;  %v1804_v47 = vld [vmem:[%s2418_s1 + $0x380] ss:$8 sps:$4 sm:$0xff]   ;;  %v1812_v49 = vld [vmem:[%s2418_s1 + $0x394] ss:$8 sps:$4 sm:$0xff]  }
  0x31   :  { %1154 = vmatprep.subr.bf16.mxu0 %v1725_v50  ;;  %v1807_v50 = vld [vmem:[%s2418_s1 + $0x190] ss:$8 sps:$4 sm:$0xff]  }
  0x33   :  { %1053 = vmatpush1.bf16.msra.mxu1 %v1727_v52  ;;  %v1815_v52 = vld [vmem:[%s2418_s1 + $0x1a4] ss:$8 sps:$4 sm:$0xff]  }
  0x34   :  { %1155 = vmatpush1.bf16.msra.mxu0 %v1728_v53  ;;  %1054 = vmatprep.subr.bf16.mxu1 %v1729_v54  ;;  %v1818_v53 = vld [vmem:[%s2418_s1 + $0x3a4] ss:$8 sps:$4 sm:$0xff]   ;;  %v1813_v54 = vld [vmem:[%s2418_s1 + $0x1a0] ss:$8 sps:$4 sm:$0xff]  }
  0x35   :  { %1156 = vmatprep.subr.bf16.mxu0 %v1731_v55  ;;  %v1816_v55 = vld [vmem:[%s2418_s1 + $0x3a0] ss:$8 sps:$4 sm:$0xff]  }
  0x37   :  { %1055 = vmatpush1.bf16.msra.mxu1 %v1733_v56  ;;  %v1821_v56 = vld [vmem:[%s2418_s1 + $0x1b4] ss:$8 sps:$4 sm:$0xff]  }
  0x38   :  { %1157 = vmatpush1.bf16.msra.mxu0 %v1734_v57  ;;  %1056 = vmatprep.subr.bf16.mxu1 %v1735_v58  ;;  %v1824_v57 = vld [vmem:[%s2418_s1 + $0x3b4] ss:$8 sps:$4 sm:$0xff]   ;;  %v1819_v58 = vld [vmem:[%s2418_s1 + $0x1b0] ss:$8 sps:$4 sm:$0xff]  }
  0x39   :  { %1158 = vmatprep.subr.bf16.mxu0 %v1737_v59  ;;  %v1822_v59 = vld [vmem:[%s2418_s1 + $0x3b0] ss:$8 sps:$4 sm:$0xff]  }
  0x3b   :  { %1057 = vmatpush1.bf16.msra.mxu1 %v1739_v60  ;;  %v1827_v60 = vld [vmem:[%s2418_s1 + $0x1c4] ss:$8 sps:$4 sm:$0xff]  }
  0x3c   :  { %1159 = vmatpush1.bf16.msra.mxu0 %v1740_v61  ;;  %1058 = vmatprep.subr.bf16.mxu1 %v1741_v62  ;;  %v1830_v61 = vld [vmem:[%s2418_s1 + $0x3c4] ss:$8 sps:$4 sm:$0xff]   ;;  %v1825_v62 = vld [vmem:[%s2418_s1 + $0x1c0] ss:$8 sps:$4 sm:$0xff]  }
  0x3d   :  { %1160 = vmatprep.subr.bf16.mxu0 %v1743_v63  ;;  %v1828_v63 = vld [vmem:[%s2418_s1 + $0x3c0] ss:$8 sps:$4 sm:$0xff]  }
  0x3f   :  { %1059 = vmatpush1.bf16.msra.mxu1 %v1745_v0  ;;  %v1833_v0 = vld [vmem:[%s2418_s1 + $0x1d4] ss:$8 sps:$4 sm:$0xff]  }
  0x40   :  { %1161 = vmatpush1.bf16.msra.mxu0 %v1746_v1  ;;  %1079 = vmatprep.subr.bf16.mxu1 %v1752_v2  ;;  %v1836_v1 = vld [vmem:[%s2418_s1 + $0x3d4] ss:$8 sps:$4 sm:$0xff]   ;;  %v1831_v2 = vld [vmem:[%s2418_s1 + $0x1d0] ss:$8 sps:$4 sm:$0xff]  }
  0x41   :  { %1181 = vmatprep.subr.bf16.mxu0 %v1758_v3  ;;  %v1834_v3 = vld [vmem:[%s2418_s1 + $0x3d0] ss:$8 sps:$4 sm:$0xff]  }
  0x42   :  { %1061 = vmatmul.mubr.bf16.vlgmr.msra.gmra.mrb[0].mxu1 %v1747_v4  ;;  %v1842_v4 = vld [vmem:[%s2418_s1 + $0x1e4] ss:$8 sps:$4 sm:$0xff]  }
  0x43   :  { %1163 = vmatmul.mubr.bf16.vlgmr.msra.gmra.mrb[0].mxu0 %v1753_v6  ;;  %1080 = vmatpush1.bf16.msra.mxu1 %v1750_v5  ;;  %v1846_v5 = vld [vmem:[%s2418_s1 + $0x3e4] ss:$8 sps:$4 sm:$0xff]   ;;  %v1840_v6 = vld [vmem:[%s2418_s1 + $0x1e0] ss:$8 sps:$4 sm:$0xff]  }
  0x44   :  { %1182 = vmatpush1.bf16.msra.mxu0 %v1756_v7  ;;  %1081 = vmatprep.subr.bf16.mxu1 %v1761_v8  ;;  %v1844_v7 = vld [vmem:[%s2418_s1 + $0x3e0] ss:$8 sps:$4 sm:$0xff]   ;;  %v1849_v8 = vld [vmem:[%s2418_s1 + $0x1f4] ss:$8 sps:$4 sm:$0xff]  }
  0x45   :  { %1183 = vmatprep.subr.bf16.mxu0 %v1764_v9  ;;  %1070 = vmatprep.mubr.bf16.mxu1 %v1441_v27  ;;  %v1852_v9 = vld [vmem:[%s2418_s1 + $0x3f4] ss:$8 sps:$4 sm:$0xff]   ;;  %v1872_v27 = vld [vmem:[%s2418_s1 + $0x430] ss:$8 sps:$4 sm:$0xff]  }
  0x46   :  { %1172 = vmatprep.mubr.bf16.mxu0 %v1445_v32  ;;  %v1878_v32 = vld [vmem:[%s2418_s1 + $0x450] ss:$8 sps:$4 sm:$0xff]  }
  0x47   :  { %1082 = vmatpush1.bf16.msra.mxu1 %v1759_v10  ;;  %v1847_v10 = vld [vmem:[%s2418_s1 + $0x1f0] ss:$8 sps:$4 sm:$0xff]  }
  0x48   :  { %1184 = vmatpush1.bf16.msra.mxu0 %v1762_v11  ;;  %1083 = vmatprep.subr.bf16.mxu1 %v1767_v12  ;;  %v1850_v11 = vld [vmem:[%s2418_s1 + $0x3f0] ss:$8 sps:$4 sm:$0xff]   ;;  %v1861_v12 = vld [vmem:[%s2418_s1 + $0x404] ss:$8 sps:$4 sm:$0xff]  }
  0x49   :  { %1185 = vmatprep.subr.bf16.mxu0 %v1770_v13  ;;  %v1853_v13 = vld [vmem:[%s2419_s0 + $0x8] ss:$36 sps:$4 sm:$0xff]  }
  0x4a   :  { %1071 = vmatmul.mubr.bf16.gmra.mrb[4].mxu1 %v1440_v29  ;;  %v1889_v29 = vmov 0  }
  0x4b   :  { %1084 = vmatpush1.bf16.msra.mxu1 %v1765_v14  ;;  %1173 = vmatmul.mubr.bf16.gmra.mrb[4].mxu0 %v1444_v33  ;;  %v1856_v14 = vld [vmem:[%s2419_s0 + $0x18] ss:$36 sps:$4 sm:$0xff]   ;;  %v1883_v33 = vld [vmem:[%s2418_s1 + $0x464] ss:$8 sps:$4 sm:$0xff]  }
  0x4c   :  { %1186 = vmatpush1.bf16.msra.mxu0 %v1768_v15  ;;  %1085 = vmatprep.subr.bf16.mxu1 %v1773_v16  ;;  %v70_v15 = vld [vmem:[%s2419_s0 + $0x50] sm:$0xff]  ;;  %v72_v16 = vld [vmem:[%s2419_s0 + $0x60] sm:$0xff] }
  0x4d   :  { %1187 = vmatprep.subr.bf16.mxu0 %v1776_v17  ;;  %1111 = vmatprep.mubr.bf16.mxu1 %v1855_v40  ;;  %v1859_v17 = vld [vmem:[%s2418_s1 + $0x400] ss:$8 sps:$4 sm:$0xff]  }
  0x4e   :  { %1213 = vmatprep.mubr.bf16.mxu0 %v1858_v41 }
  0x4f   :  { %1086 = vmatpush1.bf16.msra.mxu1 %v1771_v18  ;;  %v1864_v18 = vld [vmem:[%s2418_s1 + $0x414] ss:$8 sps:$4 sm:$0xff]  }
  0x50   :  { %1188 = vmatpush1.bf16.msra.mxu0 %v1774_v19  ;;  %1087 = vmatprep.subr.bf16.mxu1 %v1779_v20  ;;  %v1443_v19 = vcombine.high %v70_v15, %v70_v15  ;;  %v1447_v20 = vcombine.high %v72_v16, %v72_v16 }
  0x51   :  { %1189 = vmatprep.subr.bf16.mxu0 %v1782_v21  ;;  %v1862_v21 = vld [vmem:[%s2418_s1 + $0x410] ss:$8 sps:$4 sm:$0xff]  }
  0x53   :  { %1088 = vmatpush1.bf16.msra.mxu1 %v1777_v22  ;;  %v1871_v22 = vld [vmem:[%s2418_s1 + $0x424] ss:$8 sps:$4 sm:$0xff]  }
  0x54   :  { %1190 = vmatpush1.bf16.msra.mxu0 %v1780_v23  ;;  %1089 = vmatprep.subr.bf16.mxu1 %v1785_v24  ;;  %v1442_v23 = vcombine.low %v70_v15, %v70_v15  ;;  %v1446_v24 = vcombine.low %v72_v16, %v72_v16 }
  0x55   :  { %1191 = vmatprep.subr.bf16.mxu0 %v1788_v25  ;;  %v1869_v25 = vld [vmem:[%s2418_s1 + $0x420] ss:$8 sps:$4 sm:$0xff]  }
  0x57   :  { %1090 = vmatpush1.bf16.msra.mxu1 %v1783_v30  ;;  %v1875_v30 = vld [vmem:[%s2418_s1 + $0x440] ss:$8 sps:$4 sm:$0xff]  }
  0x58   :  { %1192 = vmatpush1.bf16.msra.mxu0 %v1786_v31  ;;  %1091 = vmatprep.subr.bf16.mxu1 %v1791_v34  ;;  %v1880_v31 = vld [vmem:[%s2418_s1 + $0x454] ss:$8 sps:$4 sm:$0xff]   ;;  %v1881_v34 = vld [vmem:[%s2418_s1 + $0x460] ss:$8 sps:$4 sm:$0xff]  }
  0x59   :  { %1193 = vmatprep.subr.bf16.mxu0 %v1794_v35  ;;  %v1886_v35 = vld [vmem:[%s2418_s1 + $0x474] ss:$8 sps:$4 sm:$0xff]  }
  0x5b   :  { %1092 = vmatpush1.bf16.msra.mxu1 %v1789_v36  ;;  %v1884_v36 = vld [vmem:[%s2418_s1 + $0x470] ss:$8 sps:$4 sm:$0xff]  }
  0x5c   :  { %1194 = vmatpush1.bf16.msra.mxu0 %v1792_v37  ;;  %1093 = vmatprep.subr.bf16.mxu1 %v1797_v38  ;;  %v1887_v37 = vld [vmem:[%s2419_s0 + $0x20] ss:$36 sps:$4 sm:$0xff]   ;;  %v1888_v38 = vld [vmem:[%s2419_s0 + $0x68] ss:$0 sps:$4 sm:$0xff]  }
  0x5d   :  { %1195 = vmatprep.subr.bf16.mxu0 %v1800_v39  ;;  %v220_v39 = vlaneseq }
  0x5f   :  { %1094 = vmatpush1.bf16.msra.mxu1 %v1795_v42  ;;  %v221_v40 = vshrl.u32 %v220_v39, 7 }
  0x60   :  { %1196 = vmatpush1.bf16.msra.mxu0 %v1798_v43  ;;  %1095 = vmatprep.subr.bf16.mxu1 %v1803_v44 }
  0x61   :  { %1197 = vmatprep.subr.bf16.mxu0 %v1806_v45  ;;  %v222_v44 = vsub.s32 0, %v221_v40 }
  0x63   :  { %1096 = vmatpush1.bf16.msra.mxu1 %v1801_v46  ;;  %v218_v46 = vld [vmem:[%s2420_s2] sm:$0x3] }
  0x64   :  { %1198 = vmatpush1.bf16.msra.mxu0 %v1804_v47  ;;  %1097 = vmatprep.subr.bf16.mxu1 %v1809_v48  ;;  %v226_v47 = vsub.s32 1, %v221_v40  ;;  %v223_v48 = vrot.slane %v218_v46, %v222_v44 }
  0x65   :  { %1199 = vmatprep.subr.bf16.mxu0 %v1812_v49 }
  0x66   :  { %v227_v49 = vrot.slane %v218_v46, %v226_v47 }
  0x67   :  { %1098 = vmatpush1.bf16.msra.mxu1 %v1807_v50 }
  0x68   :  { %1200 = vmatpush1.bf16.msra.mxu0 %v1810_v51  ;;  %1099 = vmatprep.subr.bf16.mxu1 %v1815_v52 }
  0x69   :  { %1201 = vmatprep.subr.bf16.mxu0 %v1818_v53 }
  0x6b   :  { %1100 = vmatpush1.bf16.msra.mxu1 %v1813_v54 }
  0x6c   :  { %1202 = vmatpush1.bf16.msra.mxu0 %v1816_v55  ;;  %1101 = vmatprep.subr.bf16.mxu1 %v1821_v56 }
  0x6d   :  { %1203 = vmatprep.subr.bf16.mxu0 %v1824_v57 }
  0x6f   :  { %1102 = vmatpush1.bf16.msra.mxu1 %v1819_v58 }
  0x70   :  { %1204 = vmatpush1.bf16.msra.mxu0 %v1822_v59  ;;  %1103 = vmatprep.subr.bf16.mxu1 %v1827_v60 }
  0x71   :  { %1205 = vmatprep.subr.bf16.mxu0 %v1830_v61 }
  0x73   :  { %1104 = vmatpush1.bf16.msra.mxu1 %v1825_v62 }
  0x74   :  { %1206 = vmatpush1.bf16.msra.mxu0 %v1828_v63  ;;  %1105 = vmatprep.subr.bf16.mxu1 %v1833_v0 }
  0x75   :  { %1207 = vmatprep.subr.bf16.mxu0 %v1836_v1 }
  0x77   :  { %1106 = vmatpush1.bf16.msra.mxu1 %v1831_v2 }
  0x78   :  { %1208 = vmatpush1.bf16.msra.mxu0 %v1834_v3  ;;  %1107 = vmatprep.subr.bf16.mxu1 %v1842_v4 }
  0x79   :  { %1209 = vmatprep.subr.bf16.mxu0 %v1846_v5 }
  0x7b   :  { %1108 = vmatpush1.bf16.msra.mxu1 %v1840_v6 }
  0x7c   :  { %1210 = vmatpush1.bf16.msra.mxu0 %v1844_v7  ;;  %1109 = vmatprep.subr.bf16.mxu1 %v1849_v8 }
  0x7d   :  { %1211 = vmatprep.subr.bf16.mxu0 %v1852_v9 }
  0x7f   :  { %1110 = vmatpush1.bf16.msra.mxu1 %v1847_v10 }
  0x80   :  { %1212 = vmatpush1.bf16.msra.mxu0 %v1850_v11  ;;  %1599 = vmatprep.subr.bf16.mxu1 %v1861_v12 }
  0x81   :  { %1232 = vmatprep.subr.bf16.mxu0 %v1861_v12 }
  0x82   :  { %1112 = vmatmul.mubr.bf16.vlgmr.msra.gmra.mrb[0].mxu1 %v1853_v13 }
  0x83   :  { %1214 = vmatmul.mubr.bf16.vlgmr.msra.gmra.mrb[0].mxu0 %v1856_v14  ;;  %1607 = vmatpush1.bf16.msra.mxu1 %v1859_v17 }
  0x84   :  { %1233 = vmatpush1.bf16.msra.mxu0 %v1859_v17  ;;  %1600 = vmatprep.subr.bf16.mxu1 %v1864_v18 }
  0x85   :  { %1234 = vmatprep.subr.bf16.mxu0 %v1864_v18  ;;  %1121 = vmatprep.mubr.bf16.mxu1 %v1443_v19  ;;  %v1329_v18 = vadd.s32 16, %v221_v40 }
  0x86   :  { %1223 = vmatprep.mubr.bf16.mxu0 %v1447_v20 }
  0x87   :  { %1608 = vmatpush1.bf16.msra.mxu1 %v1862_v21  ;;  %vm1336_vm6 = vcmp.lt.s32.totalorder %v1329_v18, 18 }
  0x88   :  { %1235 = vmatpush1.bf16.msra.mxu0 %v1862_v21  ;;  %1601 = vmatprep.subr.bf16.mxu1 %v1871_v22 }
  0x89   :  { %1236 = vmatprep.subr.bf16.mxu0 %v1871_v22 }
  0x8a   :  { %1122 = vmatmul.mubr.bf16.gmra.mrb[4].mxu1 %v1442_v23 }
  0x8b   :  { %1224 = vmatmul.mubr.bf16.gmra.mrb[4].mxu0 %v1446_v24  ;;  %1609 = vmatpush1.bf16.msra.mxu1 %v1869_v25 }
  0x8c   :  { %1237 = vmatpush1.bf16.msra.mxu0 %v1869_v25  ;;  %1602 = vmatprep.subr.bf16.mxu1 %v1874_v26 }
  0x8d   :  { %1238 = vmatprep.subr.bf16.mxu0 %v1874_v26  ;;  %1264 = vmatprep.mubr.bf16.mxu0 %v1889_v29 }
  0x8e   :  { %1274 = vmatprep.mubr.bf16.mxu1 %v1889_v29 }
  0x8f   :  { %1610 = vmatpush1.bf16.msra.mxu1 %v1872_v27 }
  0x90   :  { %1239 = vmatpush1.bf16.msra.mxu0 %v1872_v27  ;;  %1603 = vmatprep.subr.bf16.mxu1 %v1877_v28 }
  0x91   :  { %1240 = vmatprep.subr.bf16.mxu0 %v1877_v28 }
  0x93   :  { %1611 = vmatpush1.bf16.msra.mxu1 %v1875_v30 }
  0x94   :  { %1241 = vmatpush1.bf16.msra.mxu0 %v1875_v30  ;;  %1604 = vmatprep.subr.bf16.mxu1 %v1880_v31 }
  0x95   :  { %1242 = vmatprep.subr.bf16.mxu0 %v1880_v31 }
  0x97   :  { %1612 = vmatpush1.bf16.msra.mxu1 %v1878_v32 }
  0x98   :  { %1243 = vmatpush1.bf16.msra.mxu0 %v1878_v32  ;;  %1605 = vmatprep.subr.bf16.mxu1 %v1883_v33 }
  0x99   :  { %1244 = vmatprep.subr.bf16.mxu0 %v1883_v33 }
  0x9b   :  { %1613 = vmatpush1.bf16.msra.mxu1 %v1881_v34 }
  0x9c   :  { %1245 = vmatpush1.bf16.msra.mxu0 %v1881_v34  ;;  %1606 = vmatprep.subr.bf16.mxu1 %v1886_v35 }
  0x9d   :  { %1246 = vmatprep.subr.bf16.mxu0 %v1886_v35 }
  0x9f   :  { %1614 = vmatpush1.bf16.msra.mxu1 %v1884_v36 }
  0xa0   :  { %1247 = vmatpush1.bf16.msra.mxu0 %v1884_v36 }
  0xa2   :  { %1275 = vmatmul.mubr.bf16.vlgmr.msra.gmra.mrb[8].mxu1 %v1888_v38 }
  0xa3   :  { %1265 = vmatmul.mubr.bf16.vlgmr.msra.gmra.mrb[0].mxu0 %v1887_v37 }
 0x155   :  { %v1113_v41 = vpop.f32.mrb[0].mxu1 }
 0x156   :  { %v1115_v42 = vpop.f32.mrb[1].mxu1  ;;  %v1615_v62 = vadd.f32 %v1113_v41, %v223_v48 }
 0x157   :  { %v1117_v43 = vpop.f32.mrb[2].mxu1  ;;  %v1617_v63 = vadd.f32 %v1115_v42, %v227_v49 }
 0x158   :  { %v1119_v45 = vpop.f32.mrb[3].mxu1  ;;  %v1619_v6 = vadd.f32 %v1117_v43, %v223_v48 }
 0x159   :  { %v1621_v7 = vadd.f32 %v1119_v45, %v227_v49 }
 0x15d   :  { %v1123_v50 = vpop.f32.mrb[4].mxu1 }
 0x15e   :  { %v1225_v51 = vpop.f32.mrb[4].mxu0  ;;  %v1623_v52 = vadd.f32 %v1123_v50, %v223_v48  ;;  %v1125_v53 = vpop.f32.mrb[5].mxu1 }
 0x15f   :  { %v1227_v54 = vpop.f32.mrb[5].mxu0  ;;  %v1626_v55 = vadd.f32 %v1125_v53, %v227_v49  ;;  %v1127_v56 = vpop.f32.mrb[6].mxu1 }
 0x160   :  { %v1229_v57 = vpop.f32.mrb[6].mxu0  ;;  %v1624_v58 = vadd.f32 %v1623_v52, %v1225_v51  ;;  %v1128_v59 = vpop.f32.mrb[7].mxu1 }
 0x161   :  { %v1230_v60 = vpop.f32.mrb[7].mxu0  ;;  %v1627_v61 = vadd.f32 %v1626_v55, %v1227_v54 }
 0x175   :  { %v1276_v1 = vpop.f32.mrb[8].mxu1 }
 0x176   :  { %v1266_v0 = vpop.f32.mrb[0].mxu0  ;;  %v1625_v3 = vadd.f32 %v1624_v58, %v1276_v1  ;;  %v1278_v5 = vpop.f32.mrb[9].mxu1 }
 0x177   :  { %v1616_v2 = vadd.f32 %v1615_v62, %v1266_v0  ;;  %v1268_v4 = vpop.f32.mrb[1].mxu0  ;;  %v1628_v9 = vadd.f32 %v1627_v61, %v1278_v5  ;;  %v1280_v11 = vpop.f32.mrb[10].mxu1 }
 0x178   :  { %v1618_v8 = vadd.f32 %v1617_v63, %v1268_v4  ;;  %v1270_v10 = vpop.f32.mrb[2].mxu0  ;;  %vm1287_vm1 = vcmp.gt.f32.partialorder %v1625_v3, 0.0  ;;  %v1293_v13 = vmul.f32 0.2, %v1625_v3  ;;  %v1281_v21 = vpop.f32.mrb[11].mxu1 }
 0x179   :  { %vm1283_vm0 = vcmp.gt.f32.partialorder %v1616_v2, 0.0  ;;  %v1289_v12 = vmul.f32 0.2, %v1616_v2  ;;  %vm1288_vm3 = vcmp.gt.f32.partialorder %v1628_v9, 0.0  ;;  %v1294_v15 = vmul.f32 0.2, %v1628_v9 }
 0x17a   :  { %vm1284_vm2 = vcmp.gt.f32.partialorder %v1618_v8, 0.0  ;;  %v1290_v14 = vmul.f32 0.2, %v1618_v8  ;;  %v1299_v17 = vsel %vm1287_vm1, %v1625_v3, %v1293_v13  ;;  %v1620_v19 = vadd.f32 %v1619_v6, %v1270_v10  ;;  %v1272_v20 = vpop.f32.mrb[3].mxu0 }
 0x17b   :  { %v1295_v16 = vsel %vm1283_vm0, %v1616_v2, %v1289_v12  ;;  %v1303_v22 = vpack.c.bf16 %v1299_v17, %v1299_v17  ;;  %v1300_v24 = vsel %vm1288_vm3, %v1628_v9, %v1294_v15  ;;  %v1622_v25 = vadd.f32 %v1621_v7, %v1272_v20 }
 0x17c   :  { %v1296_v23 = vsel %vm1284_vm2, %v1618_v8, %v1290_v14  ;;  %v1304_v27 = vpack.c.bf16 %v1300_v24, %v1300_v24  ;;  %v1598_v28 = vpack.c.bf16 %v1300_v24, %v1299_v17  ;;  %vm1285_vm4 = vcmp.gt.f32.partialorder %v1620_v19, 0.0 }
 0x17d   :  { %v1596_v26 = vpack.c.bf16 %v1296_v23, %v1295_v16  ;;  %v1291_v29 = vmul.f32 0.2, %v1620_v19  ;;  %vm1286_vm5 = vcmp.gt.f32.partialorder %v1622_v25, 0.0  ;;  %v1292_v30 = vmul.f32 0.2, %v1622_v25 }
 0x17e   :  { %1323 = vst [vmem:[%s2421_s3 + $0x10] sm:$0xff] %v1598_v28  ;;  %v1341_v31 = vunpack.c.l.bf16 %v1303_v22  ;;  %v1342_v32 = vunpack.c.l.bf16 %v1304_v27 }
 0x17f   :  { %1321 = vst [vmem:[%s2421_s3] sm:$0xff] %v1596_v26  ;;  %v1297_v33 = vsel %vm1285_vm4, %v1620_v19, %v1291_v29  ;;  %v1298_v34 = vsel %vm1286_vm5, %v1622_v25, %v1292_v30 }
 0x180   :  { %v1301_v35 = vpack.c.bf16 %v1297_v33, %v1295_v16  ;;  %v1302_v36 = vpack.c.bf16 %v1298_v34, %v1296_v23  ;;  %v1597_v37 = vpack.c.bf16 %v1298_v34, %v1297_v33  ;;  %v1353_v42 = vsel %vm1336_vm6, %v1341_v31, 0.0 }
 0x181   :  { %v1354_v43 = vsel %vm1336_vm6, %v1342_v32, 0.0  ;;  %v1379_v50 = vmul.f32 %v1353_v42, %v1353_v42 }
 0x182   :  { %v1337_v38 = vunpack.c.l.bf16 %v1301_v35  ;;  %v1339_v39 = vunpack.c.h.bf16 %v1301_v35  ;;  %v1338_v40 = vunpack.c.l.bf16 %v1302_v36  ;;  %v1340_v41 = vunpack.c.h.bf16 %v1302_v36  ;;  %1322 = vst [vmem:[%s2421_s3 + $0x8] sm:$0xff] %v1597_v37 }
 0x183   :  { %v1380_v54 = vmul.f32 %v1354_v43, %v1354_v43 }
 0x184   :  { %v1365_v44 = vadd.f32 %v1339_v39, %v1337_v38  ;;  %v1375_v45 = vmul.f32 %v1337_v38, %v1337_v38  ;;  %v1377_v46 = vmul.f32 %v1339_v39, %v1339_v39  ;;  %v1367_v47 = vadd.f32 %v1340_v41, %v1338_v40 }
 0x185   :  { %v1376_v48 = vmul.f32 %v1338_v40, %v1338_v40  ;;  %v1378_v49 = vmul.f32 %v1340_v41, %v1340_v41 }
 0x186   :  { %v1366_v51 = vadd.f32 %v1365_v44, %v1353_v42  ;;  %v1381_v52 = vadd.f32 %v1377_v46, %v1375_v45  ;;  %v1368_v53 = vadd.f32 %v1367_v47, %v1354_v43 }
 0x187   :  { %v1383_v55 = vadd.f32 %v1378_v49, %v1376_v48 }
 0x188   :  { %v1382_v56 = vadd.f32 %v1381_v52, %v1379_v50  ;;  %1371 = vst [vmem:[%s2422_s4] sm:$0xff] %v1366_v51  ;;  %1372 = vst [vmem:[%s2422_s4 + $0x8] sm:$0xff] %v1368_v53 }
 0x189   :  { %v1384_v57 = vadd.f32 %v1383_v55, %v1380_v54 }
 0x18a   :  { %1387 = vst [vmem:[%s2423_s5] sm:$0xff] %v1382_v56 }
 0x18b   :  { %1388 = vst [vmem:[%s2423_s5 + $0x8] sm:$0xff] %v1384_v57 }

// kernel: discriminator_forward.9
= control target key start
LH: loop header
LB: loop body
LE: loop exit
PB: predicated region body
PF: predicated region fallthrough
CT: control target
= control target key end

     0   :  { %vm543_vm2 = vcmask 7168   ;;  %s970_s2 = inlined_call_operand.vmem [shape: bf16[512,256], index: 2, kind: input, shape index: {}]   ;;  %s971_s0 = inlined_call_operand.vmem [shape: bf16[8,512], index: 0, kind: input, shape index: {}]   ;;  %s972_s4 = inlined_call_operand.<no memory space> [shape: f32[1,1], index: 4, kind: input, shape index: {}]   ;;  %s973_s1 = inlined_call_operand.vmem [shape: f32[8,256], index: 1, kind: input, shape index: {}]   ;;  %s974_s3 = inlined_call_operand.vmem [shape: f32[1,256], index: 3, kind: input, shape index: {}]   ;;  %s975_s5 = inlined_call_operand.vmem [shape: f32[8,1], index: 5, kind: output, shape index: {}]  }
   0x1   :  { %v623_v0 = vld [vmem:[%s970_s2 + $0x4] ss:$8 sps:$4 sm:$0xff]   ;;  %v627_v2 = vld [vmem:[%s970_s2] ss:$8 sps:$4 sm:$0xff]   ;;  %v629_v4 = vld [vmem:[%s970_s2 + $0x14] ss:$8 sps:$4 sm:$0xff]  }
   0x2   :  { %v625_v1 = vld [vmem:[%s970_s2 + $0x104] ss:$8 sps:$4 sm:$0xff]   ;;  %424 = vmatprep.subr.bf16.mxu1 %v623_v0  ;;  %v628_v3 = vld [vmem:[%s970_s2 + $0x100] ss:$8 sps:$4 sm:$0xff]   ;;  %v631_v5 = vld [vmem:[%s970_s2 + $0x114] ss:$8 sps:$4 sm:$0xff]  }
   0x3   :  { %465 = vmatprep.subr.bf16.mxu0 %v625_v1  ;;  %425 = vmatpush1.bf16.msra.mxu1 %v627_v2  ;;  %v633_v6 = vld [vmem:[%s970_s2 + $0x10] ss:$8 sps:$4 sm:$0xff]   ;;  %v635_v8 = vld [vmem:[%s970_s2 + $0x24] ss:$8 sps:$4 sm:$0xff]   ;;  %v639_v10 = vld [vmem:[%s970_s2 + $0x20] ss:$8 sps:$4 sm:$0xff]  }
   0x4   :  { %466 = vmatpush1.bf16.msra.mxu0 %v628_v3  ;;  %426 = vmatprep.subr.bf16.mxu1 %v629_v4  ;;  %v634_v7 = vld [vmem:[%s970_s2 + $0x110] ss:$8 sps:$4 sm:$0xff]   ;;  %v637_v9 = vld [vmem:[%s970_s2 + $0x124] ss:$8 sps:$4 sm:$0xff]   ;;  %v640_v11 = vld [vmem:[%s970_s2 + $0x120] ss:$8 sps:$4 sm:$0xff]  }
   0x5   :  { %467 = vmatprep.subr.bf16.mxu0 %v631_v5  ;;  %v641_v12 = vld [vmem:[%s970_s2 + $0x34] ss:$8 sps:$4 sm:$0xff]   ;;  %v645_v14 = vld [vmem:[%s970_s2 + $0x30] ss:$8 sps:$4 sm:$0xff]   ;;  %v647_v16 = vld [vmem:[%s970_s2 + $0x44] ss:$8 sps:$4 sm:$0xff]  }
   0x6   :  { %v643_v13 = vld [vmem:[%s970_s2 + $0x134] ss:$8 sps:$4 sm:$0xff]   ;;  %v646_v15 = vld [vmem:[%s970_s2 + $0x130] ss:$8 sps:$4 sm:$0xff]   ;;  %v649_v17 = vld [vmem:[%s970_s2 + $0x144] ss:$8 sps:$4 sm:$0xff]  }
   0x7   :  { %427 = vmatpush1.bf16.msra.mxu1 %v633_v6  ;;  %v651_v18 = vld [vmem:[%s970_s2 + $0x40] ss:$8 sps:$4 sm:$0xff]   ;;  %v653_v20 = vld [vmem:[%s970_s2 + $0x54] ss:$8 sps:$4 sm:$0xff]   ;;  %v657_v22 = vld [vmem:[%s970_s2 + $0x50] ss:$8 sps:$4 sm:$0xff]   ;;  %v10_v6 = vstv %s972_s4 }
   0x8   :  { %468 = vmatpush1.bf16.msra.mxu0 %v634_v7  ;;  %428 = vmatprep.subr.bf16.mxu1 %v635_v8  ;;  %v652_v19 = vld [vmem:[%s970_s2 + $0x140] ss:$8 sps:$4 sm:$0xff]   ;;  %v655_v21 = vld [vmem:[%s970_s2 + $0x154] ss:$8 sps:$4 sm:$0xff]   ;;  %v658_v23 = vld [vmem:[%s970_s2 + $0x150] ss:$8 sps:$4 sm:$0xff]   ;;  %v514_v7 = vlaneseq }
   0x9   :  { %469 = vmatprep.subr.bf16.mxu0 %v637_v9  ;;  %v659_v24 = vld [vmem:[%s970_s2 + $0x64] ss:$8 sps:$4 sm:$0xff]   ;;  %v663_v26 = vld [vmem:[%s970_s2 + $0x60] ss:$8 sps:$4 sm:$0xff]   ;;  %v665_v28 = vld [vmem:[%s970_s2 + $0x74] ss:$8 sps:$4 sm:$0xff]  }
   0xa   :  { %v661_v25 = vld [vmem:[%s970_s2 + $0x164] ss:$8 sps:$4 sm:$0xff]   ;;  %v664_v27 = vld [vmem:[%s970_s2 + $0x160] ss:$8 sps:$4 sm:$0xff]   ;;  %v667_v29 = vld [vmem:[%s970_s2 + $0x174] ss:$8 sps:$4 sm:$0xff]  }
   0xb   :  { %429 = vmatpush1.bf16.msra.mxu1 %v639_v10  ;;  %v669_v30 = vld [vmem:[%s970_s2 + $0x70] ss:$8 sps:$4 sm:$0xff]   ;;  %v671_v32 = vld [vmem:[%s970_s2 + $0x84] ss:$8 sps:$4 sm:$0xff]   ;;  %v675_v34 = vld [vmem:[%s970_s2 + $0x80] ss:$8 sps:$4 sm:$0xff]  }
   0xc   :  { %470 = vmatpush1.bf16.msra.mxu0 %v640_v11  ;;  %430 = vmatprep.subr.bf16.mxu1 %v641_v12  ;;  %v670_v31 = vld [vmem:[%s970_s2 + $0x170] ss:$8 sps:$4 sm:$0xff]   ;;  %v673_v33 = vld [vmem:[%s970_s2 + $0x184] ss:$8 sps:$4 sm:$0xff]   ;;  %v676_v35 = vld [vmem:[%s970_s2 + $0x180] ss:$8 sps:$4 sm:$0xff]  }
   0xd   :  { %471 = vmatprep.subr.bf16.mxu0 %v643_v13  ;;  %v677_v36 = vld [vmem:[%s970_s2 + $0x94] ss:$8 sps:$4 sm:$0xff]   ;;  %v681_v38 = vld [vmem:[%s970_s2 + $0x90] ss:$8 sps:$4 sm:$0xff]   ;;  %v683_v40 = vld [vmem:[%s970_s2 + $0xa4] ss:$8 sps:$4 sm:$0xff]  }
   0xe   :  { %v679_v37 = vld [vmem:[%s970_s2 + $0x194] ss:$8 sps:$4 sm:$0xff]   ;;  %v682_v39 = vld [vmem:[%s970_s2 + $0x190] ss:$8 sps:$4 sm:$0xff]   ;;  %v685_v41 = vld [vmem:[%s970_s2 + $0x1a4] ss:$8 sps:$4 sm:$0xff]  }
   0xf   :  { %431 = vmatpush1.bf16.msra.mxu1 %v645_v14  ;;  %v687_v42 = vld [vmem:[%s970_s2 + $0xa0] ss:$8 sps:$4 sm:$0xff]   ;;  %v689_v44 = vld [vmem:[%s970_s2 + $0xb4] ss:$8 sps:$4 sm:$0xff]   ;;  %v693_v49 = vld [vmem:[%s970_s2 + $0xb0] ss:$8 sps:$4 sm:$0xff]  }
  0x10   :  { %472 = vmatpush1.bf16.msra.mxu0 %v646_v15  ;;  %432 = vmatprep.subr.bf16.mxu1 %v647_v16  ;;  %v688_v43 = vld [vmem:[%s970_s2 + $0x1a0] ss:$8 sps:$4 sm:$0xff]   ;;  %v691_v45 = vld [vmem:[%s970_s2 + $0x1b4] ss:$8 sps:$4 sm:$0xff]   ;;  %v694_v50 = vld [vmem:[%s970_s2 + $0x1b0] ss:$8 sps:$4 sm:$0xff]  }
  0x11   :  { %473 = vmatprep.subr.bf16.mxu0 %v649_v17  ;;  %v22_v46 = vld [vmem:[%s971_s0] sm:$0xff]  ;;  %v23_v48 = vld [vmem:[%s971_s0 + $0x8] sm:$0xff]  ;;  %v701_v56 = vld [vmem:[%s970_s2 + $0xd4] ss:$8 sps:$4 sm:$0xff]   ;;  %11 = vst [vmem:[#allocation2] sm:$0x1] %v10_v6 }
  0x12   :  { %v550_v47 = vcombine.high %v22_v46, %v22_v46  ;;  %v552_v51 = vcombine.high %v23_v48, %v23_v48  ;;  %v695_v52 = vld [vmem:[%s970_s2 + $0xc4] ss:$8 sps:$4 sm:$0xff]   ;;  %v699_v54 = vld [vmem:[%s970_s2 + $0xc0] ss:$8 sps:$4 sm:$0xff]   ;;  %v703_v57 = vld [vmem:[%s970_s2 + $0x1d4] ss:$8 sps:$4 sm:$0xff]   ;;  %v549_v4 = vcombine.low %v22_v46, %v22_v46  ;;  %v551_v5 = vcombine.low %v23_v48, %v23_v48 }
  0x13   :  { %433 = vmatpush1.bf16.msra.mxu1 %v651_v18  ;;  %v697_v53 = vld [vmem:[%s970_s2 + $0x1c4] ss:$8 sps:$4 sm:$0xff]   ;;  %v700_v55 = vld [vmem:[%s970_s2 + $0x1c0] ss:$8 sps:$4 sm:$0xff]   ;;  %v705_v58 = vld [vmem:[%s970_s2 + $0xd0] ss:$8 sps:$4 sm:$0xff]  }
  0x14   :  { %474 = vmatpush1.bf16.msra.mxu0 %v652_v19  ;;  %434 = vmatprep.subr.bf16.mxu1 %v653_v20  ;;  %v706_v59 = vld [vmem:[%s970_s2 + $0x1d0] ss:$8 sps:$4 sm:$0xff]   ;;  %v707_v60 = vld [vmem:[%s970_s2 + $0xe4] ss:$8 sps:$4 sm:$0xff]   ;;  %v711_v62 = vld [vmem:[%s970_s2 + $0xe0] ss:$8 sps:$4 sm:$0xff]  }
  0x15   :  { %475 = vmatprep.subr.bf16.mxu0 %v655_v21  ;;  %456 = vmatprep.mubr.bf16.mxu1 %v550_v47  ;;  %v709_v61 = vld [vmem:[%s970_s2 + $0x1e4] ss:$8 sps:$4 sm:$0xff]   ;;  %v712_v63 = vld [vmem:[%s970_s2 + $0x1e0] ss:$8 sps:$4 sm:$0xff]   ;;  %v713_v0 = vld [vmem:[%s970_s2 + $0xf4] ss:$8 sps:$4 sm:$0xff]  }
  0x16   :  { %497 = vmatprep.mubr.bf16.mxu0 %v552_v51  ;;  %v715_v1 = vld [vmem:[%s970_s2 + $0x1f4] ss:$8 sps:$4 sm:$0xff]   ;;  %v717_v2 = vld [vmem:[%s970_s2 + $0xf0] ss:$8 sps:$4 sm:$0xff]   ;;  %v515_v8 = vshrl.u32 %v514_v7, 7  ;;  %v88_v9 = vld [vmem:[%s973_s1] sm:$0xff] }
  0x17   :  { %435 = vmatpush1.bf16.msra.mxu1 %v657_v22  ;;  %v718_v3 = vld [vmem:[%s970_s2 + $0x1f0] ss:$8 sps:$4 sm:$0xff]   ;;  %v89_v10 = vld [vmem:[%s973_s1 + $0x8] sm:$0xff]  ;;  %v512_v17 = vld [vmem:[%s974_s3] sm:$0x3] }
  0x18   :  { %476 = vmatpush1.bf16.msra.mxu0 %v658_v23  ;;  %436 = vmatprep.subr.bf16.mxu1 %v659_v24  ;;  %v516_v13 = vsub.s32 0, %v515_v8  ;;  %v520_v18 = vsub.s32 1, %v515_v8 }
  0x19   :  { %477 = vmatprep.subr.bf16.mxu0 %v661_v25 }
  0x1b   :  { %437 = vmatpush1.bf16.msra.mxu1 %v663_v26  ;;  %v517_v26 = vrot.slane %v512_v17, %v516_v13 }
  0x1c   :  { %478 = vmatpush1.bf16.msra.mxu0 %v664_v27  ;;  %438 = vmatprep.subr.bf16.mxu1 %v665_v28  ;;  %v521_v28 = vrot.slane %v512_v17, %v520_v18 }
  0x1d   :  { %479 = vmatprep.subr.bf16.mxu0 %v667_v29 }
  0x1f   :  { %439 = vmatpush1.bf16.msra.mxu1 %v669_v30 }
  0x20   :  { %480 = vmatpush1.bf16.msra.mxu0 %v670_v31  ;;  %440 = vmatprep.subr.bf16.mxu1 %v671_v32 }
  0x21   :  { %481 = vmatprep.subr.bf16.mxu0 %v673_v33 }
  0x23   :  { %441 = vmatpush1.bf16.msra.mxu1 %v675_v34 }
  0x24   :  { %482 = vmatpush1.bf16.msra.mxu0 %v676_v35  ;;  %442 = vmatprep.subr.bf16.mxu1 %v677_v36  ;;  %v617_v35 = vld [vmem:[#allocation2] ss:$0 sm:$0xff] }
  0x25   :  { %483 = vmatprep.subr.bf16.mxu0 %v679_v37 }
  0x27   :  { %443 = vmatpush1.bf16.msra.mxu1 %v681_v38 }
  0x28   :  { %484 = vmatpush1.bf16.msra.mxu0 %v682_v39  ;;  %444 = vmatprep.subr.bf16.mxu1 %v683_v40 }
  0x29   :  { %485 = vmatprep.subr.bf16.mxu0 %v685_v41 }
  0x2b   :  { %445 = vmatpush1.bf16.msra.mxu1 %v687_v42 }
  0x2c   :  { %486 = vmatpush1.bf16.msra.mxu0 %v688_v43  ;;  %446 = vmatprep.subr.bf16.mxu1 %v689_v44 }
  0x2d   :  { %487 = vmatprep.subr.bf16.mxu0 %v691_v45 }
  0x2f   :  { %447 = vmatpush1.bf16.msra.mxu1 %v693_v49 }
  0x30   :  { %488 = vmatpush1.bf16.msra.mxu0 %v694_v50  ;;  %448 = vmatprep.subr.bf16.mxu1 %v695_v52 }
  0x31   :  { %489 = vmatprep.subr.bf16.mxu0 %v697_v53 }
  0x33   :  { %449 = vmatpush1.bf16.msra.mxu1 %v699_v54 }
  0x34   :  { %490 = vmatpush1.bf16.msra.mxu0 %v700_v55  ;;  %450 = vmatprep.subr.bf16.mxu1 %v701_v56 }
  0x35   :  { %491 = vmatprep.subr.bf16.mxu0 %v703_v57 }
  0x37   :  { %451 = vmatpush1.bf16.msra.mxu1 %v705_v58 }
  0x38   :  { %492 = vmatpush1.bf16.msra.mxu0 %v706_v59  ;;  %452 = vmatprep.subr.bf16.mxu1 %v707_v60 }
  0x39   :  { %493 = vmatprep.subr.bf16.mxu0 %v709_v61 }
  0x3b   :  { %453 = vmatpush1.bf16.msra.mxu1 %v711_v62 }
  0x3c   :  { %494 = vmatpush1.bf16.msra.mxu0 %v712_v63  ;;  %454 = vmatprep.subr.bf16.mxu1 %v713_v0 }
  0x3d   :  { %495 = vmatprep.subr.bf16.mxu0 %v715_v1 }
  0x3f   :  { %455 = vmatpush1.bf16.msra.mxu1 %v717_v2 }
  0x40   :  { %496 = vmatpush1.bf16.msra.mxu0 %v718_v3 }
  0x42   :  { %457 = vmatmul.mubr.bf16.vlgmr.msra.gmra.mrb[0].mxu1 %v549_v4 }
  0x43   :  { %498 = vmatmul.mubr.bf16.vlgmr.msra.gmra.mrb[0].mxu0 %v551_v5 }
 0x115   :  { %v458_v11 = vpop.f32.mrb[0].mxu1 }
 0x116   :  { %v499_v12 = vpop.f32.mrb[0].mxu0  ;;  %v459_v14 = vadd.f32 %v458_v11, %v88_v9  ;;  %v460_v15 = vpop.f32.mrb[1].mxu1 }
 0x117   :  { %v501_v16 = vpop.f32.mrb[1].mxu0  ;;  %v461_v19 = vadd.f32 %v460_v15, %v89_v10  ;;  %v462_v20 = vpop.f32.mrb[2].mxu1 }
 0x118   :  { %v503_v21 = vpop.f32.mrb[2].mxu0  ;;  %v500_v22 = vadd.f32 %v499_v12, %v459_v14  ;;  %v463_v23 = vpop.f32.mrb[3].mxu1 }
 0x119   :  { %v504_v24 = vpop.f32.mrb[3].mxu0  ;;  %v502_v25 = vadd.f32 %v501_v16, %v461_v19 }
 0x11a   :  { %vm506_vm0 = vcmp.gt.f32.partialorder %v500_v22, 0.0  ;;  %v508_v27 = vmul.f32 0.2, %v500_v22 }
 0x11b   :  { %vm507_vm1 = vcmp.gt.f32.partialorder %v502_v25, 0.0  ;;  %v509_v29 = vmul.f32 0.2, %v502_v25 }
 0x11c   :  { %v510_v30 = vsel %vm506_vm0, %v500_v22, %v508_v27 }
 0x11d   :  { %v511_v31 = vsel %vm507_vm1, %v502_v25, %v509_v29  ;;  %v524_v32 = vmul.f32 %v517_v26, %v510_v30 }
 0x11e   :  { %v525_v33 = vmul.f32 %v521_v28, %v511_v31 }
 0x120   :  { %v526_v34 = vadd.f32 %v525_v33, %v524_v32 }
 0x122   :  { %527 = vadd.xlane.f32.xlu0 %v526_v34 }
 0x1af   :  { %v528_v36 = vpop.xlane.xlu0 %527 }
 0x1b0   :  { %v536_v37 = vadd.f32 %v617_v35, %v528_v36 }
 0x1b2   :  { %v618_v38 = vmul.f32 -1.442695, %v536_v37 }
 0x1b4   :  { %723 = vpow2.f32 %v618_v38 }
 0x1be   :  { %v724_v39 = vpop.eup %723 }
 0x1bf   :  { %v540_v40 = vadd.f32 1.0, %v724_v39 }
 0x1c1   :  { %725 = vrcp.f32 %v540_v40 }
 0x1cb   :  { %v726_v41 = vpop.eup %725 }
 0x1cc   :  { %544 = vst.msk [vmem:[%s975_s5] sm:$0xff] %vm543_vm2, %v726_v41 }

// kernel: discriminator_forward.8
= control target key start
LH: loop header
LB: loop body
LE: loop exit
PB: predicated region body
PF: predicated region fallthrough
CT: control target
= control target key end

     0   :  { %s7891_s1 = inlined_call_operand.vmem [shape: bf16[2304,512], index: 1, kind: input, shape index: {}]   ;;  %s7892_s0 = inlined_call_operand.vmem [shape: bf16[8,2304], index: 0, kind: input, shape index: {}]   ;;  %s7893_s2 = inlined_call_operand.vmem [shape: f32[1,512], index: 2, kind: input, shape index: {}]   ;;  %s7894_s3 = inlined_call_operand.vmem [shape: bf16[8,512], index: 3, kind: output, shape index: {0}]   ;;  %s7895_s4 = inlined_call_operand.vmem [shape: f32[8,512], index: 4, kind: output, shape index: {1}]   ;;  %s7896_s5 = inlined_call_operand.vmem [shape: f32[8,512], index: 5, kind: output, shape index: {2}]  }
   0x1   :  { %v5139_v0 = vld [vmem:[%s7891_s1 + $0x4] ss:$16 sps:$4 sm:$0xff]   ;;  %v5141_v1 = vld [vmem:[%s7891_s1 + $0xc] ss:$16 sps:$4 sm:$0xff]   ;;  %v5143_v2 = vld [vmem:[%s7891_s1] ss:$16 sps:$4 sm:$0xff]  }
   0x2   :  { %3600 = vmatprep.subr.bf16.mxu0 %v5139_v0  ;;  %v5144_v3 = vld [vmem:[%s7891_s1 + $0x8] ss:$16 sps:$4 sm:$0xff]   ;;  %3969 = vmatprep.subr.bf16.mxu1 %v5141_v1  ;;  %v5145_v4 = vld [vmem:[%s7891_s1 + $0x24] ss:$16 sps:$4 sm:$0xff]   ;;  %v5147_v5 = vld [vmem:[%s7891_s1 + $0x2c] ss:$16 sps:$4 sm:$0xff]  }
   0x3   :  { %3601 = vmatpush1.bf16.msra.mxu0 %v5143_v2  ;;  %3970 = vmatpush1.bf16.msra.mxu1 %v5144_v3  ;;  %v5149_v6 = vld [vmem:[%s7891_s1 + $0x20] ss:$16 sps:$4 sm:$0xff]   ;;  %v5150_v7 = vld [vmem:[%s7891_s1 + $0x28] ss:$16 sps:$4 sm:$0xff]   ;;  %v5151_v8 = vld [vmem:[%s7891_s1 + $0x44] ss:$16 sps:$4 sm:$0xff]  }
   0x4   :  { %3602 = vmatprep.subr.bf16.mxu0 %v5145_v4  ;;  %3971 = vmatprep.subr.bf16.mxu1 %v5147_v5  ;;  %v5153_v9 = vld [vmem:[%s7891_s1 + $0x4c] ss:$16 sps:$4 sm:$0xff]   ;;  %v5155_v10 = vld [vmem:[%s7891_s1 + $0x40] ss:$16 sps:$4 sm:$0xff]   ;;  %v5156_v11 = vld [vmem:[%s7891_s1 + $0x48] ss:$16 sps:$4 sm:$0xff]  }
   0x5   :  { %v5157_v12 = vld [vmem:[%s7891_s1 + $0x64] ss:$16 sps:$4 sm:$0xff]   ;;  %v5159_v13 = vld [vmem:[%s7891_s1 + $0x6c] ss:$16 sps:$4 sm:$0xff]   ;;  %v5161_v14 = vld [vmem:[%s7891_s1 + $0x60] ss:$16 sps:$4 sm:$0xff]  }
   0x6   :  { %v5162_v15 = vld [vmem:[%s7891_s1 + $0x68] ss:$16 sps:$4 sm:$0xff]   ;;  %v5163_v16 = vld [vmem:[%s7891_s1 + $0x84] ss:$16 sps:$4 sm:$0xff]   ;;  %v5165_v17 = vld [vmem:[%s7891_s1 + $0x8c] ss:$16 sps:$4 sm:$0xff]  }
   0x7   :  { %3603 = vmatpush1.bf16.msra.mxu0 %v5149_v6  ;;  %3972 = vmatpush1.bf16.msra.mxu1 %v5150_v7  ;;  %v5167_v18 = vld [vmem:[%s7891_s1 + $0x80] ss:$16 sps:$4 sm:$0xff]   ;;  %v5168_v19 = vld [vmem:[%s7891_s1 + $0x88] ss:$16 sps:$4 sm:$0xff]   ;;  %v5169_v20 = vld [vmem:[%s7891_s1 + $0xa4] ss:$16 sps:$4 sm:$0xff]  }
   0x8   :  { %3604 = vmatprep.subr.bf16.mxu0 %v5151_v8  ;;  %3973 = vmatprep.subr.bf16.mxu1 %v5153_v9  ;;  %v5171_v21 = vld [vmem:[%s7891_s1 + $0xac] ss:$16 sps:$4 sm:$0xff]   ;;  %v5173_v22 = vld [vmem:[%s7891_s1 + $0xa0] ss:$16 sps:$4 sm:$0xff]   ;;  %v5174_v23 = vld [vmem:[%s7891_s1 + $0xa8] ss:$16 sps:$4 sm:$0xff]  }
   0x9   :  { %v5175_v24 = vld [vmem:[%s7891_s1 + $0xc4] ss:$16 sps:$4 sm:$0xff]   ;;  %v5177_v25 = vld [vmem:[%s7891_s1 + $0xcc] ss:$16 sps:$4 sm:$0xff]   ;;  %v5179_v26 = vld [vmem:[%s7891_s1 + $0xc0] ss:$16 sps:$4 sm:$0xff]  }
   0xa   :  { %v5180_v27 = vld [vmem:[%s7891_s1 + $0xc8] ss:$16 sps:$4 sm:$0xff]   ;;  %v5181_v28 = vld [vmem:[%s7891_s1 + $0xe4] ss:$16 sps:$4 sm:$0xff]   ;;  %v5183_v29 = vld [vmem:[%s7891_s1 + $0xec] ss:$16 sps:$4 sm:$0xff]  }
   0xb   :  { %3605 = vmatpush1.bf16.msra.mxu0 %v5155_v10  ;;  %3974 = vmatpush1.bf16.msra.mxu1 %v5156_v11  ;;  %v5185_v30 = vld [vmem:[%s7891_s1 + $0xe0] ss:$16 sps:$4 sm:$0xff]   ;;  %v5186_v31 = vld [vmem:[%s7891_s1 + $0xe8] ss:$16 sps:$4 sm:$0xff]   ;;  %v5187_v32 = vld [vmem:[%s7891_s1 + $0x104] ss:$16 sps:$4 sm:$0xff]  }
   0xc   :  { %3606 = vmatprep.subr.bf16.mxu0 %v5157_v12  ;;  %3975 = vmatprep.subr.bf16.mxu1 %v5159_v13  ;;  %v5189_v33 = vld [vmem:[%s7891_s1 + $0x10c] ss:$16 sps:$4 sm:$0xff]   ;;  %v5191_v34 = vld [vmem:[%s7891_s1 + $0x100] ss:$16 sps:$4 sm:$0xff]   ;;  %v5192_v35 = vld [vmem:[%s7891_s1 + $0x108] ss:$16 sps:$4 sm:$0xff]  }
   0xd   :  { %v5193_v36 = vld [vmem:[%s7891_s1 + $0x124] ss:$16 sps:$4 sm:$0xff]   ;;  %v5195_v37 = vld [vmem:[%s7891_s1 + $0x12c] ss:$16 sps:$4 sm:$0xff]   ;;  %v5197_v38 = vld [vmem:[%s7891_s1 + $0x120] ss:$16 sps:$4 sm:$0xff]  }
   0xe   :  { %v5198_v39 = vld [vmem:[%s7891_s1 + $0x128] ss:$16 sps:$4 sm:$0xff]   ;;  %v5199_v40 = vld [vmem:[%s7891_s1 + $0x144] ss:$16 sps:$4 sm:$0xff]   ;;  %v5201_v41 = vld [vmem:[%s7891_s1 + $0x14c] ss:$16 sps:$4 sm:$0xff]  }
   0xf   :  { %3607 = vmatpush1.bf16.msra.mxu0 %v5161_v14  ;;  %3976 = vmatpush1.bf16.msra.mxu1 %v5162_v15  ;;  %v5203_v42 = vld [vmem:[%s7891_s1 + $0x140] ss:$16 sps:$4 sm:$0xff]   ;;  %v5204_v43 = vld [vmem:[%s7891_s1 + $0x148] ss:$16 sps:$4 sm:$0xff]   ;;  %v5205_v44 = vld [vmem:[%s7891_s1 + $0x164] ss:$16 sps:$4 sm:$0xff]  }
  0x10   :  { %3608 = vmatprep.subr.bf16.mxu0 %v5163_v16  ;;  %3977 = vmatprep.subr.bf16.mxu1 %v5165_v17  ;;  %v5207_v45 = vld [vmem:[%s7891_s1 + $0x16c] ss:$16 sps:$4 sm:$0xff]   ;;  %v50_v46 = vld [vmem:[%s7892_s0] sm:$0xff]  ;;  %v5210_v49 = vld [vmem:[%s7891_s1 + $0x168] ss:$16 sps:$4 sm:$0xff]  }
  0x11   :  { %v5209_v47 = vld [vmem:[%s7891_s1 + $0x160] ss:$16 sps:$4 sm:$0xff]   ;;  %v4473_v48 = vcombine.high %v50_v46, %v50_v46  ;;  %v5211_v50 = vld [vmem:[%s7891_s1 + $0x184] ss:$16 sps:$4 sm:$0xff]   ;;  %v5213_v51 = vld [vmem:[%s7891_s1 + $0x18c] ss:$16 sps:$4 sm:$0xff]   ;;  %v4472_v4 = vcombine.low %v50_v46, %v50_v46 }
  0x12   :  { %v5215_v52 = vld [vmem:[%s7891_s1 + $0x180] ss:$16 sps:$4 sm:$0xff]   ;;  %v5216_v53 = vld [vmem:[%s7891_s1 + $0x188] ss:$16 sps:$4 sm:$0xff]   ;;  %v5217_v54 = vld [vmem:[%s7891_s1 + $0x1a4] ss:$16 sps:$4 sm:$0xff]  }
  0x13   :  { %3609 = vmatpush1.bf16.msra.mxu0 %v5167_v18  ;;  %3978 = vmatpush1.bf16.msra.mxu1 %v5168_v19  ;;  %v5219_v55 = vld [vmem:[%s7891_s1 + $0x1ac] ss:$16 sps:$4 sm:$0xff]   ;;  %v5221_v56 = vld [vmem:[%s7891_s1 + $0x1a0] ss:$16 sps:$4 sm:$0xff]   ;;  %v5222_v57 = vld [vmem:[%s7891_s1 + $0x1a8] ss:$16 sps:$4 sm:$0xff]  }
  0x14   :  { %3610 = vmatprep.subr.bf16.mxu0 %v5169_v20  ;;  %3979 = vmatprep.subr.bf16.mxu1 %v5171_v21  ;;  %v5223_v58 = vld [vmem:[%s7891_s1 + $0x1c4] ss:$16 sps:$4 sm:$0xff]   ;;  %v5225_v59 = vld [vmem:[%s7891_s1 + $0x1cc] ss:$16 sps:$4 sm:$0xff]   ;;  %v5227_v60 = vld [vmem:[%s7891_s1 + $0x1c0] ss:$16 sps:$4 sm:$0xff]  }
  0x15   :  { %3632 = vmatprep.mubr.bf16.mxu0 %v4473_v48  ;;  %4001 = vmatprep.mubr.bf16.mxu1 %v4473_v48  ;;  %v5228_v61 = vld [vmem:[%s7891_s1 + $0x1c8] ss:$16 sps:$4 sm:$0xff]   ;;  %v5229_v62 = vld [vmem:[%s7891_s1 + $0x1e4] ss:$16 sps:$4 sm:$0xff]   ;;  %v5231_v63 = vld [vmem:[%s7891_s1 + $0x1ec] ss:$16 sps:$4 sm:$0xff]  }
  0x16   :  { %v5233_v0 = vld [vmem:[%s7891_s1 + $0x1e0] ss:$16 sps:$4 sm:$0xff]   ;;  %v5234_v1 = vld [vmem:[%s7891_s1 + $0x1e8] ss:$16 sps:$4 sm:$0xff]   ;;  %v5239_v2 = vld [vmem:[%s7891_s1 + $0x204] ss:$16 sps:$4 sm:$0xff]  }
  0x17   :  { %3611 = vmatpush1.bf16.msra.mxu0 %v5173_v22  ;;  %3980 = vmatpush1.bf16.msra.mxu1 %v5174_v23  ;;  %v5242_v3 = vld [vmem:[%s7891_s1 + $0x20c] ss:$16 sps:$4 sm:$0xff]   ;;  %v5237_v5 = vld [vmem:[%s7891_s1 + $0x200] ss:$16 sps:$4 sm:$0xff]   ;;  %v5240_v6 = vld [vmem:[%s7891_s1 + $0x208] ss:$16 sps:$4 sm:$0xff]  }
  0x18   :  { %3612 = vmatprep.subr.bf16.mxu0 %v5175_v24  ;;  %3981 = vmatprep.subr.bf16.mxu1 %v5177_v25  ;;  %v5245_v7 = vld [vmem:[%s7891_s1 + $0x224] ss:$16 sps:$4 sm:$0xff]   ;;  %v5248_v8 = vld [vmem:[%s7891_s1 + $0x22c] ss:$16 sps:$4 sm:$0xff]   ;;  %v5243_v9 = vld [vmem:[%s7891_s1 + $0x220] ss:$16 sps:$4 sm:$0xff]  }
  0x19   :  { %v5246_v10 = vld [vmem:[%s7891_s1 + $0x228] ss:$16 sps:$4 sm:$0xff]   ;;  %v5251_v11 = vld [vmem:[%s7891_s1 + $0x244] ss:$16 sps:$4 sm:$0xff]   ;;  %v5254_v12 = vld [vmem:[%s7891_s1 + $0x24c] ss:$16 sps:$4 sm:$0xff]  }
  0x1a   :  { %v5249_v13 = vld [vmem:[%s7891_s1 + $0x240] ss:$16 sps:$4 sm:$0xff]   ;;  %v5252_v14 = vld [vmem:[%s7891_s1 + $0x248] ss:$16 sps:$4 sm:$0xff]   ;;  %v5257_v15 = vld [vmem:[%s7891_s1 + $0x264] ss:$16 sps:$4 sm:$0xff]  }
  0x1b   :  { %3613 = vmatpush1.bf16.msra.mxu0 %v5179_v26  ;;  %3982 = vmatpush1.bf16.msra.mxu1 %v5180_v27  ;;  %v5260_v16 = vld [vmem:[%s7891_s1 + $0x26c] ss:$16 sps:$4 sm:$0xff]   ;;  %v5255_v17 = vld [vmem:[%s7891_s1 + $0x260] ss:$16 sps:$4 sm:$0xff]   ;;  %v5258_v18 = vld [vmem:[%s7891_s1 + $0x268] ss:$16 sps:$4 sm:$0xff]  }
  0x1c   :  { %3614 = vmatprep.subr.bf16.mxu0 %v5181_v28  ;;  %3983 = vmatprep.subr.bf16.mxu1 %v5183_v29  ;;  %v5263_v19 = vld [vmem:[%s7891_s1 + $0x284] ss:$16 sps:$4 sm:$0xff]   ;;  %v5266_v20 = vld [vmem:[%s7891_s1 + $0x28c] ss:$16 sps:$4 sm:$0xff]   ;;  %v5261_v21 = vld [vmem:[%s7891_s1 + $0x280] ss:$16 sps:$4 sm:$0xff]  }
  0x1d   :  { %v5264_v22 = vld [vmem:[%s7891_s1 + $0x288] ss:$16 sps:$4 sm:$0xff]   ;;  %v5269_v23 = vld [vmem:[%s7891_s1 + $0x2a4] ss:$16 sps:$4 sm:$0xff]   ;;  %v5272_v24 = vld [vmem:[%s7891_s1 + $0x2ac] ss:$16 sps:$4 sm:$0xff]  }
  0x1e   :  { %v5267_v25 = vld [vmem:[%s7891_s1 + $0x2a0] ss:$16 sps:$4 sm:$0xff]   ;;  %v5270_v26 = vld [vmem:[%s7891_s1 + $0x2a8] ss:$16 sps:$4 sm:$0xff]   ;;  %v5275_v27 = vld [vmem:[%s7891_s1 + $0x2c4] ss:$16 sps:$4 sm:$0xff]  }
  0x1f   :  { %3615 = vmatpush1.bf16.msra.mxu0 %v5185_v30  ;;  %3984 = vmatpush1.bf16.msra.mxu1 %v5186_v31  ;;  %v5278_v28 = vld [vmem:[%s7891_s1 + $0x2cc] ss:$16 sps:$4 sm:$0xff]   ;;  %v5273_v31 = vld [vmem:[%s7891_s1 + $0x2c0] ss:$16 sps:$4 sm:$0xff]   ;;  %v5300_v48 = vld [vmem:[%s7891_s1 + $0x348] ss:$16 sps:$4 sm:$0xff]  }
  0x20   :  { %3616 = vmatprep.subr.bf16.mxu0 %v5187_v32  ;;  %3985 = vmatprep.subr.bf16.mxu1 %v5189_v33  ;;  %v6327_v29 = vld [vmem:[%s7892_s0 + $0x8] sm:$0xff]  ;;  %v5281_v33 = vld [vmem:[%s7891_s1 + $0x2e4] ss:$16 sps:$4 sm:$0xff]  }
  0x21   :  { %v4475_v30 = vcombine.high %v6327_v29, %v6327_v29  ;;  %v5276_v32 = vld [vmem:[%s7891_s1 + $0x2c8] ss:$16 sps:$4 sm:$0xff]   ;;  %v5302_v46 = vld [vmem:[%s7891_s1 + $0x34c] ss:$16 sps:$4 sm:$0xff]  }
  0x23   :  { %3617 = vmatpush1.bf16.msra.mxu0 %v5191_v34  ;;  %3986 = vmatpush1.bf16.msra.mxu1 %v5192_v35  ;;  %v5284_v34 = vld [vmem:[%s7891_s1 + $0x2ec] ss:$16 sps:$4 sm:$0xff]   ;;  %v5279_v35 = vld [vmem:[%s7891_s1 + $0x2e0] ss:$16 sps:$4 sm:$0xff]  }
  0x24   :  { %3618 = vmatprep.subr.bf16.mxu0 %v5193_v36  ;;  %3987 = vmatprep.subr.bf16.mxu1 %v5195_v37  ;;  %v5282_v36 = vld [vmem:[%s7891_s1 + $0x2e8] ss:$16 sps:$4 sm:$0xff]   ;;  %v5287_v37 = vld [vmem:[%s7891_s1 + $0x304] ss:$16 sps:$4 sm:$0xff]  }
  0x27   :  { %3619 = vmatpush1.bf16.msra.mxu0 %v5197_v38  ;;  %3988 = vmatpush1.bf16.msra.mxu1 %v5198_v39  ;;  %v5290_v38 = vld [vmem:[%s7891_s1 + $0x30c] ss:$16 sps:$4 sm:$0xff]   ;;  %v5285_v39 = vld [vmem:[%s7891_s1 + $0x300] ss:$16 sps:$4 sm:$0xff]  }
  0x28   :  { %3620 = vmatprep.subr.bf16.mxu0 %v5199_v40  ;;  %3989 = vmatprep.subr.bf16.mxu1 %v5201_v41  ;;  %v5288_v40 = vld [vmem:[%s7891_s1 + $0x308] ss:$16 sps:$4 sm:$0xff]   ;;  %v5293_v41 = vld [vmem:[%s7891_s1 + $0x324] ss:$16 sps:$4 sm:$0xff]  }
  0x2b   :  { %3621 = vmatpush1.bf16.msra.mxu0 %v5203_v42  ;;  %3990 = vmatpush1.bf16.msra.mxu1 %v5204_v43  ;;  %v5296_v42 = vld [vmem:[%s7891_s1 + $0x32c] ss:$16 sps:$4 sm:$0xff]   ;;  %v5291_v43 = vld [vmem:[%s7891_s1 + $0x320] ss:$16 sps:$4 sm:$0xff]  }
  0x2c   :  { %3622 = vmatprep.subr.bf16.mxu0 %v5205_v44  ;;  %3991 = vmatprep.subr.bf16.mxu1 %v5207_v45  ;;  %v5294_v44 = vld [vmem:[%s7891_s1 + $0x328] ss:$16 sps:$4 sm:$0xff]   ;;  %v5299_v45 = vld [vmem:[%s7891_s1 + $0x344] ss:$16 sps:$4 sm:$0xff]  }
  0x2f   :  { %3623 = vmatpush1.bf16.msra.mxu0 %v5209_v47  ;;  %3992 = vmatpush1.bf16.msra.mxu1 %v5210_v49  ;;  %v5297_v47 = vld [vmem:[%s7891_s1 + $0x340] ss:$16 sps:$4 sm:$0xff]   ;;  %v5305_v49 = vld [vmem:[%s7891_s1 + $0x364] ss:$16 sps:$4 sm:$0xff]  }
  0x30   :  { %3624 = vmatprep.subr.bf16.mxu0 %v5211_v50  ;;  %3993 = vmatprep.subr.bf16.mxu1 %v5213_v51  ;;  %v5308_v50 = vld [vmem:[%s7891_s1 + $0x36c] ss:$16 sps:$4 sm:$0xff]   ;;  %v5303_v51 = vld [vmem:[%s7891_s1 + $0x360] ss:$16 sps:$4 sm:$0xff]  }
  0x33   :  { %3625 = vmatpush1.bf16.msra.mxu0 %v5215_v52  ;;  %3994 = vmatpush1.bf16.msra.mxu1 %v5216_v53  ;;  %v5306_v52 = vld [vmem:[%s7891_s1 + $0x368] ss:$16 sps:$4 sm:$0xff]   ;;  %v5311_v53 = vld [vmem:[%s7891_s1 + $0x384] ss:$16 sps:$4 sm:$0xff]  }
  0x34   :  { %3626 = vmatprep.subr.bf16.mxu0 %v5217_v54  ;;  %3995 = vmatprep.subr.bf16.mxu1 %v5219_v55  ;;  %v5314_v54 = vld [vmem:[%s7891_s1 + $0x38c] ss:$16 sps:$4 sm:$0xff]   ;;  %v5309_v55 = vld [vmem:[%s7891_s1 + $0x380] ss:$16 sps:$4 sm:$0xff]  }
  0x37   :  { %3627 = vmatpush1.bf16.msra.mxu0 %v5221_v56  ;;  %3996 = vmatpush1.bf16.msra.mxu1 %v5222_v57  ;;  %v5312_v56 = vld [vmem:[%s7891_s1 + $0x388] ss:$16 sps:$4 sm:$0xff]   ;;  %v5317_v57 = vld [vmem:[%s7891_s1 + $0x3a4] ss:$16 sps:$4 sm:$0xff]  }
  0x38   :  { %3628 = vmatprep.subr.bf16.mxu0 %v5223_v58  ;;  %3997 = vmatprep.subr.bf16.mxu1 %v5225_v59  ;;  %v5320_v58 = vld [vmem:[%s7891_s1 + $0x3ac] ss:$16 sps:$4 sm:$0xff]   ;;  %v5315_v59 = vld [vmem:[%s7891_s1 + $0x3a0] ss:$16 sps:$4 sm:$0xff]  }
  0x3b   :  { %3629 = vmatpush1.bf16.msra.mxu0 %v5227_v60  ;;  %3998 = vmatpush1.bf16.msra.mxu1 %v5228_v61  ;;  %v5318_v60 = vld [vmem:[%s7891_s1 + $0x3a8] ss:$16 sps:$4 sm:$0xff]   ;;  %v5323_v61 = vld [vmem:[%s7891_s1 + $0x3c4] ss:$16 sps:$4 sm:$0xff]  }
  0x3c   :  { %3630 = vmatprep.subr.bf16.mxu0 %v5229_v62  ;;  %3999 = vmatprep.subr.bf16.mxu1 %v5231_v63  ;;  %v5326_v62 = vld [vmem:[%s7891_s1 + $0x3cc] ss:$16 sps:$4 sm:$0xff]   ;;  %v5321_v63 = vld [vmem:[%s7891_s1 + $0x3c0] ss:$16 sps:$4 sm:$0xff]  }
  0x3f   :  { %3631 = vmatpush1.bf16.msra.mxu0 %v5233_v0  ;;  %4000 = vmatpush1.bf16.msra.mxu1 %v5234_v1  ;;  %v5324_v0 = vld [vmem:[%s7891_s1 + $0x3c8] ss:$16 sps:$4 sm:$0xff]   ;;  %v5329_v1 = vld [vmem:[%s7891_s1 + $0x3e4] ss:$16 sps:$4 sm:$0xff]  }
  0x40   :  { %3641 = vmatprep.subr.bf16.mxu0 %v5239_v2  ;;  %4010 = vmatprep.subr.bf16.mxu1 %v5242_v3  ;;  %v5332_v2 = vld [vmem:[%s7891_s1 + $0x3ec] ss:$16 sps:$4 sm:$0xff]   ;;  %v5327_v3 = vld [vmem:[%s7891_s1 + $0x3e0] ss:$16 sps:$4 sm:$0xff]  }
  0x42   :  { %3633 = vmatmul.mubr.bf16.vlgmr.msra.gmra.mrb[0].mxu0 %v4472_v4  ;;  %4002 = vmatmul.mubr.bf16.vlgmr.msra.gmra.mrb[0].mxu1 %v4472_v4  ;;  %v5330_v4 = vld [vmem:[%s7891_s1 + $0x3e8] ss:$16 sps:$4 sm:$0xff]  }
  0x43   :  { %3642 = vmatpush1.bf16.msra.mxu0 %v5237_v5  ;;  %4011 = vmatpush1.bf16.msra.mxu1 %v5240_v6  ;;  %v5337_v5 = vld [vmem:[%s7891_s1 + $0x404] ss:$16 sps:$4 sm:$0xff]   ;;  %v5340_v6 = vld [vmem:[%s7891_s1 + $0x40c] ss:$16 sps:$4 sm:$0xff]  }
  0x44   :  { %3643 = vmatprep.subr.bf16.mxu0 %v5245_v7  ;;  %4012 = vmatprep.subr.bf16.mxu1 %v5248_v8  ;;  %v4474_v7 = vcombine.low %v6327_v29, %v6327_v29  ;;  %v5335_v8 = vld [vmem:[%s7891_s1 + $0x400] ss:$16 sps:$4 sm:$0xff]   ;;  %v5370_v29 = vld [vmem:[%s7891_s1 + $0x4ac] ss:$16 sps:$4 sm:$0xff]  }
  0x45   :  { %3673 = vmatprep.mubr.bf16.mxu0 %v4475_v30  ;;  %4042 = vmatprep.mubr.bf16.mxu1 %v4475_v30  ;;  %v5365_v30 = vld [vmem:[%s7891_s1 + $0x4a0] ss:$16 sps:$4 sm:$0xff]  }
  0x47   :  { %3644 = vmatpush1.bf16.msra.mxu0 %v5243_v9  ;;  %4013 = vmatpush1.bf16.msra.mxu1 %v5246_v10  ;;  %v5338_v9 = vld [vmem:[%s7891_s1 + $0x408] ss:$16 sps:$4 sm:$0xff]   ;;  %v5343_v10 = vld [vmem:[%s7891_s1 + $0x424] ss:$16 sps:$4 sm:$0xff]  }
  0x48   :  { %3645 = vmatprep.subr.bf16.mxu0 %v5251_v11  ;;  %4014 = vmatprep.subr.bf16.mxu1 %v5254_v12  ;;  %v6465_v11 = vld [vmem:[%s7892_s0 + $0x10] sm:$0xff]  ;;  %v5346_v12 = vld [vmem:[%s7891_s1 + $0x42c] ss:$16 sps:$4 sm:$0xff]  }
  0x4b   :  { %3646 = vmatpush1.bf16.msra.mxu0 %v5249_v13  ;;  %4015 = vmatpush1.bf16.msra.mxu1 %v5252_v14  ;;  %v4477_v13 = vcombine.high %v6465_v11, %v6465_v11  ;;  %v5341_v14 = vld [vmem:[%s7891_s1 + $0x420] ss:$16 sps:$4 sm:$0xff]  }
  0x4c   :  { %3647 = vmatprep.subr.bf16.mxu0 %v5257_v15  ;;  %4016 = vmatprep.subr.bf16.mxu1 %v5260_v16  ;;  %v5344_v15 = vld [vmem:[%s7891_s1 + $0x428] ss:$16 sps:$4 sm:$0xff]   ;;  %v5349_v16 = vld [vmem:[%s7891_s1 + $0x444] ss:$16 sps:$4 sm:$0xff]  }
  0x4f   :  { %3648 = vmatpush1.bf16.msra.mxu0 %v5255_v17  ;;  %4017 = vmatpush1.bf16.msra.mxu1 %v5258_v18  ;;  %v5352_v17 = vld [vmem:[%s7891_s1 + $0x44c] ss:$16 sps:$4 sm:$0xff]   ;;  %v5347_v18 = vld [vmem:[%s7891_s1 + $0x440] ss:$16 sps:$4 sm:$0xff]  }
  0x50   :  { %3649 = vmatprep.subr.bf16.mxu0 %v5263_v19  ;;  %4018 = vmatprep.subr.bf16.mxu1 %v5266_v20  ;;  %v5350_v19 = vld [vmem:[%s7891_s1 + $0x448] ss:$16 sps:$4 sm:$0xff]   ;;  %v5355_v20 = vld [vmem:[%s7891_s1 + $0x464] ss:$16 sps:$4 sm:$0xff]  }
  0x53   :  { %3650 = vmatpush1.bf16.msra.mxu0 %v5261_v21  ;;  %4019 = vmatpush1.bf16.msra.mxu1 %v5264_v22  ;;  %v5358_v21 = vld [vmem:[%s7891_s1 + $0x46c] ss:$16 sps:$4 sm:$0xff]   ;;  %v5353_v22 = vld [vmem:[%s7891_s1 + $0x460] ss:$16 sps:$4 sm:$0xff]  }
  0x54   :  { %3651 = vmatprep.subr.bf16.mxu0 %v5269_v23  ;;  %4020 = vmatprep.subr.bf16.mxu1 %v5272_v24  ;;  %v5356_v23 = vld [vmem:[%s7891_s1 + $0x468] ss:$16 sps:$4 sm:$0xff]   ;;  %v5361_v24 = vld [vmem:[%s7891_s1 + $0x484] ss:$16 sps:$4 sm:$0xff]  }
  0x57   :  { %3652 = vmatpush1.bf16.msra.mxu0 %v5267_v25  ;;  %4021 = vmatpush1.bf16.msra.mxu1 %v5270_v26  ;;  %v5364_v25 = vld [vmem:[%s7891_s1 + $0x48c] ss:$16 sps:$4 sm:$0xff]   ;;  %v5359_v26 = vld [vmem:[%s7891_s1 + $0x480] ss:$16 sps:$4 sm:$0xff]  }
  0x58   :  { %3653 = vmatprep.subr.bf16.mxu0 %v5275_v27  ;;  %4022 = vmatprep.subr.bf16.mxu1 %v5278_v28  ;;  %v5362_v27 = vld [vmem:[%s7891_s1 + $0x488] ss:$16 sps:$4 sm:$0xff]   ;;  %v5367_v28 = vld [vmem:[%s7891_s1 + $0x4a4] ss:$16 sps:$4 sm:$0xff]  }
  0x5b   :  { %3654 = vmatpush1.bf16.msra.mxu0 %v5273_v31  ;;  %4023 = vmatpush1.bf16.msra.mxu1 %v5276_v32  ;;  %v5368_v31 = vld [vmem:[%s7891_s1 + $0x4a8] ss:$16 sps:$4 sm:$0xff]   ;;  %v5373_v32 = vld [vmem:[%s7891_s1 + $0x4c4] ss:$16 sps:$4 sm:$0xff]  }
  0x5c   :  { %3655 = vmatprep.subr.bf16.mxu0 %v5281_v33  ;;  %4024 = vmatprep.subr.bf16.mxu1 %v5284_v34  ;;  %v5376_v33 = vld [vmem:[%s7891_s1 + $0x4cc] ss:$16 sps:$4 sm:$0xff]   ;;  %v5371_v34 = vld [vmem:[%s7891_s1 + $0x4c0] ss:$16 sps:$4 sm:$0xff]  }
  0x5f   :  { %3656 = vmatpush1.bf16.msra.mxu0 %v5279_v35  ;;  %4025 = vmatpush1.bf16.msra.mxu1 %v5282_v36  ;;  %v5374_v35 = vld [vmem:[%s7891_s1 + $0x4c8] ss:$16 sps:$4 sm:$0xff]   ;;  %v5379_v36 = vld [vmem:[%s7891_s1 + $0x4e4] ss:$16 sps:$4 sm:$0xff]  }
  0x60   :  { %3657 = vmatprep.subr.bf16.mxu0 %v5287_v37  ;;  %4026 = vmatprep.subr.bf16.mxu1 %v5290_v38  ;;  %v5382_v37 = vld [vmem:[%s7891_s1 + $0x4ec] ss:$16 sps:$4 sm:$0xff]   ;;  %v5377_v38 = vld [vmem:[%s7891_s1 + $0x4e0] ss:$16 sps:$4 sm:$0xff]  }
  0x63   :  { %3658 = vmatpush1.bf16.msra.mxu0 %v5285_v39  ;;  %4027 = vmatpush1.bf16.msra.mxu1 %v5288_v40  ;;  %v5380_v39 = vld [vmem:[%s7891_s1 + $0x4e8] ss:$16 sps:$4 sm:$0xff]   ;;  %v5385_v40 = vld [vmem:[%s7891_s1 + $0x504] ss:$16 sps:$4 sm:$0xff]  }
  0x64   :  { %3659 = vmatprep.subr.bf16.mxu0 %v5293_v41  ;;  %4028 = vmatprep.subr.bf16.mxu1 %v5296_v42  ;;  %v5388_v41 = vld [vmem:[%s7891_s1 + $0x50c] ss:$16 sps:$4 sm:$0xff]   ;;  %v5383_v42 = vld [vmem:[%s7891_s1 + $0x500] ss:$16 sps:$4 sm:$0xff]  }
  0x67   :  { %3660 = vmatpush1.bf16.msra.mxu0 %v5291_v43  ;;  %4029 = vmatpush1.bf16.msra.mxu1 %v5294_v44  ;;  %v5386_v43 = vld [vmem:[%s7891_s1 + $0x508] ss:$16 sps:$4 sm:$0xff]   ;;  %v5391_v44 = vld [vmem:[%s7891_s1 + $0x524] ss:$16 sps:$4 sm:$0xff]  }
  0x68   :  { %3661 = vmatprep.subr.bf16.mxu0 %v5299_v45  ;;  %4030 = vmatprep.subr.bf16.mxu1 %v5302_v46  ;;  %v5394_v45 = vld [vmem:[%s7891_s1 + $0x52c] ss:$16 sps:$4 sm:$0xff]   ;;  %v5389_v46 = vld [vmem:[%s7891_s1 + $0x520] ss:$16 sps:$4 sm:$0xff]  }
  0x6b   :  { %3662 = vmatpush1.bf16.msra.mxu0 %v5297_v47  ;;  %4031 = vmatpush1.bf16.msra.mxu1 %v5300_v48  ;;  %v5392_v47 = vld [vmem:[%s7891_s1 + $0x528] ss:$16 sps:$4 sm:$0xff]   ;;  %v5397_v48 = vld [vmem:[%s7891_s1 + $0x544] ss:$16 sps:$4 sm:$0xff]  }
  0x6c   :  { %3663 = vmatprep.subr.bf16.mxu0 %v5305_v49  ;;  %4032 = vmatprep.subr.bf16.mxu1 %v5308_v50  ;;  %v5400_v49 = vld [vmem:[%s7891_s1 + $0x54c] ss:$16 sps:$4 sm:$0xff]   ;;  %v5395_v50 = vld [vmem:[%s7891_s1 + $0x540] ss:$16 sps:$4 sm:$0xff]  }
  0x6f   :  { %3664 = vmatpush1.bf16.msra.mxu0 %v5303_v51  ;;  %4033 = vmatpush1.bf16.msra.mxu1 %v5306_v52  ;;  %v5398_v51 = vld [vmem:[%s7891_s1 + $0x548] ss:$16 sps:$4 sm:$0xff]   ;;  %v5403_v52 = vld [vmem:[%s7891_s1 + $0x564] ss:$16 sps:$4 sm:$0xff]  }
  0x70   :  { %3665 = vmatprep.subr.bf16.mxu0 %v5311_v53  ;;  %4034 = vmatprep.subr.bf16.mxu1 %v5314_v54  ;;  %v5406_v53 = vld [vmem:[%s7891_s1 + $0x56c] ss:$16 sps:$4 sm:$0xff]   ;;  %v5401_v54 = vld [vmem:[%s7891_s1 + $0x560] ss:$16 sps:$4 sm:$0xff]  }
  0x73   :  { %3666 = vmatpush1.bf16.msra.mxu0 %v5309_v55  ;;  %4035 = vmatpush1.bf16.msra.mxu1 %v5312_v56  ;;  %v5404_v55 = vld [vmem:[%s7891_s1 + $0x568] ss:$16 sps:$4 sm:$0xff]   ;;  %v5409_v56 = vld [vmem:[%s7891_s1 + $0x584] ss:$16 sps:$4 sm:$0xff]  }
  0x74   :  { %3667 = vmatprep.subr.bf16.mxu0 %v5317_v57  ;;  %4036 = vmatprep.subr.bf16.mxu1 %v5320_v58  ;;  %v5412_v57 = vld [vmem:[%s7891_s1 + $0x58c] ss:$16 sps:$4 sm:$0xff]   ;;  %v5407_v58 = vld [vmem:[%s7891_s1 + $0x580] ss:$16 sps:$4 sm:$0xff]  }
  0x77   :  { %3668 = vmatpush1.bf16.msra.mxu0 %v5315_v59  ;;  %4037 = vmatpush1.bf16.msra.mxu1 %v5318_v60  ;;  %v5410_v59 = vld [vmem:[%s7891_s1 + $0x588] ss:$16 sps:$4 sm:$0xff]   ;;  %v5415_v60 = vld [vmem:[%s7891_s1 + $0x5a4] ss:$16 sps:$4 sm:$0xff]  }
  0x78   :  { %3669 = vmatprep.subr.bf16.mxu0 %v5323_v61  ;;  %4038 = vmatprep.subr.bf16.mxu1 %v5326_v62  ;;  %v5418_v61 = vld [vmem:[%s7891_s1 + $0x5ac] ss:$16 sps:$4 sm:$0xff]   ;;  %v5413_v62 = vld [vmem:[%s7891_s1 + $0x5a0] ss:$16 sps:$4 sm:$0xff]  }
  0x7b   :  { %3670 = vmatpush1.bf16.msra.mxu0 %v5321_v63  ;;  %4039 = vmatpush1.bf16.msra.mxu1 %v5324_v0  ;;  %v5416_v63 = vld [vmem:[%s7891_s1 + $0x5a8] ss:$16 sps:$4 sm:$0xff]   ;;  %v5421_v0 = vld [vmem:[%s7891_s1 + $0x5c4] ss:$16 sps:$4 sm:$0xff]  }
  0x7c   :  { %3671 = vmatprep.subr.bf16.mxu0 %v5329_v1  ;;  %4040 = vmatprep.subr.bf16.mxu1 %v5332_v2  ;;  %v5424_v1 = vld [vmem:[%s7891_s1 + $0x5cc] ss:$16 sps:$4 sm:$0xff]   ;;  %v5419_v2 = vld [vmem:[%s7891_s1 + $0x5c0] ss:$16 sps:$4 sm:$0xff]  }
  0x7f   :  { %3672 = vmatpush1.bf16.msra.mxu0 %v5327_v3  ;;  %4041 = vmatpush1.bf16.msra.mxu1 %v5330_v4  ;;  %v5422_v3 = vld [vmem:[%s7891_s1 + $0x5c8] ss:$16 sps:$4 sm:$0xff]   ;;  %v5427_v4 = vld [vmem:[%s7891_s1 + $0x5e4] ss:$16 sps:$4 sm:$0xff]  }
  0x80   :  { %3682 = vmatprep.subr.bf16.mxu0 %v5337_v5  ;;  %4051 = vmatprep.subr.bf16.mxu1 %v5340_v6  ;;  %v5430_v5 = vld [vmem:[%s7891_s1 + $0x5ec] ss:$16 sps:$4 sm:$0xff]   ;;  %v5425_v6 = vld [vmem:[%s7891_s1 + $0x5e0] ss:$16 sps:$4 sm:$0xff]  }
  0x82   :  { %3674 = vmatmul.mubr.bf16.vlgmr.msra.gmra.mrb[0].mxu0 %v4474_v7  ;;  %4043 = vmatmul.mubr.bf16.vlgmr.msra.gmra.mrb[0].mxu1 %v4474_v7  ;;  %v5428_v7 = vld [vmem:[%s7891_s1 + $0x5e8] ss:$16 sps:$4 sm:$0xff]  }
  0x83   :  { %3683 = vmatpush1.bf16.msra.mxu0 %v5335_v8  ;;  %4052 = vmatpush1.bf16.msra.mxu1 %v5338_v9  ;;  %v5435_v8 = vld [vmem:[%s7891_s1 + $0x604] ss:$16 sps:$4 sm:$0xff]   ;;  %v5438_v9 = vld [vmem:[%s7891_s1 + $0x60c] ss:$16 sps:$4 sm:$0xff]  }
  0x84   :  { %3684 = vmatprep.subr.bf16.mxu0 %v5343_v10  ;;  %4053 = vmatprep.subr.bf16.mxu1 %v5346_v12  ;;  %v5433_v10 = vld [vmem:[%s7891_s1 + $0x600] ss:$16 sps:$4 sm:$0xff]   ;;  %v4476_v12 = vcombine.low %v6465_v11, %v6465_v11  ;;  %v5444_v11 = vld [vmem:[%s7891_s1 + $0x62c] ss:$16 sps:$4 sm:$0xff]  }
  0x85   :  { %3714 = vmatprep.mubr.bf16.mxu0 %v4477_v13  ;;  %4083 = vmatprep.mubr.bf16.mxu1 %v4477_v13  ;;  %v5436_v13 = vld [vmem:[%s7891_s1 + $0x608] ss:$16 sps:$4 sm:$0xff]  }
  0x87   :  { %3685 = vmatpush1.bf16.msra.mxu0 %v5341_v14  ;;  %4054 = vmatpush1.bf16.msra.mxu1 %v5344_v15  ;;  %v6663_v14 = vld [vmem:[%s7892_s0 + $0x18] sm:$0xff]  ;;  %v5441_v15 = vld [vmem:[%s7891_s1 + $0x624] ss:$16 sps:$4 sm:$0xff]  }
  0x88   :  { %3686 = vmatprep.subr.bf16.mxu0 %v5349_v16  ;;  %4055 = vmatprep.subr.bf16.mxu1 %v5352_v17  ;;  %v4479_v16 = vcombine.high %v6663_v14, %v6663_v14  ;;  %v5439_v17 = vld [vmem:[%s7891_s1 + $0x620] ss:$16 sps:$4 sm:$0xff]  }
  0x8b   :  { %3687 = vmatpush1.bf16.msra.mxu0 %v5347_v18  ;;  %4056 = vmatpush1.bf16.msra.mxu1 %v5350_v19  ;;  %v5442_v18 = vld [vmem:[%s7891_s1 + $0x628] ss:$16 sps:$4 sm:$0xff]   ;;  %v5447_v19 = vld [vmem:[%s7891_s1 + $0x644] ss:$16 sps:$4 sm:$0xff]  }
  0x8c   :  { %3688 = vmatprep.subr.bf16.mxu0 %v5355_v20  ;;  %4057 = vmatprep.subr.bf16.mxu1 %v5358_v21  ;;  %v5450_v20 = vld [vmem:[%s7891_s1 + $0x64c] ss:$16 sps:$4 sm:$0xff]   ;;  %v5445_v21 = vld [vmem:[%s7891_s1 + $0x640] ss:$16 sps:$4 sm:$0xff]  }
  0x8f   :  { %3689 = vmatpush1.bf16.msra.mxu0 %v5353_v22  ;;  %4058 = vmatpush1.bf16.msra.mxu1 %v5356_v23  ;;  %v5448_v22 = vld [vmem:[%s7891_s1 + $0x648] ss:$16 sps:$4 sm:$0xff]   ;;  %v5453_v23 = vld [vmem:[%s7891_s1 + $0x664] ss:$16 sps:$4 sm:$0xff]  }
  0x90   :  { %3690 = vmatprep.subr.bf16.mxu0 %v5361_v24  ;;  %4059 = vmatprep.subr.bf16.mxu1 %v5364_v25  ;;  %v5456_v24 = vld [vmem:[%s7891_s1 + $0x66c] ss:$16 sps:$4 sm:$0xff]   ;;  %v5451_v25 = vld [vmem:[%s7891_s1 + $0x660] ss:$16 sps:$4 sm:$0xff]  }
  0x93   :  { %3691 = vmatpush1.bf16.msra.mxu0 %v5359_v26  ;;  %4060 = vmatpush1.bf16.msra.mxu1 %v5362_v27  ;;  %v5454_v26 = vld [vmem:[%s7891_s1 + $0x668] ss:$16 sps:$4 sm:$0xff]   ;;  %v5459_v27 = vld [vmem:[%s7891_s1 + $0x684] ss:$16 sps:$4 sm:$0xff]  }
  0x94   :  { %3692 = vmatprep.subr.bf16.mxu0 %v5367_v28  ;;  %4061 = vmatprep.subr.bf16.mxu1 %v5370_v29  ;;  %v5462_v28 = vld [vmem:[%s7891_s1 + $0x68c] ss:$16 sps:$4 sm:$0xff]   ;;  %v5457_v29 = vld [vmem:[%s7891_s1 + $0x680] ss:$16 sps:$4 sm:$0xff]  }
  0x97   :  { %3693 = vmatpush1.bf16.msra.mxu0 %v5365_v30  ;;  %4062 = vmatpush1.bf16.msra.mxu1 %v5368_v31  ;;  %v5460_v30 = vld [vmem:[%s7891_s1 + $0x688] ss:$16 sps:$4 sm:$0xff]   ;;  %v5465_v31 = vld [vmem:[%s7891_s1 + $0x6a4] ss:$16 sps:$4 sm:$0xff]  }
  0x98   :  { %3694 = vmatprep.subr.bf16.mxu0 %v5373_v32  ;;  %4063 = vmatprep.subr.bf16.mxu1 %v5376_v33  ;;  %v5468_v32 = vld [vmem:[%s7891_s1 + $0x6ac] ss:$16 sps:$4 sm:$0xff]   ;;  %v5463_v33 = vld [vmem:[%s7891_s1 + $0x6a0] ss:$16 sps:$4 sm:$0xff]  }
  0x9b   :  { %3695 = vmatpush1.bf16.msra.mxu0 %v5371_v34  ;;  %4064 = vmatpush1.bf16.msra.mxu1 %v5374_v35  ;;  %v5466_v34 = vld [vmem:[%s7891_s1 + $0x6a8] ss:$16 sps:$4 sm:$0xff]   ;;  %v5471_v35 = vld [vmem:[%s7891_s1 + $0x6c4] ss:$16 sps:$4 sm:$0xff]  }
  0x9c   :  { %3696 = vmatprep.subr.bf16.mxu0 %v5379_v36  ;;  %4065 = vmatprep.subr.bf16.mxu1 %v5382_v37  ;;  %v5474_v36 = vld [vmem:[%s7891_s1 + $0x6cc] ss:$16 sps:$4 sm:$0xff]   ;;  %v5469_v37 = vld [vmem:[%s7891_s1 + $0x6c0] ss:$16 sps:$4 sm:$0xff]  }
  0x9f   :  { %3697 = vmatpush1.bf16.msra.mxu0 %v5377_v38  ;;  %4066 = vmatpush1.bf16.msra.mxu1 %v5380_v39  ;;  %v5472_v38 = vld [vmem:[%s7891_s1 + $0x6c8] ss:$16 sps:$4 sm:$0xff]   ;;  %v5477_v39 = vld [vmem:[%s7891_s1 + $0x6e4] ss:$16 sps:$4 sm:$0xff]  }
  0xa0   :  { %3698 = vmatprep.subr.bf16.mxu0 %v5385_v40  ;;  %4067 = vmatprep.subr.bf16.mxu1 %v5388_v41  ;;  %v5480_v40 = vld [vmem:[%s7891_s1 + $0x6ec] ss:$16 sps:$4 sm:$0xff]   ;;  %v5475_v41 = vld [vmem:[%s7891_s1 + $0x6e0] ss:$16 sps:$4 sm:$0xff]  }
  0xa3   :  { %3699 = vmatpush1.bf16.msra.mxu0 %v5383_v42  ;;  %4068 = vmatpush1.bf16.msra.mxu1 %v5386_v43  ;;  %v5478_v42 = vld [vmem:[%s7891_s1 + $0x6e8] ss:$16 sps:$4 sm:$0xff]   ;;  %v5483_v43 = vld [vmem:[%s7891_s1 + $0x704] ss:$16 sps:$4 sm:$0xff]  }
  0xa4   :  { %3700 = vmatprep.subr.bf16.mxu0 %v5391_v44  ;;  %4069 = vmatprep.subr.bf16.mxu1 %v5394_v45  ;;  %v5486_v44 = vld [vmem:[%s7891_s1 + $0x70c] ss:$16 sps:$4 sm:$0xff]   ;;  %v5481_v45 = vld [vmem:[%s7891_s1 + $0x700] ss:$16 sps:$4 sm:$0xff]  }
  0xa7   :  { %3701 = vmatpush1.bf16.msra.mxu0 %v5389_v46  ;;  %4070 = vmatpush1.bf16.msra.mxu1 %v5392_v47  ;;  %v5484_v46 = vld [vmem:[%s7891_s1 + $0x708] ss:$16 sps:$4 sm:$0xff]   ;;  %v5489_v47 = vld [vmem:[%s7891_s1 + $0x724] ss:$16 sps:$4 sm:$0xff]  }
  0xa8   :  { %3702 = vmatprep.subr.bf16.mxu0 %v5397_v48  ;;  %4071 = vmatprep.subr.bf16.mxu1 %v5400_v49  ;;  %v5492_v48 = vld [vmem:[%s7891_s1 + $0x72c] ss:$16 sps:$4 sm:$0xff]   ;;  %v5487_v49 = vld [vmem:[%s7891_s1 + $0x720] ss:$16 sps:$4 sm:$0xff]  }
  0xab   :  { %3703 = vmatpush1.bf16.msra.mxu0 %v5395_v50  ;;  %4072 = vmatpush1.bf16.msra.mxu1 %v5398_v51  ;;  %v5490_v50 = vld [vmem:[%s7891_s1 + $0x728] ss:$16 sps:$4 sm:$0xff]   ;;  %v5495_v51 = vld [vmem:[%s7891_s1 + $0x744] ss:$16 sps:$4 sm:$0xff]  }
  0xac   :  { %3704 = vmatprep.subr.bf16.mxu0 %v5403_v52  ;;  %4073 = vmatprep.subr.bf16.mxu1 %v5406_v53  ;;  %v5498_v52 = vld [vmem:[%s7891_s1 + $0x74c] ss:$16 sps:$4 sm:$0xff]   ;;  %v5493_v53 = vld [vmem:[%s7891_s1 + $0x740] ss:$16 sps:$4 sm:$0xff]  }
  0xaf   :  { %3705 = vmatpush1.bf16.msra.mxu0 %v5401_v54  ;;  %4074 = vmatpush1.bf16.msra.mxu1 %v5404_v55  ;;  %v5496_v54 = vld [vmem:[%s7891_s1 + $0x748] ss:$16 sps:$4 sm:$0xff]   ;;  %v5501_v55 = vld [vmem:[%s7891_s1 + $0x764] ss:$16 sps:$4 sm:$0xff]  }
  0xb0   :  { %3706 = vmatprep.subr.bf16.mxu0 %v5409_v56  ;;  %4075 = vmatprep.subr.bf16.mxu1 %v5412_v57  ;;  %v5504_v56 = vld [vmem:[%s7891_s1 + $0x76c] ss:$16 sps:$4 sm:$0xff]   ;;  %v5499_v57 = vld [vmem:[%s7891_s1 + $0x760] ss:$16 sps:$4 sm:$0xff]  }
  0xb3   :  { %3707 = vmatpush1.bf16.msra.mxu0 %v5407_v58  ;;  %4076 = vmatpush1.bf16.msra.mxu1 %v5410_v59  ;;  %v5502_v58 = vld [vmem:[%s7891_s1 + $0x768] ss:$16 sps:$4 sm:$0xff]   ;;  %v5507_v59 = vld [vmem:[%s7891_s1 + $0x784] ss:$16 sps:$4 sm:$0xff]  }
  0xb4   :  { %3708 = vmatprep.subr.bf16.mxu0 %v5415_v60  ;;  %4077 = vmatprep.subr.bf16.mxu1 %v5418_v61  ;;  %v5510_v60 = vld [vmem:[%s7891_s1 + $0x78c] ss:$16 sps:$4 sm:$0xff]   ;;  %v5505_v61 = vld [vmem:[%s7891_s1 + $0x780] ss:$16 sps:$4 sm:$0xff]  }
  0xb7   :  { %3709 = vmatpush1.bf16.msra.mxu0 %v5413_v62  ;;  %4078 = vmatpush1.bf16.msra.mxu1 %v5416_v63  ;;  %v5508_v62 = vld [vmem:[%s7891_s1 + $0x788] ss:$16 sps:$4 sm:$0xff]   ;;  %v5513_v63 = vld [vmem:[%s7891_s1 + $0x7a4] ss:$16 sps:$4 sm:$0xff]  }
  0xb8   :  { %3710 = vmatprep.subr.bf16.mxu0 %v5421_v0  ;;  %4079 = vmatprep.subr.bf16.mxu1 %v5424_v1  ;;  %v5516_v0 = vld [vmem:[%s7891_s1 + $0x7ac] ss:$16 sps:$4 sm:$0xff]   ;;  %v5511_v1 = vld [vmem:[%s7891_s1 + $0x7a0] ss:$16 sps:$4 sm:$0xff]  }
  0xbb   :  { %3711 = vmatpush1.bf16.msra.mxu0 %v5419_v2  ;;  %4080 = vmatpush1.bf16.msra.mxu1 %v5422_v3  ;;  %v5514_v2 = vld [vmem:[%s7891_s1 + $0x7a8] ss:$16 sps:$4 sm:$0xff]   ;;  %v5519_v3 = vld [vmem:[%s7891_s1 + $0x7c4] ss:$16 sps:$4 sm:$0xff]  }
  0xbc   :  { %3712 = vmatprep.subr.bf16.mxu0 %v5427_v4  ;;  %4081 = vmatprep.subr.bf16.mxu1 %v5430_v5  ;;  %v5522_v4 = vld [vmem:[%s7891_s1 + $0x7cc] ss:$16 sps:$4 sm:$0xff]   ;;  %v5517_v5 = vld [vmem:[%s7891_s1 + $0x7c0] ss:$16 sps:$4 sm:$0xff]  }
  0xbf   :  { %3713 = vmatpush1.bf16.msra.mxu0 %v5425_v6  ;;  %4082 = vmatpush1.bf16.msra.mxu1 %v5428_v7  ;;  %v5520_v6 = vld [vmem:[%s7891_s1 + $0x7c8] ss:$16 sps:$4 sm:$0xff]   ;;  %v5525_v7 = vld [vmem:[%s7891_s1 + $0x7e4] ss:$16 sps:$4 sm:$0xff]  }
  0xc0   :  { %3723 = vmatprep.subr.bf16.mxu0 %v5435_v8  ;;  %4092 = vmatprep.subr.bf16.mxu1 %v5438_v9  ;;  %v5528_v8 = vld [vmem:[%s7891_s1 + $0x7ec] ss:$16 sps:$4 sm:$0xff]   ;;  %v5523_v9 = vld [vmem:[%s7891_s1 + $0x7e0] ss:$16 sps:$4 sm:$0xff]  }
  0xc2   :  { %3715 = vmatmul.mubr.bf16.vlgmr.msra.gmra.mrb[0].mxu0 %v4476_v12  ;;  %4084 = vmatmul.mubr.bf16.vlgmr.msra.gmra.mrb[0].mxu1 %v4476_v12  ;;  %v5533_v12 = vld [vmem:[%s7891_s1 + $0x804] ss:$16 sps:$4 sm:$0xff]  }
  0xc3   :  { %3724 = vmatpush1.bf16.msra.mxu0 %v5433_v10  ;;  %4093 = vmatpush1.bf16.msra.mxu1 %v5436_v13  ;;  %v5526_v10 = vld [vmem:[%s7891_s1 + $0x7e8] ss:$16 sps:$4 sm:$0xff]   ;;  %v5536_v13 = vld [vmem:[%s7891_s1 + $0x80c] ss:$16 sps:$4 sm:$0xff]  }
  0xc4   :  { %3725 = vmatprep.subr.bf16.mxu0 %v5441_v15  ;;  %4094 = vmatprep.subr.bf16.mxu1 %v5444_v11  ;;  %v5531_v15 = vld [vmem:[%s7891_s1 + $0x800] ss:$16 sps:$4 sm:$0xff]   ;;  %v4478_v11 = vcombine.low %v6663_v14, %v6663_v14  ;;  %v5542_v14 = vld [vmem:[%s7891_s1 + $0x82c] ss:$16 sps:$4 sm:$0xff]  }
  0xc5   :  { %3755 = vmatprep.mubr.bf16.mxu0 %v4479_v16  ;;  %4124 = vmatprep.mubr.bf16.mxu1 %v4479_v16  ;;  %v6861_v16 = vld [vmem:[%s7892_s0 + $0x20] sm:$0xff] }
  0xc7   :  { %3726 = vmatpush1.bf16.msra.mxu0 %v5439_v17  ;;  %4095 = vmatpush1.bf16.msra.mxu1 %v5442_v18  ;;  %v5534_v17 = vld [vmem:[%s7891_s1 + $0x808] ss:$16 sps:$4 sm:$0xff]   ;;  %v5539_v18 = vld [vmem:[%s7891_s1 + $0x824] ss:$16 sps:$4 sm:$0xff]  }
  0xc8   :  { %3727 = vmatprep.subr.bf16.mxu0 %v5447_v19  ;;  %4096 = vmatprep.subr.bf16.mxu1 %v5450_v20  ;;  %v4481_v19 = vcombine.high %v6861_v16, %v6861_v16  ;;  %v5537_v20 = vld [vmem:[%s7891_s1 + $0x820] ss:$16 sps:$4 sm:$0xff]  }
  0xcb   :  { %3728 = vmatpush1.bf16.msra.mxu0 %v5445_v21  ;;  %4097 = vmatpush1.bf16.msra.mxu1 %v5448_v22  ;;  %v5540_v21 = vld [vmem:[%s7891_s1 + $0x828] ss:$16 sps:$4 sm:$0xff]   ;;  %v5545_v22 = vld [vmem:[%s7891_s1 + $0x844] ss:$16 sps:$4 sm:$0xff]  }
  0xcc   :  { %3729 = vmatprep.subr.bf16.mxu0 %v5453_v23  ;;  %4098 = vmatprep.subr.bf16.mxu1 %v5456_v24  ;;  %v5548_v23 = vld [vmem:[%s7891_s1 + $0x84c] ss:$16 sps:$4 sm:$0xff]   ;;  %v5543_v24 = vld [vmem:[%s7891_s1 + $0x840] ss:$16 sps:$4 sm:$0xff]  }
  0xcf   :  { %3730 = vmatpush1.bf16.msra.mxu0 %v5451_v25  ;;  %4099 = vmatpush1.bf16.msra.mxu1 %v5454_v26  ;;  %v5546_v25 = vld [vmem:[%s7891_s1 + $0x848] ss:$16 sps:$4 sm:$0xff]   ;;  %v5551_v26 = vld [vmem:[%s7891_s1 + $0x864] ss:$16 sps:$4 sm:$0xff]  }
  0xd0   :  { %3731 = vmatprep.subr.bf16.mxu0 %v5459_v27  ;;  %4100 = vmatprep.subr.bf16.mxu1 %v5462_v28  ;;  %v5554_v27 = vld [vmem:[%s7891_s1 + $0x86c] ss:$16 sps:$4 sm:$0xff]   ;;  %v5549_v28 = vld [vmem:[%s7891_s1 + $0x860] ss:$16 sps:$4 sm:$0xff]  }
  0xd3   :  { %3732 = vmatpush1.bf16.msra.mxu0 %v5457_v29  ;;  %4101 = vmatpush1.bf16.msra.mxu1 %v5460_v30  ;;  %v5552_v29 = vld [vmem:[%s7891_s1 + $0x868] ss:$16 sps:$4 sm:$0xff]   ;;  %v5557_v30 = vld [vmem:[%s7891_s1 + $0x884] ss:$16 sps:$4 sm:$0xff]  }
  0xd4   :  { %3733 = vmatprep.subr.bf16.mxu0 %v5465_v31  ;;  %4102 = vmatprep.subr.bf16.mxu1 %v5468_v32  ;;  %v5560_v31 = vld [vmem:[%s7891_s1 + $0x88c] ss:$16 sps:$4 sm:$0xff]   ;;  %v5555_v32 = vld [vmem:[%s7891_s1 + $0x880] ss:$16 sps:$4 sm:$0xff]  }
  0xd7   :  { %3734 = vmatpush1.bf16.msra.mxu0 %v5463_v33  ;;  %4103 = vmatpush1.bf16.msra.mxu1 %v5466_v34  ;;  %v5558_v33 = vld [vmem:[%s7891_s1 + $0x888] ss:$16 sps:$4 sm:$0xff]   ;;  %v5563_v34 = vld [vmem:[%s7891_s1 + $0x8a4] ss:$16 sps:$4 sm:$0xff]  }
  0xd8   :  { %3735 = vmatprep.subr.bf16.mxu0 %v5471_v35  ;;  %4104 = vmatprep.subr.bf16.mxu1 %v5474_v36  ;;  %v5566_v35 = vld [vmem:[%s7891_s1 + $0x8ac] ss:$16 sps:$4 sm:$0xff]   ;;  %v5561_v36 = vld [vmem:[%s7891_s1 + $0x8a0] ss:$16 sps:$4 sm:$0xff]  }
  0xdb   :  { %3736 = vmatpush1.bf16.msra.mxu0 %v5469_v37  ;;  %4105 = vmatpush1.bf16.msra.mxu1 %v5472_v38  ;;  %v5564_v37 = vld [vmem:[%s7891_s1 + $0x8a8] ss:$16 sps:$4 sm:$0xff]   ;;  %v5569_v38 = vld [vmem:[%s7891_s1 + $0x8c4] ss:$16 sps:$4 sm:$0xff]  }
  0xdc   :  { %3737 = vmatprep.subr.bf16.mxu0 %v5477_v39  ;;  %4106 = vmatprep.subr.bf16.mxu1 %v5480_v40  ;;  %v5572_v39 = vld [vmem:[%s7891_s1 + $0x8cc] ss:$16 sps:$4 sm:$0xff]   ;;  %v5567_v40 = vld [vmem:[%s7891_s1 + $0x8c0] ss:$16 sps:$4 sm:$0xff]  }
  0xdf   :  { %3738 = vmatpush1.bf16.msra.mxu0 %v5475_v41  ;;  %4107 = vmatpush1.bf16.msra.mxu1 %v5478_v42  ;;  %v5570_v41 = vld [vmem:[%s7891_s1 + $0x8c8] ss:$16 sps:$4 sm:$0xff]   ;;  %v5575_v42 = vld [vmem:[%s7891_s1 + $0x8e4] ss:$16 sps:$4 sm:$0xff]  }
  0xe0   :  { %3739 = vmatprep.subr.bf16.mxu0 %v5483_v43  ;;  %4108 = vmatprep.subr.bf16.mxu1 %v5486_v44  ;;  %v5578_v43 = vld [vmem:[%s7891_s1 + $0x8ec] ss:$16 sps:$4 sm:$0xff]   ;;  %v5573_v44 = vld [vmem:[%s7891_s1 + $0x8e0] ss:$16 sps:$4 sm:$0xff]  }
  0xe3   :  { %3740 = vmatpush1.bf16.msra.mxu0 %v5481_v45  ;;  %4109 = vmatpush1.bf16.msra.mxu1 %v5484_v46  ;;  %v5576_v45 = vld [vmem:[%s7891_s1 + $0x8e8] ss:$16 sps:$4 sm:$0xff]   ;;  %v5581_v46 = vld [vmem:[%s7891_s1 + $0x904] ss:$16 sps:$4 sm:$0xff]  }
  0xe4   :  { %3741 = vmatprep.subr.bf16.mxu0 %v5489_v47  ;;  %4110 = vmatprep.subr.bf16.mxu1 %v5492_v48  ;;  %v5584_v47 = vld [vmem:[%s7891_s1 + $0x90c] ss:$16 sps:$4 sm:$0xff]   ;;  %v5579_v48 = vld [vmem:[%s7891_s1 + $0x900] ss:$16 sps:$4 sm:$0xff]  }
  0xe7   :  { %3742 = vmatpush1.bf16.msra.mxu0 %v5487_v49  ;;  %4111 = vmatpush1.bf16.msra.mxu1 %v5490_v50  ;;  %v5582_v49 = vld [vmem:[%s7891_s1 + $0x908] ss:$16 sps:$4 sm:$0xff]   ;;  %v5587_v50 = vld [vmem:[%s7891_s1 + $0x924] ss:$16 sps:$4 sm:$0xff]  }
  0xe8   :  { %3743 = vmatprep.subr.bf16.mxu0 %v5495_v51  ;;  %4112 = vmatprep.subr.bf16.mxu1 %v5498_v52  ;;  %v5590_v51 = vld [vmem:[%s7891_s1 + $0x92c] ss:$16 sps:$4 sm:$0xff]   ;;  %v5585_v52 = vld [vmem:[%s7891_s1 + $0x920] ss:$16 sps:$4 sm:$0xff]  }
  0xeb   :  { %3744 = vmatpush1.bf16.msra.mxu0 %v5493_v53  ;;  %4113 = vmatpush1.bf16.msra.mxu1 %v5496_v54  ;;  %v5588_v53 = vld [vmem:[%s7891_s1 + $0x928] ss:$16 sps:$4 sm:$0xff]   ;;  %v5593_v54 = vld [vmem:[%s7891_s1 + $0x944] ss:$16 sps:$4 sm:$0xff]  }
  0xec   :  { %3745 = vmatprep.subr.bf16.mxu0 %v5501_v55  ;;  %4114 = vmatprep.subr.bf16.mxu1 %v5504_v56  ;;  %v5596_v55 = vld [vmem:[%s7891_s1 + $0x94c] ss:$16 sps:$4 sm:$0xff]   ;;  %v5591_v56 = vld [vmem:[%s7891_s1 + $0x940] ss:$16 sps:$4 sm:$0xff]  }
  0xef   :  { %3746 = vmatpush1.bf16.msra.mxu0 %v5499_v57  ;;  %4115 = vmatpush1.bf16.msra.mxu1 %v5502_v58  ;;  %v5594_v57 = vld [vmem:[%s7891_s1 + $0x948] ss:$16 sps:$4 sm:$0xff]   ;;  %v5599_v58 = vld [vmem:[%s7891_s1 + $0x964] ss:$16 sps:$4 sm:$0xff]  }
  0xf0   :  { %3747 = vmatprep.subr.bf16.mxu0 %v5507_v59  ;;  %4116 = vmatprep.subr.bf16.mxu1 %v5510_v60  ;;  %v5602_v59 = vld [vmem:[%s7891_s1 + $0x96c] ss:$16 sps:$4 sm:$0xff]   ;;  %v5597_v60 = vld [vmem:[%s7891_s1 + $0x960] ss:$16 sps:$4 sm:$0xff]  }
  0xf3   :  { %3748 = vmatpush1.bf16.msra.mxu0 %v5505_v61  ;;  %4117 = vmatpush1.bf16.msra.mxu1 %v5508_v62  ;;  %v5600_v61 = vld [vmem:[%s7891_s1 + $0x968] ss:$16 sps:$4 sm:$0xff]   ;;  %v5605_v62 = vld [vmem:[%s7891_s1 + $0x984] ss:$16 sps:$4 sm:$0xff]  }
  0xf4   :  { %3749 = vmatprep.subr.bf16.mxu0 %v5513_v63  ;;  %4118 = vmatprep.subr.bf16.mxu1 %v5516_v0  ;;  %v5608_v63 = vld [vmem:[%s7891_s1 + $0x98c] ss:$16 sps:$4 sm:$0xff]   ;;  %v5603_v0 = vld [vmem:[%s7891_s1 + $0x980] ss:$16 sps:$4 sm:$0xff]  }
  0xf7   :  { %3750 = vmatpush1.bf16.msra.mxu0 %v5511_v1  ;;  %4119 = vmatpush1.bf16.msra.mxu1 %v5514_v2  ;;  %v5606_v1 = vld [vmem:[%s7891_s1 + $0x988] ss:$16 sps:$4 sm:$0xff]   ;;  %v5611_v2 = vld [vmem:[%s7891_s1 + $0x9a4] ss:$16 sps:$4 sm:$0xff]  }
  0xf8   :  { %3751 = vmatprep.subr.bf16.mxu0 %v5519_v3  ;;  %4120 = vmatprep.subr.bf16.mxu1 %v5522_v4  ;;  %v5614_v3 = vld [vmem:[%s7891_s1 + $0x9ac] ss:$16 sps:$4 sm:$0xff]   ;;  %v5609_v4 = vld [vmem:[%s7891_s1 + $0x9a0] ss:$16 sps:$4 sm:$0xff]  }
  0xfb   :  { %3752 = vmatpush1.bf16.msra.mxu0 %v5517_v5  ;;  %4121 = vmatpush1.bf16.msra.mxu1 %v5520_v6  ;;  %v5612_v5 = vld [vmem:[%s7891_s1 + $0x9a8] ss:$16 sps:$4 sm:$0xff]   ;;  %v5617_v6 = vld [vmem:[%s7891_s1 + $0x9c4] ss:$16 sps:$4 sm:$0xff]  }
  0xfc   :  { %3753 = vmatprep.subr.bf16.mxu0 %v5525_v7  ;;  %4122 = vmatprep.subr.bf16.mxu1 %v5528_v8  ;;  %v5620_v7 = vld [vmem:[%s7891_s1 + $0x9cc] ss:$16 sps:$4 sm:$0xff]   ;;  %v5615_v8 = vld [vmem:[%s7891_s1 + $0x9c0] ss:$16 sps:$4 sm:$0xff]  }
  0xff   :  { %3754 = vmatpush1.bf16.msra.mxu0 %v5523_v9  ;;  %4123 = vmatpush1.bf16.msra.mxu1 %v5526_v10  ;;  %v5618_v9 = vld [vmem:[%s7891_s1 + $0x9c8] ss:$16 sps:$4 sm:$0xff]   ;;  %v5623_v10 = vld [vmem:[%s7891_s1 + $0x9e4] ss:$16 sps:$4 sm:$0xff]  }
 0x100   :  { %3764 = vmatprep.subr.bf16.mxu0 %v5533_v12  ;;  %4133 = vmatprep.subr.bf16.mxu1 %v5536_v13  ;;  %v5626_v12 = vld [vmem:[%s7891_s1 + $0x9ec] ss:$16 sps:$4 sm:$0xff]   ;;  %v5621_v13 = vld [vmem:[%s7891_s1 + $0x9e0] ss:$16 sps:$4 sm:$0xff]  }
 0x102   :  { %3756 = vmatmul.mubr.bf16.vlgmr.msra.gmra.mrb[0].mxu0 %v4478_v11  ;;  %4125 = vmatmul.mubr.bf16.vlgmr.msra.gmra.mrb[0].mxu1 %v4478_v11  ;;  %v5631_v11 = vld [vmem:[%s7891_s1 + $0xa04] ss:$16 sps:$4 sm:$0xff]  }
 0x103   :  { %3765 = vmatpush1.bf16.msra.mxu0 %v5531_v15  ;;  %4134 = vmatpush1.bf16.msra.mxu1 %v5534_v17  ;;  %v5624_v15 = vld [vmem:[%s7891_s1 + $0x9e8] ss:$16 sps:$4 sm:$0xff]   ;;  %v5634_v17 = vld [vmem:[%s7891_s1 + $0xa0c] ss:$16 sps:$4 sm:$0xff]  }
 0x104   :  { %3766 = vmatprep.subr.bf16.mxu0 %v5539_v18  ;;  %4135 = vmatprep.subr.bf16.mxu1 %v5542_v14  ;;  %v7057_v18 = vld [vmem:[%s7892_s0 + $0x28] sm:$0xff]  ;;  %v4480_v14 = vcombine.low %v6861_v16, %v6861_v16 }
 0x105   :  { %3796 = vmatprep.mubr.bf16.mxu0 %v4481_v19  ;;  %4165 = vmatprep.mubr.bf16.mxu1 %v4481_v19  ;;  %v5629_v19 = vld [vmem:[%s7891_s1 + $0xa00] ss:$16 sps:$4 sm:$0xff]   ;;  %v5640_v16 = vld [vmem:[%s7891_s1 + $0xa2c] ss:$16 sps:$4 sm:$0xff]  }
 0x107   :  { %3767 = vmatpush1.bf16.msra.mxu0 %v5537_v20  ;;  %4136 = vmatpush1.bf16.msra.mxu1 %v5540_v21  ;;  %v5632_v20 = vld [vmem:[%s7891_s1 + $0xa08] ss:$16 sps:$4 sm:$0xff]   ;;  %v5637_v21 = vld [vmem:[%s7891_s1 + $0xa24] ss:$16 sps:$4 sm:$0xff]  }
 0x108   :  { %3768 = vmatprep.subr.bf16.mxu0 %v5545_v22  ;;  %4137 = vmatprep.subr.bf16.mxu1 %v5548_v23  ;;  %v4483_v22 = vcombine.high %v7057_v18, %v7057_v18  ;;  %v5635_v23 = vld [vmem:[%s7891_s1 + $0xa20] ss:$16 sps:$4 sm:$0xff]  }
 0x10b   :  { %3769 = vmatpush1.bf16.msra.mxu0 %v5543_v24  ;;  %4138 = vmatpush1.bf16.msra.mxu1 %v5546_v25  ;;  %v5638_v24 = vld [vmem:[%s7891_s1 + $0xa28] ss:$16 sps:$4 sm:$0xff]   ;;  %v5643_v25 = vld [vmem:[%s7891_s1 + $0xa44] ss:$16 sps:$4 sm:$0xff]  }
 0x10c   :  { %3770 = vmatprep.subr.bf16.mxu0 %v5551_v26  ;;  %4139 = vmatprep.subr.bf16.mxu1 %v5554_v27  ;;  %v5646_v26 = vld [vmem:[%s7891_s1 + $0xa4c] ss:$16 sps:$4 sm:$0xff]   ;;  %v5641_v27 = vld [vmem:[%s7891_s1 + $0xa40] ss:$16 sps:$4 sm:$0xff]  }
 0x10f   :  { %3771 = vmatpush1.bf16.msra.mxu0 %v5549_v28  ;;  %4140 = vmatpush1.bf16.msra.mxu1 %v5552_v29  ;;  %v5644_v28 = vld [vmem:[%s7891_s1 + $0xa48] ss:$16 sps:$4 sm:$0xff]   ;;  %v5649_v29 = vld [vmem:[%s7891_s1 + $0xa64] ss:$16 sps:$4 sm:$0xff]  }
 0x110   :  { %3772 = vmatprep.subr.bf16.mxu0 %v5557_v30  ;;  %4141 = vmatprep.subr.bf16.mxu1 %v5560_v31  ;;  %v5652_v30 = vld [vmem:[%s7891_s1 + $0xa6c] ss:$16 sps:$4 sm:$0xff]   ;;  %v5647_v31 = vld [vmem:[%s7891_s1 + $0xa60] ss:$16 sps:$4 sm:$0xff]  }
 0x113   :  { %3773 = vmatpush1.bf16.msra.mxu0 %v5555_v32  ;;  %4142 = vmatpush1.bf16.msra.mxu1 %v5558_v33  ;;  %v5650_v32 = vld [vmem:[%s7891_s1 + $0xa68] ss:$16 sps:$4 sm:$0xff]   ;;  %v5655_v33 = vld [vmem:[%s7891_s1 + $0xa84] ss:$16 sps:$4 sm:$0xff]  }
 0x114   :  { %3774 = vmatprep.subr.bf16.mxu0 %v5563_v34  ;;  %4143 = vmatprep.subr.bf16.mxu1 %v5566_v35  ;;  %v5658_v34 = vld [vmem:[%s7891_s1 + $0xa8c] ss:$16 sps:$4 sm:$0xff]   ;;  %v5653_v35 = vld [vmem:[%s7891_s1 + $0xa80] ss:$16 sps:$4 sm:$0xff]  }
 0x117   :  { %3775 = vmatpush1.bf16.msra.mxu0 %v5561_v36  ;;  %4144 = vmatpush1.bf16.msra.mxu1 %v5564_v37  ;;  %v5656_v36 = vld [vmem:[%s7891_s1 + $0xa88] ss:$16 sps:$4 sm:$0xff]   ;;  %v5661_v37 = vld [vmem:[%s7891_s1 + $0xaa4] ss:$16 sps:$4 sm:$0xff]  }
 0x118   :  { %3776 = vmatprep.subr.bf16.mxu0 %v5569_v38  ;;  %4145 = vmatprep.subr.bf16.mxu1 %v5572_v39  ;;  %v5664_v38 = vld [vmem:[%s7891_s1 + $0xaac] ss:$16 sps:$4 sm:$0xff]   ;;  %v5659_v39 = vld [vmem:[%s7891_s1 + $0xaa0] ss:$16 sps:$4 sm:$0xff]  }
 0x11b   :  { %3777 = vmatpush1.bf16.msra.mxu0 %v5567_v40  ;;  %4146 = vmatpush1.bf16.msra.mxu1 %v5570_v41  ;;  %v5662_v40 = vld [vmem:[%s7891_s1 + $0xaa8] ss:$16 sps:$4 sm:$0xff]   ;;  %v5667_v41 = vld [vmem:[%s7891_s1 + $0xac4] ss:$16 sps:$4 sm:$0xff]  }
 0x11c   :  { %3778 = vmatprep.subr.bf16.mxu0 %v5575_v42  ;;  %4147 = vmatprep.subr.bf16.mxu1 %v5578_v43  ;;  %v5670_v42 = vld [vmem:[%s7891_s1 + $0xacc] ss:$16 sps:$4 sm:$0xff]   ;;  %v5665_v43 = vld [vmem:[%s7891_s1 + $0xac0] ss:$16 sps:$4 sm:$0xff]  }
 0x11f   :  { %3779 = vmatpush1.bf16.msra.mxu0 %v5573_v44  ;;  %4148 = vmatpush1.bf16.msra.mxu1 %v5576_v45  ;;  %v5668_v44 = vld [vmem:[%s7891_s1 + $0xac8] ss:$16 sps:$4 sm:$0xff]   ;;  %v5673_v45 = vld [vmem:[%s7891_s1 + $0xae4] ss:$16 sps:$4 sm:$0xff]  }
 0x120   :  { %3780 = vmatprep.subr.bf16.mxu0 %v5581_v46  ;;  %4149 = vmatprep.subr.bf16.mxu1 %v5584_v47  ;;  %v5676_v46 = vld [vmem:[%s7891_s1 + $0xaec] ss:$16 sps:$4 sm:$0xff]   ;;  %v5671_v47 = vld [vmem:[%s7891_s1 + $0xae0] ss:$16 sps:$4 sm:$0xff]  }
 0x123   :  { %3781 = vmatpush1.bf16.msra.mxu0 %v5579_v48  ;;  %4150 = vmatpush1.bf16.msra.mxu1 %v5582_v49  ;;  %v5674_v48 = vld [vmem:[%s7891_s1 + $0xae8] ss:$16 sps:$4 sm:$0xff]   ;;  %v5679_v49 = vld [vmem:[%s7891_s1 + $0xb04] ss:$16 sps:$4 sm:$0xff]  }
 0x124   :  { %3782 = vmatprep.subr.bf16.mxu0 %v5587_v50  ;;  %4151 = vmatprep.subr.bf16.mxu1 %v5590_v51  ;;  %v5682_v50 = vld [vmem:[%s7891_s1 + $0xb0c] ss:$16 sps:$4 sm:$0xff]   ;;  %v5677_v51 = vld [vmem:[%s7891_s1 + $0xb00] ss:$16 sps:$4 sm:$0xff]  }
 0x127   :  { %3783 = vmatpush1.bf16.msra.mxu0 %v5585_v52  ;;  %4152 = vmatpush1.bf16.msra.mxu1 %v5588_v53  ;;  %v5680_v52 = vld [vmem:[%s7891_s1 + $0xb08] ss:$16 sps:$4 sm:$0xff]   ;;  %v5685_v53 = vld [vmem:[%s7891_s1 + $0xb24] ss:$16 sps:$4 sm:$0xff]  }
 0x128   :  { %3784 = vmatprep.subr.bf16.mxu0 %v5593_v54  ;;  %4153 = vmatprep.subr.bf16.mxu1 %v5596_v55  ;;  %v5688_v54 = vld [vmem:[%s7891_s1 + $0xb2c] ss:$16 sps:$4 sm:$0xff]   ;;  %v5683_v55 = vld [vmem:[%s7891_s1 + $0xb20] ss:$16 sps:$4 sm:$0xff]  }
 0x12b   :  { %3785 = vmatpush1.bf16.msra.mxu0 %v5591_v56  ;;  %4154 = vmatpush1.bf16.msra.mxu1 %v5594_v57  ;;  %v5686_v56 = vld [vmem:[%s7891_s1 + $0xb28] ss:$16 sps:$4 sm:$0xff]   ;;  %v5691_v57 = vld [vmem:[%s7891_s1 + $0xb44] ss:$16 sps:$4 sm:$0xff]  }
 0x12c   :  { %3786 = vmatprep.subr.bf16.mxu0 %v5599_v58  ;;  %4155 = vmatprep.subr.bf16.mxu1 %v5602_v59  ;;  %v5694_v58 = vld [vmem:[%s7891_s1 + $0xb4c] ss:$16 sps:$4 sm:$0xff]   ;;  %v5689_v59 = vld [vmem:[%s7891_s1 + $0xb40] ss:$16 sps:$4 sm:$0xff]  }
 0x12f   :  { %3787 = vmatpush1.bf16.msra.mxu0 %v5597_v60  ;;  %4156 = vmatpush1.bf16.msra.mxu1 %v5600_v61  ;;  %v5692_v60 = vld [vmem:[%s7891_s1 + $0xb48] ss:$16 sps:$4 sm:$0xff]   ;;  %v5697_v61 = vld [vmem:[%s7891_s1 + $0xb64] ss:$16 sps:$4 sm:$0xff]  }
 0x130   :  { %3788 = vmatprep.subr.bf16.mxu0 %v5605_v62  ;;  %4157 = vmatprep.subr.bf16.mxu1 %v5608_v63  ;;  %v5700_v62 = vld [vmem:[%s7891_s1 + $0xb6c] ss:$16 sps:$4 sm:$0xff]   ;;  %v5695_v63 = vld [vmem:[%s7891_s1 + $0xb60] ss:$16 sps:$4 sm:$0xff]  }
 0x133   :  { %3789 = vmatpush1.bf16.msra.mxu0 %v5603_v0  ;;  %4158 = vmatpush1.bf16.msra.mxu1 %v5606_v1  ;;  %v5698_v0 = vld [vmem:[%s7891_s1 + $0xb68] ss:$16 sps:$4 sm:$0xff]   ;;  %v5703_v1 = vld [vmem:[%s7891_s1 + $0xb84] ss:$16 sps:$4 sm:$0xff]  }
 0x134   :  { %3790 = vmatprep.subr.bf16.mxu0 %v5611_v2  ;;  %4159 = vmatprep.subr.bf16.mxu1 %v5614_v3  ;;  %v5706_v2 = vld [vmem:[%s7891_s1 + $0xb8c] ss:$16 sps:$4 sm:$0xff]   ;;  %v5701_v3 = vld [vmem:[%s7891_s1 + $0xb80] ss:$16 sps:$4 sm:$0xff]  }
 0x137   :  { %3791 = vmatpush1.bf16.msra.mxu0 %v5609_v4  ;;  %4160 = vmatpush1.bf16.msra.mxu1 %v5612_v5  ;;  %v5704_v4 = vld [vmem:[%s7891_s1 + $0xb88] ss:$16 sps:$4 sm:$0xff]   ;;  %v5709_v5 = vld [vmem:[%s7891_s1 + $0xba4] ss:$16 sps:$4 sm:$0xff]  }
 0x138   :  { %3792 = vmatprep.subr.bf16.mxu0 %v5617_v6  ;;  %4161 = vmatprep.subr.bf16.mxu1 %v5620_v7  ;;  %v5712_v6 = vld [vmem:[%s7891_s1 + $0xbac] ss:$16 sps:$4 sm:$0xff]   ;;  %v5707_v7 = vld [vmem:[%s7891_s1 + $0xba0] ss:$16 sps:$4 sm:$0xff]  }
 0x13b   :  { %3793 = vmatpush1.bf16.msra.mxu0 %v5615_v8  ;;  %4162 = vmatpush1.bf16.msra.mxu1 %v5618_v9  ;;  %v5710_v8 = vld [vmem:[%s7891_s1 + $0xba8] ss:$16 sps:$4 sm:$0xff]   ;;  %v5715_v9 = vld [vmem:[%s7891_s1 + $0xbc4] ss:$16 sps:$4 sm:$0xff]  }
 0x13c   :  { %3794 = vmatprep.subr.bf16.mxu0 %v5623_v10  ;;  %4163 = vmatprep.subr.bf16.mxu1 %v5626_v12  ;;  %v5718_v10 = vld [vmem:[%s7891_s1 + $0xbcc] ss:$16 sps:$4 sm:$0xff]   ;;  %v5713_v12 = vld [vmem:[%s7891_s1 + $0xbc0] ss:$16 sps:$4 sm:$0xff]  }
 0x13f   :  { %3795 = vmatpush1.bf16.msra.mxu0 %v5621_v13  ;;  %4164 = vmatpush1.bf16.msra.mxu1 %v5624_v15  ;;  %v5716_v13 = vld [vmem:[%s7891_s1 + $0xbc8] ss:$16 sps:$4 sm:$0xff]   ;;  %v5721_v15 = vld [vmem:[%s7891_s1 + $0xbe4] ss:$16 sps:$4 sm:$0xff]  }
 0x140   :  { %3805 = vmatprep.subr.bf16.mxu0 %v5631_v11  ;;  %4174 = vmatprep.subr.bf16.mxu1 %v5634_v17  ;;  %v5724_v11 = vld [vmem:[%s7891_s1 + $0xbec] ss:$16 sps:$4 sm:$0xff]   ;;  %v5719_v17 = vld [vmem:[%s7891_s1 + $0xbe0] ss:$16 sps:$4 sm:$0xff]  }
 0x142   :  { %3797 = vmatmul.mubr.bf16.vlgmr.msra.gmra.mrb[0].mxu0 %v4480_v14  ;;  %4166 = vmatmul.mubr.bf16.vlgmr.msra.gmra.mrb[0].mxu1 %v4480_v14  ;;  %v5722_v14 = vld [vmem:[%s7891_s1 + $0xbe8] ss:$16 sps:$4 sm:$0xff]  }
 0x143   :  { %3806 = vmatpush1.bf16.msra.mxu0 %v5629_v19  ;;  %4175 = vmatpush1.bf16.msra.mxu1 %v5632_v20  ;;  %v5729_v19 = vld [vmem:[%s7891_s1 + $0xc04] ss:$16 sps:$4 sm:$0xff]   ;;  %v5732_v20 = vld [vmem:[%s7891_s1 + $0xc0c] ss:$16 sps:$4 sm:$0xff]  }
 0x144   :  { %3807 = vmatprep.subr.bf16.mxu0 %v5637_v21  ;;  %4176 = vmatprep.subr.bf16.mxu1 %v5640_v16  ;;  %v4482_v21 = vcombine.low %v7057_v18, %v7057_v18  ;;  %v7260_v16 = vld [vmem:[%s7892_s0 + $0x30] sm:$0xff] }
 0x145   :  { %3837 = vmatprep.mubr.bf16.mxu0 %v4483_v22  ;;  %4206 = vmatprep.mubr.bf16.mxu1 %v4483_v22  ;;  %v5727_v22 = vld [vmem:[%s7891_s1 + $0xc00] ss:$16 sps:$4 sm:$0xff]   ;;  %v5735_v18 = vld [vmem:[%s7891_s1 + $0xc24] ss:$16 sps:$4 sm:$0xff]  }
 0x147   :  { %3808 = vmatpush1.bf16.msra.mxu0 %v5635_v23  ;;  %4177 = vmatpush1.bf16.msra.mxu1 %v5638_v24  ;;  %v5730_v23 = vld [vmem:[%s7891_s1 + $0xc08] ss:$16 sps:$4 sm:$0xff]   ;;  %v5738_v24 = vld [vmem:[%s7891_s1 + $0xc2c] ss:$16 sps:$4 sm:$0xff]  }
 0x148   :  { %3809 = vmatprep.subr.bf16.mxu0 %v5643_v25  ;;  %4178 = vmatprep.subr.bf16.mxu1 %v5646_v26  ;;  %v4485_v25 = vcombine.high %v7260_v16, %v7260_v16  ;;  %v5733_v26 = vld [vmem:[%s7891_s1 + $0xc20] ss:$16 sps:$4 sm:$0xff]  }
 0x14b   :  { %3810 = vmatpush1.bf16.msra.mxu0 %v5641_v27  ;;  %4179 = vmatpush1.bf16.msra.mxu1 %v5644_v28  ;;  %v5736_v27 = vld [vmem:[%s7891_s1 + $0xc28] ss:$16 sps:$4 sm:$0xff]   ;;  %v5741_v28 = vld [vmem:[%s7891_s1 + $0xc44] ss:$16 sps:$4 sm:$0xff]  }
 0x14c   :  { %3811 = vmatprep.subr.bf16.mxu0 %v5649_v29  ;;  %4180 = vmatprep.subr.bf16.mxu1 %v5652_v30  ;;  %v5744_v29 = vld [vmem:[%s7891_s1 + $0xc4c] ss:$16 sps:$4 sm:$0xff]   ;;  %v5739_v30 = vld [vmem:[%s7891_s1 + $0xc40] ss:$16 sps:$4 sm:$0xff]  }
 0x14f   :  { %3812 = vmatpush1.bf16.msra.mxu0 %v5647_v31  ;;  %4181 = vmatpush1.bf16.msra.mxu1 %v5650_v32  ;;  %v5742_v31 = vld [vmem:[%s7891_s1 + $0xc48] ss:$16 sps:$4 sm:$0xff]   ;;  %v5747_v32 = vld [vmem:[%s7891_s1 + $0xc64] ss:$16 sps:$4 sm:$0xff]  }
 0x150   :  { %3813 = vmatprep.subr.bf16.mxu0 %v5655_v33  ;;  %4182 = vmatprep.subr.bf16.mxu1 %v5658_v34  ;;  %v5750_v33 = vld [vmem:[%s7891_s1 + $0xc6c] ss:$16 sps:$4 sm:$0xff]   ;;  %v5745_v34 = vld [vmem:[%s7891_s1 + $0xc60] ss:$16 sps:$4 sm:$0xff]  }
 0x153   :  { %3814 = vmatpush1.bf16.msra.mxu0 %v5653_v35  ;;  %4183 = vmatpush1.bf16.msra.mxu1 %v5656_v36  ;;  %v5748_v35 = vld [vmem:[%s7891_s1 + $0xc68] ss:$16 sps:$4 sm:$0xff]   ;;  %v5753_v36 = vld [vmem:[%s7891_s1 + $0xc84] ss:$16 sps:$4 sm:$0xff]  }
 0x154   :  { %3815 = vmatprep.subr.bf16.mxu0 %v5661_v37  ;;  %4184 = vmatprep.subr.bf16.mxu1 %v5664_v38  ;;  %v5756_v37 = vld [vmem:[%s7891_s1 + $0xc8c] ss:$16 sps:$4 sm:$0xff]   ;;  %v5751_v38 = vld [vmem:[%s7891_s1 + $0xc80] ss:$16 sps:$4 sm:$0xff]  }
 0x157   :  { %3816 = vmatpush1.bf16.msra.mxu0 %v5659_v39  ;;  %4185 = vmatpush1.bf16.msra.mxu1 %v5662_v40  ;;  %v5754_v39 = vld [vmem:[%s7891_s1 + $0xc88] ss:$16 sps:$4 sm:$0xff]   ;;  %v5759_v40 = vld [vmem:[%s7891_s1 + $0xca4] ss:$16 sps:$4 sm:$0xff]  }
 0x158   :  { %3817 = vmatprep.subr.bf16.mxu0 %v5667_v41  ;;  %4186 = vmatprep.subr.bf16.mxu1 %v5670_v42  ;;  %v5762_v41 = vld [vmem:[%s7891_s1 + $0xcac] ss:$16 sps:$4 sm:$0xff]   ;;  %v5757_v42 = vld [vmem:[%s7891_s1 + $0xca0] ss:$16 sps:$4 sm:$0xff]  }
 0x15b   :  { %3818 = vmatpush1.bf16.msra.mxu0 %v5665_v43  ;;  %4187 = vmatpush1.bf16.msra.mxu1 %v5668_v44  ;;  %v5760_v43 = vld [vmem:[%s7891_s1 + $0xca8] ss:$16 sps:$4 sm:$0xff]   ;;  %v5765_v44 = vld [vmem:[%s7891_s1 + $0xcc4] ss:$16 sps:$4 sm:$0xff]  }
 0x15c   :  { %3819 = vmatprep.subr.bf16.mxu0 %v5673_v45  ;;  %4188 = vmatprep.subr.bf16.mxu1 %v5676_v46  ;;  %v5768_v45 = vld [vmem:[%s7891_s1 + $0xccc] ss:$16 sps:$4 sm:$0xff]   ;;  %v5763_v46 = vld [vmem:[%s7891_s1 + $0xcc0] ss:$16 sps:$4 sm:$0xff]  }
 0x15f   :  { %3820 = vmatpush1.bf16.msra.mxu0 %v5671_v47  ;;  %4189 = vmatpush1.bf16.msra.mxu1 %v5674_v48  ;;  %v5766_v47 = vld [vmem:[%s7891_s1 + $0xcc8] ss:$16 sps:$4 sm:$0xff]   ;;  %v5771_v48 = vld [vmem:[%s7891_s1 + $0xce4] ss:$16 sps:$4 sm:$0xff]  }
 0x160   :  { %3821 = vmatprep.subr.bf16.mxu0 %v5679_v49  ;;  %4190 = vmatprep.subr.bf16.mxu1 %v5682_v50  ;;  %v5774_v49 = vld [vmem:[%s7891_s1 + $0xcec] ss:$16 sps:$4 sm:$0xff]   ;;  %v5769_v50 = vld [vmem:[%s7891_s1 + $0xce0] ss:$16 sps:$4 sm:$0xff]  }
 0x163   :  { %3822 = vmatpush1.bf16.msra.mxu0 %v5677_v51  ;;  %4191 = vmatpush1.bf16.msra.mxu1 %v5680_v52  ;;  %v5772_v51 = vld [vmem:[%s7891_s1 + $0xce8] ss:$16 sps:$4 sm:$0xff]   ;;  %v5777_v52 = vld [vmem:[%s7891_s1 + $0xd04] ss:$16 sps:$4 sm:$0xff]  }
 0x164   :  { %3823 = vmatprep.subr.bf16.mxu0 %v5685_v53  ;;  %4192 = vmatprep.subr.bf16.mxu1 %v5688_v54  ;;  %v5780_v53 = vld [vmem:[%s7891_s1 + $0xd0c] ss:$16 sps:$4 sm:$0xff]   ;;  %v5775_v54 = vld [vmem:[%s7891_s1 + $0xd00] ss:$16 sps:$4 sm:$0xff]  }
 0x167   :  { %3824 = vmatpush1.bf16.msra.mxu0 %v5683_v55  ;;  %4193 = vmatpush1.bf16.msra.mxu1 %v5686_v56  ;;  %v5778_v55 = vld [vmem:[%s7891_s1 + $0xd08] ss:$16 sps:$4 sm:$0xff]   ;;  %v5783_v56 = vld [vmem:[%s7891_s1 + $0xd24] ss:$16 sps:$4 sm:$0xff]  }
 0x168   :  { %3825 = vmatprep.subr.bf16.mxu0 %v5691_v57  ;;  %4194 = vmatprep.subr.bf16.mxu1 %v5694_v58  ;;  %v5786_v57 = vld [vmem:[%s7891_s1 + $0xd2c] ss:$16 sps:$4 sm:$0xff]   ;;  %v5781_v58 = vld [vmem:[%s7891_s1 + $0xd20] ss:$16 sps:$4 sm:$0xff]  }
 0x16b   :  { %3826 = vmatpush1.bf16.msra.mxu0 %v5689_v59  ;;  %4195 = vmatpush1.bf16.msra.mxu1 %v5692_v60  ;;  %v5784_v59 = vld [vmem:[%s7891_s1 + $0xd28] ss:$16 sps:$4 sm:$0xff]   ;;  %v5789_v60 = vld [vmem:[%s7891_s1 + $0xd44] ss:$16 sps:$4 sm:$0xff]  }
 0x16c   :  { %3827 = vmatprep.subr.bf16.mxu0 %v5697_v61  ;;  %4196 = vmatprep.subr.bf16.mxu1 %v5700_v62  ;;  %v5792_v61 = vld [vmem:[%s7891_s1 + $0xd4c] ss:$16 sps:$4 sm:$0xff]   ;;  %v5787_v62 = vld [vmem:[%s7891_s1 + $0xd40] ss:$16 sps:$4 sm:$0xff]  }
 0x16f   :  { %3828 = vmatpush1.bf16.msra.mxu0 %v5695_v63  ;;  %4197 = vmatpush1.bf16.msra.mxu1 %v5698_v0  ;;  %v5790_v63 = vld [vmem:[%s7891_s1 + $0xd48] ss:$16 sps:$4 sm:$0xff]   ;;  %v5795_v0 = vld [vmem:[%s7891_s1 + $0xd64] ss:$16 sps:$4 sm:$0xff]  }
 0x170   :  { %3829 = vmatprep.subr.bf16.mxu0 %v5703_v1  ;;  %4198 = vmatprep.subr.bf16.mxu1 %v5706_v2  ;;  %v5798_v1 = vld [vmem:[%s7891_s1 + $0xd6c] ss:$16 sps:$4 sm:$0xff]   ;;  %v5793_v2 = vld [vmem:[%s7891_s1 + $0xd60] ss:$16 sps:$4 sm:$0xff]  }
 0x173   :  { %3830 = vmatpush1.bf16.msra.mxu0 %v5701_v3  ;;  %4199 = vmatpush1.bf16.msra.mxu1 %v5704_v4  ;;  %v5796_v3 = vld [vmem:[%s7891_s1 + $0xd68] ss:$16 sps:$4 sm:$0xff]   ;;  %v5801_v4 = vld [vmem:[%s7891_s1 + $0xd84] ss:$16 sps:$4 sm:$0xff]  }
 0x174   :  { %3831 = vmatprep.subr.bf16.mxu0 %v5709_v5  ;;  %4200 = vmatprep.subr.bf16.mxu1 %v5712_v6  ;;  %v5804_v5 = vld [vmem:[%s7891_s1 + $0xd8c] ss:$16 sps:$4 sm:$0xff]   ;;  %v5799_v6 = vld [vmem:[%s7891_s1 + $0xd80] ss:$16 sps:$4 sm:$0xff]  }
 0x177   :  { %3832 = vmatpush1.bf16.msra.mxu0 %v5707_v7  ;;  %4201 = vmatpush1.bf16.msra.mxu1 %v5710_v8  ;;  %v5802_v7 = vld [vmem:[%s7891_s1 + $0xd88] ss:$16 sps:$4 sm:$0xff]   ;;  %v5807_v8 = vld [vmem:[%s7891_s1 + $0xda4] ss:$16 sps:$4 sm:$0xff]  }
 0x178   :  { %3833 = vmatprep.subr.bf16.mxu0 %v5715_v9  ;;  %4202 = vmatprep.subr.bf16.mxu1 %v5718_v10  ;;  %v5810_v9 = vld [vmem:[%s7891_s1 + $0xdac] ss:$16 sps:$4 sm:$0xff]   ;;  %v5805_v10 = vld [vmem:[%s7891_s1 + $0xda0] ss:$16 sps:$4 sm:$0xff]  }
 0x17b   :  { %3834 = vmatpush1.bf16.msra.mxu0 %v5713_v12  ;;  %4203 = vmatpush1.bf16.msra.mxu1 %v5716_v13  ;;  %v5808_v12 = vld [vmem:[%s7891_s1 + $0xda8] ss:$16 sps:$4 sm:$0xff]   ;;  %v5813_v13 = vld [vmem:[%s7891_s1 + $0xdc4] ss:$16 sps:$4 sm:$0xff]  }
 0x17c   :  { %3835 = vmatprep.subr.bf16.mxu0 %v5721_v15  ;;  %4204 = vmatprep.subr.bf16.mxu1 %v5724_v11  ;;  %v5816_v15 = vld [vmem:[%s7891_s1 + $0xdcc] ss:$16 sps:$4 sm:$0xff]   ;;  %v5811_v11 = vld [vmem:[%s7891_s1 + $0xdc0] ss:$16 sps:$4 sm:$0xff]  }
 0x17f   :  { %3836 = vmatpush1.bf16.msra.mxu0 %v5719_v17  ;;  %4205 = vmatpush1.bf16.msra.mxu1 %v5722_v14  ;;  %v5814_v17 = vld [vmem:[%s7891_s1 + $0xdc8] ss:$16 sps:$4 sm:$0xff]   ;;  %v5819_v14 = vld [vmem:[%s7891_s1 + $0xde4] ss:$16 sps:$4 sm:$0xff]  }
 0x180   :  { %3846 = vmatprep.subr.bf16.mxu0 %v5729_v19  ;;  %4215 = vmatprep.subr.bf16.mxu1 %v5732_v20  ;;  %v5822_v19 = vld [vmem:[%s7891_s1 + $0xdec] ss:$16 sps:$4 sm:$0xff]   ;;  %v5817_v20 = vld [vmem:[%s7891_s1 + $0xde0] ss:$16 sps:$4 sm:$0xff]  }
 0x182   :  { %3838 = vmatmul.mubr.bf16.vlgmr.msra.gmra.mrb[0].mxu0 %v4482_v21  ;;  %4207 = vmatmul.mubr.bf16.vlgmr.msra.gmra.mrb[0].mxu1 %v4482_v21  ;;  %v5820_v21 = vld [vmem:[%s7891_s1 + $0xde8] ss:$16 sps:$4 sm:$0xff]  }
 0x183   :  { %3847 = vmatpush1.bf16.msra.mxu0 %v5727_v22  ;;  %4216 = vmatpush1.bf16.msra.mxu1 %v5730_v23  ;;  %v5827_v22 = vld [vmem:[%s7891_s1 + $0xe04] ss:$16 sps:$4 sm:$0xff]   ;;  %v5830_v23 = vld [vmem:[%s7891_s1 + $0xe0c] ss:$16 sps:$4 sm:$0xff]  }
 0x184   :  { %3848 = vmatprep.subr.bf16.mxu0 %v5735_v18  ;;  %4217 = vmatprep.subr.bf16.mxu1 %v5738_v24  ;;  %v4484_v18 = vcombine.low %v7260_v16, %v7260_v16  ;;  %v7461_v24 = vld [vmem:[%s7892_s0 + $0x38] sm:$0xff]  ;;  %v5833_v16 = vld [vmem:[%s7891_s1 + $0xe24] ss:$16 sps:$4 sm:$0xff]  }
 0x185   :  { %3878 = vmatprep.mubr.bf16.mxu0 %v4485_v25  ;;  %4247 = vmatprep.mubr.bf16.mxu1 %v4485_v25  ;;  %v5825_v25 = vld [vmem:[%s7891_s1 + $0xe00] ss:$16 sps:$4 sm:$0xff]  }
 0x187   :  { %3849 = vmatpush1.bf16.msra.mxu0 %v5733_v26  ;;  %4218 = vmatpush1.bf16.msra.mxu1 %v5736_v27  ;;  %v5828_v26 = vld [vmem:[%s7891_s1 + $0xe08] ss:$16 sps:$4 sm:$0xff]   ;;  %v5836_v27 = vld [vmem:[%s7891_s1 + $0xe2c] ss:$16 sps:$4 sm:$0xff]  }
 0x188   :  { %3850 = vmatprep.subr.bf16.mxu0 %v5741_v28  ;;  %4219 = vmatprep.subr.bf16.mxu1 %v5744_v29  ;;  %v4487_v28 = vcombine.high %v7461_v24, %v7461_v24  ;;  %v5831_v29 = vld [vmem:[%s7891_s1 + $0xe20] ss:$16 sps:$4 sm:$0xff]  }
 0x18b   :  { %3851 = vmatpush1.bf16.msra.mxu0 %v5739_v30  ;;  %4220 = vmatpush1.bf16.msra.mxu1 %v5742_v31  ;;  %v5834_v30 = vld [vmem:[%s7891_s1 + $0xe28] ss:$16 sps:$4 sm:$0xff]   ;;  %v5839_v31 = vld [vmem:[%s7891_s1 + $0xe44] ss:$16 sps:$4 sm:$0xff]  }
 0x18c   :  { %3852 = vmatprep.subr.bf16.mxu0 %v5747_v32  ;;  %4221 = vmatprep.subr.bf16.mxu1 %v5750_v33  ;;  %v5842_v32 = vld [vmem:[%s7891_s1 + $0xe4c] ss:$16 sps:$4 sm:$0xff]   ;;  %v5837_v33 = vld [vmem:[%s7891_s1 + $0xe40] ss:$16 sps:$4 sm:$0xff]  }
 0x18f   :  { %3853 = vmatpush1.bf16.msra.mxu0 %v5745_v34  ;;  %4222 = vmatpush1.bf16.msra.mxu1 %v5748_v35  ;;  %v5840_v34 = vld [vmem:[%s7891_s1 + $0xe48] ss:$16 sps:$4 sm:$0xff]   ;;  %v5845_v35 = vld [vmem:[%s7891_s1 + $0xe64] ss:$16 sps:$4 sm:$0xff]  }
 0x190   :  { %3854 = vmatprep.subr.bf16.mxu0 %v5753_v36  ;;  %4223 = vmatprep.subr.bf16.mxu1 %v5756_v37  ;;  %v5848_v36 = vld [vmem:[%s7891_s1 + $0xe6c] ss:$16 sps:$4 sm:$0xff]   ;;  %v5843_v37 = vld [vmem:[%s7891_s1 + $0xe60] ss:$16 sps:$4 sm:$0xff]  }
 0x193   :  { %3855 = vmatpush1.bf16.msra.mxu0 %v5751_v38  ;;  %4224 = vmatpush1.bf16.msra.mxu1 %v5754_v39  ;;  %v5846_v38 = vld [vmem:[%s7891_s1 + $0xe68] ss:$16 sps:$4 sm:$0xff]   ;;  %v5851_v39 = vld [vmem:[%s7891_s1 + $0xe84] ss:$16 sps:$4 sm:$0xff]  }
 0x194   :  { %3856 = vmatprep.subr.bf16.mxu0 %v5759_v40  ;;  %4225 = vmatprep.subr.bf16.mxu1 %v5762_v41  ;;  %v5854_v40 = vld [vmem:[%s7891_s1 + $0xe8c] ss:$16 sps:$4 sm:$0xff]   ;;  %v5849_v41 = vld [vmem:[%s7891_s1 + $0xe80] ss:$16 sps:$4 sm:$0xff]  }
 0x197   :  { %3857 = vmatpush1.bf16.msra.mxu0 %v5757_v42  ;;  %4226 = vmatpush1.bf16.msra.mxu1 %v5760_v43  ;;  %v5852_v42 = vld [vmem:[%s7891_s1 + $0xe88] ss:$16 sps:$4 sm:$0xff]   ;;  %v5857_v43 = vld [vmem:[%s7891_s1 + $0xea4] ss:$16 sps:$4 sm:$0xff]  }
 0x198   :  { %3858 = vmatprep.subr.bf16.mxu0 %v5765_v44  ;;  %4227 = vmatprep.subr.bf16.mxu1 %v5768_v45  ;;  %v5860_v44 = vld [vmem:[%s7891_s1 + $0xeac] ss:$16 sps:$4 sm:$0xff]   ;;  %v5855_v45 = vld [vmem:[%s7891_s1 + $0xea0] ss:$16 sps:$4 sm:$0xff]  }
 0x19b   :  { %3859 = vmatpush1.bf16.msra.mxu0 %v5763_v46  ;;  %4228 = vmatpush1.bf16.msra.mxu1 %v5766_v47  ;;  %v5858_v46 = vld [vmem:[%s7891_s1 + $0xea8] ss:$16 sps:$4 sm:$0xff]   ;;  %v5863_v47 = vld [vmem:[%s7891_s1 + $0xec4] ss:$16 sps:$4 sm:$0xff]  }
 0x19c   :  { %3860 = vmatprep.subr.bf16.mxu0 %v5771_v48  ;;  %4229 = vmatprep.subr.bf16.mxu1 %v5774_v49  ;;  %v5866_v48 = vld [vmem:[%s7891_s1 + $0xecc] ss:$16 sps:$4 sm:$0xff]   ;;  %v5861_v49 = vld [vmem:[%s7891_s1 + $0xec0] ss:$16 sps:$4 sm:$0xff]  }
 0x19f   :  { %3861 = vmatpush1.bf16.msra.mxu0 %v5769_v50  ;;  %4230 = vmatpush1.bf16.msra.mxu1 %v5772_v51  ;;  %v5864_v50 = vld [vmem:[%s7891_s1 + $0xec8] ss:$16 sps:$4 sm:$0xff]   ;;  %v5869_v51 = vld [vmem:[%s7891_s1 + $0xee4] ss:$16 sps:$4 sm:$0xff]  }
 0x1a0   :  { %3862 = vmatprep.subr.bf16.mxu0 %v5777_v52  ;;  %4231 = vmatprep.subr.bf16.mxu1 %v5780_v53  ;;  %v5872_v52 = vld [vmem:[%s7891_s1 + $0xeec] ss:$16 sps:$4 sm:$0xff]   ;;  %v5867_v53 = vld [vmem:[%s7891_s1 + $0xee0] ss:$16 sps:$4 sm:$0xff]  }
 0x1a3   :  { %3863 = vmatpush1.bf16.msra.mxu0 %v5775_v54  ;;  %4232 = vmatpush1.bf16.msra.mxu1 %v5778_v55  ;;  %v5870_v54 = vld [vmem:[%s7891_s1 + $0xee8] ss:$16 sps:$4 sm:$0xff]   ;;  %v5875_v55 = vld [vmem:[%s7891_s1 + $0xf04] ss:$16 sps:$4 sm:$0xff]  }
 0x1a4   :  { %3864 = vmatprep.subr.bf16.mxu0 %v5783_v56  ;;  %4233 = vmatprep.subr.bf16.mxu1 %v5786_v57  ;;  %v5878_v56 = vld [vmem:[%s7891_s1 + $0xf0c] ss:$16 sps:$4 sm:$0xff]   ;;  %v5873_v57 = vld [vmem:[%s7891_s1 + $0xf00] ss:$16 sps:$4 sm:$0xff]  }
 0x1a7   :  { %3865 = vmatpush1.bf16.msra.mxu0 %v5781_v58  ;;  %4234 = vmatpush1.bf16.msra.mxu1 %v5784_v59  ;;  %v5876_v58 = vld [vmem:[%s7891_s1 + $0xf08] ss:$16 sps:$4 sm:$0xff]   ;;  %v5881_v59 = vld [vmem:[%s7891_s1 + $0xf24] ss:$16 sps:$4 sm:$0xff]  }
 0x1a8   :  { %3866 = vmatprep.subr.bf16.mxu0 %v5789_v60  ;;  %4235 = vmatprep.subr.bf16.mxu1 %v5792_v61  ;;  %v5884_v60 = vld [vmem:[%s7891_s1 + $0xf2c] ss:$16 sps:$4 sm:$0xff]   ;;  %v5879_v61 = vld [vmem:[%s7891_s1 + $0xf20] ss:$16 sps:$4 sm:$0xff]  }
 0x1ab   :  { %3867 = vmatpush1.bf16.msra.mxu0 %v5787_v62  ;;  %4236 = vmatpush1.bf16.msra.mxu1 %v5790_v63  ;;  %v5882_v62 = vld [vmem:[%s7891_s1 + $0xf28] ss:$16 sps:$4 sm:$0xff]   ;;  %v5887_v63 = vld [vmem:[%s7891_s1 + $0xf44] ss:$16 sps:$4 sm:$0xff]  }
 0x1ac   :  { %3868 = vmatprep.subr.bf16.mxu0 %v5795_v0  ;;  %4237 = vmatprep.subr.bf16.mxu1 %v5798_v1  ;;  %v5890_v0 = vld [vmem:[%s7891_s1 + $0xf4c] ss:$16 sps:$4 sm:$0xff]   ;;  %v5885_v1 = vld [vmem:[%s7891_s1 + $0xf40] ss:$16 sps:$4 sm:$0xff]  }
 0x1af   :  { %3869 = vmatpush1.bf16.msra.mxu0 %v5793_v2  ;;  %4238 = vmatpush1.bf16.msra.mxu1 %v5796_v3  ;;  %v5888_v2 = vld [vmem:[%s7891_s1 + $0xf48] ss:$16 sps:$4 sm:$0xff]   ;;  %v5893_v3 = vld [vmem:[%s7891_s1 + $0xf64] ss:$16 sps:$4 sm:$0xff]  }
 0x1b0   :  { %3870 = vmatprep.subr.bf16.mxu0 %v5801_v4  ;;  %4239 = vmatprep.subr.bf16.mxu1 %v5804_v5  ;;  %v5896_v4 = vld [vmem:[%s7891_s1 + $0xf6c] ss:$16 sps:$4 sm:$0xff]   ;;  %v5891_v5 = vld [vmem:[%s7891_s1 + $0xf60] ss:$16 sps:$4 sm:$0xff]  }
 0x1b3   :  { %3871 = vmatpush1.bf16.msra.mxu0 %v5799_v6  ;;  %4240 = vmatpush1.bf16.msra.mxu1 %v5802_v7  ;;  %v5894_v6 = vld [vmem:[%s7891_s1 + $0xf68] ss:$16 sps:$4 sm:$0xff]   ;;  %v5899_v7 = vld [vmem:[%s7891_s1 + $0xf84] ss:$16 sps:$4 sm:$0xff]  }
 0x1b4   :  { %3872 = vmatprep.subr.bf16.mxu0 %v5807_v8  ;;  %4241 = vmatprep.subr.bf16.mxu1 %v5810_v9  ;;  %v5902_v8 = vld [vmem:[%s7891_s1 + $0xf8c] ss:$16 sps:$4 sm:$0xff]   ;;  %v5897_v9 = vld [vmem:[%s7891_s1 + $0xf80] ss:$16 sps:$4 sm:$0xff]  }
 0x1b7   :  { %3873 = vmatpush1.bf16.msra.mxu0 %v5805_v10  ;;  %4242 = vmatpush1.bf16.msra.mxu1 %v5808_v12  ;;  %v5900_v10 = vld [vmem:[%s7891_s1 + $0xf88] ss:$16 sps:$4 sm:$0xff]   ;;  %v5905_v12 = vld [vmem:[%s7891_s1 + $0xfa4] ss:$16 sps:$4 sm:$0xff]  }
 0x1b8   :  { %3874 = vmatprep.subr.bf16.mxu0 %v5813_v13  ;;  %4243 = vmatprep.subr.bf16.mxu1 %v5816_v15  ;;  %v5908_v13 = vld [vmem:[%s7891_s1 + $0xfac] ss:$16 sps:$4 sm:$0xff]   ;;  %v5903_v15 = vld [vmem:[%s7891_s1 + $0xfa0] ss:$16 sps:$4 sm:$0xff]  }
 0x1bb   :  { %3875 = vmatpush1.bf16.msra.mxu0 %v5811_v11  ;;  %4244 = vmatpush1.bf16.msra.mxu1 %v5814_v17  ;;  %v5906_v11 = vld [vmem:[%s7891_s1 + $0xfa8] ss:$16 sps:$4 sm:$0xff]   ;;  %v5911_v17 = vld [vmem:[%s7891_s1 + $0xfc4] ss:$16 sps:$4 sm:$0xff]  }
 0x1bc   :  { %3876 = vmatprep.subr.bf16.mxu0 %v5819_v14  ;;  %4245 = vmatprep.subr.bf16.mxu1 %v5822_v19  ;;  %v5914_v14 = vld [vmem:[%s7891_s1 + $0xfcc] ss:$16 sps:$4 sm:$0xff]   ;;  %v5909_v19 = vld [vmem:[%s7891_s1 + $0xfc0] ss:$16 sps:$4 sm:$0xff]  }
 0x1bf   :  { %3877 = vmatpush1.bf16.msra.mxu0 %v5817_v20  ;;  %4246 = vmatpush1.bf16.msra.mxu1 %v5820_v21  ;;  %v5912_v20 = vld [vmem:[%s7891_s1 + $0xfc8] ss:$16 sps:$4 sm:$0xff]   ;;  %v5917_v21 = vld [vmem:[%s7891_s1 + $0xfe4] ss:$16 sps:$4 sm:$0xff]  }
 0x1c0   :  { %3887 = vmatprep.subr.bf16.mxu0 %v5827_v22  ;;  %4256 = vmatprep.subr.bf16.mxu1 %v5830_v23  ;;  %v5920_v22 = vld [vmem:[%s7891_s1 + $0xfec] ss:$16 sps:$4 sm:$0xff]   ;;  %v5915_v23 = vld [vmem:[%s7891_s1 + $0xfe0] ss:$16 sps:$4 sm:$0xff]  }
 0x1c2   :  { %3879 = vmatmul.mubr.bf16.vlgmr.msra.gmra.mrb[0].mxu0 %v4484_v18  ;;  %4248 = vmatmul.mubr.bf16.vlgmr.msra.gmra.mrb[0].mxu1 %v4484_v18  ;;  %v5918_v18 = vld [vmem:[%s7891_s1 + $0xfe8] ss:$16 sps:$4 sm:$0xff]  }
 0x1c3   :  { %3888 = vmatpush1.bf16.msra.mxu0 %v5825_v25  ;;  %4257 = vmatpush1.bf16.msra.mxu1 %v5828_v26  ;;  %v5925_v25 = vld [vmem:[%s7891_s1 + $0x1004] ss:$16 sps:$4 sm:$0xff]   ;;  %v5928_v26 = vld [vmem:[%s7891_s1 + $0x100c] ss:$16 sps:$4 sm:$0xff]  }
 0x1c4   :  { %3889 = vmatprep.subr.bf16.mxu0 %v5833_v16  ;;  %4258 = vmatprep.subr.bf16.mxu1 %v5836_v27  ;;  %v4486_v16 = vcombine.low %v7461_v24, %v7461_v24  ;;  %v7662_v27 = vld [vmem:[%s7892_s0 + $0x40] sm:$0xff] }
 0x1c5   :  { %3919 = vmatprep.mubr.bf16.mxu0 %v4487_v28  ;;  %4288 = vmatprep.mubr.bf16.mxu1 %v4487_v28  ;;  %v5923_v28 = vld [vmem:[%s7891_s1 + $0x1000] ss:$16 sps:$4 sm:$0xff]   ;;  %v5931_v24 = vld [vmem:[%s7891_s1 + $0x1024] ss:$16 sps:$4 sm:$0xff]  }
 0x1c7   :  { %3890 = vmatpush1.bf16.msra.mxu0 %v5831_v29  ;;  %4259 = vmatpush1.bf16.msra.mxu1 %v5834_v30  ;;  %v5926_v29 = vld [vmem:[%s7891_s1 + $0x1008] ss:$16 sps:$4 sm:$0xff]   ;;  %v5934_v30 = vld [vmem:[%s7891_s1 + $0x102c] ss:$16 sps:$4 sm:$0xff]  }
 0x1c8   :  { %3891 = vmatprep.subr.bf16.mxu0 %v5839_v31  ;;  %4260 = vmatprep.subr.bf16.mxu1 %v5842_v32  ;;  %v4489_v31 = vcombine.high %v7662_v27, %v7662_v27  ;;  %v5929_v32 = vld [vmem:[%s7891_s1 + $0x1020] ss:$16 sps:$4 sm:$0xff]  }
 0x1cb   :  { %3892 = vmatpush1.bf16.msra.mxu0 %v5837_v33  ;;  %4261 = vmatpush1.bf16.msra.mxu1 %v5840_v34  ;;  %v5932_v33 = vld [vmem:[%s7891_s1 + $0x1028] ss:$16 sps:$4 sm:$0xff]   ;;  %v5937_v34 = vld [vmem:[%s7891_s1 + $0x1044] ss:$16 sps:$4 sm:$0xff]  }
 0x1cc   :  { %3893 = vmatprep.subr.bf16.mxu0 %v5845_v35  ;;  %4262 = vmatprep.subr.bf16.mxu1 %v5848_v36  ;;  %v5940_v35 = vld [vmem:[%s7891_s1 + $0x104c] ss:$16 sps:$4 sm:$0xff]   ;;  %v5935_v36 = vld [vmem:[%s7891_s1 + $0x1040] ss:$16 sps:$4 sm:$0xff]  }
 0x1cf   :  { %3894 = vmatpush1.bf16.msra.mxu0 %v5843_v37  ;;  %4263 = vmatpush1.bf16.msra.mxu1 %v5846_v38  ;;  %v5938_v37 = vld [vmem:[%s7891_s1 + $0x1048] ss:$16 sps:$4 sm:$0xff]   ;;  %v5943_v38 = vld [vmem:[%s7891_s1 + $0x1064] ss:$16 sps:$4 sm:$0xff]  }
 0x1d0   :  { %3895 = vmatprep.subr.bf16.mxu0 %v5851_v39  ;;  %4264 = vmatprep.subr.bf16.mxu1 %v5854_v40  ;;  %v5946_v39 = vld [vmem:[%s7891_s1 + $0x106c] ss:$16 sps:$4 sm:$0xff]   ;;  %v5941_v40 = vld [vmem:[%s7891_s1 + $0x1060] ss:$16 sps:$4 sm:$0xff]  }
 0x1d3   :  { %3896 = vmatpush1.bf16.msra.mxu0 %v5849_v41  ;;  %4265 = vmatpush1.bf16.msra.mxu1 %v5852_v42  ;;  %v5944_v41 = vld [vmem:[%s7891_s1 + $0x1068] ss:$16 sps:$4 sm:$0xff]   ;;  %v5949_v42 = vld [vmem:[%s7891_s1 + $0x1084] ss:$16 sps:$4 sm:$0xff]  }
 0x1d4   :  { %3897 = vmatprep.subr.bf16.mxu0 %v5857_v43  ;;  %4266 = vmatprep.subr.bf16.mxu1 %v5860_v44  ;;  %v5952_v43 = vld [vmem:[%s7891_s1 + $0x108c] ss:$16 sps:$4 sm:$0xff]   ;;  %v5947_v44 = vld [vmem:[%s7891_s1 + $0x1080] ss:$16 sps:$4 sm:$0xff]  }
 0x1d7   :  { %3898 = vmatpush1.bf16.msra.mxu0 %v5855_v45  ;;  %4267 = vmatpush1.bf16.msra.mxu1 %v5858_v46  ;;  %v5950_v45 = vld [vmem:[%s7891_s1 + $0x1088] ss:$16 sps:$4 sm:$0xff]   ;;  %v5955_v46 = vld [vmem:[%s7891_s1 + $0x10a4] ss:$16 sps:$4 sm:$0xff]  }
 0x1d8   :  { %3899 = vmatprep.subr.bf16.mxu0 %v5863_v47  ;;  %4268 = vmatprep.subr.bf16.mxu1 %v5866_v48  ;;  %v5958_v47 = vld [vmem:[%s7891_s1 + $0x10ac] ss:$16 sps:$4 sm:$0xff]   ;;  %v5953_v48 = vld [vmem:[%s7891_s1 + $0x10a0] ss:$16 sps:$4 sm:$0xff]  }
 0x1db   :  { %3900 = vmatpush1.bf16.msra.mxu0 %v5861_v49  ;;  %4269 = vmatpush1.bf16.msra.mxu1 %v5864_v50  ;;  %v5956_v49 = vld [vmem:[%s7891_s1 + $0x10a8] ss:$16 sps:$4 sm:$0xff]   ;;  %v5961_v50 = vld [vmem:[%s7891_s1 + $0x10c4] ss:$16 sps:$4 sm:$0xff]  }
 0x1dc   :  { %3901 = vmatprep.subr.bf16.mxu0 %v5869_v51  ;;  %4270 = vmatprep.subr.bf16.mxu1 %v5872_v52  ;;  %v5964_v51 = vld [vmem:[%s7891_s1 + $0x10cc] ss:$16 sps:$4 sm:$0xff]   ;;  %v5959_v52 = vld [vmem:[%s7891_s1 + $0x10c0] ss:$16 sps:$4 sm:$0xff]  }
 0x1df   :  { %3902 = vmatpush1.bf16.msra.mxu0 %v5867_v53  ;;  %4271 = vmatpush1.bf16.msra.mxu1 %v5870_v54  ;;  %v5962_v53 = vld [vmem:[%s7891_s1 + $0x10c8] ss:$16 sps:$4 sm:$0xff]   ;;  %v5967_v54 = vld [vmem:[%s7891_s1 + $0x10e4] ss:$16 sps:$4 sm:$0xff]  }
 0x1e0   :  { %3903 = vmatprep.subr.bf16.mxu0 %v5875_v55  ;;  %4272 = vmatprep.subr.bf16.mxu1 %v5878_v56  ;;  %v5970_v55 = vld [vmem:[%s7891_s1 + $0x10ec] ss:$16 sps:$4 sm:$0xff]   ;;  %v5965_v56 = vld [vmem:[%s7891_s1 + $0x10e0] ss:$16 sps:$4 sm:$0xff]  }
 0x1e3   :  { %3904 = vmatpush1.bf16.msra.mxu0 %v5873_v57  ;;  %4273 = vmatpush1.bf16.msra.mxu1 %v5876_v58  ;;  %v5968_v57 = vld [vmem:[%s7891_s1 + $0x10e8] ss:$16 sps:$4 sm:$0xff]   ;;  %v5973_v58 = vld [vmem:[%s7891_s1 + $0x1104] ss:$16 sps:$4 sm:$0xff]  }
 0x1e4   :  { %3905 = vmatprep.subr.bf16.mxu0 %v5881_v59  ;;  %4274 = vmatprep.subr.bf16.mxu1 %v5884_v60  ;;  %v5976_v59 = vld [vmem:[%s7891_s1 + $0x110c] ss:$16 sps:$4 sm:$0xff]   ;;  %v5971_v60 = vld [vmem:[%s7891_s1 + $0x1100] ss:$16 sps:$4 sm:$0xff]  }
 0x1e7   :  { %3906 = vmatpush1.bf16.msra.mxu0 %v5879_v61  ;;  %4275 = vmatpush1.bf16.msra.mxu1 %v5882_v62  ;;  %v5974_v61 = vld [vmem:[%s7891_s1 + $0x1108] ss:$16 sps:$4 sm:$0xff]   ;;  %v5979_v62 = vld [vmem:[%s7891_s1 + $0x1124] ss:$16 sps:$4 sm:$0xff]  }
 0x1e8   :  { %3907 = vmatprep.subr.bf16.mxu0 %v5887_v63  ;;  %4276 = vmatprep.subr.bf16.mxu1 %v5890_v0  ;;  %v5982_v63 = vld [vmem:[%s7891_s1 + $0x112c] ss:$16 sps:$4 sm:$0xff]   ;;  %v5977_v0 = vld [vmem:[%s7891_s1 + $0x1120] ss:$16 sps:$4 sm:$0xff]  }
 0x1eb   :  { %3908 = vmatpush1.bf16.msra.mxu0 %v5885_v1  ;;  %4277 = vmatpush1.bf16.msra.mxu1 %v5888_v2  ;;  %v5980_v1 = vld [vmem:[%s7891_s1 + $0x1128] ss:$16 sps:$4 sm:$0xff]   ;;  %v5985_v2 = vld [vmem:[%s7891_s1 + $0x1144] ss:$16 sps:$4 sm:$0xff]  }
 0x1ec   :  { %3909 = vmatprep.subr.bf16.mxu0 %v5893_v3  ;;  %4278 = vmatprep.subr.bf16.mxu1 %v5896_v4  ;;  %v5988_v3 = vld [vmem:[%s7891_s1 + $0x114c] ss:$16 sps:$4 sm:$0xff]   ;;  %v5983_v4 = vld [vmem:[%s7891_s1 + $0x1140] ss:$16 sps:$4 sm:$0xff]  }
 0x1ef   :  { %3910 = vmatpush1.bf16.msra.mxu0 %v5891_v5  ;;  %4279 = vmatpush1.bf16.msra.mxu1 %v5894_v6  ;;  %v5986_v5 = vld [vmem:[%s7891_s1 + $0x1148] ss:$16 sps:$4 sm:$0xff]   ;;  %v5991_v6 = vld [vmem:[%s7891_s1 + $0x1164] ss:$16 sps:$4 sm:$0xff]  }
 0x1f0   :  { %3911 = vmatprep.subr.bf16.mxu0 %v5899_v7  ;;  %4280 = vmatprep.subr.bf16.mxu1 %v5902_v8  ;;  %v5994_v7 = vld [vmem:[%s7891_s1 + $0x116c] ss:$16 sps:$4 sm:$0xff]   ;;  %v5989_v8 = vld [vmem:[%s7891_s1 + $0x1160] ss:$16 sps:$4 sm:$0xff]  }
 0x1f3   :  { %3912 = vmatpush1.bf16.msra.mxu0 %v5897_v9  ;;  %4281 = vmatpush1.bf16.msra.mxu1 %v5900_v10  ;;  %v5992_v9 = vld [vmem:[%s7891_s1 + $0x1168] ss:$16 sps:$4 sm:$0xff]   ;;  %v5997_v10 = vld [vmem:[%s7891_s1 + $0x1184] ss:$16 sps:$4 sm:$0xff]  }
 0x1f4   :  { %3913 = vmatprep.subr.bf16.mxu0 %v5905_v12  ;;  %4282 = vmatprep.subr.bf16.mxu1 %v5908_v13  ;;  %v6000_v12 = vld [vmem:[%s7891_s1 + $0x118c] ss:$16 sps:$4 sm:$0xff]   ;;  %v5995_v13 = vld [vmem:[%s7891_s1 + $0x1180] ss:$16 sps:$4 sm:$0xff]  }
 0x1f7   :  { %3914 = vmatpush1.bf16.msra.mxu0 %v5903_v15  ;;  %4283 = vmatpush1.bf16.msra.mxu1 %v5906_v11  ;;  %v5998_v15 = vld [vmem:[%s7891_s1 + $0x1188] ss:$16 sps:$4 sm:$0xff]   ;;  %v6003_v11 = vld [vmem:[%s7891_s1 + $0x11a4] ss:$16 sps:$4 sm:$0xff]  }
 0x1f8   :  { %3915 = vmatprep.subr.bf16.mxu0 %v5911_v17  ;;  %4284 = vmatprep.subr.bf16.mxu1 %v5914_v14  ;;  %v6006_v17 = vld [vmem:[%s7891_s1 + $0x11ac] ss:$16 sps:$4 sm:$0xff]   ;;  %v6001_v14 = vld [vmem:[%s7891_s1 + $0x11a0] ss:$16 sps:$4 sm:$0xff]  }
 0x1fb   :  { %3916 = vmatpush1.bf16.msra.mxu0 %v5909_v19  ;;  %4285 = vmatpush1.bf16.msra.mxu1 %v5912_v20  ;;  %v6004_v19 = vld [vmem:[%s7891_s1 + $0x11a8] ss:$16 sps:$4 sm:$0xff]   ;;  %v6009_v20 = vld [vmem:[%s7891_s1 + $0x11c4] ss:$16 sps:$4 sm:$0xff]  }
 0x1fc   :  { %3917 = vmatprep.subr.bf16.mxu0 %v5917_v21  ;;  %4286 = vmatprep.subr.bf16.mxu1 %v5920_v22  ;;  %v6012_v21 = vld [vmem:[%s7891_s1 + $0x11cc] ss:$16 sps:$4 sm:$0xff]   ;;  %v6007_v22 = vld [vmem:[%s7891_s1 + $0x11c0] ss:$16 sps:$4 sm:$0xff]  }
 0x1ff   :  { %3918 = vmatpush1.bf16.msra.mxu0 %v5915_v23  ;;  %4287 = vmatpush1.bf16.msra.mxu1 %v5918_v18  ;;  %v6010_v23 = vld [vmem:[%s7891_s1 + $0x11c8] ss:$16 sps:$4 sm:$0xff]   ;;  %v6015_v18 = vld [vmem:[%s7891_s1 + $0x11e4] ss:$16 sps:$4 sm:$0xff]  }
 0x200   :  { %3928 = vmatprep.subr.bf16.mxu0 %v5925_v25  ;;  %4297 = vmatprep.subr.bf16.mxu1 %v5928_v26  ;;  %v6018_v25 = vld [vmem:[%s7891_s1 + $0x11ec] ss:$16 sps:$4 sm:$0xff]   ;;  %v6013_v26 = vld [vmem:[%s7891_s1 + $0x11e0] ss:$16 sps:$4 sm:$0xff]  }
 0x202   :  { %3920 = vmatmul.mubr.bf16.vlgmr.msra.gmra.mrb[0].mxu0 %v4486_v16  ;;  %4289 = vmatmul.mubr.bf16.vlgmr.msra.gmra.mrb[0].mxu1 %v4486_v16  ;;  %v6016_v16 = vld [vmem:[%s7891_s1 + $0x11e8] ss:$16 sps:$4 sm:$0xff]  }
 0x203   :  { %3929 = vmatpush1.bf16.msra.mxu0 %v5923_v28  ;;  %4298 = vmatpush1.bf16.msra.mxu1 %v5926_v29  ;;  %v4488_v28 = vcombine.low %v7662_v27, %v7662_v27  ;;  %v637_v29 = vlaneseq }
 0x204   :  { %3930 = vmatprep.subr.bf16.mxu0 %v5931_v24  ;;  %4299 = vmatprep.subr.bf16.mxu1 %v5934_v30 }
 0x205   :  { %3960 = vmatprep.mubr.bf16.mxu0 %v4489_v31  ;;  %4329 = vmatprep.mubr.bf16.mxu1 %v4489_v31  ;;  %v638_v24 = vshrl.u32 %v637_v29, 7 }
 0x207   :  { %3931 = vmatpush1.bf16.msra.mxu0 %v5929_v32  ;;  %4300 = vmatpush1.bf16.msra.mxu1 %v5932_v33  ;;  %v639_v30 = vsub.s32 0, %v638_v24  ;;  %v647_v31 = vsub.s32 2, %v638_v24  ;;  %v635_v32 = vld [vmem:[%s7893_s2] sm:$0xf]  ;;  %v643_v33 = vsub.s32 1, %v638_v24  ;;  %vm4374_vm4 = vcmp.lt.s32.totalorder %v638_v24, 2 }
 0x208   :  { %3932 = vmatprep.subr.bf16.mxu0 %v5937_v34  ;;  %4301 = vmatprep.subr.bf16.mxu1 %v5940_v35  ;;  %v651_v34 = vsub.s32 3, %v638_v24 }
 0x209   :  { %v640_v35 = vrot.slane %v635_v32, %v639_v30 }
 0x20b   :  { %3933 = vmatpush1.bf16.msra.mxu0 %v5935_v36  ;;  %4302 = vmatpush1.bf16.msra.mxu1 %v5938_v37  ;;  %v648_v36 = vrot.slane %v635_v32, %v647_v31  ;;  %v644_v37 = vrot.slane %v635_v32, %v643_v33 }
 0x20c   :  { %3934 = vmatprep.subr.bf16.mxu0 %v5943_v38  ;;  %4303 = vmatprep.subr.bf16.mxu1 %v5946_v39  ;;  %v652_v38 = vrot.slane %v635_v32, %v651_v34 }
 0x20f   :  { %3935 = vmatpush1.bf16.msra.mxu0 %v5941_v40  ;;  %4304 = vmatpush1.bf16.msra.mxu1 %v5944_v41 }
 0x210   :  { %3936 = vmatprep.subr.bf16.mxu0 %v5949_v42  ;;  %4305 = vmatprep.subr.bf16.mxu1 %v5952_v43 }
 0x213   :  { %3937 = vmatpush1.bf16.msra.mxu0 %v5947_v44  ;;  %4306 = vmatpush1.bf16.msra.mxu1 %v5950_v45 }
 0x214   :  { %3938 = vmatprep.subr.bf16.mxu0 %v5955_v46  ;;  %4307 = vmatprep.subr.bf16.mxu1 %v5958_v47 }
 0x217   :  { %3939 = vmatpush1.bf16.msra.mxu0 %v5953_v48  ;;  %4308 = vmatpush1.bf16.msra.mxu1 %v5956_v49 }
 0x218   :  { %3940 = vmatprep.subr.bf16.mxu0 %v5961_v50  ;;  %4309 = vmatprep.subr.bf16.mxu1 %v5964_v51 }
 0x21b   :  { %3941 = vmatpush1.bf16.msra.mxu0 %v5959_v52  ;;  %4310 = vmatpush1.bf16.msra.mxu1 %v5962_v53 }
 0x21c   :  { %3942 = vmatprep.subr.bf16.mxu0 %v5967_v54  ;;  %4311 = vmatprep.subr.bf16.mxu1 %v5970_v55 }
 0x21f   :  { %3943 = vmatpush1.bf16.msra.mxu0 %v5965_v56  ;;  %4312 = vmatpush1.bf16.msra.mxu1 %v5968_v57 }
 0x220   :  { %3944 = vmatprep.subr.bf16.mxu0 %v5973_v58  ;;  %4313 = vmatprep.subr.bf16.mxu1 %v5976_v59 }
 0x223   :  { %3945 = vmatpush1.bf16.msra.mxu0 %v5971_v60  ;;  %4314 = vmatpush1.bf16.msra.mxu1 %v5974_v61 }
 0x224   :  { %3946 = vmatprep.subr.bf16.mxu0 %v5979_v62  ;;  %4315 = vmatprep.subr.bf16.mxu1 %v5982_v63 }
 0x227   :  { %3947 = vmatpush1.bf16.msra.mxu0 %v5977_v0  ;;  %4316 = vmatpush1.bf16.msra.mxu1 %v5980_v1 }
 0x228   :  { %3948 = vmatprep.subr.bf16.mxu0 %v5985_v2  ;;  %4317 = vmatprep.subr.bf16.mxu1 %v5988_v3 }
 0x22b   :  { %3949 = vmatpush1.bf16.msra.mxu0 %v5983_v4  ;;  %4318 = vmatpush1.bf16.msra.mxu1 %v5986_v5 }
 0x22c   :  { %3950 = vmatprep.subr.bf16.mxu0 %v5991_v6  ;;  %4319 = vmatprep.subr.bf16.mxu1 %v5994_v7 }
 0x22f   :  { %3951 = vmatpush1.bf16.msra.mxu0 %v5989_v8  ;;  %4320 = vmatpush1.bf16.msra.mxu1 %v5992_v9 }
 0x230   :  { %3952 = vmatprep.subr.bf16.mxu0 %v5997_v10  ;;  %4321 = vmatprep.subr.bf16.mxu1 %v6000_v12 }
 0x233   :  { %3953 = vmatpush1.bf16.msra.mxu0 %v5995_v13  ;;  %4322 = vmatpush1.bf16.msra.mxu1 %v5998_v15 }
 0x234   :  { %3954 = vmatprep.subr.bf16.mxu0 %v6003_v11  ;;  %4323 = vmatprep.subr.bf16.mxu1 %v6006_v17 }
 0x237   :  { %3955 = vmatpush1.bf16.msra.mxu0 %v6001_v14  ;;  %4324 = vmatpush1.bf16.msra.mxu1 %v6004_v19 }
 0x238   :  { %3956 = vmatprep.subr.bf16.mxu0 %v6009_v20  ;;  %4325 = vmatprep.subr.bf16.mxu1 %v6012_v21 }
 0x23b   :  { %3957 = vmatpush1.bf16.msra.mxu0 %v6007_v22  ;;  %4326 = vmatpush1.bf16.msra.mxu1 %v6010_v23 }
 0x23c   :  { %3958 = vmatprep.subr.bf16.mxu0 %v6015_v18  ;;  %4327 = vmatprep.subr.bf16.mxu1 %v6018_v25 }
 0x23f   :  { %3959 = vmatpush1.bf16.msra.mxu0 %v6013_v26  ;;  %4328 = vmatpush1.bf16.msra.mxu1 %v6016_v16 }
 0x242   :  { %3961 = vmatmul.mubr.bf16.vlgmr.msra.gmra.mrb[0].mxu0 %v4488_v28  ;;  %4330 = vmatmul.mubr.bf16.vlgmr.msra.gmra.mrb[0].mxu1 %v4488_v28 }
 0x315   :  { %v3962_v39 = vpop.f32.mrb[0].mxu0  ;;  %v4331_v27 = vpop.f32.mrb[0].mxu1 }
 0x316   :  { %v5070_v40 = vadd.f32 %v3962_v39, %v640_v35  ;;  %v5072_v41 = vadd.f32 %v4331_v27, %v648_v36  ;;  %v3964_v42 = vpop.f32.mrb[1].mxu0  ;;  %v4333_v43 = vpop.f32.mrb[1].mxu1 }
 0x317   :  { %v5071_v44 = vadd.f32 %v3964_v42, %v644_v37  ;;  %v5073_v45 = vadd.f32 %v4333_v43, %v652_v38  ;;  %v3966_v46 = vpop.f32.mrb[2].mxu0  ;;  %v4335_v47 = vpop.f32.mrb[2].mxu1 }
 0x318   :  { %vm4338_vm0 = vcmp.gt.f32.partialorder %v5070_v40, 0.0  ;;  %v4342_v48 = vmul.f32 0.2, %v5070_v40  ;;  %vm4340_vm1 = vcmp.gt.f32.partialorder %v5072_v41, 0.0  ;;  %v4344_v49 = vmul.f32 0.2, %v5072_v41 }
 0x319   :  { %vm4339_vm2 = vcmp.gt.f32.partialorder %v5071_v44, 0.0  ;;  %v4343_v50 = vmul.f32 0.2, %v5071_v44  ;;  %vm4341_vm3 = vcmp.gt.f32.partialorder %v5073_v45, 0.0  ;;  %v4345_v51 = vmul.f32 0.2, %v5073_v45 }
 0x31a   :  { %v4346_v52 = vsel %vm4338_vm0, %v5070_v40, %v4342_v48  ;;  %v4348_v53 = vsel %vm4340_vm1, %v5072_v41, %v4344_v49  ;;  %v3967_v54 = vpop.f32.mrb[3].mxu0  ;;  %v4336_v55 = vpop.f32.mrb[3].mxu1 }
 0x31b   :  { %v4350_v56 = vpack.c.bf16 %v4346_v52, %v4346_v52  ;;  %v4352_v57 = vpack.c.bf16 %v4348_v53, %v4348_v53  ;;  %v4347_v58 = vsel %vm4339_vm2, %v5071_v44, %v4343_v50  ;;  %v4349_v59 = vsel %vm4341_vm3, %v5073_v45, %v4345_v51 }
 0x31c   :  { %v4351_v60 = vpack.c.bf16 %v4347_v58, %v4347_v58  ;;  %v5068_v61 = vpack.c.bf16 %v4347_v58, %v4346_v52  ;;  %v4353_v62 = vpack.c.bf16 %v4349_v59, %v4349_v59  ;;  %v5069_v63 = vpack.c.bf16 %v4349_v59, %v4348_v53 }
 0x31d   :  { %v4375_v0 = vunpack.c.l.bf16 %v4350_v56  ;;  %v4377_v1 = vunpack.c.l.bf16 %v4352_v57 }
 0x31e   :  { %4366 = vst [vmem:[%s7894_s3] sm:$0xff] %v5068_v61  ;;  %v4376_v2 = vunpack.c.l.bf16 %v4351_v60  ;;  %4367 = vst [vmem:[%s7894_s3 + $0x8] sm:$0xff] %v5069_v63  ;;  %v4378_v3 = vunpack.c.l.bf16 %v4353_v62 }
 0x31f   :  { %v4381_v4 = vsel %vm4374_vm4, %v4375_v0, 0.0  ;;  %v4383_v5 = vsel %vm4374_vm4, %v4377_v1, 0.0 }
 0x320   :  { %v4417_v6 = vmul.f32 %v4381_v4, %v4381_v4  ;;  %v4419_v7 = vmul.f32 %v4383_v5, %v4383_v5  ;;  %v4382_v8 = vsel %vm4374_vm4, %v4376_v2, 0.0  ;;  %v4384_v9 = vsel %vm4374_vm4, %v4378_v3, 0.0  ;;  %4409 = vst [vmem:[%s7895_s4] sm:$0xff] %v4381_v4  ;;  %4411 = vst [vmem:[%s7895_s4 + $0x10] sm:$0xff] %v4383_v5 }
 0x321   :  { %v4418_v10 = vmul.f32 %v4382_v8, %v4382_v8  ;;  %v4420_v12 = vmul.f32 %v4384_v9, %v4384_v9  ;;  %4410 = vst [vmem:[%s7895_s4 + $0x8] sm:$0xff] %v4382_v8  ;;  %4412 = vst [vmem:[%s7895_s4 + $0x18] sm:$0xff] %v4384_v9 }
 0x322   :  { %4429 = vst [vmem:[%s7896_s5] sm:$0xff] %v4417_v6  ;;  %4431 = vst [vmem:[%s7896_s5 + $0x10] sm:$0xff] %v4419_v7 }
 0x323   :  { %4430 = vst [vmem:[%s7896_s5 + $0x8] sm:$0xff] %v4418_v10  ;;  %4432 = vst [vmem:[%s7896_s5 + $0x18] sm:$0xff] %v4420_v12 }

</bundles_post_ra>
